<compile_context>
chip_gen: v5e
topology: v5e:2x2
jax: 0.10.0
libtpu: 0.0.40
codegen_flags: <defaults>
</compile_context>

<pallas_src>
import jax
import jax.numpy as jnp
from jax import lax
from jax.experimental import pallas as pl
from jax.experimental.pallas import tpu as pltpu

# ---- module hyper-parameters (small shapes consistent with the forward) ----
B = 2             # batch_size
C = 4             # n_channels
DIM = 16          # width == height
N_FILTERS = 2     # number of residual conv blocks
DROPOUT_P = 0.1   # nn.Dropout prob (identity at inference)
NEG_SLOPE = 0.01  # nn.LeakyReLU default
LN_EPS = 1e-5     # nn.LayerNorm default eps
SN_EPS = 1e-12    # spectral_norm normalize eps

CP = 8                   # channels zero-padded to one 8-sublane tile
HW = DIM * DIM           # 256 flattened spatial per sample
NL = B * HW              # 512 lane-dense working width (batch folded along lanes)
DIM_O = DIM // 2         # 8
HWO = DIM_O * DIM_O      # 64
C_OUT = 2 * C            # 8
NLO = B * HWO            # 128 lane-dense output width

MM_PREC = lax.Precision.HIGHEST


def _ilog2(n):
    assert n & (n - 1) == 0 and n > 0
    return n.bit_length() - 1


_HWO_B, _HW_B, _DIMO_B, _DIM_B = _ilog2(HWO), _ilog2(HW), _ilog2(DIM_O), _ilog2(DIM)


# --------------------------- static tap geometry -----------------------------
def _tap_offsets(ksize, dim):
    """Lane offset of tap (ky, kx) in the flattened h*dim + w index (padding=1)."""
    return [(ky - 1) * dim + (kx - 1) for ky in range(ksize) for kx in range(ksize)]


_OFFS3 = _tap_offsets(3, DIM)
_OFFS4 = _tap_offsets(4, DIM)


def _make_tap_masks(ksize):
    """(ksize*ksize, NL) 0/1 masks: tap (ky,kx) is valid at flattened pixel (h,w) iff
    the source pixel (h+ky-1, w+kx-1) lies inside the unpadded image.  The per-sample
    pattern is tiled across both 256-lane halves (batch folded along lanes)."""
    hh = jnp.arange(DIM)[:, None]
    ww = jnp.arange(DIM)[None, :]
    rows = []
    for ky in range(ksize):
        for kx in range(ksize):
            dy, dx = ky - 1, kx - 1
            valid = ((hh + dy >= 0) & (hh + dy < DIM) &
                     (ww + dx >= 0) & (ww + dx < DIM))
            rows.append(valid.reshape(1, HW))
    m = jnp.concatenate(rows, axis=0).astype(jnp.float32)        # (k*k, HW)
    return jnp.tile(m, (1, B))                                   # (k*k, NL)


# ----------------------------- Pallas kernel ---------------------------------
def _disc_block_kernel(x_ref, m3_ref, m4_ref, cw_ref, lnw_ref, lnb_ref,
                       wds_ref, o_ref):
    """Fused DiscriminatorBlock forward, whole batch folded along lanes.

      x_ref   : (CP, NL)           channel-padded, batch-folded input
      m3_ref  : (9, NL)            3x3 tap validity masks
      m4_ref  : (16, NL)           4x4 tap validity masks
      cw_ref  : (F, CP, 9*CP)      spectrally-normalized conv weights (matrix form)
      lnw_ref : (F, CP, HW)        LayerNorm affine weights (pad rows 0)
      lnb_ref : (F, CP, HW)        LayerNorm affine biases (pad rows 0)
      wds_ref : (C_OUT, 16*CP+1)   downsample weight matrix, bias folded as last column
      o_ref   : (C_OUT, NLO)       lane-dense output (sample b in lanes [b*HWO,(b+1)*HWO))
    """
    inv_n = 1.0 / (C * HW)            # real element count (pad channels excluded)

    def shifted(v, off):
        sh = (-off) % NL              # static, positive shift -> one XLU lane rotate
        return v if sh == 0 else pltpu.roll(v, shift=sh, axis=1)

    # --- expand tap masks to channel width ONCE (hoisted out of all loops) ---
    m3full = jnp.concatenate(
        [jnp.broadcast_to(m3_ref[t:t + 1, :], (CP, NL)) for t in range(9)],
        axis=0)                                                    # (9*CP, NL)

    x = x_ref[...]                                                 # (CP, NL)

    # --------------------- residual 3x3 conv blocks ---------------------------
    for f in range(N_FILTERS):                                     # static unroll
        w_mat = cw_ref[f]                                          # (CP, 9*CP)
        # in-kernel im2col: 8-sublane-aligned tap slabs, one mask multiply
        cols = jnp.concatenate(
            [shifted(x, off) for off in _OFFS3], axis=0) * m3full  # (9*CP, NL)
        y = jnp.dot(w_mat, cols, preferred_element_type=jnp.float32,
                    precision=MM_PREC)                             # (CP, NL)

        lnw = lnw_ref[f]                                           # (CP, HW)
        lnb = lnb_ref[f]
        parts = []
        for s in range(B):                                         # per-sample LN
            yh = y[:, s * HW:(s + 1) * HW]                         # aligned (CP, HW) view
            # single-pass stats: E[y] and E[y^2] (pad rows are exactly 0)
            s1 = jnp.sum(jnp.sum(yh, axis=1, keepdims=True),
                         axis=0, keepdims=True) * inv_n            # (1,1) mean
            s2 = jnp.sum(jnp.sum(yh * yh, axis=1, keepdims=True),
                         axis=0, keepdims=True) * inv_n            # (1,1) E[y^2]
            inv_std = lax.rsqrt(s2 - s1 * s1 + LN_EPS)
            yn = (yh - s1) * inv_std * lnw + lnb                   # pad rows stay 0
            parts.append(jnp.where(yn >= 0, yn, NEG_SLOPE * yn))   # LeakyReLU
        x = x + jnp.concatenate(parts, axis=1)                     # residual add

    # ------------------- 4x4 stride-2 downsample + bias -----------------------
    m4full = jnp.concatenate(
        [jnp.broadcast_to(m4_ref[t:t + 1, :], (CP, NL)) for t in range(16)],
        axis=0)                                                    # (16*CP, NL)
    cols4 = jnp.concatenate(
        [shifted(x, off) for off in _OFFS4], axis=0) * m4full      # (16*CP, NL)
    cols4 = jnp.concatenate(
        [cols4, jnp.ones((1, NL), jnp.float32)], axis=0)           # +bias row -> (129, NL)
    full = jnp.dot(wds_ref[...], cols4, preferred_element_type=jnp.float32,
                   precision=MM_PREC)                              # (C_OUT, NL), bias incl.

    # stride-2 lane selector built in-kernel (0/1); selects pixel (2*ho, 2*wo) of each
    # sample and emits the lane-dense (C_OUT, NLO) output slab directly.
    row = lax.broadcasted_iota(jnp.int32, (NL, NLO), 0)
    col = lax.broadcasted_iota(jnp.int32, (NL, NLO), 1)
    src = (((col >> _HWO_B) << _HW_B)
           | (((col & (HWO - 1)) >> _DIMO_B) << (_DIM_B + 1))
           | ((col & (DIM_O - 1)) << 1))
    ssel = (row == src).astype(jnp.float32)                        # (NL, NLO)
    o_ref[...] = jnp.dot(full, ssel, preferred_element_type=jnp.float32,
                         precision=MM_PREC)                        # (C_OUT, NLO)


# ------------------------------ wrapper --------------------------------------
@jax.jit
def discriminator_block_forward(x_nchw, conv_w_sn, ln_w, ln_b, down_w, down_b):
    # ---- host-side layout prep (cheap XLA, layout plumbing only) ----
    # activations: NCHW -> channel-padded, batch folded along lanes: (CP, B*HW)
    x_flat = x_nchw.reshape(B, C, HW)
    x_pad = jnp.zeros((B, CP, HW), jnp.float32).at[:, :C, :].set(x_flat)
    x_k = jnp.transpose(x_pad, (1, 0, 2)).reshape(CP, NL)

    # residual conv weights -> (F, CP, 9*CP) matrices (tap-major, channel-minor)
    w_okki = jnp.transpose(conv_w_sn, (0, 1, 3, 4, 2))             # (F, O, ky, kx, I)
    w_pad = jnp.zeros((N_FILTERS, CP, 3, 3, CP),
                      jnp.float32).at[:, :C, :, :, :C].set(w_okki)
    cw_mats = w_pad.reshape(N_FILTERS, CP, 9 * CP)

    # LayerNorm affine params, channel-padded (zero rows keep pad channels at 0)
    lnw_pad = jnp.zeros((N_FILTERS, CP, DIM, DIM),
                        jnp.float32).at[:, :C].set(ln_w).reshape(N_FILTERS, CP, HW)
    lnb_pad = jnp.zeros((N_FILTERS, CP, DIM, DIM),
                        jnp.float32).at[:, :C].set(ln_b).reshape(N_FILTERS, CP, HW)

    # downsample conv weight -> (C_OUT, 16*CP) matrix + bias folded as last column
    wd_okki = jnp.transpose(down_w, (0, 2, 3, 1))                  # (O, ky, kx, I)
    wd_pad = jnp.zeros((C_OUT, 4, 4, CP), jnp.float32).at[:, :, :, :C].set(wd_okki)
    wds_aug = jnp.concatenate(
        [wd_pad.reshape(C_OUT, 16 * CP), down_b.reshape(C_OUT, 1)], axis=1)  # (8, 129)

    m3 = _make_tap_masks(3)                                        # (9, NL)
    m4 = _make_tap_masks(4)                                        # (16, NL)

    out = pl.pallas_call(
        _disc_block_kernel,
        out_shape=jax.ShapeDtypeStruct((C_OUT, NLO), jnp.float32),
        grid_spec=pltpu.PrefetchScalarGridSpec(
            num_scalar_prefetch=0,
            grid=(1,),                                             # whole batch, one step
            in_specs=[
                pl.BlockSpec((CP, NL), lambda i: (0, 0)),
                pl.BlockSpec((9, NL), lambda i: (0, 0)),
                pl.BlockSpec((16, NL), lambda i: (0, 0)),
                pl.BlockSpec((N_FILTERS, CP, 9 * CP), lambda i: (0, 0, 0)),
                pl.BlockSpec((N_FILTERS, CP, HW), lambda i: (0, 0, 0)),
                pl.BlockSpec((N_FILTERS, CP, HW), lambda i: (0, 0, 0)),
                pl.BlockSpec((C_OUT, 16 * CP + 1), lambda i: (0, 0)),
            ],
            out_specs=pl.BlockSpec((C_OUT, NLO), lambda i: (0, 0)),
        ),
        compiler_params=pltpu.CompilerParams(
            dimension_semantics=("arbitrary",)),
    )(x_k, m3, m4, cw_mats, lnw_pad, lnb_pad, wds_aug)

    # un-pack lane-dense (C_OUT, B*HWO) -> NCHW (B, C_OUT, DIM//2, DIM//2)
    return jnp.transpose(out.reshape(C_OUT, B, DIM_O, DIM_O), (1, 0, 2, 3))


# ------------------- parameter setup (plain JAX, deterministic) --------------
def _spectral_normalize(w, u):
    """One power iteration of nn.utils.spectral_norm on an OIHW conv weight."""
    wm = w.reshape(w.shape[0], -1)                                 # (O, I*K*K)
    u = u / (jnp.linalg.norm(u) + SN_EPS)
    v = wm.T @ u
    v = v / (jnp.linalg.norm(v) + SN_EPS)
    u = wm @ v
    u = u / (jnp.linalg.norm(u) + SN_EPS)
    sigma = u @ (wm @ v)
    return w / sigma


def reference_forward(x, conv_w_sn, ln_w, ln_b, down_w, down_b):
    """Pure-JAX NCHW reference mirroring the PyTorch forward (eval mode)."""
    dn = ("NCHW", "OIHW", "NCHW")
    for f in range(N_FILTERS):
        h = lax.conv_general_dilated(
            x, conv_w_sn[f], window_strides=(1, 1), padding=((1, 1), (1, 1)),
            dimension_numbers=dn, precision=lax.Precision.HIGHEST)
        mean = jnp.mean(h, axis=(1, 2, 3), keepdims=True)
        var = jnp.mean((h - mean) ** 2, axis=(1, 2, 3), keepdims=True)
        hn = (h - mean) / jnp.sqrt(var + LN_EPS)
        hn = hn * ln_w[f][None] + ln_b[f][None]
        hn = jnp.where(hn >= 0, hn, NEG_SLOPE * hn)
        x = x + hn
    y = lax.conv_general_dilated(
        x, down_w, window_strides=(2, 2), padding=((1, 1), (1, 1)),
        dimension_numbers=dn, precision=lax.Precision.HIGHEST)
    return y + down_b[None, :, None, None]


if __name__ == "__main__":
    key = jax.random.PRNGKey(0)
    ks = jax.random.split(key, 7)

    x_nchw = jax.random.normal(ks[0], (B, C, DIM, DIM), jnp.float32)

    # conv weights (OIHW) + spectral normalization (one power iteration)
    conv_w = 0.3 * jax.random.normal(ks[1], (N_FILTERS, C, C, 3, 3), jnp.float32)
    u0 = jax.random.normal(ks[2], (N_FILTERS, C), jnp.float32)
    conv_w_sn = jax.vmap(_spectral_normalize)(conv_w, u0)

    # LayerNorm((C, DIM, DIM)) affine params
    ln_w = 1.0 + 0.1 * jax.random.normal(ks[3], (N_FILTERS, C, DIM, DIM), jnp.float32)
    ln_b = 0.1 * jax.random.normal(ks[4], (N_FILTERS, C, DIM, DIM), jnp.float32)

    # downsample Conv2d(C, 2C, 4, 2, 1) params (OIHW + bias)
    down_w = 0.1 * jax.random.normal(ks[5], (C_OUT, C, 4, 4), jnp.float32)
    down_b = 0.1 * jax.random.normal(ks[6], (C_OUT,), jnp.float32)

    out = discriminator_block_forward(x_nchw, conv_w_sn, ln_w, ln_b, down_w, down_b)
    out = jax.block_until_ready(out)
    assert out.shape == (B, C_OUT, DIM // 2, DIM // 2), out.shape

    ref = jax.block_until_ready(
        reference_forward(x_nchw, conv_w_sn, ln_w, ln_b, down_w, down_b))
    max_err = float(jnp.max(jnp.abs(out - ref)))
    # HIGHEST matmul precision in-kernel -> tight tolerance (was 3e-2 with default)
    if not bool(jnp.allclose(out, ref, atol=1e-3, rtol=1e-3)):
        raise AssertionError(f"Pallas output mismatch vs reference, max|err|={max_err}")

    print("KERNEL_OK")
</pallas_src>

<mosaic_0001>
module attributes {stable_mosaic.version = 11 : i64} {
  func.func @_disc_block_kernel(%arg0: i32, %arg1: memref<8x512xf32, #tpu.memory_space<vmem>>, %arg2: memref<9x512xf32, #tpu.memory_space<vmem>>, %arg3: memref<16x512xf32, #tpu.memory_space<vmem>>, %arg4: memref<2x8x72xf32, #tpu.memory_space<vmem>>, %arg5: memref<2x8x256xf32, #tpu.memory_space<vmem>>, %arg6: memref<2x8x256xf32, #tpu.memory_space<vmem>>, %arg7: memref<8x129xf32, #tpu.memory_space<vmem>>, %arg8: memref<8x128xf32, #tpu.memory_space<vmem>>) attributes {dimension_semantics = [#tpu.dimension_semantics<arbitrary>], iteration_bounds = array<i64: 1>, scalar_prefetch = 0 : i64, scratch_operands = 0 : i64, tpu.core_type = #tpu.core_type<tc>, window_params = [{pipeline_mode = #tpu.pipeline_mode<synchronous>, transform_indices = @transform_0, window_bounds = array<i64: 8, 512>}, {pipeline_mode = #tpu.pipeline_mode<synchronous>, transform_indices = @transform_1, window_bounds = array<i64: 9, 512>}, {pipeline_mode = #tpu.pipeline_mode<synchronous>, transform_indices = @transform_2, window_bounds = array<i64: 16, 512>}, {pipeline_mode = #tpu.pipeline_mode<synchronous>, transform_indices = @transform_3, window_bounds = array<i64: 2, 8, 72>}, {pipeline_mode = #tpu.pipeline_mode<synchronous>, transform_indices = @transform_4, window_bounds = array<i64: 2, 8, 256>}, {pipeline_mode = #tpu.pipeline_mode<synchronous>, transform_indices = @transform_5, window_bounds = array<i64: 2, 8, 256>}, {pipeline_mode = #tpu.pipeline_mode<synchronous>, transform_indices = @transform_6, window_bounds = array<i64: 8, 129>}, {pipeline_mode = #tpu.pipeline_mode<synchronous>, transform_indices = @transform_7, window_bounds = array<i64: 8, 128>}]} {
    %c0 = arith.constant 0 : index
    %c0_0 = arith.constant 0 : index
    %0 = vector.load %arg2[%c0, %c0_0] : memref<9x512xf32, #tpu.memory_space<vmem>>, vector<1x512xf32>
    %1 = vector.shape_cast %0 : vector<1x512xf32> to vector<1x512xf32>
    %2 = vector.broadcast %1 : vector<1x512xf32> to vector<8x512xf32>
    %c1 = arith.constant 1 : index
    %c0_1 = arith.constant 0 : index
    %3 = vector.load %arg2[%c1, %c0_1] : memref<9x512xf32, #tpu.memory_space<vmem>>, vector<1x512xf32>
    %4 = vector.shape_cast %3 : vector<1x512xf32> to vector<1x512xf32>
    %5 = vector.broadcast %4 : vector<1x512xf32> to vector<8x512xf32>
    %c2 = arith.constant 2 : index
    %c0_2 = arith.constant 0 : index
    %6 = vector.load %arg2[%c2, %c0_2] : memref<9x512xf32, #tpu.memory_space<vmem>>, vector<1x512xf32>
    %7 = vector.shape_cast %6 : vector<1x512xf32> to vector<1x512xf32>
    %8 = vector.broadcast %7 : vector<1x512xf32> to vector<8x512xf32>
    %c3 = arith.constant 3 : index
    %c0_3 = arith.constant 0 : index
    %9 = vector.load %arg2[%c3, %c0_3] : memref<9x512xf32, #tpu.memory_space<vmem>>, vector<1x512xf32>
    %10 = vector.shape_cast %9 : vector<1x512xf32> to vector<1x512xf32>
    %11 = vector.broadcast %10 : vector<1x512xf32> to vector<8x512xf32>
    %c4 = arith.constant 4 : index
    %c0_4 = arith.constant 0 : index
    %12 = vector.load %arg2[%c4, %c0_4] : memref<9x512xf32, #tpu.memory_space<vmem>>, vector<1x512xf32>
    %13 = vector.shape_cast %12 : vector<1x512xf32> to vector<1x512xf32>
    %14 = vector.broadcast %13 : vector<1x512xf32> to vector<8x512xf32>
    %c5 = arith.constant 5 : index
    %c0_5 = arith.constant 0 : index
    %15 = vector.load %arg2[%c5, %c0_5] : memref<9x512xf32, #tpu.memory_space<vmem>>, vector<1x512xf32>
    %16 = vector.shape_cast %15 : vector<1x512xf32> to vector<1x512xf32>
    %17 = vector.broadcast %16 : vector<1x512xf32> to vector<8x512xf32>
    %c6 = arith.constant 6 : index
    %c0_6 = arith.constant 0 : index
    %18 = vector.load %arg2[%c6, %c0_6] : memref<9x512xf32, #tpu.memory_space<vmem>>, vector<1x512xf32>
    %19 = vector.shape_cast %18 : vector<1x512xf32> to vector<1x512xf32>
    %20 = vector.broadcast %19 : vector<1x512xf32> to vector<8x512xf32>
    %c7 = arith.constant 7 : index
    %c0_7 = arith.constant 0 : index
    %21 = vector.load %arg2[%c7, %c0_7] : memref<9x512xf32, #tpu.memory_space<vmem>>, vector<1x512xf32>
    %22 = vector.shape_cast %21 : vector<1x512xf32> to vector<1x512xf32>
    %23 = vector.broadcast %22 : vector<1x512xf32> to vector<8x512xf32>
    %c8 = arith.constant 8 : index
    %c0_8 = arith.constant 0 : index
    %24 = vector.load %arg2[%c8, %c0_8] : memref<9x512xf32, #tpu.memory_space<vmem>>, vector<1x512xf32>
    %25 = vector.shape_cast %24 : vector<1x512xf32> to vector<1x512xf32>
    %26 = vector.broadcast %25 : vector<1x512xf32> to vector<8x512xf32>
    %27 = tpu.concatenate %2, %5, %8, %11, %14, %17, %20, %23, %26 in 0 : vector<8x512xf32>, vector<8x512xf32>, vector<8x512xf32>, vector<8x512xf32>, vector<8x512xf32>, vector<8x512xf32>, vector<8x512xf32>, vector<8x512xf32>, vector<8x512xf32> -> vector<72x512xf32>
    %c0_9 = arith.constant 0 : index
    %c0_10 = arith.constant 0 : index
    %28 = vector.load %arg1[%c0_9, %c0_10] : memref<8x512xf32, #tpu.memory_space<vmem>>, vector<8x512xf32>
    %c0_11 = arith.constant 0 : index
    %c0_12 = arith.constant 0 : index
    %c0_13 = arith.constant 0 : index
    %29 = vector.load %arg4[%c0_11, %c0_12, %c0_13] : memref<2x8x72xf32, #tpu.memory_space<vmem>>, vector<1x8x72xf32>
    %30 = vector.shape_cast %29 : vector<1x8x72xf32> to vector<8x72xf32>
    %c17_i32 = arith.constant 17 : i32
    %31 = tpu.dynamic_rotate %28 by %c17_i32 dim 1 : vector<8x512xf32>, i32 -> vector<8x512xf32>
    %c16_i32 = arith.constant 16 : i32
    %32 = tpu.dynamic_rotate %28 by %c16_i32 dim 1 : vector<8x512xf32>, i32 -> vector<8x512xf32>
    %c15_i32 = arith.constant 15 : i32
    %33 = tpu.dynamic_rotate %28 by %c15_i32 dim 1 : vector<8x512xf32>, i32 -> vector<8x512xf32>
    %c1_i32 = arith.constant 1 : i32
    %34 = tpu.dynamic_rotate %28 by %c1_i32 dim 1 : vector<8x512xf32>, i32 -> vector<8x512xf32>
    %c511_i32 = arith.constant 511 : i32
    %35 = tpu.dynamic_rotate %28 by %c511_i32 dim 1 : vector<8x512xf32>, i32 -> vector<8x512xf32>
    %c497_i32 = arith.constant 497 : i32
    %36 = tpu.dynamic_rotate %28 by %c497_i32 dim 1 : vector<8x512xf32>, i32 -> vector<8x512xf32>
    %c496_i32 = arith.constant 496 : i32
    %37 = tpu.dynamic_rotate %28 by %c496_i32 dim 1 : vector<8x512xf32>, i32 -> vector<8x512xf32>
    %c495_i32 = arith.constant 495 : i32
    %38 = tpu.dynamic_rotate %28 by %c495_i32 dim 1 : vector<8x512xf32>, i32 -> vector<8x512xf32>
    %39 = tpu.concatenate %31, %32, %33, %34, %28, %35, %36, %37, %38 in 0 : vector<8x512xf32>, vector<8x512xf32>, vector<8x512xf32>, vector<8x512xf32>, vector<8x512xf32>, vector<8x512xf32>, vector<8x512xf32>, vector<8x512xf32>, vector<8x512xf32> -> vector<72x512xf32>
    %40 = arith.mulf %39, %27 : vector<72x512xf32>
    %cst = arith.constant dense<0.000000e+00> : vector<8x512xf32>
    %41 = tpu.matmul %30, %40, %cst {dimension_numbers = #tpu.dot_dimension_numbers<[1], [0], [0], [1], [0, 0, 1, 1], [], []>, precision = #tpu.contract_precision<fp32>} : vector<8x72xf32>, vector<72x512xf32>, vector<8x512xf32> -> vector<8x512xf32>
    %c0_14 = arith.constant 0 : index
    %c0_15 = arith.constant 0 : index
    %c0_16 = arith.constant 0 : index
    %42 = vector.load %arg5[%c0_14, %c0_15, %c0_16] : memref<2x8x256xf32, #tpu.memory_space<vmem>>, vector<1x8x256xf32>
    %43 = vector.shape_cast %42 : vector<1x8x256xf32> to vector<8x256xf32>
    %c0_17 = arith.constant 0 : index
    %c0_18 = arith.constant 0 : index
    %c0_19 = arith.constant 0 : index
    %44 = vector.load %arg6[%c0_17, %c0_18, %c0_19] : memref<2x8x256xf32, #tpu.memory_space<vmem>>, vector<1x8x256xf32>
    %45 = vector.shape_cast %44 : vector<1x8x256xf32> to vector<8x256xf32>
    %46 = vector.extract_strided_slice %41 {offsets = [0, 0], sizes = [8, 256], strides = [1, 1]} : vector<8x512xf32> to vector<8x256xf32>
    %cst_20 = arith.constant dense<0.000000e+00> : vector<8xf32>
    %47 = vector.multi_reduction <add>, %46, %cst_20 [1] : vector<8x256xf32> to vector<8xf32>
    %48 = vector.shape_cast %47 : vector<8xf32> to vector<8x1xf32>
    %cst_21 = arith.constant dense<0.000000e+00> : vector<1xf32>
    %49 = vector.multi_reduction <add>, %48, %cst_21 [0] : vector<8x1xf32> to vector<1xf32>
    %50 = vector.shape_cast %49 : vector<1xf32> to vector<1x1xf32>
    %cst_22 = arith.constant 9.765625E-4 : f32
    %51 = vector.broadcast %cst_22 : f32 to vector<1x1xf32>
    %52 = arith.mulf %50, %51 : vector<1x1xf32>
    %53 = arith.mulf %46, %46 : vector<8x256xf32>
    %cst_23 = arith.constant dense<0.000000e+00> : vector<8xf32>
    %54 = vector.multi_reduction <add>, %53, %cst_23 [1] : vector<8x256xf32> to vector<8xf32>
    %55 = vector.shape_cast %54 : vector<8xf32> to vector<8x1xf32>
    %cst_24 = arith.constant dense<0.000000e+00> : vector<1xf32>
    %56 = vector.multi_reduction <add>, %55, %cst_24 [0] : vector<8x1xf32> to vector<1xf32>
    %57 = vector.shape_cast %56 : vector<1xf32> to vector<1x1xf32>
    %cst_25 = arith.constant 9.765625E-4 : f32
    %58 = vector.broadcast %cst_25 : f32 to vector<1x1xf32>
    %59 = arith.mulf %57, %58 : vector<1x1xf32>
    %60 = arith.mulf %52, %52 : vector<1x1xf32>
    %61 = arith.subf %59, %60 : vector<1x1xf32>
    %cst_26 = arith.constant 9.99999974E-6 : f32
    %62 = vector.broadcast %cst_26 : f32 to vector<1x1xf32>
    %63 = arith.addf %61, %62 : vector<1x1xf32>
    %64 = math.rsqrt %63 : vector<1x1xf32>
    %65 = vector.broadcast %52 : vector<1x1xf32> to vector<8x256xf32>
    %66 = arith.subf %46, %65 : vector<8x256xf32>
    %67 = vector.broadcast %64 : vector<1x1xf32> to vector<8x256xf32>
    %68 = arith.mulf %66, %67 : vector<8x256xf32>
    %69 = arith.mulf %68, %43 : vector<8x256xf32>
    %70 = arith.addf %69, %45 : vector<8x256xf32>
    %cst_27 = arith.constant 0.000000e+00 : f32
    %71 = vector.broadcast %cst_27 : f32 to vector<8x256xf32>
    %72 = arith.cmpf oge, %70, %71 : vector<8x256xf32>
    %cst_28 = arith.constant 0.00999999977 : f32
    %73 = vector.broadcast %cst_28 : f32 to vector<8x256xf32>
    %74 = arith.mulf %73, %70 : vector<8x256xf32>
    %75 = arith.select %72, %70, %74 : vector<8x256xi1>, vector<8x256xf32>
    %76 = vector.extract_strided_slice %41 {offsets = [0, 256], sizes = [8, 256], strides = [1, 1]} : vector<8x512xf32> to vector<8x256xf32>
    %cst_29 = arith.constant dense<0.000000e+00> : vector<8xf32>
    %77 = vector.multi_reduction <add>, %76, %cst_29 [1] : vector<8x256xf32> to vector<8xf32>
    %78 = vector.shape_cast %77 : vector<8xf32> to vector<8x1xf32>
    %cst_30 = arith.constant dense<0.000000e+00> : vector<1xf32>
    %79 = vector.multi_reduction <add>, %78, %cst_30 [0] : vector<8x1xf32> to vector<1xf32>
    %80 = vector.shape_cast %79 : vector<1xf32> to vector<1x1xf32>
    %cst_31 = arith.constant 9.765625E-4 : f32
    %81 = vector.broadcast %cst_31 : f32 to vector<1x1xf32>
    %82 = arith.mulf %80, %81 : vector<1x1xf32>
    %83 = arith.mulf %76, %76 : vector<8x256xf32>
    %cst_32 = arith.constant dense<0.000000e+00> : vector<8xf32>
    %84 = vector.multi_reduction <add>, %83, %cst_32 [1] : vector<8x256xf32> to vector<8xf32>
    %85 = vector.shape_cast %84 : vector<8xf32> to vector<8x1xf32>
    %cst_33 = arith.constant dense<0.000000e+00> : vector<1xf32>
    %86 = vector.multi_reduction <add>, %85, %cst_33 [0] : vector<8x1xf32> to vector<1xf32>
    %87 = vector.shape_cast %86 : vector<1xf32> to vector<1x1xf32>
    %cst_34 = arith.constant 9.765625E-4 : f32
    %88 = vector.broadcast %cst_34 : f32 to vector<1x1xf32>
    %89 = arith.mulf %87, %88 : vector<1x1xf32>
    %90 = arith.mulf %82, %82 : vector<1x1xf32>
    %91 = arith.subf %89, %90 : vector<1x1xf32>
    %cst_35 = arith.constant 9.99999974E-6 : f32
    %92 = vector.broadcast %cst_35 : f32 to vector<1x1xf32>
    %93 = arith.addf %91, %92 : vector<1x1xf32>
    %94 = math.rsqrt %93 : vector<1x1xf32>
    %95 = vector.broadcast %82 : vector<1x1xf32> to vector<8x256xf32>
    %96 = arith.subf %76, %95 : vector<8x256xf32>
    %97 = vector.broadcast %94 : vector<1x1xf32> to vector<8x256xf32>
    %98 = arith.mulf %96, %97 : vector<8x256xf32>
    %99 = arith.mulf %98, %43 : vector<8x256xf32>
    %100 = arith.addf %99, %45 : vector<8x256xf32>
    %cst_36 = arith.constant 0.000000e+00 : f32
    %101 = vector.broadcast %cst_36 : f32 to vector<8x256xf32>
    %102 = arith.cmpf oge, %100, %101 : vector<8x256xf32>
    %cst_37 = arith.constant 0.00999999977 : f32
    %103 = vector.broadcast %cst_37 : f32 to vector<8x256xf32>
    %104 = arith.mulf %103, %100 : vector<8x256xf32>
    %105 = arith.select %102, %100, %104 : vector<8x256xi1>, vector<8x256xf32>
    %106 = tpu.concatenate %75, %105 in 1 : vector<8x256xf32>, vector<8x256xf32> -> vector<8x512xf32>
    %107 = arith.addf %28, %106 : vector<8x512xf32>
    %c1_38 = arith.constant 1 : index
    %c0_39 = arith.constant 0 : index
    %c0_40 = arith.constant 0 : index
    %108 = vector.load %arg4[%c1_38, %c0_39, %c0_40] : memref<2x8x72xf32, #tpu.memory_space<vmem>>, vector<1x8x72xf32>
    %109 = vector.shape_cast %108 : vector<1x8x72xf32> to vector<8x72xf32>
    %c17_i32_41 = arith.constant 17 : i32
    %110 = tpu.dynamic_rotate %107 by %c17_i32_41 dim 1 : vector<8x512xf32>, i32 -> vector<8x512xf32>
    %c16_i32_42 = arith.constant 16 : i32
    %111 = tpu.dynamic_rotate %107 by %c16_i32_42 dim 1 : vector<8x512xf32>, i32 -> vector<8x512xf32>
    %c15_i32_43 = arith.constant 15 : i32
    %112 = tpu.dynamic_rotate %107 by %c15_i32_43 dim 1 : vector<8x512xf32>, i32 -> vector<8x512xf32>
    %c1_i32_44 = arith.constant 1 : i32
    %113 = tpu.dynamic_rotate %107 by %c1_i32_44 dim 1 : vector<8x512xf32>, i32 -> vector<8x512xf32>
    %c511_i32_45 = arith.constant 511 : i32
    %114 = tpu.dynamic_rotate %107 by %c511_i32_45 dim 1 : vector<8x512xf32>, i32 -> vector<8x512xf32>
    %c497_i32_46 = arith.constant 497 : i32
    %115 = tpu.dynamic_rotate %107 by %c497_i32_46 dim 1 : vector<8x512xf32>, i32 -> vector<8x512xf32>
    %c496_i32_47 = arith.constant 496 : i32
    %116 = tpu.dynamic_rotate %107 by %c496_i32_47 dim 1 : vector<8x512xf32>, i32 -> vector<8x512xf32>
    %c495_i32_48 = arith.constant 495 : i32
    %117 = tpu.dynamic_rotate %107 by %c495_i32_48 dim 1 : vector<8x512xf32>, i32 -> vector<8x512xf32>
    %118 = tpu.concatenate %110, %111, %112, %113, %107, %114, %115, %116, %117 in 0 : vector<8x512xf32>, vector<8x512xf32>, vector<8x512xf32>, vector<8x512xf32>, vector<8x512xf32>, vector<8x512xf32>, vector<8x512xf32>, vector<8x512xf32>, vector<8x512xf32> -> vector<72x512xf32>
    %119 = arith.mulf %118, %27 : vector<72x512xf32>
    %cst_49 = arith.constant dense<0.000000e+00> : vector<8x512xf32>
    %120 = tpu.matmul %109, %119, %cst_49 {dimension_numbers = #tpu.dot_dimension_numbers<[1], [0], [0], [1], [0, 0, 1, 1], [], []>, precision = #tpu.contract_precision<fp32>} : vector<8x72xf32>, vector<72x512xf32>, vector<8x512xf32> -> vector<8x512xf32>
    %c1_50 = arith.constant 1 : index
    %c0_51 = arith.constant 0 : index
    %c0_52 = arith.constant 0 : index
    %121 = vector.load %arg5[%c1_50, %c0_51, %c0_52] : memref<2x8x256xf32, #tpu.memory_space<vmem>>, vector<1x8x256xf32>
    %122 = vector.shape_cast %121 : vector<1x8x256xf32> to vector<8x256xf32>
    %c1_53 = arith.constant 1 : index
    %c0_54 = arith.constant 0 : index
    %c0_55 = arith.constant 0 : index
    %123 = vector.load %arg6[%c1_53, %c0_54, %c0_55] : memref<2x8x256xf32, #tpu.memory_space<vmem>>, vector<1x8x256xf32>
    %124 = vector.shape_cast %123 : vector<1x8x256xf32> to vector<8x256xf32>
    %125 = vector.extract_strided_slice %120 {offsets = [0, 0], sizes = [8, 256], strides = [1, 1]} : vector<8x512xf32> to vector<8x256xf32>
    %cst_56 = arith.constant dense<0.000000e+00> : vector<8xf32>
    %126 = vector.multi_reduction <add>, %125, %cst_56 [1] : vector<8x256xf32> to vector<8xf32>
    %127 = vector.shape_cast %126 : vector<8xf32> to vector<8x1xf32>
    %cst_57 = arith.constant dense<0.000000e+00> : vector<1xf32>
    %128 = vector.multi_reduction <add>, %127, %cst_57 [0] : vector<8x1xf32> to vector<1xf32>
    %129 = vector.shape_cast %128 : vector<1xf32> to vector<1x1xf32>
    %cst_58 = arith.constant 9.765625E-4 : f32
    %130 = vector.broadcast %cst_58 : f32 to vector<1x1xf32>
    %131 = arith.mulf %129, %130 : vector<1x1xf32>
    %132 = arith.mulf %125, %125 : vector<8x256xf32>
    %cst_59 = arith.constant dense<0.000000e+00> : vector<8xf32>
    %133 = vector.multi_reduction <add>, %132, %cst_59 [1] : vector<8x256xf32> to vector<8xf32>
    %134 = vector.shape_cast %133 : vector<8xf32> to vector<8x1xf32>
    %cst_60 = arith.constant dense<0.000000e+00> : vector<1xf32>
    %135 = vector.multi_reduction <add>, %134, %cst_60 [0] : vector<8x1xf32> to vector<1xf32>
    %136 = vector.shape_cast %135 : vector<1xf32> to vector<1x1xf32>
    %cst_61 = arith.constant 9.765625E-4 : f32
    %137 = vector.broadcast %cst_61 : f32 to vector<1x1xf32>
    %138 = arith.mulf %136, %137 : vector<1x1xf32>
    %139 = arith.mulf %131, %131 : vector<1x1xf32>
    %140 = arith.subf %138, %139 : vector<1x1xf32>
    %cst_62 = arith.constant 9.99999974E-6 : f32
    %141 = vector.broadcast %cst_62 : f32 to vector<1x1xf32>
    %142 = arith.addf %140, %141 : vector<1x1xf32>
    %143 = math.rsqrt %142 : vector<1x1xf32>
    %144 = vector.broadcast %131 : vector<1x1xf32> to vector<8x256xf32>
    %145 = arith.subf %125, %144 : vector<8x256xf32>
    %146 = vector.broadcast %143 : vector<1x1xf32> to vector<8x256xf32>
    %147 = arith.mulf %145, %146 : vector<8x256xf32>
    %148 = arith.mulf %147, %122 : vector<8x256xf32>
    %149 = arith.addf %148, %124 : vector<8x256xf32>
    %cst_63 = arith.constant 0.000000e+00 : f32
    %150 = vector.broadcast %cst_63 : f32 to vector<8x256xf32>
    %151 = arith.cmpf oge, %149, %150 : vector<8x256xf32>
    %cst_64 = arith.constant 0.00999999977 : f32
    %152 = vector.broadcast %cst_64 : f32 to vector<8x256xf32>
    %153 = arith.mulf %152, %149 : vector<8x256xf32>
    %154 = arith.select %151, %149, %153 : vector<8x256xi1>, vector<8x256xf32>
    %155 = vector.extract_strided_slice %120 {offsets = [0, 256], sizes = [8, 256], strides = [1, 1]} : vector<8x512xf32> to vector<8x256xf32>
    %cst_65 = arith.constant dense<0.000000e+00> : vector<8xf32>
    %156 = vector.multi_reduction <add>, %155, %cst_65 [1] : vector<8x256xf32> to vector<8xf32>
    %157 = vector.shape_cast %156 : vector<8xf32> to vector<8x1xf32>
    %cst_66 = arith.constant dense<0.000000e+00> : vector<1xf32>
    %158 = vector.multi_reduction <add>, %157, %cst_66 [0] : vector<8x1xf32> to vector<1xf32>
    %159 = vector.shape_cast %158 : vector<1xf32> to vector<1x1xf32>
    %cst_67 = arith.constant 9.765625E-4 : f32
    %160 = vector.broadcast %cst_67 : f32 to vector<1x1xf32>
    %161 = arith.mulf %159, %160 : vector<1x1xf32>
    %162 = arith.mulf %155, %155 : vector<8x256xf32>
    %cst_68 = arith.constant dense<0.000000e+00> : vector<8xf32>
    %163 = vector.multi_reduction <add>, %162, %cst_68 [1] : vector<8x256xf32> to vector<8xf32>
    %164 = vector.shape_cast %163 : vector<8xf32> to vector<8x1xf32>
    %cst_69 = arith.constant dense<0.000000e+00> : vector<1xf32>
    %165 = vector.multi_reduction <add>, %164, %cst_69 [0] : vector<8x1xf32> to vector<1xf32>
    %166 = vector.shape_cast %165 : vector<1xf32> to vector<1x1xf32>
    %cst_70 = arith.constant 9.765625E-4 : f32
    %167 = vector.broadcast %cst_70 : f32 to vector<1x1xf32>
    %168 = arith.mulf %166, %167 : vector<1x1xf32>
    %169 = arith.mulf %161, %161 : vector<1x1xf32>
    %170 = arith.subf %168, %169 : vector<1x1xf32>
    %cst_71 = arith.constant 9.99999974E-6 : f32
    %171 = vector.broadcast %cst_71 : f32 to vector<1x1xf32>
    %172 = arith.addf %170, %171 : vector<1x1xf32>
    %173 = math.rsqrt %172 : vector<1x1xf32>
    %174 = vector.broadcast %161 : vector<1x1xf32> to vector<8x256xf32>
    %175 = arith.subf %155, %174 : vector<8x256xf32>
    %176 = vector.broadcast %173 : vector<1x1xf32> to vector<8x256xf32>
    %177 = arith.mulf %175, %176 : vector<8x256xf32>
    %178 = arith.mulf %177, %122 : vector<8x256xf32>
    %179 = arith.addf %178, %124 : vector<8x256xf32>
    %cst_72 = arith.constant 0.000000e+00 : f32
    %180 = vector.broadcast %cst_72 : f32 to vector<8x256xf32>
    %181 = arith.cmpf oge, %179, %180 : vector<8x256xf32>
    %cst_73 = arith.constant 0.00999999977 : f32
    %182 = vector.broadcast %cst_73 : f32 to vector<8x256xf32>
    %183 = arith.mulf %182, %179 : vector<8x256xf32>
    %184 = arith.select %181, %179, %183 : vector<8x256xi1>, vector<8x256xf32>
    %185 = tpu.concatenate %154, %184 in 1 : vector<8x256xf32>, vector<8x256xf32> -> vector<8x512xf32>
    %186 = arith.addf %107, %185 : vector<8x512xf32>
    %c0_74 = arith.constant 0 : index
    %c0_75 = arith.constant 0 : index
    %187 = vector.load %arg3[%c0_74, %c0_75] : memref<16x512xf32, #tpu.memory_space<vmem>>, vector<1x512xf32>
    %188 = vector.shape_cast %187 : vector<1x512xf32> to vector<1x512xf32>
    %189 = vector.broadcast %188 : vector<1x512xf32> to vector<8x512xf32>
    %c1_76 = arith.constant 1 : index
    %c0_77 = arith.constant 0 : index
    %190 = vector.load %arg3[%c1_76, %c0_77] : memref<16x512xf32, #tpu.memory_space<vmem>>, vector<1x512xf32>
    %191 = vector.shape_cast %190 : vector<1x512xf32> to vector<1x512xf32>
    %192 = vector.broadcast %191 : vector<1x512xf32> to vector<8x512xf32>
    %c2_78 = arith.constant 2 : index
    %c0_79 = arith.constant 0 : index
    %193 = vector.load %arg3[%c2_78, %c0_79] : memref<16x512xf32, #tpu.memory_space<vmem>>, vector<1x512xf32>
    %194 = vector.shape_cast %193 : vector<1x512xf32> to vector<1x512xf32>
    %195 = vector.broadcast %194 : vector<1x512xf32> to vector<8x512xf32>
    %c3_80 = arith.constant 3 : index
    %c0_81 = arith.constant 0 : index
    %196 = vector.load %arg3[%c3_80, %c0_81] : memref<16x512xf32, #tpu.memory_space<vmem>>, vector<1x512xf32>
    %197 = vector.shape_cast %196 : vector<1x512xf32> to vector<1x512xf32>
    %198 = vector.broadcast %197 : vector<1x512xf32> to vector<8x512xf32>
    %c4_82 = arith.constant 4 : index
    %c0_83 = arith.constant 0 : index
    %199 = vector.load %arg3[%c4_82, %c0_83] : memref<16x512xf32, #tpu.memory_space<vmem>>, vector<1x512xf32>
    %200 = vector.shape_cast %199 : vector<1x512xf32> to vector<1x512xf32>
    %201 = vector.broadcast %200 : vector<1x512xf32> to vector<8x512xf32>
    %c5_84 = arith.constant 5 : index
    %c0_85 = arith.constant 0 : index
    %202 = vector.load %arg3[%c5_84, %c0_85] : memref<16x512xf32, #tpu.memory_space<vmem>>, vector<1x512xf32>
    %203 = vector.shape_cast %202 : vector<1x512xf32> to vector<1x512xf32>
    %204 = vector.broadcast %203 : vector<1x512xf32> to vector<8x512xf32>
    %c6_86 = arith.constant 6 : index
    %c0_87 = arith.constant 0 : index
    %205 = vector.load %arg3[%c6_86, %c0_87] : memref<16x512xf32, #tpu.memory_space<vmem>>, vector<1x512xf32>
    %206 = vector.shape_cast %205 : vector<1x512xf32> to vector<1x512xf32>
    %207 = vector.broadcast %206 : vector<1x512xf32> to vector<8x512xf32>
    %c7_88 = arith.constant 7 : index
    %c0_89 = arith.constant 0 : index
    %208 = vector.load %arg3[%c7_88, %c0_89] : memref<16x512xf32, #tpu.memory_space<vmem>>, vector<1x512xf32>
    %209 = vector.shape_cast %208 : vector<1x512xf32> to vector<1x512xf32>
    %210 = vector.broadcast %209 : vector<1x512xf32> to vector<8x512xf32>
    %c8_90 = arith.constant 8 : index
    %c0_91 = arith.constant 0 : index
    %211 = vector.load %arg3[%c8_90, %c0_91] : memref<16x512xf32, #tpu.memory_space<vmem>>, vector<1x512xf32>
    %212 = vector.shape_cast %211 : vector<1x512xf32> to vector<1x512xf32>
    %213 = vector.broadcast %212 : vector<1x512xf32> to vector<8x512xf32>
    %c9 = arith.constant 9 : index
    %c0_92 = arith.constant 0 : index
    %214 = vector.load %arg3[%c9, %c0_92] : memref<16x512xf32, #tpu.memory_space<vmem>>, vector<1x512xf32>
    %215 = vector.shape_cast %214 : vector<1x512xf32> to vector<1x512xf32>
    %216 = vector.broadcast %215 : vector<1x512xf32> to vector<8x512xf32>
    %c10 = arith.constant 10 : index
    %c0_93 = arith.constant 0 : index
    %217 = vector.load %arg3[%c10, %c0_93] : memref<16x512xf32, #tpu.memory_space<vmem>>, vector<1x512xf32>
    %218 = vector.shape_cast %217 : vector<1x512xf32> to vector<1x512xf32>
    %219 = vector.broadcast %218 : vector<1x512xf32> to vector<8x512xf32>
    %c11 = arith.constant 11 : index
    %c0_94 = arith.constant 0 : index
    %220 = vector.load %arg3[%c11, %c0_94] : memref<16x512xf32, #tpu.memory_space<vmem>>, vector<1x512xf32>
    %221 = vector.shape_cast %220 : vector<1x512xf32> to vector<1x512xf32>
    %222 = vector.broadcast %221 : vector<1x512xf32> to vector<8x512xf32>
    %c12 = arith.constant 12 : index
    %c0_95 = arith.constant 0 : index
    %223 = vector.load %arg3[%c12, %c0_95] : memref<16x512xf32, #tpu.memory_space<vmem>>, vector<1x512xf32>
    %224 = vector.shape_cast %223 : vector<1x512xf32> to vector<1x512xf32>
    %225 = vector.broadcast %224 : vector<1x512xf32> to vector<8x512xf32>
    %c13 = arith.constant 13 : index
    %c0_96 = arith.constant 0 : index
    %226 = vector.load %arg3[%c13, %c0_96] : memref<16x512xf32, #tpu.memory_space<vmem>>, vector<1x512xf32>
    %227 = vector.shape_cast %226 : vector<1x512xf32> to vector<1x512xf32>
    %228 = vector.broadcast %227 : vector<1x512xf32> to vector<8x512xf32>
    %c14 = arith.constant 14 : index
    %c0_97 = arith.constant 0 : index
    %229 = vector.load %arg3[%c14, %c0_97] : memref<16x512xf32, #tpu.memory_space<vmem>>, vector<1x512xf32>
    %230 = vector.shape_cast %229 : vector<1x512xf32> to vector<1x512xf32>
    %231 = vector.broadcast %230 : vector<1x512xf32> to vector<8x512xf32>
    %c15 = arith.constant 15 : index
    %c0_98 = arith.constant 0 : index
    %232 = vector.load %arg3[%c15, %c0_98] : memref<16x512xf32, #tpu.memory_space<vmem>>, vector<1x512xf32>
    %233 = vector.shape_cast %232 : vector<1x512xf32> to vector<1x512xf32>
    %234 = vector.broadcast %233 : vector<1x512xf32> to vector<8x512xf32>
    %235 = tpu.concatenate %189, %192, %195, %198, %201, %204, %207, %210, %213, %216, %219, %222, %225, %228, %231, %234 in 0 : vector<8x512xf32>, vector<8x512xf32>, vector<8x512xf32>, vector<8x512xf32>, vector<8x512xf32>, vector<8x512xf32>, vector<8x512xf32>, vector<8x512xf32>, vector<8x512xf32>, vector<8x512xf32>, vector<8x512xf32>, vector<8x512xf32>, vector<8x512xf32>, vector<8x512xf32>, vector<8x512xf32>, vector<8x512xf32> -> vector<128x512xf32>
    %c17_i32_99 = arith.constant 17 : i32
    %236 = tpu.dynamic_rotate %186 by %c17_i32_99 dim 1 : vector<8x512xf32>, i32 -> vector<8x512xf32>
    %c16_i32_100 = arith.constant 16 : i32
    %237 = tpu.dynamic_rotate %186 by %c16_i32_100 dim 1 : vector<8x512xf32>, i32 -> vector<8x512xf32>
    %c15_i32_101 = arith.constant 15 : i32
    %238 = tpu.dynamic_rotate %186 by %c15_i32_101 dim 1 : vector<8x512xf32>, i32 -> vector<8x512xf32>
    %c14_i32 = arith.constant 14 : i32
    %239 = tpu.dynamic_rotate %186 by %c14_i32 dim 1 : vector<8x512xf32>, i32 -> vector<8x512xf32>
    %c1_i32_102 = arith.constant 1 : i32
    %240 = tpu.dynamic_rotate %186 by %c1_i32_102 dim 1 : vector<8x512xf32>, i32 -> vector<8x512xf32>
    %c511_i32_103 = arith.constant 511 : i32
    %241 = tpu.dynamic_rotate %186 by %c511_i32_103 dim 1 : vector<8x512xf32>, i32 -> vector<8x512xf32>
    %c510_i32 = arith.constant 510 : i32
    %242 = tpu.dynamic_rotate %186 by %c510_i32 dim 1 : vector<8x512xf32>, i32 -> vector<8x512xf32>
    %c497_i32_104 = arith.constant 497 : i32
    %243 = tpu.dynamic_rotate %186 by %c497_i32_104 dim 1 : vector<8x512xf32>, i32 -> vector<8x512xf32>
    %c496_i32_105 = arith.constant 496 : i32
    %244 = tpu.dynamic_rotate %186 by %c496_i32_105 dim 1 : vector<8x512xf32>, i32 -> vector<8x512xf32>
    %c495_i32_106 = arith.constant 495 : i32
    %245 = tpu.dynamic_rotate %186 by %c495_i32_106 dim 1 : vector<8x512xf32>, i32 -> vector<8x512xf32>
    %c494_i32 = arith.constant 494 : i32
    %246 = tpu.dynamic_rotate %186 by %c494_i32 dim 1 : vector<8x512xf32>, i32 -> vector<8x512xf32>
    %c481_i32 = arith.constant 481 : i32
    %247 = tpu.dynamic_rotate %186 by %c481_i32 dim 1 : vector<8x512xf32>, i32 -> vector<8x512xf32>
    %c480_i32 = arith.constant 480 : i32
    %248 = tpu.dynamic_rotate %186 by %c480_i32 dim 1 : vector<8x512xf32>, i32 -> vector<8x512xf32>
    %c479_i32 = arith.constant 479 : i32
    %249 = tpu.dynamic_rotate %186 by %c479_i32 dim 1 : vector<8x512xf32>, i32 -> vector<8x512xf32>
    %c478_i32 = arith.constant 478 : i32
    %250 = tpu.dynamic_rotate %186 by %c478_i32 dim 1 : vector<8x512xf32>, i32 -> vector<8x512xf32>
    %251 = tpu.concatenate %236, %237, %238, %239, %240, %186, %241, %242, %243, %244, %245, %246, %247, %248, %249, %250 in 0 : vector<8x512xf32>, vector<8x512xf32>, vector<8x512xf32>, vector<8x512xf32>, vector<8x512xf32>, vector<8x512xf32>, vector<8x512xf32>, vector<8x512xf32>, vector<8x512xf32>, vector<8x512xf32>, vector<8x512xf32>, vector<8x512xf32>, vector<8x512xf32>, vector<8x512xf32>, vector<8x512xf32>, vector<8x512xf32> -> vector<128x512xf32>
    %252 = arith.mulf %251, %235 : vector<128x512xf32>
    %cst_107 = arith.constant 1.000000e+00 : f32
    %253 = vector.broadcast %cst_107 : f32 to vector<1x512xf32>
    %254 = tpu.concatenate %252, %253 in 0 : vector<128x512xf32>, vector<1x512xf32> -> vector<129x512xf32>
    %c0_108 = arith.constant 0 : index
    %c0_109 = arith.constant 0 : index
    %255 = vector.load %arg7[%c0_108, %c0_109] : memref<8x129xf32, #tpu.memory_space<vmem>>, vector<8x129xf32>
    %cst_110 = arith.constant dense<0.000000e+00> : vector<8x512xf32>
    %256 = tpu.matmul %255, %254, %cst_110 {dimension_numbers = #tpu.dot_dimension_numbers<[1], [0], [0], [1], [0, 0, 1, 1], [], []>, precision = #tpu.contract_precision<fp32>} : vector<8x129xf32>, vector<129x512xf32>, vector<8x512xf32> -> vector<8x512xf32>
    %257 = tpu.iota {dimensions = array<i32: 0>} : vector<512x128xi32>
    %258 = tpu.iota {dimensions = array<i32: 1>} : vector<512x128xi32>
    %c6_i32 = arith.constant 6 : i32
    %259 = vector.broadcast %c6_i32 : i32 to vector<512x128xi32>
    %260 = arith.shrsi %258, %259 : vector<512x128xi32>
    %c8_i32 = arith.constant 8 : i32
    %261 = vector.broadcast %c8_i32 : i32 to vector<512x128xi32>
    %262 = arith.shli %260, %261 : vector<512x128xi32>
    %c63_i32 = arith.constant 63 : i32
    %263 = vector.broadcast %c63_i32 : i32 to vector<512x128xi32>
    %264 = arith.andi %258, %263 : vector<512x128xi32>
    %c3_i32 = arith.constant 3 : i32
    %265 = vector.broadcast %c3_i32 : i32 to vector<512x128xi32>
    %266 = arith.shrsi %264, %265 : vector<512x128xi32>
    %c5_i32 = arith.constant 5 : i32
    %267 = vector.broadcast %c5_i32 : i32 to vector<512x128xi32>
    %268 = arith.shli %266, %267 : vector<512x128xi32>
    %269 = arith.ori %262, %268 : vector<512x128xi32>
    %c7_i32 = arith.constant 7 : i32
    %270 = vector.broadcast %c7_i32 : i32 to vector<512x128xi32>
    %271 = arith.andi %258, %270 : vector<512x128xi32>
    %c1_i32_111 = arith.constant 1 : i32
    %272 = vector.broadcast %c1_i32_111 : i32 to vector<512x128xi32>
    %273 = arith.shli %271, %272 : vector<512x128xi32>
    %274 = arith.ori %269, %273 : vector<512x128xi32>
    %275 = arith.cmpi eq, %257, %274 : vector<512x128xi32>
    %276 = arith.extui %275 : vector<512x128xi1> to vector<512x128xi32>
    %277 = arith.sitofp %276 : vector<512x128xi32> to vector<512x128xf32>
    %cst_112 = arith.constant dense<0.000000e+00> : vector<8x128xf32>
    %278 = tpu.matmul %256, %277, %cst_112 {dimension_numbers = #tpu.dot_dimension_numbers<[1], [0], [0], [1], [0, 0, 1, 1], [], []>, precision = #tpu.contract_precision<fp32>} : vector<8x512xf32>, vector<512x128xf32>, vector<8x128xf32> -> vector<8x128xf32>
    %c0_113 = arith.constant 0 : index
    %c0_114 = arith.constant 0 : index
    %279 = vector.load %arg8[%c0_113, %c0_114] : memref<8x128xf32, #tpu.memory_space<vmem>>, vector<8x128xf32>
    tpu.vector_store %arg8[%c0_113, %c0_114], %278 {strides = array<i32>} : memref<8x128xf32, #tpu.memory_space<vmem>>, vector<8x128xf32>,
    return
  }
  func.func @transform_0(%arg0: i32) -> (i32, i32) {
    %c0_i32 = arith.constant 0 : i32
    %c0_i32_0 = arith.constant 0 : i32
    %c0_i32_1 = arith.constant 0 : i32
    return %c0_i32, %c0_i32_0 : i32, i32
  }
  func.func @transform_1(%arg0: i32) -> (i32, i32) {
    %c0_i32 = arith.constant 0 : i32
    %c0_i32_0 = arith.constant 0 : i32
    %c0_i32_1 = arith.constant 0 : i32
    return %c0_i32, %c0_i32_0 : i32, i32
  }
  func.func @transform_2(%arg0: i32) -> (i32, i32) {
    %c0_i32 = arith.constant 0 : i32
    %c0_i32_0 = arith.constant 0 : i32
    %c0_i32_1 = arith.constant 0 : i32
    return %c0_i32, %c0_i32_0 : i32, i32
  }
  func.func @transform_3(%arg0: i32) -> (i32, i32, i32) {
    %c0_i32 = arith.constant 0 : i32
    %c0_i32_0 = arith.constant 0 : i32
    %c0_i32_1 = arith.constant 0 : i32
    %c0_i32_2 = arith.constant 0 : i32
    return %c0_i32, %c0_i32_0, %c0_i32_1 : i32, i32, i32
  }
  func.func @transform_4(%arg0: i32) -> (i32, i32, i32) {
    %c0_i32 = arith.constant 0 : i32
    %c0_i32_0 = arith.constant 0 : i32
    %c0_i32_1 = arith.constant 0 : i32
    %c0_i32_2 = arith.constant 0 : i32
    return %c0_i32, %c0_i32_0, %c0_i32_1 : i32, i32, i32
  }
  func.func @transform_5(%arg0: i32) -> (i32, i32, i32) {
    %c0_i32 = arith.constant 0 : i32
    %c0_i32_0 = arith.constant 0 : i32
    %c0_i32_1 = arith.constant 0 : i32
    %c0_i32_2 = arith.constant 0 : i32
    return %c0_i32, %c0_i32_0, %c0_i32_1 : i32, i32, i32
  }
  func.func @transform_6(%arg0: i32) -> (i32, i32) {
    %c0_i32 = arith.constant 0 : i32
    %c0_i32_0 = arith.constant 0 : i32
    %c0_i32_1 = arith.constant 0 : i32
    return %c0_i32, %c0_i32_0 : i32, i32
  }
  func.func @transform_7(%arg0: i32) -> (i32, i32) {
    %c0_i32 = arith.constant 0 : i32
    %c0_i32_0 = arith.constant 0 : i32
    %c0_i32_1 = arith.constant 0 : i32
    return %c0_i32, %c0_i32_0 : i32, i32
  }
}

</mosaic_0001>

<bundles_post_ra>
// kernel: discriminator_block_forward.1
= control target key start
LH: loop header
LB: loop body
LE: loop exit
PB: predicated region body
PF: predicated region fallthrough
CT: control target
= control target key end

     0   :  { %s6987_s26 = smov 113   ;;  %s6988_s27 = smov 112   ;;  %v12928_v6 = vlaneseq  ;;  %vm271_vm6 = vcmask 588800   ;;  %s12920_s0 = inlined_call_operand.vmem [shape: f32[8,512], index: 0, kind: input, shape index: {}]   ;;  %s12921_s1 = inlined_call_operand.vmem [shape: f32[9,512], index: 1, kind: input, shape index: {}]   ;;  %s12922_s3 = inlined_call_operand.vmem [shape: f32[2,8,72], index: 3, kind: input, shape index: {}]   ;;  %s12923_s4 = inlined_call_operand.vmem [shape: f32[2,8,256], index: 4, kind: input, shape index: {}]   ;;  %s12924_s5 = inlined_call_operand.vmem [shape: f32[2,8,256], index: 5, kind: input, shape index: {}]   ;;  %s12925_s2 = inlined_call_operand.vmem [shape: f32[16,512], index: 2, kind: input, shape index: {}]   ;;  %s12926_s6 = inlined_call_operand.vmem [shape: f32[8,129], index: 6, kind: input, shape index: {}]   ;;  %s12927_s7 = inlined_call_operand.vmem [shape: f32[8,128], index: 7, kind: output, shape index: {}]  }
   0x1   :  { %v7048_v0 = vld [vmem:[%s12920_s0] sm:$0xff]  ;;  %s6989_s28 = smov 111   ;;  %v7059_v1 = vld [vmem:[%s12920_s0 + $0x8] sm:$0xff]  ;;  %v7070_v2 = vld [vmem:[%s12920_s0 + $0x10] sm:$0xff]  ;;  %s6990_s10 = smov 127  }
   0x2   :  { %196 = vrot.lane.b32.xlu2 %v7048_v0, %s6987_s26  ;;  %209 = vrot.lane.b32.xlu1 %v7048_v0, %s6988_s27  ;;  %13235 = vst [vmem:[#allocation2_spill] sm:$0xff] %v7070_v2  ;;  %v7081_v3 = vld [vmem:[%s12920_s0 + $0x18] sm:$0xff]  ;;  %s6991_s13 = smov 1   ;;  %s6992_s14 = smov 15   ;;  %v7134_v7 = vand.u32 127, %v12928_v6 }
   0x3   :  { %222 = vrot.lane.b32.xlu0 %v7048_v0, %s6989_s28  ;;  %13236 = vst [vmem:[#allocation3_spill] sm:$0xff] %v7081_v3  ;;  %s6993_s15 = smov 16   ;;  %s6994_s16 = smov 17   ;;  %v7139_v8 = vld [vmem:[%s12921_s1 + $0x6] ss:$8 sm:$0xf] }
   0x4   :  { %vm204_vm0 = vcmp.lt.s32.totalorder %v7134_v7, 113  ;;  %v12936_v11 = vperm.slane %v7139_v8, 0  ;;  %v7156_v14 = vld [vmem:[%s12921_s1 + $0x4] ss:$8 sm:$0xf]  ;;  %vm217_vm1 = vcmp.lt.s32.totalorder %v7134_v7, 112 }
   0x5   :  { %13239 = vst [vmem:[#allocation6_spill] sm:$0xff] %v7156_v14  ;;  %v7161_v15 = vld [vmem:[%s12921_s1 + $0x7] ss:$8 sm:$0xf]  ;;  %v12934_v18 = vperm.slane %v7156_v14, 0  ;;  %vm230_vm2 = vcmp.lt.s32.totalorder %v7134_v7, 111 }
   0x6   :  { %v7166_v16 = vld [vmem:[%s12921_s1 + $0x20] ss:$8 sm:$0xf]  ;;  %v12937_v19 = vperm.slane %v7161_v15, 0  ;;  %vm191_vm3 = vcmp.lt.s32.totalorder %v7134_v7, 127  ;;  %vm178_vm4 = vcmp.lt.s32.totalorder %v7134_v7, 1 }
   0x7   :  { %v12938_v20 = vperm.slane %v7166_v16, 0  ;;  %v251_v25 = vmul.f32 %v7048_v0, %v12934_v18  ;;  %v7203_v31 = vld [vmem:[%s12921_s1 + $0x5] ss:$8 sm:$0xf]  ;;  %vm165_vm5 = vcmp.lt.s32.totalorder %v7134_v7, 15  ;;  %v12939_v6 = vperm.slane %v7156_v14, 1 }
   0x8   :  { %v12932_v37 = vperm.slane %v7203_v31, 0  ;;  %v7249_v47 = vld [vmem:[%s12921_s1 + $0x3] ss:$8 sm:$0xf]  ;;  %vm13057_vm7 = vcmp.lt.s32.totalorder %v7134_v7, 16  ;;  %vm139_vm8 = vcmp.lt.s32.totalorder %v7134_v7, 17 }
   0x9   :  { %v7210_v34 = vand.u32 4294901760, %v251_v25  ;;  %13242 = vst [vmem:[#allocation9_spill] sm:$0xff] %v7249_v47  ;;  %v12931_v54 = vperm.slane %v7249_v47, 0  ;;  %s6997_s9 = smov 97   ;;  %s6998_s11 = smov 96  }
   0xa   :  { %198 = vrot.lane.b32.xlu2 %v7059_v1, %s6987_s26  ;;  %211 = vrot.lane.b32.xlu1 %v7059_v1, %s6988_s27  ;;  %s6999_s12 = smov 110   ;;  %s7000_s17 = smov 126  }
   0xb   :  { %224 = vrot.lane.b32.xlu0 %v7059_v1, %s6989_s28  ;;  %v7232_v43 = vsub.f32 %v251_v25, %v7210_v34  ;;  %s7001_s18 = smov 14  }
   0xd   :  { %v12941_v53 = vand.u32 4294901760, %v7232_v43 }
   0xf   :  { %v343_v62 = vsub.f32 %v7232_v43, %v12941_v53 }
  0x12   :  { %226 = vrot.lane.b32.xlu2 %v7070_v2, %s6989_s28  ;;  %185 = vrot.lane.b32.xlu1 %v7059_v1, %s6990_s10 }
  0x13   :  { %183 = vrot.lane.b32.xlu0 %v7048_v0, %s6990_s10 }
  0x1a   :  { %176 = vrot.lane.b32.xlu2 %v7081_v3, %s6991_s13  ;;  %170 = vrot.lane.b32.xlu1 %v7048_v0, %s6991_s13 }
  0x1b   :  { %213 = vrot.lane.b32.xlu0 %v7070_v2, %s6988_s27 }
  0x22   :  { %163 = vrot.lane.b32.xlu2 %v7081_v3, %s6992_s14  ;;  %157 = vrot.lane.b32.xlu1 %v7048_v0, %s6992_s14 }
  0x23   :  { %200 = vrot.lane.b32.xlu0 %v7070_v2, %s6987_s26 }
  0x2a   :  { %150 = vrot.lane.b32.xlu2 %v7081_v3, %s6993_s15  ;;  %144 = vrot.lane.b32.xlu1 %v7048_v0, %s6993_s15 }
  0x2b   :  { %187 = vrot.lane.b32.xlu0 %v7070_v2, %s6990_s10 }
  0x32   :  { %172 = vrot.lane.b32.xlu2 %v7059_v1, %s6991_s13  ;;  %135 = vrot.lane.b32.xlu1 %v7081_v3, %s6994_s16 }
  0x33   :  { %129 = vrot.lane.b32.xlu0 %v7048_v0, %s6994_s16 }
  0x3a   :  { %131 = vrot.lane.b32.xlu2 %v7059_v1, %s6994_s16  ;;  %146 = vrot.lane.b32.xlu1 %v7059_v1, %s6993_s15 }
  0x3b   :  { %159 = vrot.lane.b32.xlu0 %v7059_v1, %s6992_s14 }
  0x42   :  { %202 = vrot.lane.b32.xlu2 %v7081_v3, %s6987_s26  ;;  %215 = vrot.lane.b32.xlu1 %v7081_v3, %s6988_s27 }
  0x43   :  { %228 = vrot.lane.b32.xlu0 %v7081_v3, %s6989_s28 }
  0x4a   :  { %161 = vrot.lane.b32.xlu2 %v7070_v2, %s6992_s14  ;;  %174 = vrot.lane.b32.xlu1 %v7070_v2, %s6991_s13 }
  0x4b   :  { %189 = vrot.lane.b32.xlu0 %v7081_v3, %s6990_s10 }
  0x52   :  { %133 = vrot.lane.b32.xlu1 %v7070_v2, %s6994_s16 }
  0x53   :  { %148 = vrot.lane.b32.xlu0 %v7070_v2, %s6993_s15 }
  0x5c   :  { %v7129_v4 = vpop.permute.xlu2 %196 }
  0x64   :  { %v7131_v5 = vpop.permute.xlu2 %198 }
  0x65   :  { %v207_v13 = vsel %vm204_vm0, %v7129_v4, %v7131_v5 }
  0x66   :  { %v259_v17 = vmul.f32 %v207_v13, %v12936_v11  ;;  %v7295_v13 = vld [vmem:[%s12921_s1 + $0x2] ss:$8 sm:$0xf] }
  0x67   :  { %13244 = vst [vmem:[#allocation11_spill] sm:$0xff] %v7295_v13 }
  0x68   :  { %v7177_v22 = vand.u32 4294901760, %v259_v17 }
  0x6a   :  { %v7208_v33 = vsub.f32 %v259_v17, %v7177_v22 }
  0x6c   :  { %v7142_v9 = vpop.permute.xlu2 %226  ;;  %v12944_v42 = vand.u32 4294901760, %v7208_v33 }
  0x6e   :  { %v331_v52 = vsub.f32 %v7208_v33, %v12944_v42 }
  0x70   :  { %v332_v60 = vand.u32 4294901760, %v331_v52  ;;  %v12933_v52 = vperm.slane %v7161_v15, 1 }
  0x74   :  { %v7144_v10 = vpop.permute.xlu1 %209  ;;  %v7188_v26 = vpop.permute.xlu2 %176 }
  0x75   :  { %13237 = vst [vmem:[#allocation4_spill] sm:$0xff] %v7144_v10  ;;  %v7147_v12 = vpop.permute.xlu0 %222 }
  0x76   :  { %13238 = vst [vmem:[#allocation5_spill] sm:$0xff] %v7147_v12 }
  0x77   :  { %13240 = vst [vmem:[#allocation7_spill] sm:$0xff] %v7188_v26 }
  0x7c   :  { %v7175_v21 = vpop.permute.xlu1 %211  ;;  %v7254_v49 = vpop.permute.xlu2 %163 }
  0x7d   :  { %v220_v23 = vsel %vm217_vm1, %v7144_v10, %v7175_v21  ;;  %v7183_v24 = vpop.permute.xlu0 %224  ;;  %13243 = vst [vmem:[#allocation10_spill] sm:$0xff] %v7254_v49 }
  0x7e   :  { %v263_v27 = vmul.f32 %v220_v23, %v12937_v19  ;;  %v233_v28 = vsel %vm230_vm2, %v7147_v12, %v7183_v24  ;;  %v12930_v23 = vperm.slane %v7166_v16, 1 }
  0x7f   :  { %v267_v29 = vmul.f32 %v233_v28, %v12938_v20  ;;  %v232_v28 = vsel %vm230_vm2, %v7183_v24, %v7142_v9  ;;  %v12949_v20 = vperm.slane %v7249_v47, 1 }
  0x80   :  { %v7198_v30 = vand.u32 4294901760, %v263_v27 }
  0x81   :  { %v7205_v32 = vand.u32 4294901760, %v267_v29 }
  0x82   :  { %v7213_v35 = vsub.f32 %v263_v27, %v7198_v30  ;;  %v344_v27 = vand.u32 4294901760, %v343_v62 }
  0x83   :  { %283 = vmatpush.msra.mxu0 %v7205_v32  ;;  %423 = vmatpush.msra.mxu3 %v7205_v32  ;;  %v7218_v36 = vsub.f32 %v267_v29, %v7205_v32 }
  0x84   :  { %v7222_v38 = vpop.permute.xlu1 %185  ;;  %v12947_v39 = vand.u32 4294901760, %v7213_v35  ;;  %v7304_v29 = vpop.permute.xlu2 %150 }
  0x85   :  { %285 = vmatpush.msra.mxu0 %v7198_v30  ;;  %384 = vmatpush.msra.mxu2 %v7218_v36  ;;  %v7227_v40 = vpop.permute.xlu0 %183  ;;  %v12948_v41 = vand.u32 4294901760, %v7218_v36  ;;  %13245 = vst [vmem:[#allocation12_spill] sm:$0xff] %v7304_v29 }
  0x86   :  { %13241 = vst [vmem:[#allocation8_spill] sm:$0xff] %v7227_v40  ;;  %425 = vmatpush.msra.mxu3 %v7198_v30  ;;  %v194_v44 = vsel %vm191_vm3, %v7227_v40, %v7222_v38  ;;  %v325_v48 = vsub.f32 %v7213_v35, %v12947_v39 }
  0x87   :  { %v255_v45 = vmul.f32 %v194_v44, %v12932_v37  ;;  %287 = vmatpush.msra.mxu0 %v7177_v22  ;;  %387 = vmatpush.msra.mxu2 %v7213_v35  ;;  %v319_v46 = vsub.f32 %v7218_v36, %v12948_v41  ;;  %v12929_v44 = vperm.slane %v7295_v13, 0 }
  0x88   :  { %427 = vmatpush.msra.mxu3 %v7177_v22  ;;  %v326_v55 = vand.u32 4294901760, %v325_v48 }
  0x89   :  { %v7257_v50 = vand.u32 4294901760, %v255_v45  ;;  %390 = vmatpush.msra.mxu2 %v7208_v33  ;;  %v320_v51 = vand.u32 4294901760, %v319_v46  ;;  %v128_v46 = vld [vmem:[%s12922_s3] sm:$0xff] }
  0x8b   :  { %289 = vmatpush.msra.mxu0 %v7257_v50  ;;  %321 = vmatpush.msra.mxu1 %v320_v51  ;;  %v7268_v56 = vsub.f32 %v255_v45, %v7257_v50  ;;  %v268_v51 = vmul.f32 %v232_v28, %v12930_v23 }
  0x8c   :  { %429 = vmatpush.msra.mxu3 %v7257_v50  ;;  %v7271_v57 = vpop.permute.xlu1 %170 }
  0x8d   :  { %v182_v58 = vsel %vm178_vm4, %v7188_v26, %v7271_v57  ;;  %327 = vmatpush.msra.mxu1 %v326_v55  ;;  %393 = vmatpush.msra.mxu2 %v7268_v56  ;;  %v7278_v59 = vpop.permute.xlu0 %213  ;;  %v12943_v61 = vand.u32 4294901760, %v7268_v56  ;;  %v7356_v23 = vand.u32 4294901760, %v268_v51 }
  0x8e   :  { %v247_v63 = vmul.f32 %v182_v58, %v12931_v54  ;;  %291 = vmatpush.msra.mxu0 %v7210_v34  ;;  %431 = vmatpush.msra.mxu3 %v7210_v34 }
  0x8f   :  { %333 = vmatpush.msra.mxu1 %v332_v60  ;;  %v337_v0 = vsub.f32 %v7268_v56, %v12943_v61  ;;  %396 = vmatpush.msra.mxu2 %v7232_v43  ;;  %v219_v60 = vsel %vm217_vm1, %v7175_v21, %v7278_v59  ;;  %v7389_v19 = vsub.f32 %v268_v51, %v7356_v23 }
  0x90   :  { %v7297_v17 = vand.u32 4294901760, %v247_v63 }
  0x91   :  { %v338_v25 = vand.u32 4294901760, %v337_v0  ;;  %v273_v0 = vsel %vm271_vm6, %v128_v46, 0  ;;  %v264_v46 = vmul.f32 %v219_v60, %v12933_v52  ;;  %v12945_v60 = vperm.slane %v7203_v31, 1 }
  0x92   :  { %293 = vmatpush.msra.mxu0 %v7297_v17  ;;  %433 = vmatpush.msra.mxu3 %v7297_v17  ;;  %v7311_v45 = vsub.f32 %v247_v63, %v7297_v17 }
  0x93   :  { %339 = vmatpush.msra.mxu1 %v338_v25  ;;  %v12935_v25 = vperm.slane %v7139_v8, 1  ;;  %v7377_v18 = vand.u32 4294901760, %v264_v46 }
  0x94   :  { %v7316_v24 = vpop.permute.xlu1 %157  ;;  %399 = vmatpush.msra.mxu2 %v7311_v45  ;;  %v12940_v48 = vand.u32 4294901760, %v7311_v45 }
  0x95   :  { %v169_v55 = vsel %vm165_vm5, %v7254_v49, %v7316_v24  ;;  %v7327_v58 = vpop.permute.xlu0 %200  ;;  %345 = vmatpush.msra.mxu1 %v344_v27  ;;  %v7343_v27 = vld [vmem:[%s12921_s1 + $0x1] ss:$8 sm:$0xf] }
  0x96   :  { %v243_v62 = vmul.f32 %v169_v55, %v12929_v44  ;;  %v349_v63 = vsub.f32 %v7311_v45, %v12940_v48  ;;  %13246 = vst [vmem:[#allocation13_spill] sm:$0xff] %v7343_v27  ;;  %v206_v21 = vsel %vm204_vm0, %v7131_v5, %v7327_v58  ;;  %v7354_v44 = vand.u32 4294901760, %v273_v0 }
  0x97   :  { %v12942_v54 = vperm.slane %v7343_v27, 0  ;;  %v260_v5 = vmul.f32 %v206_v21, %v12935_v25 }
  0x98   :  { %v7345_v28 = vand.u32 4294901760, %v243_v62  ;;  %v350_v55 = vand.u32 4294901760, %v349_v63  ;;  %v7368_v63 = vpop.permute.xlu2 %172  ;;  %v7386_v11 = vsub.f32 %v273_v0, %v7354_v44 }
  0x99   :  { %13247 = vst [vmem:[#allocation14_spill] sm:$0xff] %v7368_v63  ;;  %v181_v48 = vsel %vm178_vm4, %v7271_v57, %v7368_v63  ;;  %v7402_v0 = vand.u32 4294901760, %v260_v5  ;;  %v7419_v57 = vsub.f32 %v264_v46, %v7377_v18 }
  0x9a   :  { %295 = vmatpush.msra.mxu0 %v7345_v28  ;;  %351 = vmatpush.msra.mxu1 %v350_v55  ;;  %v7362_v37 = vsub.f32 %v243_v62, %v7345_v28  ;;  %v252_v62 = vmul.f32 %v7059_v1, %v12939_v6 }
  0x9b   :  { %435 = vmatpush.msra.mxu3 %v7345_v28  ;;  %v7435_v46 = vsub.f32 %v260_v5, %v7402_v0  ;;  %v13251_v5 = vand.u32 4294901760, %v7389_v19 }
  0x9c   :  { %v7370_v52 = vpop.permute.xlu1 %144  ;;  %402 = vmatpush.msra.mxu2 %v7362_v37  ;;  %v12946_v55 = vand.u32 4294901760, %v7362_v37 }
  0x9d   :  { %v156_v21 = vsel %vm13057_vm7, %v7304_v29, %v7370_v52  ;;  %v7383_v25 = vpop.permute.xlu0 %187  ;;  %v569_v26 = vsub.f32 %v7389_v19, %v13251_v5  ;;  %v12963_v10 = vand.u32 4294901760, %v7435_v46 }
  0x9e   :  { %v239_v1 = vmul.f32 %v156_v21, %v12942_v54  ;;  %v193_v6 = vsel %vm191_vm3, %v7222_v38, %v7383_v25  ;;  %v355_v53 = vsub.f32 %v7362_v37, %v12946_v55  ;;  %v7414_v38 = vld [vmem:[%s12921_s1] ss:$8 sm:$0xf]  ;;  %v7416_v54 = vand.u32 4294901760, %v252_v62 }
  0x9f   :  { %v256_v51 = vmul.f32 %v193_v6, %v12945_v60  ;;  %13248 = vst [vmem:[#allocation15_spill] sm:$0xff] %v7414_v38  ;;  %v7424_v6 = vand.u32 4294901760, %v7386_v11  ;;  %v248_v60 = vmul.f32 %v181_v48, %v12949_v20  ;;  %v13252_v49 = vperm.slane %v7414_v38, 0 }
  0xa0   :  { %v7409_v21 = vand.u32 4294901760, %v239_v1  ;;  %v356_v42 = vand.u32 4294901760, %v355_v53  ;;  %v7444_v20 = vsub.f32 %v252_v62, %v7416_v54  ;;  %v7455_v3 = vpop.permute.xlu2 %131 }
  0xa1   :  { %v7421_v61 = vand.u32 4294901760, %v256_v51  ;;  %v303_v53 = vsub.f32 %v7386_v11, %v7424_v6  ;;  %v7453_v29 = vand.u32 4294901760, %v248_v60  ;;  %13250 = vst [vmem:[#allocation17_spill] sm:$0xff] %v7455_v3 }
  0xa2   :  { %297 = vmatpush.msra.mxu0 %v7409_v21  ;;  %437 = vmatpush.msra.mxu3 %v7409_v21  ;;  %v7431_v55 = vsub.f32 %v239_v1, %v7409_v21 }
  0xa3   :  { %357 = vmatpush.msra.mxu1 %v356_v42  ;;  %v7447_v1 = vsub.f32 %v256_v51, %v7421_v61  ;;  %v7479_v47 = vand.u32 4294901760, %v303_v53  ;;  %v13255_v53 = vand.u32 4294901760, %v7218_v36 }
  0xa4   :  { %v7439_v41 = vpop.permute.xlu1 %135  ;;  %405 = vmatpush.msra.mxu2 %v7431_v55  ;;  %v12959_v48 = vand.u32 4294901760, %v7431_v55 }
  0xa5   :  { %13249 = vst [vmem:[#allocation16_spill] sm:$0xff] %v7439_v41  ;;  %v130_v39 = vpop.permute.xlu0 %129  ;;  %v13258_v36 = vand.u32 4294901760, %v7447_v1 }
  0xa6   :  { %v143_v62 = vsel %vm139_vm8, %v7439_v41, %v130_v39  ;;  %v361_v51 = vsub.f32 %v7431_v55, %v12959_v48  ;;  %v142_v42 = vsel %vm139_vm8, %v130_v39, %v7455_v3  ;;  %v13253_v48 = vand.u32 4294901760, %v7419_v57 }
  0xa7   :  { %v235_v40 = vmul.f32 %v143_v62, %v13252_v49  ;;  %v7482_v39 = vsub.f32 %v248_v60, %v7453_v29  ;;  %v13254_v49 = vperm.slane %v7414_v38, 1  ;;  %v12970_v41 = vperm.slane %v7343_v27, 1 }
  0xa8   :  { %v362_v12 = vand.u32 4294901760, %v361_v51  ;;  %v575_v2 = vsub.f32 %v7419_v57, %v13253_v48  ;;  %v570_v51 = vand.u32 4294901760, %v569_v26  ;;  %v581_v60 = vsub.f32 %v7435_v46, %v12963_v10 }
  0xa9   :  { %v7473_v63 = vand.u32 4294901760, %v235_v40  ;;  %v236_v62 = vmul.f32 %v142_v42, %v13254_v49  ;;  %v13257_v26 = vand.u32 4294901760, %v7444_v20  ;;  %v13260_v3 = vperm.slane %v7295_v13, 1 }
  0xaa   :  { %363 = vmatpush.msra.mxu1 %v362_v12  ;;  %v576_v10 = vand.u32 4294901760, %v575_v2  ;;  %v13259_v2 = vand.u32 4294901760, %v7213_v35 }
  0xab   :  { %299 = vmatpush.msra.mxu0 %v7473_v63  ;;  %439 = vmatpush.msra.mxu3 %v7473_v63  ;;  %v7491_v5 = vsub.f32 %v235_v40, %v7473_v63  ;;  %v593_v42 = vsub.f32 %v7444_v20, %v13257_v26  ;;  %v7515_v48 = vand.u32 4294901760, %v236_v62 }
  0xac   :  { %v7498_v12 = vpop.permute.xlu1 %146  ;;  %305 = vmatmul.f32.vlgmr.msra.gmra.mxu0 %v7479_v47  ;;  %443 = vmatmul.f32.vlgmr.msra.gmra.mxu3 %v7424_v6 }
  0xad   :  { %457 = vmatpush.msrb.mxu0 %v13255_v53  ;;  %571 = vmatpush.msrb.mxu3 %v570_v51  ;;  %13256 = vst [vmem:[#allocation18_spill] sm:$0xff] %v7498_v12  ;;  %v155_v40 = vsel %vm13057_vm7, %v7370_v52, %v7498_v12  ;;  %v7507_v49 = vpop.permute.xlu0 %159  ;;  %v587_v51 = vsub.f32 %v7447_v1, %v13258_v36  ;;  %v366_v53 = vand.u32 4294901760, %v7491_v5  ;;  %v582_v12 = vand.u32 4294901760, %v581_v60 }
  0xae   :  { %408 = vmatpush.msra.mxu2 %v7491_v5  ;;  %v240_v26 = vmul.f32 %v155_v40, %v12970_v41  ;;  %v168_v52 = vsel %vm165_vm5, %v7316_v24, %v7507_v49  ;;  %v13261_v24 = vand.u32 4294901760, %v7208_v33  ;;  %v594_v36 = vand.u32 4294901760, %v593_v42 }
  0xaf   :  { %461 = vmatpush.msrb.mxu0 %v13259_v2  ;;  %v244_v38 = vmul.f32 %v168_v52, %v13260_v3  ;;  %577 = vmatpush.msrb.mxu3 %v576_v10  ;;  %v367_v27 = vsub.f32 %v7491_v5, %v366_v53  ;;  %v588_v2 = vand.u32 4294901760, %v587_v51  ;;  %v7539_v3 = vsub.f32 %v236_v62, %v7515_v48 }
  0xb0   :  { %533 = vmatpush.msrb.mxu2 %v7356_v23  ;;  %v7531_v40 = vand.u32 4294901760, %v240_v26  ;;  %v13262_v5 = vand.u32 4294901760, %v7268_v56  ;;  %v13263_v33 = vand.u32 4294901760, %v7482_v39  ;;  %v13265_v42 = vand.u32 4294901760, %v7311_v45 }
  0xb1   :  { %411 = vmatmul.f32.vlgmr.msra.gmra.mxu2 %v7386_v11  ;;  %465 = vmatpush.msrb.mxu0 %v13261_v24  ;;  %v7536_v35 = vand.u32 4294901760, %v244_v38  ;;  %v368_v41 = vand.u32 4294901760, %v367_v27  ;;  %v13264_v27 = vand.u32 4294901760, %v7232_v43  ;;  %v12984_v24 = vperm.slane %v7139_v8, 2 }
  0xb2   :  { %535 = vmatpush.msrb.mxu2 %v7377_v18  ;;  %583 = vmatpush.msrb.mxu3 %v582_v12  ;;  %v7542_v10 = vsub.f32 %v240_v26, %v7531_v40  ;;  %v599_v60 = vsub.f32 %v7482_v39, %v13263_v33  ;;  %v12977_v33 = vperm.slane %v7156_v14, 2 }
  0xb3   :  { %469 = vmatpush.msrb.mxu0 %v13262_v5  ;;  %v7551_v12 = vsub.f32 %v244_v38, %v7536_v35  ;;  %369 = vmatpush.msra.mxu1 %v368_v41  ;;  %v616_v38 = vand.u32 4294901760, %v7539_v3  ;;  %v13266_v41 = vand.u32 4294901760, %v7362_v37  ;;  %v12983_v5 = vperm.slane %v7203_v31, 2 }
  0xb4   :  { %537 = vmatpush.msrb.mxu2 %v7402_v0  ;;  %589 = vmatpush.msrb.mxu3 %v588_v2  ;;  %v610_v62 = vand.u32 4294901760, %v7542_v10  ;;  %v600_v51 = vand.u32 4294901760, %v599_v60 }
  0xb5   :  { %473 = vmatpush.msrb.mxu0 %v13264_v27  ;;  %503 = vmatpush.msrb.mxu1 %v7205_v32  ;;  %v604_v56 = vand.u32 4294901760, %v7551_v12  ;;  %v617_v26 = vsub.f32 %v7539_v3, %v616_v38  ;;  %v7582_v37 = vpop.permute.xlu0 %228 }
  0xb6   :  { %539 = vmatpush.msrb.mxu2 %v7421_v61  ;;  %595 = vmatpush.msrb.mxu3 %v594_v36  ;;  %v611_v43 = vsub.f32 %v7542_v10, %v610_v62  ;;  %v12985_v36 = vperm.slane %v7161_v15, 2 }
  0xb7   :  { %477 = vmatpush.msrb.mxu0 %v13265_v42  ;;  %505 = vmatpush.msrb.mxu1 %v7198_v30  ;;  %v605_v32 = vsub.f32 %v7551_v12, %v604_v56  ;;  %v13267_v30 = vand.u32 4294901760, %v7431_v55  ;;  %v7586_v55 = vpop.permute.xlu1 %215  ;;  %v618_v52 = vand.u32 4294901760, %v617_v26  ;;  %v13273_v42 = vand.u32 4294901760, %v7482_v39 }
  0xb8   :  { %541 = vmatpush.msrb.mxu2 %v7416_v54  ;;  %601 = vmatpush.msrb.mxu3 %v600_v51 }
  0xb9   :  { %481 = vmatpush.msrb.mxu0 %v13266_v41  ;;  %507 = vmatpush.msrb.mxu1 %v7177_v22  ;;  %v606_v45 = vand.u32 4294901760, %v605_v32  ;;  %v612_v22 = vand.u32 4294901760, %v611_v43  ;;  %v13276_v43 = vld [vmem:[#allocation14_spill] sm:$0xff] }
  0xba   :  { %543 = vmatpush.msrb.mxu2 %v7453_v29  ;;  %371 = vmatmul.f32.vlgmr.msra.gmra.mxu1 %v7354_v44 }
  0xbb   :  { %485 = vmatpush.msrb.mxu0 %v13267_v30  ;;  %509 = vmatpush.msrb.mxu1 %v7257_v50  ;;  %v13268_v50 = vand.u32 4294901760, %v7389_v19  ;;  %v12980_v30 = vperm.slane %v7295_v13, 3 }
  0xbc   :  { %545 = vmatpush.msrb.mxu2 %v7536_v35  ;;  %607 = vmatpush.msrb.mxu3 %v606_v45 }
  0xbd   :  { %489 = vmatpush.msrb.mxu0 %v366_v53  ;;  %511 = vmatpush.msrb.mxu1 %v7210_v34  ;;  %v13269_v34 = vand.u32 4294901760, %v7419_v57  ;;  %v12986_v53 = vperm.slane %v7166_v16, 2 }
  0xbe   :  { %547 = vmatpush.msrb.mxu2 %v7531_v40  ;;  %613 = vmatpush.msrb.mxu3 %v612_v22  ;;  %v12973_v22 = vperm.slane %v7295_v13, 2 }
  0xbf   :  { %634 = vmatpush.msra.mxu0 %v7389_v19  ;;  %513 = vmatpush.msrb.mxu1 %v7297_v17  ;;  %v203_v17 = vpop.permute.xlu2 %202  ;;  %v231_v19 = vsel %vm230_vm2, %v7142_v9, %v7582_v37  ;;  %v7626_v2 = vpop.permute.xlu1 %174 }
  0xc0   :  { %549 = vmatpush.msrb.mxu2 %v7515_v48  ;;  %619 = vmatpush.msrb.mxu3 %v618_v52  ;;  %v205_v9 = vsel %vm204_vm0, %v7327_v58, %v203_v17  ;;  %v13272_v58 = vand.u32 4294901760, %v7444_v20  ;;  %v180_v45 = vsel %vm178_vm4, %v13276_v43, %v7626_v2 }
  0xc1   :  { %637 = vmatpush.msra.mxu0 %v7419_v57  ;;  %515 = vmatpush.msrb.mxu1 %v7345_v28  ;;  %v218_v28 = vsel %vm217_vm1, %v7278_v59, %v7586_v55  ;;  %v13270_v57 = vand.u32 4294901760, %v7435_v46  ;;  %v269_v59 = vmul.f32 %v231_v19, %v12986_v53 }
  0xc2   :  { %707 = vmatpush.msra.mxu2 %v13268_v50  ;;  %753 = vmatpush.msra.mxu3 %v7356_v23 }
  0xc3   :  { %640 = vmatpush.msra.mxu0 %v7435_v46  ;;  %517 = vmatpush.msrb.mxu1 %v7409_v21  ;;  %v7613_v21 = vpop.permute.xlu0 %189  ;;  %v13271_v46 = vand.u32 4294901760, %v7447_v1 }
  0xc4   :  { %711 = vmatpush.msra.mxu2 %v13269_v34  ;;  %755 = vmatpush.msra.mxu3 %v7377_v18  ;;  %v192_v60 = vsel %vm191_vm3, %v7383_v25, %v7613_v21  ;;  %v13274_v25 = vld [vmem:[#allocation9_spill] sm:$0xff] }
  0xc5   :  { %643 = vmatpush.msra.mxu0 %v7447_v1  ;;  %519 = vmatpush.msrb.mxu1 %v7473_v63  ;;  %v265_v63 = vmul.f32 %v218_v28, %v12985_v36  ;;  %v261_v1 = vmul.f32 %v205_v9, %v12984_v24  ;;  %v12978_v51 = vperm.slane %v13274_v25, 2  ;;  %v257_v32 = vmul.f32 %v192_v60, %v12983_v5 }
  0xc6   :  { %715 = vmatpush.msra.mxu2 %v13270_v57  ;;  %757 = vmatpush.msra.mxu3 %v7402_v0  ;;  %v13278_v57 = vld [vmem:[#allocation5_spill] sm:$0xff]  ;;  %v12981_v43 = vperm.slane %v13274_v25, 3 }
  0xc7   :  { %646 = vmatpush.msra.mxu0 %v7444_v20  ;;  %673 = vmatpush.msra.mxu1 %v7356_v23  ;;  %v12972_v23 = vperm.slane %v7139_v8, 3  ;;  %v7652_v20 = vand.u32 4294901760, %v269_v59  ;;  %v7656_v27 = vand.u32 4294901760, %v265_v63  ;;  %v162_v26 = vpop.permute.xlu2 %161  ;;  %v7709_v9 = vpop.permute.xlu1 %133 }
  0xc8   :  { %719 = vmatpush.msra.mxu2 %v13271_v46  ;;  %759 = vmatpush.msra.mxu3 %v7421_v61  ;;  %v167_v34 = vsel %vm165_vm5, %v7507_v49, %v162_v26  ;;  %v7707_v49 = vand.u32 4294901760, %v257_v32 }
  0xc9   :  { %649 = vmatpush.msra.mxu0 %v7482_v39  ;;  %675 = vmatpush.msra.mxu1 %v7377_v18  ;;  %v208_v18 = vsel %vm204_vm0, %v203_v17, %v7129_v4  ;;  %v13275_v4 = vld [vmem:[#allocation2_spill] sm:$0xff]  ;;  %v7673_v39 = vand.u32 4294901760, %v261_v1  ;;  %v7684_v52 = vsub.f32 %v269_v59, %v7652_v20  ;;  %v13277_v17 = vld [vmem:[#allocation13_spill] sm:$0xff]  ;;  %v7699_v28 = vsub.f32 %v265_v63, %v7656_v27 }
  0xca   :  { %723 = vmatpush.msra.mxu2 %v13272_v58  ;;  %761 = vmatpush.msra.mxu3 %v7416_v54  ;;  %v7671_v41 = vmul.f32 %v208_v18, %v12972_v23  ;;  %v12971_v19 = vperm.slane %v13277_v17, 2  ;;  %v12974_v63 = vperm.slane %v7161_v15, 3 }
  0xcb   :  { %491 = vmatmul.f32.vlgmr.msrb.gmra.mxu0 %v7354_v44  ;;  %677 = vmatpush.msra.mxu1 %v7402_v0  ;;  %v253_v0 = vmul.f32 %v13275_v4, %v12977_v33  ;;  %v7686_v50 = vpop.permute.xlu0 %148  ;;  %v818_v18 = vand.u32 4294901760, %v7684_v52 }
  0xcc   :  { %652 = vmatpush.msra.mxu0 %v7551_v12  ;;  %727 = vmatpush.msra.mxu2 %v13273_v42  ;;  %v234_v12 = vsel %vm230_vm2, %v7582_v37, %v13278_v57  ;;  %v7717_v46 = vand.u32 4294901760, %v7671_v41  ;;  %v13279_v37 = vld [vmem:[#allocation18_spill] sm:$0xff]  ;;  %v13281_v42 = vld [vmem:[#allocation15_spill] sm:$0xff] }
  0xcd   :  { %763 = vmatpush.msra.mxu3 %v7453_v29  ;;  %555 = vmatmul.f32.vlgmr.msrb.gmra.mxu2 %v7479_v47  ;;  %v7714_v59 = vand.u32 4294901760, %v253_v0  ;;  %v154_v58 = vsel %vm13057_vm7, %v13279_v37, %v7686_v50  ;;  %v12975_v4 = vperm.slane %v13281_v42, 2  ;;  %v12979_v37 = vperm.slane %v7203_v31, 3 }
  0xce   :  { %521 = vmatmul.f32.vlgmr.msrb.gmra.mxu1 %v7354_v44  ;;  %655 = vmatpush.msra.mxu0 %v7542_v10  ;;  %v245_v10 = vmul.f32 %v167_v34, %v12973_v22 }
  0xcf   :  { %679 = vmatpush.msra.mxu1 %v7421_v61  ;;  %731 = vmatpush.msra.mxu2 %v604_v56  ;;  %v12976_v61 = vperm.slane %v7166_v16, 3  ;;  %v249_v56 = vmul.f32 %v180_v45, %v12978_v51  ;;  %v13282_v45 = vld [vmem:[#allocation17_spill] sm:$0xff]  ;;  %v7760_v57 = vsub.f32 %v253_v0, %v7714_v59 }
  0xd0   :  { %621 = vmatmul.f32.vlgmr.msrb.gmra.mxu3 %v7354_v44  ;;  %658 = vmatpush.msra.mxu0 %v7539_v3  ;;  %v141_v34 = vsel %vm139_vm8, %v13282_v45, %v7709_v9  ;;  %v241_v3 = vmul.f32 %v154_v58, %v12971_v19  ;;  %v819_v45 = vsub.f32 %v7684_v52, %v818_v18  ;;  %v13284_v19 = vld [vmem:[#allocation10_spill] sm:$0xff] }
  0xd1   :  { %765 = vmatpush.msra.mxu3 %v7536_v35  ;;  %681 = vmatpush.msra.mxu1 %v7416_v54  ;;  %v7727_v54 = vsub.f32 %v261_v1, %v7673_v39  ;;  %v270_v1 = vmul.f32 %v234_v12, %v12976_v61  ;;  %v166_v23 = vsel %vm165_vm5, %v162_v26, %v13284_v19 }
  0xd2   :  { %735 = vmatpush.msra.mxu2 %v610_v62  ;;  %783 = vmatpush.msrb.mxu0 %v7652_v20  ;;  %v13280_v62 = vld [vmem:[#allocation4_spill] sm:$0xff] }
  0xd3   :  { %767 = vmatpush.msra.mxu3 %v7531_v40  ;;  %v221_v60 = vsel %vm217_vm1, %v7586_v55, %v13280_v62  ;;  %683 = vmatpush.msra.mxu1 %v7453_v29  ;;  %v824_v55 = vand.u32 4294901760, %v7699_v28  ;;  %v7750_v29 = vand.u32 4294901760, %v249_v56  ;;  %v12989_v58 = vand.u32 4294901760, %v7727_v54 }
  0xd4   :  { %739 = vmatpush.msra.mxu2 %v616_v38  ;;  %785 = vmatpush.msrb.mxu0 %v7656_v27  ;;  %v7757_v38 = vsub.f32 %v257_v32, %v7707_v49  ;;  %v266_v12 = vmul.f32 %v221_v60, %v12974_v63  ;;  %v12982_v62 = vperm.slane %v7156_v14, 3  ;;  %v13283_v32 = vld [vmem:[#allocation8_spill] sm:$0xff]  ;;  %v237_v60 = vmul.f32 %v141_v34, %v12975_v4  ;;  %v13285_v63 = vld [vmem:[#allocation7_spill] sm:$0xff] }
  0xd5   :  { %769 = vmatpush.msra.mxu3 %v7515_v48  ;;  %685 = vmatpush.msra.mxu1 %v7536_v35  ;;  %v7769_v35 = vand.u32 4294901760, %v245_v10  ;;  %v195_v0 = vsel %vm191_vm3, %v7613_v21, %v13283_v32  ;;  %v7785_v22 = vand.u32 4294901760, %v270_v1  ;;  %v179_v21 = vsel %vm178_vm4, %v7626_v2, %v13285_v63 }
  0xd6   :  { %884 = vmatpush.msrb.mxu2 %v7684_v52  ;;  %787 = vmatpush.msrb.mxu0 %v7673_v39  ;;  %v825_v34 = vsub.f32 %v7699_v28, %v824_v55  ;;  %v7796_v32 = vand.u32 4294901760, %v241_v3  ;;  %v7801_v26 = vsub.f32 %v249_v56, %v7750_v29  ;;  %v12988_v19 = vand.u32 4294901760, %v7757_v38  ;;  %v13286_v56 = vld [vmem:[#allocation3_spill] sm:$0xff] }
  0xd7   :  { %923 = vmatpush.msrb.mxu3 %v7652_v20  ;;  %741 = vmatmul.f32.vlgmr.msra.gmra.mxu2 %v7354_v44  ;;  %v12987_v2 = vand.u32 4294901760, %v7760_v57  ;;  %v7809_v63 = vand.u32 4294901760, %v266_v12  ;;  %v258_v4 = vmul.f32 %v195_v0, %v12979_v37  ;;  %v254_v61 = vmul.f32 %v13286_v56, %v12982_v62  ;;  %v13287_v62 = vld [vmem:[#allocation12_spill] sm:$0xff] }
  0xd8   :  { %887 = vmatpush.msrb.mxu2 %v7699_v28  ;;  %687 = vmatpush.msra.mxu1 %v7531_v40  ;;  %v7807_v40 = vsub.f32 %v7671_v41, %v7717_v46  ;;  %v7818_v33 = vand.u32 4294901760, %v237_v60  ;;  %v820_v41 = vand.u32 4294901760, %v819_v45  ;;  %v831_v51 = vsub.f32 %v7727_v54, %v12989_v58 }
  0xd9   :  { %925 = vmatpush.msrb.mxu3 %v7656_v27  ;;  %661 = vmatmul.f32.vlgmr.msra.gmra.mxu0 %v7386_v11  ;;  %v7826_v0 = vsub.f32 %v245_v10, %v7769_v35  ;;  %v7830_v37 = vmul.f32 %v166_v23, %v12980_v30  ;;  %v7833_v56 = vsub.f32 %v270_v1, %v7785_v22  ;;  %v826_v45 = vand.u32 4294901760, %v825_v34 }
  0xda   :  { %771 = vmatmul.f32.vlgmr.msra.gmra.mxu3 %v7354_v44  ;;  %789 = vmatpush.msrb.mxu0 %v7707_v49  ;;  %v837_v10 = vsub.f32 %v7757_v38, %v12988_v19  ;;  %v843_v23 = vsub.f32 %v7760_v57, %v12987_v2  ;;  %v7847_v1 = vsub.f32 %v241_v3, %v7796_v32  ;;  %v7853_v34 = vand.u32 4294901760, %v258_v4  ;;  %v13288_v19 = vld [vmem:[#allocation16_spill] sm:$0xff] }
  0xdb   :  { %890 = vmatpush.msrb.mxu2 %v7727_v54  ;;  %689 = vmatpush.msra.mxu1 %v7515_v48  ;;  %v250_v48 = vmul.f32 %v179_v21, %v12981_v43  ;;  %v12997_v21 = vand.u32 4294901760, %v7801_v26  ;;  %v7851_v30 = vsub.f32 %v266_v12, %v7809_v63  ;;  %v7858_v43 = vand.u32 4294901760, %v254_v61 }
  0xdc   :  { %927 = vmatpush.msrb.mxu3 %v7673_v39  ;;  %693 = vmatmul.f32.vlgmr.msra.gmra.mxu1 %v7424_v6  ;;  %v153_v3 = vsel %vm13057_vm7, %v7686_v50, %v13287_v62  ;;  %v832_v12 = vand.u32 4294901760, %v831_v51  ;;  %v7866_v5 = vsub.f32 %v237_v60, %v7818_v33  ;;  %v12991_v24 = vand.u32 4294901760, %v7826_v0 }
  0xdd   :  { %791 = vmatpush.msrb.mxu0 %v7714_v59  ;;  %821 = vmatpush.msrb.mxu1 %v820_v41  ;;  %v12990_v41 = vperm.slane %v13277_v17, 3  ;;  %v12993_v36 = vand.u32 4294901760, %v7833_v56  ;;  %v7870_v53 = vand.u32 4294901760, %v250_v48  ;;  %v12992_v2 = vperm.slane %v13281_v42, 3 }
  0xde   :  { %893 = vmatpush.msrb.mxu2 %v7757_v38  ;;  %929 = vmatpush.msrb.mxu3 %v7707_v49  ;;  %v140_v50 = vsel %vm139_vm8, %v7709_v9, %v13288_v19  ;;  %v838_v51 = vand.u32 4294901760, %v837_v10  ;;  %v844_v62 = vand.u32 4294901760, %v843_v23  ;;  %v849_v60 = vsub.f32 %v7801_v26, %v12997_v21 }
  0xdf   :  { %793 = vmatpush.msrb.mxu0 %v7750_v29  ;;  %827 = vmatpush.msrb.mxu1 %v826_v45  ;;  %v12994_v45 = vand.u32 4294901760, %v7847_v1  ;;  %v7885_v58 = vsub.f32 %v258_v4, %v7853_v34  ;;  %v242_v9 = vmul.f32 %v153_v3, %v12990_v41  ;;  %v12995_v19 = vand.u32 4294901760, %v7851_v30 }
  0xe0   :  { %896 = vmatpush.msrb.mxu2 %v7760_v57  ;;  %931 = vmatpush.msrb.mxu3 %v7714_v59  ;;  %v7893_v10 = vsub.f32 %v254_v61, %v7858_v43  ;;  %v855_v4 = vsub.f32 %v7826_v0, %v12991_v24  ;;  %v12996_v23 = vand.u32 4294901760, %v7866_v5  ;;  %v7901_v3 = vand.u32 4294901760, %v7830_v37 }
  0xe1   :  { %795 = vmatpush.msrb.mxu0 %v7769_v35  ;;  %833 = vmatpush.msrb.mxu1 %v832_v12  ;;  %v238_v12 = vmul.f32 %v140_v50, %v12992_v2  ;;  %v1069_v61 = vsub.f32 %v7833_v56, %v12993_v36  ;;  %v7912_v41 = vsub.f32 %v250_v48, %v7870_v53  ;;  %v850_v24 = vand.u32 4294901760, %v849_v60 }
  0xe2   :  { %899 = vmatpush.msrb.mxu2 %v7801_v26  ;;  %933 = vmatpush.msrb.mxu3 %v7750_v29  ;;  %v861_v50 = vsub.f32 %v7847_v1, %v12994_v45  ;;  %v7918_v2 = vand.u32 4294901760, %v242_v9  ;;  %v1075_v48 = vsub.f32 %v7851_v30, %v12995_v19  ;;  %v1092_v36 = vand.u32 4294901760, %v7893_v10 }
  0xe3   :  { %797 = vmatpush.msrb.mxu0 %v7796_v32  ;;  %839 = vmatpush.msrb.mxu1 %v838_v51  ;;  %v1080_v51 = vand.u32 4294901760, %v7807_v40  ;;  %v856_v60 = vand.u32 4294901760, %v855_v4  ;;  %v867_v45 = vsub.f32 %v7866_v5, %v12996_v23  ;;  %v7934_v52 = vsub.f32 %v7830_v37, %v7901_v3 }
  0xe4   :  { %902 = vmatpush.msrb.mxu2 %v7826_v0  ;;  %935 = vmatpush.msrb.mxu3 %v7769_v35  ;;  %v1070_v19 = vand.u32 4294901760, %v1069_v61  ;;  %v862_v4 = vand.u32 4294901760, %v861_v50  ;;  %v1098_v23 = vand.u32 4294901760, %v7912_v41  ;;  %v7947_v37 = vsub.f32 %v242_v9, %v7918_v2 }
  0xe5   :  { %799 = vmatpush.msrb.mxu0 %v7818_v33  ;;  %845 = vmatpush.msrb.mxu1 %v844_v62  ;;  %v1086_v62 = vand.u32 4294901760, %v7885_v58  ;;  %v13289_v21 = vand.u32 4294901760, %v7727_v54  ;;  %v1076_v28 = vand.u32 4294901760, %v1075_v48  ;;  %v1093_v61 = vsub.f32 %v7893_v10, %v1092_v36 }
  0xe6   :  { %905 = vmatpush.msrb.mxu2 %v7847_v1  ;;  %937 = vmatpush.msrb.mxu3 %v7796_v32  ;;  %v868_v50 = vand.u32 4294901760, %v867_v45  ;;  %v13290_v54 = vand.u32 4294901760, %v7757_v38  ;;  %v13291_v48 = vand.u32 4294901760, %v7760_v57  ;;  %v1099_v45 = vsub.f32 %v7912_v41, %v1098_v23 }
  0xe7   :  { %957 = vmatpush.msra.mxu0 %v818_v18  ;;  %851 = vmatpush.msrb.mxu1 %v850_v24  ;;  %v7936_v18 = vand.u32 4294901760, %v238_v12  ;;  %v1081_v24 = vsub.f32 %v7807_v40, %v1080_v51  ;;  %v13292_v38 = vand.u32 4294901760, %v7801_v26 }
  0xe8   :  { %908 = vmatpush.msrb.mxu2 %v7866_v5  ;;  %939 = vmatpush.msrb.mxu3 %v7818_v33 }
  0xe9   :  { %961 = vmatpush.msra.mxu0 %v824_v55  ;;  %857 = vmatpush.msrb.mxu1 %v856_v60  ;;  %v1087_v55 = vsub.f32 %v7885_v58, %v1086_v62  ;;  %v7959_v9 = vsub.f32 %v238_v12, %v7936_v18  ;;  %v1110_v12 = vand.u32 4294901760, %v7947_v37 }
  0xea   :  { %1033 = vmatpush.msra.mxu2 %v7785_v22  ;;  %1071 = vmatpush.msra.mxu3 %v1070_v19  ;;  %v1104_v19 = vand.u32 4294901760, %v7934_v52 }
  0xeb   :  { %965 = vmatpush.msra.mxu0 %v13289_v21  ;;  %863 = vmatpush.msrb.mxu1 %v862_v4  ;;  %v1082_v21 = vand.u32 4294901760, %v1081_v24  ;;  %v1088_v60 = vand.u32 4294901760, %v1087_v55  ;;  %v1094_v4 = vand.u32 4294901760, %v1093_v61  ;;  %v1116_v24 = vand.u32 4294901760, %v7959_v9 }
  0xec   :  { %1035 = vmatpush.msra.mxu2 %v7809_v63  ;;  %1077 = vmatpush.msra.mxu3 %v1076_v28  ;;  %v1105_v57 = vsub.f32 %v7934_v52, %v1104_v19  ;;  %v13293_v28 = vand.u32 4294901760, %v7826_v0  ;;  %v1111_v26 = vsub.f32 %v7947_v37, %v1110_v12  ;;  %v13294_v55 = vand.u32 4294901760, %v7847_v1 }
  0xed   :  { %969 = vmatpush.msra.mxu0 %v13290_v54  ;;  %869 = vmatpush.msrb.mxu1 %v868_v50  ;;  %v1117_v61 = vsub.f32 %v7959_v9, %v1116_v24  ;;  %v13295_v0 = vand.u32 4294901760, %v7866_v5  ;;  %v13296_v5 = vand.u32 4294901760, %v7833_v56 }
  0xee   :  { %1037 = vmatpush.msra.mxu2 %v7717_v46  ;;  %1083 = vmatpush.msra.mxu3 %v1082_v21 }
  0xef   :  { %973 = vmatpush.msra.mxu0 %v13291_v48  ;;  %1003 = vmatpush.msra.mxu1 %v7652_v20  ;;  %v1100_v20 = vand.u32 4294901760, %v1099_v45  ;;  %v1118_v1 = vand.u32 4294901760, %v1117_v61 }
  0xf0   :  { %1039 = vmatpush.msra.mxu2 %v7853_v34  ;;  %1089 = vmatpush.msra.mxu3 %v1088_v60 }
  0xf1   :  { %977 = vmatpush.msra.mxu0 %v13292_v38  ;;  %1005 = vmatpush.msra.mxu1 %v7656_v27  ;;  %v1106_v27 = vand.u32 4294901760, %v1105_v57 }
  0xf2   :  { %1041 = vmatpush.msra.mxu2 %v7858_v43  ;;  %1095 = vmatpush.msra.mxu3 %v1094_v4 }
  0xf3   :  { %981 = vmatpush.msra.mxu0 %v13293_v28  ;;  %1007 = vmatpush.msra.mxu1 %v7673_v39  ;;  %v1112_v39 = vand.u32 4294901760, %v1111_v26 }
  0xf4   :  { %1043 = vmatpush.msra.mxu2 %v7870_v53  ;;  %1101 = vmatpush.msra.mxu3 %v1100_v20 }
  0xf5   :  { %985 = vmatpush.msra.mxu0 %v13294_v55  ;;  %1009 = vmatpush.msra.mxu1 %v7707_v49  ;;  %v13297_v49 = vand.u32 4294901760, %v7851_v30 }
  0xf6   :  { %1045 = vmatpush.msra.mxu2 %v7901_v3  ;;  %1107 = vmatpush.msra.mxu3 %v1106_v27 }
  0xf7   :  { %989 = vmatpush.msra.mxu0 %v13295_v0  ;;  %1011 = vmatpush.msra.mxu1 %v7714_v59 }
  0xf8   :  { %1047 = vmatpush.msra.mxu2 %v7918_v2  ;;  %805 = vmatmul.f32.vlgmr.msrb.gmra.mxu0 %v7479_v47 }
  0xf9   :  { %1113 = vmatpush.msra.mxu3 %v1112_v39  ;;  %1134 = vmatpush.msrb.mxu0 %v7833_v56 }
  0xfa   :  { %1013 = vmatpush.msra.mxu1 %v7750_v29  ;;  %1049 = vmatpush.msra.mxu2 %v7936_v18 }
  0xfb   :  { %1119 = vmatpush.msra.mxu3 %v1118_v1  ;;  %911 = vmatmul.f32.vlgmr.msrb.gmra.mxu2 %v7386_v11 }
  0xfc   :  { %1137 = vmatpush.msrb.mxu0 %v7851_v30  ;;  %1207 = vmatpush.msrb.mxu2 %v13296_v5 }
  0xfd   :  { %943 = vmatmul.f32.vlgmr.msrb.gmra.mxu3 %v7424_v6  ;;  %1015 = vmatpush.msra.mxu1 %v7769_v35 }
  0xfe   :  { %1253 = vmatpush.msrb.mxu3 %v7785_v22  ;;  %1140 = vmatpush.msrb.mxu0 %v7807_v40 }
  0xff   :  { %1211 = vmatpush.msrb.mxu2 %v13297_v49  ;;  %1017 = vmatpush.msra.mxu1 %v7796_v32 }
 0x100   :  { %1255 = vmatpush.msrb.mxu3 %v7809_v63  ;;  %871 = vmatmul.f32.vlgmr.msrb.gmra.mxu1 %v7354_v44 }
 0x101   :  { %1143 = vmatpush.msrb.mxu0 %v7885_v58  ;;  %1215 = vmatpush.msrb.mxu2 %v1080_v51 }
 0x102   :  { %1019 = vmatpush.msra.mxu1 %v7818_v33  ;;  %1257 = vmatpush.msrb.mxu3 %v7717_v46 }
 0x103   :  { %1146 = vmatpush.msrb.mxu0 %v7893_v10  ;;  %1219 = vmatpush.msrb.mxu2 %v1086_v62 }
 0x104   :  { %1173 = vmatpush.msrb.mxu1 %v7785_v22  ;;  %1259 = vmatpush.msrb.mxu3 %v7853_v34 }
 0x105   :  { %1149 = vmatpush.msrb.mxu0 %v7912_v41  ;;  %1223 = vmatpush.msrb.mxu2 %v1092_v36 }
 0x106   :  { %1175 = vmatpush.msrb.mxu1 %v7809_v63  ;;  %1261 = vmatpush.msrb.mxu3 %v7858_v43 }
 0x107   :  { %991 = vmatmul.f32.vlgmr.msra.gmra.mxu0 %v7354_v44  ;;  %1227 = vmatpush.msrb.mxu2 %v1098_v23 }
 0x108   :  { %1152 = vmatpush.msrb.mxu0 %v7934_v52  ;;  %1177 = vmatpush.msrb.mxu1 %v7717_v46 }
 0x109   :  { %1121 = vmatmul.f32.vlgmr.msra.gmra.mxu3 %v7354_v44  ;;  %1055 = vmatmul.f32.vlgmr.msra.gmra.mxu2 %v7479_v47 }
 0x10a   :  { %1263 = vmatpush.msrb.mxu3 %v7870_v53  ;;  %1021 = vmatmul.f32.vlgmr.msra.gmra.mxu1 %v7354_v44 }
 0x10b   :  { %1155 = vmatpush.msrb.mxu0 %v7947_v37  ;;  %1179 = vmatpush.msrb.mxu1 %v7853_v34 }
 0x10c   :  { %1231 = vmatpush.msrb.mxu2 %v1104_v19  ;;  %1265 = vmatpush.msrb.mxu3 %v7901_v3 }
 0x10d   :  { %1158 = vmatpush.msrb.mxu0 %v7959_v9  ;;  %1181 = vmatpush.msrb.mxu1 %v7858_v43 }
 0x10e   :  { %1235 = vmatpush.msrb.mxu2 %v1110_v12  ;;  %1267 = vmatpush.msrb.mxu3 %v7918_v2 }
 0x10f   :  { %1161 = vmatmul.f32.vlgmr.msrb.gmra.mxu0 %v7386_v11  ;;  %1183 = vmatpush.msrb.mxu1 %v7870_v53 }
 0x110   :  { %1239 = vmatpush.msrb.mxu2 %v1116_v24  ;;  %1269 = vmatpush.msrb.mxu3 %v7936_v18 }
 0x111   :  { %1185 = vmatpush.msrb.mxu1 %v7901_v3  ;;  %1241 = vmatmul.f32.vlgmr.msrb.gmra.mxu2 %v7354_v44 }
 0x112   :  { %1271 = vmatmul.f32.vlgmr.msrb.gmra.mxu3 %v7354_v44 }
 0x113   :  { %1187 = vmatpush.msrb.mxu1 %v7918_v2 }
 0x115   :  { %1189 = vmatpush.msrb.mxu1 %v7936_v18 }
 0x116   :  { %1193 = vmatmul.f32.vlgmr.msrb.gmra.mxu1 %v7424_v6 }
 0x129   :  { %v306_v11 = vpop.f32.mrf.mxu0 }
 0x12f   :  { %v444_v36 = vpop.f32.mrf.mxu3 }
 0x134   :  { %v412_v53 = vpop.f32.mrf.mxu2 }
 0x137   :  { %v372_v47 = vpop.f32.mrf.mxu1 }
 0x138   :  { %v373_v33 = vadd.f32 %v372_v47, %v306_v11 }
 0x13a   :  { %v413_v22 = vadd.f32 %v412_v53, %v373_v33 }
 0x13c   :  { %v445_v58 = vadd.f32 %v444_v36, %v413_v22 }
 0x148   :  { %v492_v30 = vpop.f32.mrf.mxu0 }
 0x149   :  { %v493_v32 = vadd.f32 %v492_v30, %v445_v58 }
 0x14b   :  { %v522_v46 = vpop.f32.mrf.mxu1 }
 0x14c   :  { %v8061_v56 = vadd.f32 %v522_v46, %v493_v32 }
 0x14e   :  { %v1289_v23 = vmul.f32 %v8061_v56, %v8061_v56 }
 0x150   :  { %v556_v59 = vpop.f32.mrf.mxu2 }
 0x153   :  { %v622_v43 = vpop.f32.mrf.mxu3 }
 0x154   :  { %v623_v29 = vadd.f32 %v622_v43, %v556_v59 }
 0x156   :  { %v662_v35 = vpop.f32.mrf.mxu0 }
 0x157   :  { %v663_v44 = vadd.f32 %v662_v35, %v623_v29 }
 0x159   :  { %v694_v2 = vpop.f32.mrf.mxu1 }
 0x15a   :  { %v742_v40 = vpop.f32.mrf.mxu2  ;;  %v695_v63 = vadd.f32 %v694_v2, %v663_v44 }
 0x15c   :  { %v743_v6 = vadd.f32 %v742_v40, %v695_v63 }
 0x15d   :  { %v772_v34 = vpop.f32.mrf.mxu3 }
 0x15e   :  { %v8063_v41 = vadd.f32 %v772_v34, %v743_v6 }
 0x160   :  { %v1279_v10 = vadd.f32 %v8063_v41, %v8061_v56  ;;  %v1290_v3 = vmul.f32 %v8063_v41, %v8063_v41 }
 0x162   :  { %1280 = vadd.xlane.f32.xlu2 %v1279_v10  ;;  %v1291_v51 = vadd.f32 %v1290_v3, %v1289_v23 }
 0x164   :  { %1292 = vadd.xlane.f32.xlu0 %v1291_v51 }
 0x175   :  { %v806_v62 = vpop.f32.mrf.mxu0 }
 0x17d   :  { %v872_v52 = vpop.f32.mrf.mxu1 }
 0x17e   :  { %v912_v37 = vpop.f32.mrf.mxu2  ;;  %v873_v9 = vadd.f32 %v872_v52, %v806_v62  ;;  %v8086_v52 = vld [vmem:[%s12923_s4] sm:$0xff] }
 0x180   :  { %v944_v18 = vpop.f32.mrf.mxu3  ;;  %v913_v54 = vadd.f32 %v912_v37, %v873_v9 }
 0x182   :  { %v945_v60 = vadd.f32 %v944_v18, %v913_v54  ;;  %v8091_v18 = vld [vmem:[%s12923_s4 + $0x8] sm:$0xff] }
 0x184   :  { %v992_v50 = vpop.f32.mrf.mxu0 }
 0x185   :  { %v993_v12 = vadd.f32 %v992_v50, %v945_v60 }
 0x187   :  { %v1022_v21 = vpop.f32.mrf.mxu1 }
 0x188   :  { %v8071_v26 = vadd.f32 %v1022_v21, %v993_v12 }
 0x18a   :  { %v1338_v0 = vmul.f32 %v8071_v26, %v8071_v26 }
 0x18c   :  { %v1122_v19 = vpop.f32.mrf.mxu3  ;;  %v1056_v48 = vpop.f32.mrf.mxu2 }
 0x18d   :  { %v1123_v4 = vadd.f32 %v1122_v19, %v1056_v48  ;;  %v1162_v45 = vpop.f32.mrf.mxu0 }
 0x18f   :  { %v1163_v38 = vadd.f32 %v1162_v45, %v1123_v4 }
 0x193   :  { %v1194_v57 = vpop.f32.mrf.mxu1 }
 0x194   :  { %v1195_v24 = vadd.f32 %v1194_v57, %v1163_v38  ;;  %v1242_v28 = vpop.f32.mrf.mxu2  ;;  %v6967_v38 = vld [vmem:[%s12920_s0] sm:$0xff] }
 0x195   :  { %v1272_v20 = vpop.f32.mrf.mxu3 }
 0x196   :  { %v1243_v55 = vadd.f32 %v1242_v28, %v1195_v24  ;;  %v6968_v24 = vld [vmem:[%s12920_s0 + $0x8] sm:$0xff] }
 0x198   :  { %v8073_v27 = vadd.f32 %v1272_v20, %v1243_v55 }
 0x19a   :  { %v1328_v61 = vadd.f32 %v8073_v27, %v8071_v26  ;;  %v1339_v39 = vmul.f32 %v8073_v27, %v8073_v27 }
 0x19c   :  { %1329 = vadd.xlane.f32.xlu1 %v1328_v61  ;;  %v1340_v1 = vadd.f32 %v1339_v39, %v1338_v0 }
 0x19e   :  { %1341 = vadd.xlane.f32.xlu2 %v1340_v1 }
 0x1d5   :  { %v1281_v5 = vpop.xlane.xlu2 %1280 }
 0x1d6   :  { %v1282_v49 = vrot.slane %v1281_v5, 4 }
 0x1d7   :  { %v1293_v11 = vpop.xlane.xlu0 %1292 }
 0x1d8   :  { %v1283_v47 = vadd.f32 %v1282_v49, %v1281_v5  ;;  %v1294_v53 = vrot.slane %v1293_v11, 4 }
 0x1da   :  { %v1284_v36 = vrot.slane %v1283_v47, 2  ;;  %v1295_v33 = vadd.f32 %v1294_v53, %v1293_v11 }
 0x1dc   :  { %v1285_v30 = vadd.f32 %v1284_v36, %v1283_v47  ;;  %v1296_v22 = vrot.slane %v1295_v33, 2 }
 0x1de   :  { %v1286_v59 = vrot.slane %v1285_v30, 1  ;;  %v1297_v46 = vadd.f32 %v1296_v22, %v1295_v33 }
 0x1e0   :  { %v1287_v43 = vadd.f32 %v1286_v59, %v1285_v30  ;;  %v1298_v29 = vrot.slane %v1297_v46, 1 }
 0x1e2   :  { %v1288_v58 = vmul.f32 0.0009765625, %v1287_v43  ;;  %v1299_v35 = vadd.f32 %v1298_v29, %v1297_v46 }
 0x1e4   :  { %v1300_v44 = vmul.f32 0.0009765625, %v1299_v35  ;;  %v1301_v32 = vmul.f32 %v1288_v58, %v1288_v58  ;;  %v1314_v51 = vsub.f32 %v8061_v56, %v1288_v58  ;;  %v1315_v62 = vsub.f32 %v8063_v41, %v1288_v58  ;;  %v8096_v56 = vld [vmem:[%s12924_s5] sm:$0xff]  ;;  %v8101_v41 = vld [vmem:[%s12924_s5 + $0x8] sm:$0xff] }
 0x1e6   :  { %v1302_v2 = vsub.f32 %v1300_v44, %v1301_v32 }
 0x1e8   :  { %v1303_v40 = vadd.f32 1e-05, %v1302_v2 }
 0x1ea   :  { %6959 = vrsqrt.f32 %v1303_v40  ;;  %vm1310_vm10 = vweird.f32 %v1303_v40 }
 0x1f0   :  { %v6960_v63 = vpop.eup %6959 }
 0x1f1   :  { %v1305_v6 = vmul.f32 %v6960_v63, %v1303_v40  ;;  %vm1311_vm9 = vweird.f32 %v6960_v63 }
 0x1f2   :  { %vm1312_vm11 = vmor %vm1310_vm10, %vm1311_vm9 }
 0x1f3   :  { %v1306_v34 = vmul.f32 %v6960_v63, %v1305_v6 }
 0x1f5   :  { %v1307_v10 = vmul.f32 0.5, %v1306_v34 }
 0x1f7   :  { %v1308_v23 = vsub.f32 1.5, %v1307_v10 }
 0x1f9   :  { %v1309_v3 = vmul.f32 %v6960_v63, %v1308_v23 }
 0x1fb   :  { %v1313_v37 = vsel %vm1312_vm11, %v6960_v63, %v1309_v3 }
 0x1fc   :  { %v1316_v50 = vmul.f32 %v1314_v51, %v1313_v37  ;;  %v1317_v9 = vmul.f32 %v1315_v62, %v1313_v37 }
 0x1fe   :  { %v1318_v54 = vmul.f32 %v1316_v50, %v8086_v52  ;;  %v1319_v21 = vmul.f32 %v1317_v9, %v8091_v18 }
 0x200   :  { %v1320_v19 = vadd.f32 %v1318_v54, %v8096_v56  ;;  %v1321_v48 = vadd.f32 %v1319_v21, %v8101_v41 }
 0x202   :  { %vm1322_vm12 = vcmp.ge.f32.partialorder %v1320_v19, 0.0  ;;  %vm1323_vm13 = vcmp.ge.f32.partialorder %v1321_v48, 0.0  ;;  %v1324_v60 = vmul.f32 0.01, %v1320_v19  ;;  %v1325_v4 = vmul.f32 0.01, %v1321_v48 }
 0x204   :  { %v1326_v45 = vsel %vm1322_vm12, %v1320_v19, %v1324_v60  ;;  %v1327_v12 = vsel %vm1323_vm13, %v1321_v48, %v1325_v4  ;;  %v13304_v60 = vperm.slane %v7166_v16, 0 }
 0x205   :  { %v8110_v57 = vadd.f32 %v6967_v38, %v1326_v45  ;;  %v8115_v28 = vadd.f32 %v6968_v24, %v1327_v12 }
 0x207   :  { %13298 = vst [vmem:[#allocation2_spill] sm:$0xff] %v8110_v57  ;;  %1469 = vrot.lane.b32.xlu0 %v8115_v28, %s6989_s28  ;;  %1455 = vrot.lane.b32.xlu1 %v8110_v57, %s6988_s27 }
 0x208   :  { %13299 = vst [vmem:[#allocation14_spill] sm:$0xff] %v8115_v28  ;;  %1467 = vrot.lane.b32.xlu2 %v8110_v57, %s6989_s28 }
 0x20f   :  { %v1330_v20 = vpop.xlane.xlu1 %1329  ;;  %1457 = vrot.lane.b32.xlu0 %v8115_v28, %s6988_s27  ;;  %1445 = vrot.lane.b32.xlu1 %v8115_v28, %s6987_s26 }
 0x210   :  { %v1331_v55 = vrot.slane %v1330_v20, 4  ;;  %1443 = vrot.lane.b32.xlu2 %v8110_v57, %s6987_s26 }
 0x211   :  { %v1342_v61 = vpop.xlane.xlu2 %1341 }
 0x212   :  { %v1332_v0 = vadd.f32 %v1331_v55, %v1330_v20  ;;  %v1343_v39 = vrot.slane %v1342_v61, 4 }
 0x214   :  { %v1333_v1 = vrot.slane %v1332_v0, 2  ;;  %v1344_v5 = vadd.f32 %v1343_v39, %v1342_v61  ;;  %v13306_v39 = vperm.slane %v7161_v15, 0 }
 0x216   :  { %v1334_v49 = vadd.f32 %v1333_v1, %v1332_v0  ;;  %v1345_v11 = vrot.slane %v1344_v5, 2 }
 0x217   :  { %1431 = vrot.lane.b32.xlu0 %v8110_v57, %s6990_s10  ;;  %1421 = vrot.lane.b32.xlu1 %v8115_v28, %s6991_s13 }
 0x218   :  { %v1335_v47 = vrot.slane %v1334_v49, 1  ;;  %v1346_v53 = vadd.f32 %v1345_v11, %v1344_v5  ;;  %1433 = vrot.lane.b32.xlu2 %v8115_v28, %s6990_s10  ;;  %v13307_v5 = vperm.slane %v7139_v8, 0 }
 0x21a   :  { %v1336_v36 = vadd.f32 %v1335_v47, %v1334_v49  ;;  %v1347_v33 = vrot.slane %v1346_v53, 1  ;;  %v13308_v47 = vperm.slane %v7156_v14, 0 }
 0x21c   :  { %v1337_v30 = vmul.f32 0.0009765625, %v1336_v36  ;;  %v1348_v22 = vadd.f32 %v1347_v33, %v1346_v53  ;;  %v1495_v53 = vmul.f32 %v8110_v57, %v13308_v47 }
 0x21e   :  { %v1350_v59 = vmul.f32 %v1337_v30, %v1337_v30  ;;  %v1349_v46 = vmul.f32 0.0009765625, %v1348_v22  ;;  %v1363_v63 = vsub.f32 %v8071_v26, %v1337_v30  ;;  %v1364_v6 = vsub.f32 %v8073_v27, %v1337_v30  ;;  %v6969_v27 = vld [vmem:[%s12920_s0 + $0x10] sm:$0xff] }
 0x21f   :  { %1383 = vrot.lane.b32.xlu0 %v8110_v57, %s6994_s16 }
 0x220   :  { %v1351_v43 = vsub.f32 %v1349_v46, %v1350_v59  ;;  %1419 = vrot.lane.b32.xlu2 %v8110_v57, %s6991_s13  ;;  %v8253_v46 = vand.u32 4294901760, %v1495_v53 }
 0x222   :  { %v1352_v29 = vadd.f32 1e-05, %v1351_v43 }
 0x224   :  { %6961 = vrsqrt.f32 %v1352_v29  ;;  %vm1359_vm15 = vweird.f32 %v1352_v29 }
 0x228   :  { %1407 = vrot.lane.b32.xlu2 %v8110_v57, %s6992_s14 }
 0x22a   :  { %v6962_v58 = vpop.eup %6961 }
 0x22b   :  { %v1354_v35 = vmul.f32 %v6962_v58, %v1352_v29  ;;  %vm1360_vm14 = vweird.f32 %v6962_v58 }
 0x22c   :  { %vm1361_vm9 = vmor %vm1359_vm15, %vm1360_vm14 }
 0x22d   :  { %v1355_v44 = vmul.f32 %v6962_v58, %v1354_v35 }
 0x22f   :  { %v1356_v32 = vmul.f32 0.5, %v1355_v44 }
 0x230   :  { %1395 = vrot.lane.b32.xlu2 %v8110_v57, %s6993_s15 }
 0x231   :  { %v1357_v2 = vsub.f32 1.5, %v1356_v32  ;;  %v13310_v32 = vperm.slane %v7203_v31, 0 }
 0x233   :  { %v1358_v40 = vmul.f32 %v6962_v58, %v1357_v2 }
 0x235   :  { %v1362_v34 = vsel %vm1361_vm9, %v6962_v58, %v1358_v40 }
 0x236   :  { %v1365_v10 = vmul.f32 %v1363_v63, %v1362_v34  ;;  %v1366_v23 = vmul.f32 %v1364_v6, %v1362_v34  ;;  %v8276_v6 = vsub.f32 %v1495_v53, %v8253_v46 }
 0x238   :  { %v1367_v3 = vmul.f32 %v1365_v10, %v8086_v52  ;;  %v1368_v51 = vmul.f32 %v1366_v23, %v8091_v18  ;;  %v6970_v52 = vld [vmem:[%s12920_s0 + $0x18] sm:$0xff] }
 0x23a   :  { %v1369_v62 = vadd.f32 %v1367_v3, %v8096_v56  ;;  %v1370_v37 = vadd.f32 %v1368_v51, %v8101_v41  ;;  %v12998_v51 = vand.u32 4294901760, %v8276_v6 }
 0x23c   :  { %vm1371_vm10 = vcmp.ge.f32.partialorder %v1369_v62, 0.0  ;;  %vm1372_vm11 = vcmp.ge.f32.partialorder %v1370_v37, 0.0  ;;  %v1373_v50 = vmul.f32 0.01, %v1369_v62  ;;  %v1374_v9 = vmul.f32 0.01, %v1370_v37 }
 0x23e   :  { %v1375_v54 = vsel %vm1371_vm10, %v1369_v62, %v1373_v50  ;;  %v1376_v26 = vsel %vm1372_vm11, %v1370_v37, %v1374_v9  ;;  %v1586_v50 = vsub.f32 %v8276_v6, %v12998_v51 }
 0x23f   :  { %v8152_v21 = vadd.f32 %v6969_v27, %v1375_v54  ;;  %v8157_v18 = vadd.f32 %v6970_v52, %v1376_v26 }
 0x240   :  { %v1587_v54 = vand.u32 4294901760, %v1586_v50 }
 0x241   :  { %13300 = vst [vmem:[#allocation5_spill] sm:$0xff] %v8152_v21  ;;  %1389 = vrot.lane.b32.xlu2 %v8157_v18, %s6994_s16  ;;  %1459 = vrot.lane.b32.xlu0 %v8152_v21, %s6988_s27 }
 0x242   :  { %13301 = vst [vmem:[#allocation18_spill] sm:$0xff] %v8157_v18  ;;  %1471 = vrot.lane.b32.xlu1 %v8152_v21, %s6989_s28 }
 0x249   :  { %1397 = vrot.lane.b32.xlu2 %v8115_v28, %s6993_s15  ;;  %1447 = vrot.lane.b32.xlu0 %v8152_v21, %s6987_s26 }
 0x24a   :  { %1425 = vrot.lane.b32.xlu1 %v8157_v18, %s6991_s13 }
 0x251   :  { %1461 = vrot.lane.b32.xlu2 %v8157_v18, %s6988_s27  ;;  %1435 = vrot.lane.b32.xlu0 %v8152_v21, %s6990_s10 }
 0x252   :  { %1413 = vrot.lane.b32.xlu1 %v8157_v18, %s6992_s14 }
 0x259   :  { %1423 = vrot.lane.b32.xlu2 %v8152_v21, %s6991_s13  ;;  %1409 = vrot.lane.b32.xlu0 %v8115_v28, %s6992_s14 }
 0x25a   :  { %1401 = vrot.lane.b32.xlu1 %v8157_v18, %s6993_s15 }
 0x261   :  { %1387 = vrot.lane.b32.xlu2 %v8152_v21, %s6994_s16  ;;  %1473 = vrot.lane.b32.xlu0 %v8157_v18, %s6989_s28 }
 0x262   :  { %1385 = vrot.lane.b32.xlu1 %v8115_v28, %s6994_s16  ;;  %v8197_v56 = vpop.permute.xlu2 %1467 }
 0x263   :  { %13302 = vst [vmem:[#allocation4_spill] sm:$0xff] %v8197_v56 }
 0x269   :  { %1437 = vrot.lane.b32.xlu0 %v8157_v18, %s6990_s10 }
 0x26a   :  { %1449 = vrot.lane.b32.xlu1 %v8157_v18, %s6987_s26  ;;  %v8211_v12 = vpop.permute.xlu2 %1443 }
 0x26b   :  { %13305 = vst [vmem:[#allocation17_spill] sm:$0xff] %v8211_v12 }
 0x271   :  { %1399 = vrot.lane.b32.xlu0 %v8152_v21, %s6993_s15 }
 0x272   :  { %1411 = vrot.lane.b32.xlu1 %v8152_v21, %s6992_s14  ;;  %v1434_v43 = vpop.permute.xlu2 %1433 }
 0x279   :  { %v8199_v41 = vpop.permute.xlu0 %1469  ;;  %v8201_v19 = vpop.permute.xlu1 %1455 }
 0x27a   :  { %13303 = vst [vmem:[#allocation15_spill] sm:$0xff] %v8201_v19  ;;  %v1477_v48 = vsel %vm230_vm2, %v8197_v56, %v8199_v41  ;;  %v1420_v26 = vpop.permute.xlu2 %1419 }
 0x27b   :  { %v1511_v4 = vmul.f32 %v1477_v48, %v13304_v60 }
 0x27d   :  { %v8209_v45 = vand.u32 4294901760, %v1511_v4 }
 0x27f   :  { %v8214_v38 = vsub.f32 %v1511_v4, %v8209_v45  ;;  %1526 = vmatpush.msra.mxu0 %v8209_v45  ;;  %1666 = vmatpush.msra.mxu3 %v8209_v45 }
 0x281   :  { %v13003_v24 = vand.u32 4294901760, %v8214_v38  ;;  %v8219_v20 = vpop.permute.xlu0 %1457  ;;  %v8221_v55 = vpop.permute.xlu1 %1445  ;;  %1627 = vmatpush.msra.mxu2 %v8214_v38 }
 0x282   :  { %v1465_v61 = vsel %vm217_vm1, %v8201_v19, %v8219_v20  ;;  %v1453_v0 = vsel %vm204_vm0, %v8211_v12, %v8221_v55  ;;  %v1408_v48 = vpop.permute.xlu2 %1407 }
 0x283   :  { %v1507_v1 = vmul.f32 %v1465_v61, %v13306_v39  ;;  %v1503_v49 = vmul.f32 %v1453_v0, %v13307_v5  ;;  %v1562_v11 = vsub.f32 %v8214_v38, %v13003_v24 }
 0x285   :  { %v8242_v36 = vand.u32 4294901760, %v1507_v1  ;;  %v8244_v33 = vand.u32 4294901760, %v1503_v49  ;;  %v1563_v30 = vand.u32 4294901760, %v1562_v11  ;;  %v13312_v11 = vperm.slane %v13274_v25, 0 }
 0x287   :  { %1528 = vmatpush.msra.mxu0 %v8242_v36  ;;  %1564 = vmatpush.msra.mxu1 %v1563_v30  ;;  %v8248_v22 = vsub.f32 %v1507_v1, %v8242_v36  ;;  %v8251_v59 = vsub.f32 %v1503_v49, %v8244_v33  ;;  %v6653_v49 = vld [vmem:[%s12922_s3 + $0x8] sm:$0xff] }
 0x288   :  { %1668 = vmatpush.msra.mxu3 %v8242_v36 }
 0x289   :  { %v8256_v29 = vpop.permute.xlu0 %1431  ;;  %1530 = vmatpush.msra.mxu0 %v8244_v33  ;;  %1630 = vmatpush.msra.mxu2 %v8248_v22  ;;  %v13001_v58 = vand.u32 4294901760, %v8248_v22  ;;  %v13000_v35 = vand.u32 4294901760, %v8251_v59  ;;  %v8299_v52 = vpop.permute.xlu1 %1421 }
 0x28a   :  { %13309 = vst [vmem:[#allocation8_spill] sm:$0xff] %v8256_v29  ;;  %v1441_v44 = vsel %vm191_vm3, %v8256_v29, %v1434_v43  ;;  %1670 = vmatpush.msra.mxu3 %v8244_v33  ;;  %v1396_v61 = vpop.permute.xlu2 %1395 }
 0x28b   :  { %v1499_v2 = vmul.f32 %v1441_v44, %v13310_v32  ;;  %1633 = vmatpush.msra.mxu2 %v8251_v59  ;;  %v1568_v40 = vsub.f32 %v8248_v22, %v13001_v58  ;;  %v1574_v63 = vsub.f32 %v8251_v59, %v13000_v35 }
 0x28d   :  { %v8278_v34 = vand.u32 4294901760, %v1499_v2  ;;  %v1569_v10 = vand.u32 4294901760, %v1568_v40  ;;  %v1575_v23 = vand.u32 4294901760, %v1574_v63 }
 0x28f   :  { %1532 = vmatpush.msra.mxu0 %v8278_v34  ;;  %1570 = vmatpush.msra.mxu1 %v1569_v10  ;;  %v8282_v3 = vsub.f32 %v1499_v2, %v8278_v34  ;;  %v1516_v2 = vsel %vm271_vm6, %v6653_v49, 0 }
 0x290   :  { %1672 = vmatpush.msra.mxu3 %v8278_v34 }
 0x291   :  { %1534 = vmatpush.msra.mxu0 %v8253_v46  ;;  %1576 = vmatpush.msra.mxu1 %v1575_v23  ;;  %v12999_v62 = vand.u32 4294901760, %v8282_v3  ;;  %v8297_v27 = vpop.permute.xlu0 %1383 }
 0x292   :  { %1636 = vmatpush.msra.mxu2 %v8282_v3  ;;  %1674 = vmatpush.msra.mxu3 %v8253_v46 }
 0x293   :  { %v1580_v37 = vsub.f32 %v8282_v3, %v12999_v62 }
 0x294   :  { %1639 = vmatpush.msra.mxu2 %v8276_v6 }
 0x295   :  { %v1581_v9 = vand.u32 4294901760, %v1580_v37  ;;  %v8345_v37 = vand.u32 4294901760, %v1516_v2 }
 0x297   :  { %1582 = vmatpush.msra.mxu1 %v1581_v9  ;;  %v8380_v35 = vsub.f32 %v1516_v2, %v8345_v37 }
 0x299   :  { %1588 = vmatpush.msra.mxu1 %v1587_v54 }
 0x29b   :  { %v8321_v53 = vpop.permute.xlu2 %1389 }
 0x29c   :  { %13313 = vst [vmem:[#allocation7_spill] sm:$0xff] %v8321_v53  ;;  %v1394_v50 = vsel %vm139_vm8, %v8321_v53, %v8297_v27 }
 0x2a3   :  { %v8394_v57 = vpop.permute.xlu2 %1397 }
 0x2a4   :  { %13323 = vst [vmem:[#allocation12_spill] sm:$0xff] %v8394_v57 }
 0x2b3   :  { %v8301_v60 = vpop.permute.xlu0 %1459 }
 0x2b4   :  { %v8303_v4 = vpop.permute.xlu1 %1471  ;;  %v1464_v30 = vsel %vm217_vm1, %v8219_v20, %v8301_v60  ;;  %v13315_v20 = vperm.slane %v7161_v15, 1 }
 0x2b5   :  { %v1476_v1 = vsel %vm230_vm2, %v8199_v41, %v8303_v4  ;;  %v13314_v41 = vperm.slane %v7166_v16, 1 }
 0x2b6   :  { %v1508_v10 = vmul.f32 %v1464_v30, %v13315_v20  ;;  %v13318_v30 = vperm.slane %v7295_v13, 0  ;;  %v13319_v20 = vperm.slane %v13281_v42, 0 }
 0x2b7   :  { %v1512_v44 = vmul.f32 %v1476_v1, %v13314_v41 }
 0x2b8   :  { %v1479_v51 = vmul.f32 %v1394_v50, %v13319_v20  ;;  %v8375_v62 = vand.u32 4294901760, %v1508_v10  ;;  %v13322_v20 = vperm.slane %v13274_v25, 1 }
 0x2ba   :  { %v8400_v2 = vand.u32 4294901760, %v1479_v51 }
 0x2bb   :  { %v8305_v0 = vpop.permute.xlu0 %1447 }
 0x2bc   :  { %v8307_v39 = vpop.permute.xlu1 %1425  ;;  %v1452_v40 = vsel %vm204_vm0, %v8221_v55, %v8305_v0  ;;  %v8351_v55 = vand.u32 4294901760, %v1512_v44  ;;  %v8445_v12 = vsub.f32 %v1479_v51, %v8400_v2 }
 0x2bd   :  { %13311 = vst [vmem:[#allocation10_spill] sm:$0xff] %v8307_v39  ;;  %v1430_v5 = vsel %vm178_vm4, %v8307_v39, %v1420_v26 }
 0x2be   :  { %v1491_v47 = vmul.f32 %v1430_v5, %v13312_v11  ;;  %v13317_v5 = vperm.slane %v7139_v8, 1 }
 0x2c0   :  { %v8329_v32 = vand.u32 4294901760, %v1491_v47  ;;  %v1504_v49 = vmul.f32 %v1452_v40, %v13317_v5  ;;  %v13320_v40 = vperm.slane %v7203_v31, 1 }
 0x2c2   :  { %1536 = vmatpush.msra.mxu0 %v8329_v32  ;;  %1676 = vmatpush.msra.mxu3 %v8329_v32  ;;  %v8339_v63 = vsub.f32 %v1491_v47, %v8329_v32  ;;  %v1429_v47 = vsel %vm178_vm4, %v1420_v26, %v8299_v52  ;;  %v8383_v26 = vsub.f32 %v1512_v44, %v8351_v55 }
 0x2c3   :  { %v8343_v23 = vpop.permute.xlu0 %1435  ;;  %v1492_v24 = vmul.f32 %v1429_v47, %v13322_v20  ;;  %v8411_v47 = vand.u32 4294901760, %v8380_v35  ;;  %v1405_v20 = vsel %vm13057_vm7, %v1396_v61, %v8394_v57 }
 0x2c4   :  { %v1440_v9 = vsel %vm191_vm3, %v1434_v43, %v8343_v23  ;;  %v8356_v54 = vpop.permute.xlu1 %1413  ;;  %1642 = vmatpush.msra.mxu2 %v8339_v63  ;;  %v13002_v1 = vand.u32 4294901760, %v8339_v63 }
 0x2c5   :  { %13316 = vst [vmem:[#allocation3_spill] sm:$0xff] %v8356_v54  ;;  %v1418_v11 = vsel %vm165_vm5, %v8356_v54, %v1408_v48  ;;  %v1500_v5 = vmul.f32 %v1440_v9, %v13320_v40  ;;  %v8403_v9 = vsub.f32 %v1508_v10, %v8375_v62  ;;  %v13326_v54 = vperm.slane %v7295_v13, 1 }
 0x2c6   :  { %v1487_v43 = vmul.f32 %v1418_v11, %v13318_v30  ;;  %v1592_v41 = vsub.f32 %v8339_v63, %v13002_v1  ;;  %v8387_v30 = vand.u32 4294901760, %v1504_v49  ;;  %v13321_v1 = vperm.slane %v7156_v14, 1 }
 0x2c7   :  { %v13327_v10 = vperm.slane %v13277_v17, 0  ;;  %v13335_v14 = vand.u32 4294901760, %v8214_v38  ;;  %v13337_v38 = vand.u32 4294901760, %v8248_v22 }
 0x2c8   :  { %v8385_v58 = vand.u32 4294901760, %v1487_v43  ;;  %v1593_v11 = vand.u32 4294901760, %v1592_v41  ;;  %v1496_v50 = vmul.f32 %v8115_v28, %v13321_v1  ;;  %v8405_v41 = vand.u32 4294901760, %v1500_v5 }
 0x2c9   :  { %v8425_v28 = vsub.f32 %v1504_v49, %v8387_v30 }
 0x2ca   :  { %1538 = vmatpush.msra.mxu0 %v8385_v58  ;;  %1594 = vmatpush.msra.mxu1 %v1593_v11  ;;  %v8398_v44 = vsub.f32 %v1487_v43, %v8385_v58  ;;  %v8430_v53 = vand.u32 4294901760, %v1496_v50  ;;  %v8442_v49 = vsub.f32 %v1500_v5, %v8405_v41 }
 0x2cb   :  { %1678 = vmatpush.msra.mxu3 %v8385_v58  ;;  %v8408_v1 = vpop.permute.xlu0 %1409 }
 0x2cc   :  { %13324 = vst [vmem:[#allocation16_spill] sm:$0xff] %v8408_v1  ;;  %v1417_v43 = vsel %vm165_vm5, %v1408_v48, %v8408_v1  ;;  %v8417_v11 = vpop.permute.xlu1 %1401  ;;  %1645 = vmatpush.msra.mxu2 %v8398_v44  ;;  %v8432_v48 = vand.u32 4294901760, %v1492_v24  ;;  %v13328_v29 = vand.u32 4294901760, %v8398_v44  ;;  %v13336_v25 = vand.u32 4294901760, %v8442_v49 }
 0x2cd   :  { %13325 = vst [vmem:[#allocation19_spill] sm:$0xff] %v8417_v11  ;;  %v1406_v40 = vsel %vm13057_vm7, %v8417_v11, %v1396_v61  ;;  %v1488_v39 = vmul.f32 %v1417_v43, %v13326_v54  ;;  %v1546_v11 = vsub.f32 %v8380_v35, %v8411_v47  ;;  %v13329_v54 = vperm.slane %v13277_v17, 1 }
 0x2ce   :  { %v1483_v18 = vmul.f32 %v1406_v40, %v13327_v10  ;;  %v1598_v57 = vsub.f32 %v8398_v44, %v13328_v29  ;;  %v13330_v10 = vand.u32 4294901760, %v8383_v26  ;;  %v8465_v61 = vsub.f32 %v1496_v50, %v8430_v53 }
 0x2cf   :  { %v1484_v43 = vmul.f32 %v1405_v20, %v13329_v54  ;;  %v8458_v1 = vand.u32 4294901760, %v1488_v39  ;;  %v8468_v20 = vsub.f32 %v1492_v24, %v8432_v48  ;;  %v8475_v5 = vand.u32 4294901760, %v1546_v11 }
 0x2d0   :  { %v8452_v13 = vand.u32 4294901760, %v1483_v18  ;;  %v1599_v40 = vand.u32 4294901760, %v1598_v57  ;;  %v1812_v29 = vsub.f32 %v8383_v26, %v13330_v10  ;;  %v13331_v57 = vand.u32 4294901760, %v8403_v9 }
 0x2d1   :  { %v1609_v17 = vand.u32 4294901760, %v8445_v12  ;;  %v13333_v11 = vand.u32 4294901760, %v8425_v28  ;;  %v8494_v19 = vsub.f32 %v1488_v39, %v8458_v1  ;;  %v1841_v39 = vand.u32 4294901760, %v8468_v20 }
 0x2d2   :  { %1540 = vmatpush.msra.mxu0 %v8452_v13  ;;  %1600 = vmatpush.msra.mxu1 %v1599_v40  ;;  %v8462_v51 = vsub.f32 %v1483_v18, %v8452_v13  ;;  %v1818_v54 = vsub.f32 %v8403_v9, %v13331_v57  ;;  %v8477_v40 = vand.u32 4294901760, %v1484_v43  ;;  %v1813_v24 = vand.u32 4294901760, %v1812_v29 }
 0x2d3   :  { %1680 = vmatpush.msra.mxu3 %v8452_v13  ;;  %v1824_v10 = vsub.f32 %v8425_v28, %v13333_v11  ;;  %v13334_v29 = vperm.slane %v13281_v42, 1  ;;  %v1830_v11 = vsub.f32 %v8442_v49, %v13336_v25 }
 0x2d4   :  { %v8479_v18 = vpop.permute.xlu1 %1385  ;;  %1542 = vmatpush.msra.mxu0 %v8400_v2  ;;  %1648 = vmatpush.msra.mxu2 %v8462_v51  ;;  %v1603_v50 = vand.u32 4294901760, %v8462_v51 }
 0x2d5   :  { %13332 = vst [vmem:[#allocation20_spill] sm:$0xff] %v8479_v18  ;;  %v1393_v57 = vsel %vm139_vm8, %v8297_v27, %v8479_v18  ;;  %1682 = vmatpush.msra.mxu3 %v8400_v2  ;;  %v1835_v27 = vand.u32 4294901760, %v8465_v61  ;;  %v1819_v18 = vand.u32 4294901760, %v1818_v54  ;;  %1548 = vmatmul.f32.vlgmr.msra.gmra.mxu0 %v8475_v5  ;;  %v1610_v54 = vsub.f32 %v8445_v12, %v1609_v17 }
 0x2d6   :  { %v1480_v21 = vmul.f32 %v1393_v57, %v13334_v29  ;;  %1700 = vmatpush.msrb.mxu0 %v13335_v14  ;;  %v1604_v56 = vsub.f32 %v8462_v51, %v1603_v50  ;;  %1651 = vmatpush.msra.mxu2 %v8445_v12  ;;  %v8509_v57 = vsub.f32 %v1484_v43, %v8477_v40  ;;  %v13338_v43 = vand.u32 4294901760, %v8251_v59 }
 0x2d7   :  { %1814 = vmatpush.msrb.mxu3 %v1813_v24  ;;  %v1825_v24 = vand.u32 4294901760, %v1824_v10  ;;  %1654 = vmatmul.f32.vlgmr.msra.gmra.mxu2 %v8380_v35  ;;  %v1836_v22 = vsub.f32 %v8465_v61, %v1835_v27  ;;  %v1831_v12 = vand.u32 4294901760, %v1830_v11  ;;  %v13339_v10 = vand.u32 4294901760, %v8282_v3 }
 0x2d8   :  { %v8511_v14 = vand.u32 4294901760, %v1480_v21  ;;  %1704 = vmatpush.msrb.mxu0 %v13337_v38  ;;  %1776 = vmatpush.msrb.mxu2 %v8351_v55  ;;  %v1605_v51 = vand.u32 4294901760, %v1604_v56  ;;  %v1847_v56 = vand.u32 4294901760, %v8494_v19  ;;  %v1842_v59 = vsub.f32 %v8468_v20, %v1841_v39 }
 0x2d9   :  { %1820 = vmatpush.msrb.mxu3 %v1819_v18  ;;  %v1853_v18 = vand.u32 4294901760, %v8509_v57  ;;  %v13340_v29 = vand.u32 4294901760, %v8276_v6  ;;  %v1837_v38 = vand.u32 4294901760, %v1836_v22 }
 0x2da   :  { %v8519_v25 = vsub.f32 %v1480_v21, %v8511_v14  ;;  %1708 = vmatpush.msrb.mxu0 %v13338_v43  ;;  %1778 = vmatpush.msrb.mxu2 %v8375_v62  ;;  %v1611_v21 = vand.u32 4294901760, %v1610_v54  ;;  %v1848_v3 = vsub.f32 %v8494_v19, %v1847_v56  ;;  %v1843_v54 = vand.u32 4294901760, %v1842_v59  ;;  %v13353_v59 = vld [vmem:[#allocation4_spill] sm:$0xff] }
 0x2db   :  { %1826 = vmatpush.msrb.mxu3 %v1825_v24  ;;  %1606 = vmatpush.msra.mxu1 %v1605_v51  ;;  %v13341_v51 = vand.u32 4294901760, %v8339_v63  ;;  %v1854_v6 = vsub.f32 %v8509_v57, %v1853_v18  ;;  %v13342_v24 = vand.u32 4294901760, %v8398_v44  ;;  %v1474_v44 = vpop.permute.xlu0 %1473 }
 0x2dc   :  { %1712 = vmatpush.msrb.mxu0 %v13339_v10  ;;  %1780 = vmatpush.msrb.mxu2 %v8387_v30  ;;  %v1859_v11 = vand.u32 4294901760, %v8519_v25 }
 0x2dd   :  { %1832 = vmatpush.msrb.mxu3 %v1831_v12  ;;  %1612 = vmatpush.msra.mxu1 %v1611_v21  ;;  %v1855_v63 = vand.u32 4294901760, %v1854_v6 }
 0x2de   :  { %1716 = vmatpush.msrb.mxu0 %v13340_v29  ;;  %1782 = vmatpush.msrb.mxu2 %v8405_v41  ;;  %v1860_v43 = vsub.f32 %v8519_v25, %v1859_v11 }
 0x2df   :  { %1746 = vmatpush.msrb.mxu1 %v8209_v45  ;;  %1838 = vmatpush.msrb.mxu3 %v1837_v38  ;;  %v1849_v45 = vand.u32 4294901760, %v1848_v3  ;;  %v13356_v38 = vld [vmem:[#allocation5_spill] sm:$0xff] }
 0x2e0   :  { %1720 = vmatpush.msrb.mxu0 %v13341_v51  ;;  %1784 = vmatpush.msrb.mxu2 %v8430_v53  ;;  %v13357_v51 = vld [vmem:[#allocation15_spill] sm:$0xff] }
 0x2e1   :  { %1748 = vmatpush.msrb.mxu1 %v8242_v36  ;;  %1844 = vmatpush.msrb.mxu3 %v1843_v54  ;;  %v1861_v36 = vand.u32 4294901760, %v1860_v43 }
 0x2e2   :  { %1724 = vmatpush.msrb.mxu0 %v13342_v24  ;;  %1786 = vmatpush.msrb.mxu2 %v8432_v48 }
 0x2e3   :  { %1750 = vmatpush.msrb.mxu1 %v8244_v33  ;;  %1850 = vmatpush.msrb.mxu3 %v1849_v45  ;;  %v1462_v33 = vpop.permute.xlu2 %1461 }
 0x2e4   :  { %1728 = vmatpush.msrb.mxu0 %v1603_v50  ;;  %1788 = vmatpush.msrb.mxu2 %v8458_v1  ;;  %v13347_v50 = vand.u32 4294901760, %v8442_v49  ;;  %v1466_v54 = vsel %vm217_vm1, %v1462_v33, %v13357_v51  ;;  %v13373_v51 = vld [vmem:[#allocation18_spill] sm:$0xff] }
 0x2e5   :  { %1752 = vmatpush.msrb.mxu1 %v8278_v34  ;;  %1856 = vmatpush.msrb.mxu3 %v1855_v63  ;;  %v1475_v34 = vsel %vm230_vm2, %v8303_v4, %v1474_v44  ;;  %v13358_v63 = vperm.slane %v7166_v16, 3 }
 0x2e6   :  { %1732 = vmatpush.msrb.mxu0 %v1609_v17  ;;  %1790 = vmatpush.msrb.mxu2 %v8477_v40  ;;  %v13343_v17 = vand.u32 4294901760, %v8383_v26 }
 0x2e7   :  { %1754 = vmatpush.msrb.mxu1 %v8253_v46  ;;  %1862 = vmatpush.msrb.mxu3 %v1861_v36  ;;  %v13344_v46 = vand.u32 4294901760, %v8403_v9 }
 0x2e8   :  { %1877 = vmatpush.msra.mxu0 %v8383_v26  ;;  %1686 = vmatmul.f32.vlgmr.msra.gmra.mxu3 %v8411_v47  ;;  %v13345_v26 = vand.u32 4294901760, %v8425_v28 }
 0x2e9   :  { %1756 = vmatpush.msrb.mxu1 %v8329_v32  ;;  %1996 = vmatpush.msra.mxu3 %v8351_v55  ;;  %v1450_v32 = vpop.permute.xlu1 %1449 }
 0x2ea   :  { %1792 = vmatpush.msrb.mxu2 %v8511_v14  ;;  %1880 = vmatpush.msra.mxu0 %v8403_v9  ;;  %v1438_v9 = vpop.permute.xlu0 %1437  ;;  %v1451_v12 = vsel %vm204_vm0, %v8305_v0, %v1450_v32 }
 0x2eb   :  { %1998 = vmatpush.msra.mxu3 %v8375_v62  ;;  %1758 = vmatpush.msrb.mxu1 %v8385_v58  ;;  %v1463_v58 = vsel %vm217_vm1, %v8301_v60, %v1462_v33  ;;  %v13348_v60 = vperm.slane %v7161_v15, 2  ;;  %v13359_v33 = vld [vmem:[#allocation16_spill] sm:$0xff] }
 0x2ec   :  { %1950 = vmatpush.msra.mxu2 %v13343_v17  ;;  %1883 = vmatpush.msra.mxu0 %v8425_v28  ;;  %v8596_v28 = vpop.permute.xlu2 %1423 }
 0x2ed   :  { %2000 = vmatpush.msra.mxu3 %v8387_v30  ;;  %1760 = vmatpush.msrb.mxu1 %v8452_v13  ;;  %v13346_v13 = vperm.slane %v7166_v16, 2  ;;  %v1509_v22 = vmul.f32 %v1463_v58, %v13348_v60  ;;  %v1428_v0 = vsel %vm178_vm4, %v8299_v52, %v8596_v28  ;;  %v13351_v52 = vld [vmem:[#allocation9_spill] sm:$0xff]  ;;  %v13363_v58 = vld [vmem:[#allocation8_spill] sm:$0xff] }
 0x2ee   :  { %1954 = vmatpush.msra.mxu2 %v13344_v46  ;;  %1614 = vmatmul.f32.vlgmr.msra.gmra.mxu1 %v8345_v37  ;;  %v13352_v10 = vperm.slane %v13351_v52, 2  ;;  %v13361_v46 = vld [vmem:[#allocation17_spill] sm:$0xff] }
 0x2ef   :  { %1886 = vmatpush.msra.mxu0 %v8442_v49  ;;  %2002 = vmatpush.msra.mxu3 %v8405_v41  ;;  %v1513_v4 = vmul.f32 %v1475_v34, %v13346_v13  ;;  %v1454_v16 = vsel %vm204_vm0, %v1450_v32, %v13361_v46  ;;  %v13364_v13 = vld [vmem:[#allocation11_spill] sm:$0xff] }
 0x2f0   :  { %1958 = vmatpush.msra.mxu2 %v13345_v26  ;;  %1762 = vmatpush.msrb.mxu1 %v8400_v2  ;;  %v1493_v21 = vmul.f32 %v1428_v0, %v13352_v10  ;;  %v1442_v26 = vsel %vm191_vm3, %v1438_v9, %v13363_v58  ;;  %v13368_v0 = vld [vmem:[#allocation13_spill] sm:$0xff]  ;;  %v13370_v10 = vperm.slane %v7203_v31, 3 }
 0x2f1   :  { %1889 = vmatpush.msra.mxu0 %v8465_v61  ;;  %2004 = vmatpush.msra.mxu3 %v8430_v53  ;;  %v8615_v2 = vand.u32 4294901760, %v1513_v4  ;;  %v8621_v61 = vand.u32 4294901760, %v1509_v22  ;;  %v8635_v29 = vpop.permute.xlu1 %1411 }
 0x2f2   :  { %1916 = vmatpush.msra.mxu1 %v8351_v55  ;;  %1962 = vmatpush.msra.mxu2 %v13347_v50  ;;  %v1439_v55 = vsel %vm191_vm3, %v8343_v23, %v1438_v9  ;;  %v13350_v23 = vperm.slane %v7203_v31, 2  ;;  %v8653_v45 = vpop.permute.xlu0 %1399  ;;  %v8673_v17 = vand.u32 4294901760, %v1493_v21 }
 0x2f3   :  { %1892 = vmatpush.msra.mxu0 %v8468_v20  ;;  %2006 = vmatpush.msra.mxu3 %v8432_v48  ;;  %v13354_v20 = vld [vmem:[#allocation6_spill] sm:$0xff]  ;;  %v8646_v6 = vsub.f32 %v1513_v4, %v8615_v2  ;;  %v8658_v43 = vsub.f32 %v1509_v22, %v8621_v61  ;;  %v13365_v4 = vperm.slane %v13364_v13, 2  ;;  %v13366_v22 = vld [vmem:[#allocation20_spill] sm:$0xff] }
 0x2f4   :  { %1918 = vmatpush.msra.mxu1 %v8375_v62  ;;  %1966 = vmatpush.msra.mxu2 %v1835_v27  ;;  %v13349_v62 = vperm.slane %v7139_v8, 2  ;;  %v1501_v27 = vmul.f32 %v1439_v55, %v13350_v23  ;;  %v8692_v32 = vpop.permute.xlu2 %1387  ;;  %v13367_v55 = vperm.slane %v7139_v8, 3  ;;  %v8726_v8 = vsub.f32 %v1493_v21, %v8673_v17 }
 0x2f5   :  { %1734 = vmatmul.f32.vlgmr.msrb.gmra.mxu0 %v8345_v37  ;;  %2008 = vmatpush.msra.mxu3 %v8458_v1  ;;  %v2067_v60 = vand.u32 4294901760, %v8658_v43  ;;  %v13372_v21 = vperm.slane %v13354_v20, 3 }
 0x2f6   :  { %v1505_v49 = vmul.f32 %v1451_v12, %v13349_v62  ;;  %1895 = vmatpush.msra.mxu0 %v8494_v19  ;;  %1920 = vmatpush.msra.mxu1 %v8387_v30  ;;  %v1478_v30 = vsel %vm230_vm2, %v1474_v44, %v13353_v59  ;;  %v8662_v44 = vand.u32 4294901760, %v1501_v27  ;;  %v1416_v19 = vsel %vm165_vm5, %v13359_v33, %v8635_v29 }
 0x2f7   :  { %1970 = vmatpush.msra.mxu2 %v1841_v39  ;;  %1864 = vmatmul.f32.vlgmr.msrb.gmra.mxu3 %v8345_v37  ;;  %v13355_v39 = vperm.slane %v13354_v20, 2  ;;  %v1514_v36 = vmul.f32 %v1478_v30, %v13358_v63  ;;  %v1489_v50 = vmul.f32 %v1416_v19, %v13365_v4  ;;  %v1392_v12 = vsel %vm139_vm8, %v13366_v22, %v8692_v32  ;;  %v13374_v63 = vld [vmem:[#allocation10_spill] sm:$0xff] }
 0x2f8   :  { %1798 = vmatmul.f32.vlgmr.msrb.gmra.mxu2 %v8475_v5  ;;  %1764 = vmatmul.f32.vlgmr.msrb.gmra.mxu1 %v8345_v37  ;;  %v8648_v24 = vand.u32 4294901760, %v1505_v49  ;;  %v1506_v9 = vmul.f32 %v1454_v16, %v13367_v55  ;;  %v13369_v62 = vperm.slane %v13368_v0, 2  ;;  %v1502_v59 = vmul.f32 %v1442_v26, %v13370_v10 }
 0x2f9   :  { %1898 = vmatpush.msra.mxu0 %v8509_v57  ;;  %v1497_v3 = vmul.f32 %v13356_v38, %v13355_v39  ;;  %1922 = vmatpush.msra.mxu1 %v8405_v41  ;;  %v13360_v41 = vperm.slane %v7161_v15, 3  ;;  %v13362_v57 = vld [vmem:[#allocation12_spill] sm:$0xff]  ;;  %v13371_v30 = vperm.slane %v13281_v42, 2  ;;  %v2068_v31 = vsub.f32 %v8658_v43, %v2067_v60 }
 0x2fa   :  { %1974 = vmatpush.msra.mxu2 %v1847_v56  ;;  %2010 = vmatpush.msra.mxu3 %v8477_v40  ;;  %v1404_v15 = vsel %vm13057_vm7, %v13362_v57, %v8653_v45  ;;  %v1427_v33 = vsel %vm178_vm4, %v8596_v28, %v13374_v63  ;;  %v8769_v57 = vand.u32 4294901760, %v1502_v59  ;;  %v13376_v26 = vperm.slane %v13351_v52, 3 }
 0x2fb   :  { %1901 = vmatpush.msra.mxu0 %v8519_v25  ;;  %1924 = vmatpush.msra.mxu1 %v8430_v53  ;;  %v1510_v56 = vmul.f32 %v1466_v54, %v13360_v41  ;;  %v8680_v34 = vand.u32 4294901760, %v1497_v3  ;;  %v2061_v53 = vand.u32 4294901760, %v8646_v6  ;;  %v8714_v25 = vsub.f32 %v1501_v27, %v8662_v44 }
 0x2fc   :  { %1978 = vmatpush.msra.mxu2 %v1853_v18  ;;  %2012 = vmatpush.msra.mxu3 %v8511_v14  ;;  %v8690_v18 = vsub.f32 %v1505_v49, %v8648_v24  ;;  %v1485_v49 = vmul.f32 %v1404_v15, %v13369_v62  ;;  %v1481_v39 = vmul.f32 %v1392_v12, %v13371_v30  ;;  %v8755_v41 = vand.u32 4294901760, %v1506_v9  ;;  %v13377_v62 = vld [vmem:[#allocation19_spill] sm:$0xff] }
 0x2fd   :  { %2026 = vmatpush.msrb.mxu0 %v8615_v2  ;;  %1926 = vmatpush.msra.mxu1 %v8432_v48  ;;  %v8703_v48 = vand.u32 4294901760, %v1514_v36  ;;  %v8723_v23 = vsub.f32 %v1497_v3, %v8680_v34  ;;  %v2062_v27 = vsub.f32 %v8646_v6, %v2061_v53  ;;  %v8738_v3 = vand.u32 4294901760, %v1489_v50 }
 0x2fe   :  { %2166 = vmatpush.msrb.mxu3 %v8615_v2  ;;  %1982 = vmatpush.msra.mxu2 %v1859_v11  ;;  %v8716_v11 = vand.u32 4294901760, %v1510_v56  ;;  %v1498_v54 = vmul.f32 %v13373_v51, %v13372_v21  ;;  %v2079_v46 = vand.u32 4294901760, %v8714_v25  ;;  %v8763_v16 = vand.u32 4294901760, %v1485_v49 }
 0x2ff   :  { %2028 = vmatpush.msrb.mxu0 %v8621_v61  ;;  %1928 = vmatpush.msra.mxu1 %v8458_v1  ;;  %v2073_v1 = vand.u32 4294901760, %v8690_v18  ;;  %v8753_v19 = vsub.f32 %v1514_v36, %v8703_v48  ;;  %v2085_v28 = vand.u32 4294901760, %v8723_v23  ;;  %v2091_v36 = vand.u32 4294901760, %v8726_v8 }
 0x300   :  { %2127 = vmatpush.msrb.mxu2 %v8646_v6  ;;  %2168 = vmatpush.msrb.mxu3 %v8621_v61  ;;  %v8761_v20 = vsub.f32 %v1510_v56, %v8716_v11  ;;  %v2063_v56 = vand.u32 4294901760, %v2062_v27  ;;  %v1494_v4 = vmul.f32 %v1427_v33, %v13376_v26  ;;  %v8782_v22 = vand.u32 4294901760, %v1481_v39 }
 0x301   :  { %1904 = vmatmul.f32.vlgmr.msra.gmra.mxu0 %v8380_v35  ;;  %1984 = vmatmul.f32.vlgmr.msra.gmra.mxu2 %v8345_v37  ;;  %v2074_v58 = vsub.f32 %v8690_v18, %v2073_v1  ;;  %v2069_v12 = vand.u32 4294901760, %v2068_v31  ;;  %v8791_v55 = vsub.f32 %v1506_v9, %v8755_v41  ;;  %v1403_v52 = vsel %vm13057_vm7, %v8653_v45, %v13377_v62  ;;  %v13379_v31 = vld [vmem:[#allocation7_spill] sm:$0xff] }
 0x302   :  { %2030 = vmatpush.msrb.mxu0 %v8648_v24  ;;  %2130 = vmatpush.msrb.mxu2 %v8658_v43  ;;  %v2080_v10 = vsub.f32 %v8714_v25, %v2079_v46  ;;  %v2086_v9 = vsub.f32 %v8723_v23, %v2085_v28  ;;  %v8809_v45 = vsub.f32 %v1485_v49, %v8763_v16  ;;  %v8811_v30 = vand.u32 4294901760, %v1498_v54 }
 0x303   :  { %2170 = vmatpush.msrb.mxu3 %v8648_v24  ;;  %1930 = vmatpush.msra.mxu1 %v8477_v40  ;;  %v13375_v40 = vld [vmem:[#allocation3_spill] sm:$0xff]  ;;  %v1391_v21 = vsel %vm139_vm8, %v8692_v32, %v13379_v31  ;;  %v2075_v63 = vand.u32 4294901760, %v2074_v58  ;;  %v13027_v33 = vand.u32 4294901760, %v8761_v20  ;;  %v13380_v49 = vperm.slane %v13368_v0, 3 }
 0x304   :  { %2014 = vmatmul.f32.vlgmr.msra.gmra.mxu3 %v8345_v37  ;;  %2032 = vmatpush.msrb.mxu0 %v8662_v44  ;;  %v1415_v15 = vsel %vm165_vm5, %v8635_v29, %v13375_v40  ;;  %v8787_v29 = vsub.f32 %v1489_v50, %v8738_v3  ;;  %v13378_v50 = vperm.slane %v13364_v13, 3  ;;  %v8818_v13 = vsub.f32 %v1502_v59, %v8769_v57 }
 0x305   :  { %2133 = vmatpush.msrb.mxu2 %v8690_v18  ;;  %2172 = vmatpush.msrb.mxu3 %v8662_v44  ;;  %v8822_v40 = vand.u32 4294901760, %v1494_v4  ;;  %v8829_v32 = vsub.f32 %v1481_v39, %v8782_v22  ;;  %v2092_v0 = vsub.f32 %v8726_v8, %v2091_v36  ;;  %v13028_v26 = vand.u32 4294901760, %v8791_v55 }
 0x306   :  { %1932 = vmatpush.msra.mxu1 %v8511_v14  ;;  %2034 = vmatpush.msrb.mxu0 %v8680_v34  ;;  %v2311_v14 = vand.u32 4294901760, %v8753_v19  ;;  %v1490_v27 = vmul.f32 %v1415_v15, %v13378_v50  ;;  %v1486_v15 = vmul.f32 %v1403_v52, %v13380_v49  ;;  %v2097_v59 = vand.u32 4294901760, %v8787_v29 }
 0x307   :  { %1936 = vmatmul.f32.vlgmr.msra.gmra.mxu1 %v8411_v47  ;;  %2136 = vmatpush.msrb.mxu2 %v8714_v25  ;;  %v2103_v52 = vand.u32 4294901760, %v8809_v45  ;;  %v2087_v50 = vand.u32 4294901760, %v2086_v9  ;;  %v2329_v31 = vand.u32 4294901760, %v8818_v13  ;;  %v2109_v9 = vand.u32 4294901760, %v8829_v32 }
 0x308   :  { %2064 = vmatpush.msrb.mxu1 %v2063_v56  ;;  %2174 = vmatpush.msrb.mxu3 %v8680_v34  ;;  %v2081_v56 = vand.u32 4294901760, %v2080_v10  ;;  %v2312_v58 = vsub.f32 %v8753_v19, %v2311_v14  ;;  %v8842_v62 = vand.u32 4294901760, %v1490_v27  ;;  %v8848_v10 = vsub.f32 %v1498_v54, %v8811_v30 }
 0x309   :  { %2036 = vmatpush.msrb.mxu0 %v8673_v17  ;;  %2139 = vmatpush.msrb.mxu2 %v8723_v23  ;;  %v2098_v54 = vsub.f32 %v8787_v29, %v2097_v59 }
 0x30a   :  { %2070 = vmatpush.msrb.mxu1 %v2069_v12  ;;  %2176 = vmatpush.msrb.mxu3 %v8673_v17  ;;  %v13381_v12 = vperm.slane %v13281_v42, 3  ;;  %v2318_v42 = vsub.f32 %v8761_v20, %v13027_v33  ;;  %v2313_v49 = vand.u32 4294901760, %v2312_v58  ;;  %v8873_v33 = vsub.f32 %v1490_v27, %v8842_v62 }
 0x30b   :  { %2038 = vmatpush.msrb.mxu0 %v8738_v3  ;;  %2142 = vmatpush.msrb.mxu2 %v8726_v8  ;;  %v2335_v58 = vand.u32 4294901760, %v8848_v10  ;;  %v2099_v6 = vand.u32 4294901760, %v2098_v54 }
 0x30c   :  { %2076 = vmatpush.msrb.mxu1 %v2075_v63  ;;  %v1482_v39 = vmul.f32 %v1391_v21, %v13381_v12  ;;  %2178 = vmatpush.msrb.mxu3 %v8738_v3  ;;  %v8856_v21 = vsub.f32 %v1494_v4, %v8822_v40  ;;  %v8858_v63 = vand.u32 4294901760, %v1486_v15  ;;  %v2324_v4 = vsub.f32 %v8791_v55, %v13028_v26 }
 0x30d   :  { %2040 = vmatpush.msrb.mxu0 %v8763_v16  ;;  %2145 = vmatpush.msrb.mxu2 %v8787_v29  ;;  %v2330_v26 = vsub.f32 %v8818_v13, %v2329_v31 }
 0x30e   :  { %2082 = vmatpush.msrb.mxu1 %v2081_v56  ;;  %2180 = vmatpush.msrb.mxu3 %v8763_v16  ;;  %v2093_v56 = vand.u32 4294901760, %v2092_v0  ;;  %v8870_v12 = vand.u32 4294901760, %v1482_v39  ;;  %v2319_v0 = vand.u32 4294901760, %v2318_v42  ;;  %v8886_v27 = vsub.f32 %v1486_v15, %v8858_v63 }
 0x30f   :  { %2042 = vmatpush.msrb.mxu0 %v8782_v22  ;;  %2148 = vmatpush.msrb.mxu2 %v8809_v45  ;;  %v2325_v42 = vand.u32 4294901760, %v2324_v4  ;;  %v2347_v15 = vand.u32 4294901760, %v8873_v33  ;;  %v2331_v54 = vand.u32 4294901760, %v2330_v26 }
 0x310   :  { %2088 = vmatpush.msrb.mxu1 %v2087_v50  ;;  %2182 = vmatpush.msrb.mxu3 %v8782_v22  ;;  %v2104_v50 = vsub.f32 %v8809_v45, %v2103_v52 }
 0x311   :  { %2200 = vmatpush.msra.mxu0 %v2061_v53  ;;  %2151 = vmatpush.msrb.mxu2 %v8829_v32  ;;  %v2110_v53 = vsub.f32 %v8829_v32, %v2109_v9  ;;  %v2348_v25 = vsub.f32 %v8873_v33, %v2347_v15 }
 0x312   :  { %2314 = vmatpush.msra.mxu3 %v2313_v49  ;;  %2094 = vmatpush.msrb.mxu1 %v2093_v56  ;;  %v2341_v49 = vand.u32 4294901760, %v8856_v21  ;;  %v8897_v56 = vsub.f32 %v1482_v39, %v8870_v12  ;;  %v2105_v43 = vand.u32 4294901760, %v2104_v50 }
 0x313   :  { %2204 = vmatpush.msra.mxu0 %v2067_v60  ;;  %2276 = vmatpush.msra.mxu2 %v8703_v48  ;;  %v2336_v60 = vsub.f32 %v8848_v10, %v2335_v58  ;;  %v2111_v39 = vand.u32 4294901760, %v2110_v53 }
 0x314   :  { %2320 = vmatpush.msra.mxu3 %v2319_v0  ;;  %2100 = vmatpush.msrb.mxu1 %v2099_v6  ;;  %v2342_v18 = vsub.f32 %v8856_v21, %v2341_v49 }
 0x315   :  { %2208 = vmatpush.msra.mxu0 %v2073_v1  ;;  %2278 = vmatpush.msra.mxu2 %v8716_v11  ;;  %v2353_v1 = vand.u32 4294901760, %v8886_v27  ;;  %v2337_v4 = vand.u32 4294901760, %v2336_v60 }
 0x316   :  { %2326 = vmatpush.msra.mxu3 %v2325_v42  ;;  %2106 = vmatpush.msrb.mxu1 %v2105_v43  ;;  %v2343_v26 = vand.u32 4294901760, %v2342_v18 }
 0x317   :  { %2212 = vmatpush.msra.mxu0 %v2079_v46  ;;  %2280 = vmatpush.msra.mxu2 %v8755_v41  ;;  %v2359_v46 = vand.u32 4294901760, %v8897_v56  ;;  %v2354_v23 = vsub.f32 %v8886_v27, %v2353_v1 }
 0x318   :  { %2332 = vmatpush.msra.mxu3 %v2331_v54  ;;  %2112 = vmatpush.msrb.mxu1 %v2111_v39 }
 0x319   :  { %2216 = vmatpush.msra.mxu0 %v2085_v28  ;;  %2282 = vmatpush.msra.mxu2 %v8769_v57  ;;  %v2360_v28 = vsub.f32 %v8897_v56, %v2359_v46 }
 0x31a   :  { %2246 = vmatpush.msra.mxu1 %v8615_v2  ;;  %2338 = vmatpush.msra.mxu3 %v2337_v4  ;;  %v2349_v2 = vand.u32 4294901760, %v2348_v25 }
 0x31b   :  { %2220 = vmatpush.msra.mxu0 %v2091_v36  ;;  %2284 = vmatpush.msra.mxu2 %v8811_v30  ;;  %v2361_v8 = vand.u32 4294901760, %v2360_v28 }
 0x31c   :  { %2248 = vmatpush.msra.mxu1 %v8621_v61  ;;  %2344 = vmatpush.msra.mxu3 %v2343_v26  ;;  %v2355_v61 = vand.u32 4294901760, %v2354_v23 }
 0x31d   :  { %2224 = vmatpush.msra.mxu0 %v2097_v59  ;;  %2286 = vmatpush.msra.mxu2 %v8822_v40 }
 0x31e   :  { %2250 = vmatpush.msra.mxu1 %v8648_v24  ;;  %2350 = vmatpush.msra.mxu3 %v2349_v2  ;;  %v13382_v24 = vand.u32 4294901760, %v8761_v20 }
 0x31f   :  { %2228 = vmatpush.msra.mxu0 %v2103_v52  ;;  %2288 = vmatpush.msra.mxu2 %v8842_v62 }
 0x320   :  { %2252 = vmatpush.msra.mxu1 %v8662_v44  ;;  %2356 = vmatpush.msra.mxu3 %v2355_v61  ;;  %v13383_v44 = vand.u32 4294901760, %v8791_v55 }
 0x321   :  { %2232 = vmatpush.msra.mxu0 %v2109_v9  ;;  %2290 = vmatpush.msra.mxu2 %v8858_v63 }
 0x322   :  { %2254 = vmatpush.msra.mxu1 %v8680_v34  ;;  %2362 = vmatpush.msra.mxu3 %v2361_v8 }
 0x323   :  { %2048 = vmatmul.f32.vlgmr.msrb.gmra.mxu0 %v8475_v5  ;;  %2186 = vmatmul.f32.vlgmr.msrb.gmra.mxu3 %v8411_v47 }
 0x324   :  { %2377 = vmatpush.msrb.mxu0 %v8753_v19  ;;  %2496 = vmatpush.msrb.mxu3 %v8703_v48 }
 0x325   :  { %2256 = vmatpush.msra.mxu1 %v8673_v17  ;;  %2292 = vmatpush.msra.mxu2 %v8870_v12 }
 0x326   :  { %2380 = vmatpush.msrb.mxu0 %v8761_v20  ;;  %2154 = vmatmul.f32.vlgmr.msrb.gmra.mxu2 %v8380_v35 }
 0x327   :  { %2498 = vmatpush.msrb.mxu3 %v8716_v11  ;;  %2450 = vmatpush.msrb.mxu2 %v2311_v14 }
 0x328   :  { %2258 = vmatpush.msra.mxu1 %v8738_v3  ;;  %2383 = vmatpush.msrb.mxu0 %v8791_v55 }
 0x329   :  { %2500 = vmatpush.msrb.mxu3 %v8755_v41  ;;  %2454 = vmatpush.msrb.mxu2 %v13382_v24 }
 0x32a   :  { %2260 = vmatpush.msra.mxu1 %v8763_v16  ;;  %2386 = vmatpush.msrb.mxu0 %v8818_v13 }
 0x32b   :  { %2502 = vmatpush.msrb.mxu3 %v8769_v57  ;;  %2458 = vmatpush.msrb.mxu2 %v13383_v44 }
 0x32c   :  { %2262 = vmatpush.msra.mxu1 %v8782_v22  ;;  %2389 = vmatpush.msrb.mxu0 %v8848_v10 }
 0x32d   :  { %2114 = vmatmul.f32.vlgmr.msrb.gmra.mxu1 %v8345_v37  ;;  %2462 = vmatpush.msrb.mxu2 %v2329_v31 }
 0x32e   :  { %2416 = vmatpush.msrb.mxu1 %v8703_v48  ;;  %2504 = vmatpush.msrb.mxu3 %v8811_v30 }
 0x32f   :  { %2392 = vmatpush.msrb.mxu0 %v8856_v21  ;;  %2466 = vmatpush.msrb.mxu2 %v2335_v58 }
 0x330   :  { %2418 = vmatpush.msrb.mxu1 %v8716_v11  ;;  %2506 = vmatpush.msrb.mxu3 %v8822_v40 }
 0x331   :  { %2395 = vmatpush.msrb.mxu0 %v8873_v33  ;;  %2470 = vmatpush.msrb.mxu2 %v2341_v49 }
 0x332   :  { %2420 = vmatpush.msrb.mxu1 %v8755_v41  ;;  %2508 = vmatpush.msrb.mxu3 %v8842_v62 }
 0x333   :  { %2298 = vmatmul.f32.vlgmr.msra.gmra.mxu2 %v8475_v5  ;;  %2398 = vmatpush.msrb.mxu0 %v8886_v27 }
 0x334   :  { %2422 = vmatpush.msrb.mxu1 %v8769_v57  ;;  %2474 = vmatpush.msrb.mxu2 %v2347_v15 }
 0x335   :  { %2510 = vmatpush.msrb.mxu3 %v8858_v63  ;;  %2234 = vmatmul.f32.vlgmr.msra.gmra.mxu0 %v8345_v37 }
 0x336   :  { %2364 = vmatmul.f32.vlgmr.msra.gmra.mxu3 %v8345_v37  ;;  %2401 = vmatpush.msrb.mxu0 %v8897_v56 }
 0x337   :  { %2424 = vmatpush.msrb.mxu1 %v8811_v30  ;;  %2478 = vmatpush.msrb.mxu2 %v2353_v1 }
 0x338   :  { %2512 = vmatpush.msrb.mxu3 %v8870_v12  ;;  %2264 = vmatmul.f32.vlgmr.msra.gmra.mxu1 %v8345_v37 }
 0x339   :  { %2426 = vmatpush.msrb.mxu1 %v8822_v40  ;;  %2482 = vmatpush.msrb.mxu2 %v2359_v46 }
 0x33b   :  { %2484 = vmatmul.f32.vlgmr.msrb.gmra.mxu2 %v8345_v37  ;;  %2428 = vmatpush.msrb.mxu1 %v8842_v62 }
 0x33d   :  { %2430 = vmatpush.msrb.mxu1 %v8858_v63  ;;  %2404 = vmatmul.f32.vlgmr.msrb.gmra.mxu0 %v8380_v35 }
 0x33e   :  { %2514 = vmatmul.f32.vlgmr.msrb.gmra.mxu3 %v8345_v37 }
 0x33f   :  { %2432 = vmatpush.msrb.mxu1 %v8870_v12 }
 0x340   :  { %2436 = vmatmul.f32.vlgmr.msrb.gmra.mxu1 %v8411_v47 }
 0x352   :  { %v1549_v5 = vpop.f32.mrf.mxu0 }
 0x35a   :  { %v1655_v48 = vpop.f32.mrf.mxu2 }
 0x36b   :  { %v1615_v17 = vpop.f32.mrf.mxu1  ;;  %v1687_v34 = vpop.f32.mrf.mxu3 }
 0x36c   :  { %v1616_v3 = vadd.f32 %v1615_v17, %v1549_v5 }
 0x36e   :  { %v1656_v19 = vadd.f32 %v1655_v48, %v1616_v3 }
 0x370   :  { %v1688_v36 = vadd.f32 %v1687_v34, %v1656_v19 }
 0x372   :  { %v1735_v11 = vpop.f32.mrf.mxu0 }
 0x373   :  { %v1736_v35 = vadd.f32 %v1735_v11, %v1688_v36 }
 0x375   :  { %v1765_v20 = vpop.f32.mrf.mxu1 }
 0x376   :  { %v9005_v45 = vadd.f32 %v1765_v20, %v1736_v35 }
 0x378   :  { %v2534_v40 = vmul.f32 %v9005_v45, %v9005_v45 }
 0x37a   :  { %v1865_v16 = vpop.f32.mrf.mxu3 }
 0x37b   :  { %v1799_v41 = vpop.f32.mrf.mxu2 }
 0x37c   :  { %v1866_v57 = vadd.f32 %v1865_v16, %v1799_v41 }
 0x37e   :  { %v1905_v22 = vpop.f32.mrf.mxu0 }
 0x37f   :  { %v1906_v29 = vadd.f32 %v1905_v22, %v1866_v57 }
 0x384   :  { %v1937_v37 = vpop.f32.mrf.mxu1  ;;  %v1985_v55 = vpop.f32.mrf.mxu2 }
 0x385   :  { %v1938_v14 = vadd.f32 %v1937_v37, %v1906_v29 }
 0x387   :  { %v1986_v47 = vadd.f32 %v1985_v55, %v1938_v14  ;;  %v2015_v30 = vpop.f32.mrf.mxu3 }
 0x389   :  { %v9007_v13 = vadd.f32 %v2015_v30, %v1986_v47  ;;  %v9030_v47 = vld [vmem:[%s12923_s4 + $0x10] sm:$0xff]  ;;  %v9035_v30 = vld [vmem:[%s12923_s4 + $0x18] sm:$0xff]  ;;  %s6995_s4 = smov 94  }
 0x38b   :  { %v2524_v33 = vadd.f32 %v9007_v13, %v9005_v45  ;;  %v2535_v32 = vmul.f32 %v9007_v13, %v9007_v13 }
 0x38d   :  { %2525 = vadd.xlane.f32.xlu1 %v2524_v33  ;;  %v2536_v59 = vadd.f32 %v2535_v32, %v2534_v40 }
 0x38f   :  { %2537 = vadd.xlane.f32.xlu0 %v2536_v59 }
 0x3a0   :  { %v2049_v62 = vpop.f32.mrf.mxu0 }
 0x3a6   :  { %v2187_v21 = vpop.f32.mrf.mxu3 }
 0x3a9   :  { %v2155_v10 = vpop.f32.mrf.mxu2 }
 0x3aa   :  { %v2115_v52 = vpop.f32.mrf.mxu1 }
 0x3ab   :  { %v2116_v31 = vadd.f32 %v2115_v52, %v2049_v62 }
 0x3ad   :  { %v2156_v63 = vadd.f32 %v2155_v10, %v2116_v31 }
 0x3af   :  { %v2188_v58 = vadd.f32 %v2187_v21, %v2156_v63 }
 0x3b2   :  { %v2235_v9 = vpop.f32.mrf.mxu0 }
 0x3b3   :  { %v2236_v6 = vadd.f32 %v2235_v9, %v2188_v58  ;;  %v13385_v58 = vld [vmem:[#allocation14_spill] sm:$0xff] }
 0x3b5   :  { %v2265_v12 = vpop.f32.mrf.mxu1 }
 0x3b6   :  { %v2299_v50 = vpop.f32.mrf.mxu2  ;;  %v9015_v43 = vadd.f32 %v2265_v12, %v2236_v6  ;;  %v13384_v12 = vld [vmem:[#allocation2_spill] sm:$0xff] }
 0x3b8   :  { %v2583_v18 = vmul.f32 %v9015_v43, %v9015_v43 }
 0x3b9   :  { %v2365_v0 = vpop.f32.mrf.mxu3 }
 0x3ba   :  { %v2366_v27 = vadd.f32 %v2365_v0, %v2299_v50  ;;  %v2405_v53 = vpop.f32.mrf.mxu0 }
 0x3bc   :  { %v2406_v49 = vadd.f32 %v2405_v53, %v2366_v27 }
 0x3bd   :  { %v2437_v42 = vpop.f32.mrf.mxu1 }
 0x3be   :  { %v2485_v56 = vpop.f32.mrf.mxu2  ;;  %v2438_v60 = vadd.f32 %v2437_v42, %v2406_v49 }
 0x3c0   :  { %v2486_v15 = vadd.f32 %v2485_v56, %v2438_v60 }
 0x3c1   :  { %v2515_v54 = vpop.f32.mrf.mxu3 }
 0x3c2   :  { %v9017_v39 = vadd.f32 %v2515_v54, %v2486_v15 }
 0x3c4   :  { %v2573_v1 = vadd.f32 %v9017_v39, %v9015_v43  ;;  %v2584_v4 = vmul.f32 %v9017_v39, %v9017_v39 }
 0x3c6   :  { %2574 = vadd.xlane.f32.xlu2 %v2573_v1  ;;  %v2585_v25 = vadd.f32 %v2584_v4, %v2583_v18 }
 0x3c8   :  { %2586 = vadd.xlane.f32.xlu1 %v2585_v25 }
 0x400   :  { %v2526_v46 = vpop.xlane.xlu1 %2525 }
 0x401   :  { %v2527_v26 = vrot.slane %v2526_v46, 4 }
 0x402   :  { %v2538_v23 = vpop.xlane.xlu0 %2537 }
 0x403   :  { %v2528_v2 = vadd.f32 %v2527_v26, %v2526_v46  ;;  %v2539_v28 = vrot.slane %v2538_v23, 4 }
 0x405   :  { %v2529_v61 = vrot.slane %v2528_v2, 2  ;;  %v2540_v8 = vadd.f32 %v2539_v28, %v2538_v23 }
 0x407   :  { %v2530_v24 = vadd.f32 %v2529_v61, %v2528_v2  ;;  %v2541_v44 = vrot.slane %v2540_v8, 2 }
 0x409   :  { %v2531_v5 = vrot.slane %v2530_v24, 1  ;;  %v2542_v17 = vadd.f32 %v2541_v44, %v2540_v8 }
 0x40b   :  { %v2532_v34 = vadd.f32 %v2531_v5, %v2530_v24  ;;  %v2543_v48 = vrot.slane %v2542_v17, 1 }
 0x40d   :  { %v2533_v11 = vmul.f32 0.0009765625, %v2532_v34  ;;  %v2544_v3 = vadd.f32 %v2543_v48, %v2542_v17 }
 0x40f   :  { %v2545_v19 = vmul.f32 0.0009765625, %v2544_v3  ;;  %v2546_v41 = vmul.f32 %v2533_v11, %v2533_v11  ;;  %v2559_v14 = vsub.f32 %v9005_v45, %v2533_v11  ;;  %v2560_v55 = vsub.f32 %v9007_v13, %v2533_v11  ;;  %v9040_v45 = vld [vmem:[%s12924_s5 + $0x10] sm:$0xff]  ;;  %v9045_v13 = vld [vmem:[%s12924_s5 + $0x18] sm:$0xff]  ;;  %s6996_s5 = smov 95  }
 0x411   :  { %v2547_v20 = vsub.f32 %v2545_v19, %v2546_v41 }
 0x413   :  { %v2548_v16 = vadd.f32 1e-05, %v2547_v20 }
 0x415   :  { %6963 = vrsqrt.f32 %v2548_v16  ;;  %vm2555_vm12 = vweird.f32 %v2548_v16 }
 0x41b   :  { %v6964_v36 = vpop.eup %6963 }
 0x41c   :  { %v2550_v57 = vmul.f32 %v6964_v36, %v2548_v16  ;;  %vm2556_vm6 = vweird.f32 %v6964_v36 }
 0x41d   :  { %vm2557_vm13 = vmor %vm2555_vm12, %vm2556_vm6 }
 0x41e   :  { %v2551_v22 = vmul.f32 %v6964_v36, %v2550_v57 }
 0x420   :  { %v2552_v35 = vmul.f32 0.5, %v2551_v22 }
 0x422   :  { %v2553_v29 = vsub.f32 1.5, %v2552_v35 }
 0x424   :  { %v2554_v37 = vmul.f32 %v6964_v36, %v2553_v29 }
 0x426   :  { %v2558_v33 = vsel %vm2557_vm13, %v6964_v36, %v2554_v37  ;;  %vm2983_vm13 = vcmp.lt.s32.totalorder %v7134_v7, 94 }
 0x427   :  { %v2561_v40 = vmul.f32 %v2559_v14, %v2558_v33  ;;  %v2562_v32 = vmul.f32 %v2560_v55, %v2558_v33  ;;  %v9162_v55 = vld [vmem:[%s12925_s2 + $0x27] ss:$8 sm:$0xf] }
 0x429   :  { %v2563_v59 = vmul.f32 %v9030_v47, %v2561_v40  ;;  %v2564_v62 = vmul.f32 %v9035_v30, %v2562_v32 }
 0x42b   :  { %v2565_v52 = vadd.f32 %v9040_v45, %v2563_v59  ;;  %v2566_v10 = vadd.f32 %v9045_v13, %v2564_v62  ;;  %v9192_v62 = vld [vmem:[%s12925_s2 + $0x24] ss:$8 sm:$0xf] }
 0x42d   :  { %vm2567_vm14 = vcmp.ge.f32.partialorder %v2565_v52, 0.0  ;;  %vm2568_vm15 = vcmp.ge.f32.partialorder %v2566_v10, 0.0  ;;  %v2569_v31 = vmul.f32 0.01, %v2565_v52  ;;  %v2570_v21 = vmul.f32 0.01, %v2566_v10 }
 0x42f   :  { %v2571_v63 = vsel %vm2567_vm14, %v2565_v52, %v2569_v31  ;;  %v2572_v9 = vsel %vm2568_vm15, %v2566_v10, %v2570_v21  ;;  %vm2970_vm14 = vcmp.lt.s32.totalorder %v7134_v7, 95  ;;  %vm2944_vm15 = vcmp.lt.s32.totalorder %v7134_v7, 97 }
 0x430   :  { %v9052_v50 = vadd.f32 %v2571_v63, %v13384_v12  ;;  %v9055_v0 = vadd.f32 %v2572_v9, %v13385_v58  ;;  %v2760_v31 = vperm.slane %v9192_v62, 0 }
 0x432   :  { %2975 = vrot.lane.b32.xlu0 %v9052_v50, %s6995_s4  ;;  %2962 = vrot.lane.b32.xlu1 %v9052_v50, %s6996_s5 }
 0x433   :  { %2977 = vrot.lane.b32.xlu2 %v9055_v0, %s6995_s4 }
 0x439   :  { %v2575_v27 = vpop.xlane.xlu2 %2574 }
 0x43a   :  { %2964 = vrot.lane.b32.xlu0 %v9055_v0, %s6996_s5  ;;  %2936 = vrot.lane.b32.xlu1 %v9052_v50, %s6997_s9  ;;  %v2576_v6 = vrot.slane %v2575_v27, 4 }
 0x43b   :  { %2949 = vrot.lane.b32.xlu2 %v9052_v50, %s6998_s11  ;;  %v2587_v53 = vpop.xlane.xlu1 %2586 }
 0x43c   :  { %v2577_v49 = vadd.f32 %v2576_v6, %v2575_v27  ;;  %v2588_v42 = vrot.slane %v2587_v53, 4 }
 0x43e   :  { %v2578_v56 = vrot.slane %v2577_v49, 2  ;;  %v2589_v60 = vadd.f32 %v2588_v42, %v2587_v53  ;;  %v9231_v42 = vld [vmem:[%s12925_s2 + $0x25] ss:$8 sm:$0xf] }
 0x440   :  { %v2579_v15 = vadd.f32 %v2578_v56, %v2577_v49  ;;  %v2590_v54 = vrot.slane %v2589_v60, 2 }
 0x442   :  { %2951 = vrot.lane.b32.xlu0 %v9055_v0, %s6998_s11  ;;  %2925 = vrot.lane.b32.xlu1 %v9055_v0, %s6999_s12  ;;  %v2580_v18 = vrot.slane %v2579_v15, 1  ;;  %v2591_v1 = vadd.f32 %v2590_v54, %v2589_v60 }
 0x443   :  { %2938 = vrot.lane.b32.xlu2 %v9055_v0, %s6997_s9 }
 0x444   :  { %v2581_v4 = vadd.f32 %v2580_v18, %v2579_v15  ;;  %v2592_v25 = vrot.slane %v2591_v1, 1  ;;  %v2771_v15 = vperm.slane %v9231_v42, 0 }
 0x446   :  { %v2582_v46 = vmul.f32 0.0009765625, %v2581_v4  ;;  %v2593_v26 = vadd.f32 %v2592_v25, %v2591_v1 }
 0x448   :  { %v2594_v23 = vmul.f32 0.0009765625, %v2593_v26  ;;  %v2595_v2 = vmul.f32 %v2582_v46, %v2582_v46  ;;  %v2608_v48 = vsub.f32 %v9015_v43, %v2582_v46  ;;  %v2609_v11 = vsub.f32 %v9017_v39, %v2582_v46 }
 0x44a   :  { %2923 = vrot.lane.b32.xlu0 %v9052_v50, %s6999_s12  ;;  %2899 = vrot.lane.b32.xlu1 %v9052_v50, %s6988_s27  ;;  %v2596_v28 = vsub.f32 %v2594_v23, %v2595_v2 }
 0x44b   :  { %2911 = vrot.lane.b32.xlu2 %v9052_v50, %s6989_s28 }
 0x44c   :  { %v2597_v61 = vadd.f32 1e-05, %v2596_v28  ;;  %v9268_v28 = vld [vmem:[%s12925_s2 + $0x23] ss:$8 sm:$0xf] }
 0x44e   :  { %6965 = vrsqrt.f32 %v2597_v61  ;;  %vm2604_vm10 = vweird.f32 %v2597_v61 }
 0x452   :  { %2913 = vrot.lane.b32.xlu0 %v9055_v0, %s6989_s28  ;;  %2889 = vrot.lane.b32.xlu1 %v9055_v0, %s6987_s26 }
 0x453   :  { %2901 = vrot.lane.b32.xlu2 %v9055_v0, %s6988_s27 }
 0x454   :  { %v6966_v8 = vpop.eup %6965 }
 0x455   :  { %v2599_v24 = vmul.f32 %v6966_v8, %v2597_v61  ;;  %vm2605_vm9 = vweird.f32 %v6966_v8 }
 0x456   :  { %vm2606_vm11 = vmor %vm2604_vm10, %vm2605_vm9  ;;  %vm2957_vm9 = vcmp.lt.s32.totalorder %v7134_v7, 96  ;;  %vm2931_vm10 = vcmp.lt.s32.totalorder %v7134_v7, 110 }
 0x457   :  { %v2600_v44 = vmul.f32 %v6966_v8, %v2599_v24 }
 0x459   :  { %v2601_v5 = vmul.f32 0.5, %v2600_v44  ;;  %v9278_v44 = vld [vmem:[%s12925_s2 + $0x21] ss:$8 sm:$0xf] }
 0x45a   :  { %2887 = vrot.lane.b32.xlu0 %v9052_v50, %s6987_s26  ;;  %2862 = vrot.lane.b32.xlu1 %v9052_v50, %s6990_s10 }
 0x45b   :  { %2874 = vrot.lane.b32.xlu2 %v9052_v50, %s7000_s17  ;;  %v2602_v17 = vsub.f32 1.5, %v2601_v5  ;;  %v2749_v5 = vperm.slane %v9268_v28, 0 }
 0x45d   :  { %v2603_v34 = vmul.f32 %v6966_v8, %v2602_v17 }
 0x45f   :  { %v2607_v3 = vsel %vm2606_vm11, %v6966_v8, %v2603_v34  ;;  %v2727_v34 = vperm.slane %v9278_v44, 0  ;;  %vm2882_vm11 = vcmp.lt.s32.totalorder %v7134_v7, 126 }
 0x460   :  { %v2610_v19 = vmul.f32 %v2608_v48, %v2607_v3  ;;  %v2611_v41 = vmul.f32 %v2609_v11, %v2607_v3 }
 0x462   :  { %2876 = vrot.lane.b32.xlu0 %v9055_v0, %s7000_s17  ;;  %2825 = vrot.lane.b32.xlu1 %v9052_v50, %s6992_s14  ;;  %v2612_v20 = vmul.f32 %v9030_v47, %v2610_v19  ;;  %v2613_v16 = vmul.f32 %v9035_v30, %v2611_v41  ;;  %v2793_v47 = vperm.slane %v9162_v55, 0 }
 0x463   :  { %2864 = vrot.lane.b32.xlu2 %v9055_v0, %s6990_s10 }
 0x464   :  { %v2614_v43 = vadd.f32 %v9040_v45, %v2612_v20  ;;  %v2615_v39 = vadd.f32 %v9045_v13, %v2613_v16  ;;  %v9185_v13 = vld [vmem:[%s12925_s2 + $0x26] ss:$8 sm:$0xf] }
 0x465   :  { %v2782_v10 = vperm.slane %v9185_v13, 0 }
 0x466   :  { %vm2617_vm6 = vcmp.ge.f32.partialorder %v2615_v39, 0.0  ;;  %v2619_v36 = vmul.f32 0.01, %v2615_v39  ;;  %v2618_v35 = vmul.f32 0.01, %v2614_v43  ;;  %vm2616_vm12 = vcmp.ge.f32.partialorder %v2614_v43, 0.0 }
 0x468   :  { %v2621_v57 = vsel %vm2617_vm6, %v2615_v39, %v2619_v36  ;;  %vm3058_vm6 = vcmask 1040384  }
 0x469   :  { %v9106_v22 = vadd.f32 %v2621_v57, %v13373_v51  ;;  %v2620_v51 = vsel %vm2616_vm12, %v2614_v43, %v2618_v35  ;;  %v9320_v57 = vld [vmem:[%s12925_s2 + $0x22] ss:$8 sm:$0xf]  ;;  %vm2845_vm12 = vcmp.lt.s32.totalorder %v7134_v7, 14 }
 0x46a   :  { %2850 = vrot.lane.b32.xlu0 %v9052_v50, %s6991_s13  ;;  %v9121_v29 = vadd.f32 %v2620_v51, %v13356_v38 }
 0x46b   :  { %13386 = vst [vmem:[#allocation9_spill] sm:$0xff] %v9106_v22  ;;  %2837 = vrot.lane.b32.xlu2 %v9052_v50, %s7001_s18  ;;  %2856 = vrot.lane.b32.xlu1 %v9106_v22, %s6991_s13 }
 0x46c   :  { %13387 = vst [vmem:[#allocation4_spill] sm:$0xff] %v9121_v29 }
 0x472   :  { %2813 = vrot.lane.b32.xlu0 %v9052_v50, %s6993_s15 }
 0x473   :  { %2831 = vrot.lane.b32.xlu2 %v9106_v22, %s6992_s14  ;;  %2819 = vrot.lane.b32.xlu1 %v9106_v22, %s6993_s15 }
 0x47a   :  { %2843 = vrot.lane.b32.xlu0 %v9106_v22, %s7001_s18 }
 0x47b   :  { %2801 = vrot.lane.b32.xlu2 %v9052_v50, %s6994_s16  ;;  %2979 = vrot.lane.b32.xlu1 %v9121_v29, %s6995_s4 }
 0x482   :  { %2807 = vrot.lane.b32.xlu0 %v9106_v22, %s6994_s16 }
 0x483   :  { %2966 = vrot.lane.b32.xlu2 %v9121_v29, %s6996_s5  ;;  %2940 = vrot.lane.b32.xlu1 %v9121_v29, %s6997_s9 }
 0x48a   :  { %2953 = vrot.lane.b32.xlu0 %v9121_v29, %s6998_s11 }
 0x48b   :  { %2927 = vrot.lane.b32.xlu2 %v9121_v29, %s6999_s12  ;;  %2903 = vrot.lane.b32.xlu1 %v9121_v29, %s6988_s27 }
 0x48d   :  { %v9141_v38 = vpop.permute.xlu2 %2977 }
 0x492   :  { %2915 = vrot.lane.b32.xlu0 %v9121_v29, %s6989_s28 }
 0x493   :  { %2891 = vrot.lane.b32.xlu2 %v9121_v29, %s6987_s26  ;;  %2866 = vrot.lane.b32.xlu1 %v9121_v29, %s6990_s10 }
 0x495   :  { %v9149_v37 = vpop.permute.xlu2 %2949 }
 0x496   :  { %13388 = vst [vmem:[#allocation6_spill] sm:$0xff] %v9149_v37 }
 0x49a   :  { %2878 = vrot.lane.b32.xlu0 %v9121_v29, %s7000_s17 }
 0x49b   :  { %2852 = vrot.lane.b32.xlu2 %v9055_v0, %s6991_s13  ;;  %2827 = vrot.lane.b32.xlu1 %v9055_v0, %s6992_s14 }
 0x49d   :  { %v9157_v14 = vpop.permute.xlu2 %2938 }
 0x4a2   :  { %2839 = vrot.lane.b32.xlu0 %v9055_v0, %s7001_s18 }
 0x4a3   :  { %2815 = vrot.lane.b32.xlu2 %v9055_v0, %s6993_s15  ;;  %2981 = vrot.lane.b32.xlu1 %v9106_v22, %s6995_s4 }
 0x4a4   :  { %v9172_v30 = vpop.permute.xlu0 %2975  ;;  %v9174_v33 = vpop.permute.xlu1 %2962 }
 0x4a5   :  { %13389 = vst [vmem:[#allocation5_spill] sm:$0xff] %v9172_v30  ;;  %v2986_v40 = vsel %vm2983_vm13, %v9172_v30, %v9141_v38  ;;  %v9180_v32 = vpop.permute.xlu2 %2911 }
 0x4a6   :  { %13390 = vst [vmem:[#allocation15_spill] sm:$0xff] %v9174_v33  ;;  %v3048_v45 = vmul.f32 %v2986_v40, %v2793_v47  ;;  %v2738_v40 = vperm.slane %v9320_v57, 0 }
 0x4a7   :  { %13391 = vst [vmem:[#allocation16_spill] sm:$0xff] %v9180_v32 }
 0x4a8   :  { %v9187_v59 = vand.u32 4294901760, %v3048_v45 }
 0x4aa   :  { %v9195_v52 = vsub.f32 %v3048_v45, %v9187_v59  ;;  %2803 = vrot.lane.b32.xlu0 %v9055_v0, %s6994_s16  ;;  %3063 = vmatpush.msra.mxu0 %v9187_v59 }
 0x4ab   :  { %2968 = vrot.lane.b32.xlu2 %v9106_v22, %s6996_s5  ;;  %3259 = vmatpush.msra.mxu3 %v9187_v59 }
 0x4ac   :  { %v13035_v21 = vand.u32 4294901760, %v9195_v52  ;;  %2942 = vrot.lane.b32.xlu1 %v9106_v22, %s6997_s9  ;;  %v9210_v63 = vpop.permute.xlu0 %2964  ;;  %v9212_v9 = vpop.permute.xlu1 %2936  ;;  %3206 = vmatpush.msra.mxu2 %v9195_v52 }
 0x4ad   :  { %13392 = vst [vmem:[#allocation17_spill] sm:$0xff] %v9212_v9  ;;  %v2973_v12 = vsel %vm2970_vm14, %v9174_v33, %v9210_v63  ;;  %v2947_v58 = vsel %vm2944_vm15, %v9212_v9, %v9157_v14  ;;  %v9223_v27 = vpop.permute.xlu2 %2901 }
 0x4ae   :  { %v3044_v6 = vmul.f32 %v2973_v12, %v2782_v10  ;;  %v3106_v53 = vsub.f32 %v9195_v52, %v13035_v21  ;;  %v3036_v49 = vmul.f32 %v2947_v58, %v2760_v31 }
 0x4b0   :  { %v9233_v56 = vand.u32 4294901760, %v3044_v6  ;;  %v3107_v60 = vand.u32 4294901760, %v3106_v53  ;;  %v9243_v18 = vand.u32 4294901760, %v3036_v49 }
 0x4b2   :  { %2955 = vrot.lane.b32.xlu0 %v9106_v22, %s6998_s11  ;;  %3065 = vmatpush.msra.mxu0 %v9233_v56  ;;  %v9241_v54 = vsub.f32 %v3044_v6, %v9233_v56  ;;  %v9271_v61 = vsub.f32 %v3036_v49, %v9243_v18 }
 0x4b3   :  { %2929 = vrot.lane.b32.xlu2 %v9106_v22, %s6999_s12  ;;  %3108 = vmatpush.msra.mxu1 %v3107_v60 }
 0x4b4   :  { %2905 = vrot.lane.b32.xlu1 %v9106_v22, %s6988_s27  ;;  %3261 = vmatpush.msra.mxu3 %v9233_v56  ;;  %v9250_v1 = vpop.permute.xlu0 %2951  ;;  %v9252_v4 = vpop.permute.xlu1 %2925  ;;  %v13034_v25 = vand.u32 4294901760, %v9241_v54  ;;  %v13030_v48 = vand.u32 4294901760, %v9271_v61 }
 0x4b5   :  { %v2960_v46 = vsel %vm2957_vm9, %v9149_v37, %v9250_v1  ;;  %3209 = vmatpush.msra.mxu2 %v9241_v54  ;;  %v9260_v26 = vpop.permute.xlu2 %2874 }
 0x4b6   :  { %13393 = vst [vmem:[#allocation12_spill] sm:$0xff] %v9260_v26  ;;  %v3040_v23 = vmul.f32 %v2960_v46, %v2771_v15  ;;  %v3112_v2 = vsub.f32 %v9241_v54, %v13034_v25  ;;  %v3124_v35 = vsub.f32 %v9271_v61, %v13030_v48  ;;  %v9357_v15 = vld [vmem:[%s12925_s2 + $0x20] ss:$8 sm:$0xf] }
 0x4b8   :  { %v9273_v8 = vand.u32 4294901760, %v3040_v23  ;;  %v3113_v24 = vand.u32 4294901760, %v3112_v2  ;;  %v3125_v31 = vand.u32 4294901760, %v3124_v35 }
 0x4ba   :  { %2917 = vrot.lane.b32.xlu0 %v9106_v22, %s6989_s28  ;;  %3067 = vmatpush.msra.mxu0 %v9273_v8  ;;  %v9286_v17 = vsub.f32 %v3040_v23, %v9273_v8 }
 0x4bb   :  { %2893 = vrot.lane.b32.xlu2 %v9106_v22, %s6987_s26  ;;  %3114 = vmatpush.msra.mxu1 %v3113_v24  ;;  %v9367_v24 = vld [vmem:[%s12925_s2 + $0x6] ss:$8 sm:$0xf] }
 0x4bc   :  { %2868 = vrot.lane.b32.xlu1 %v9106_v22, %s6990_s10  ;;  %3263 = vmatpush.msra.mxu3 %v9273_v8  ;;  %v9295_v11 = vpop.permute.xlu0 %2923  ;;  %v9297_v3 = vpop.permute.xlu1 %2899  ;;  %v13031_v19 = vand.u32 4294901760, %v9286_v17 }
 0x4bd   :  { %13394 = vst [vmem:[#allocation8_spill] sm:$0xff] %v9295_v11  ;;  %v2934_v41 = vsel %vm2931_vm10, %v9295_v11, %v9252_v4  ;;  %v2909_v20 = vsel %vm217_vm1, %v9297_v3, %v9223_v27  ;;  %3069 = vmatpush.msra.mxu0 %v9243_v18  ;;  %3212 = vmatpush.msra.mxu2 %v9286_v17  ;;  %v9314_v36 = vpop.permute.xlu2 %2864 }
 0x4be   :  { %13395 = vst [vmem:[#allocation11_spill] sm:$0xff] %v9297_v3  ;;  %v3032_v16 = vmul.f32 %v2934_v41, %v2749_v5  ;;  %3265 = vmatpush.msra.mxu3 %v9243_v18  ;;  %v3118_v43 = vsub.f32 %v9286_v17, %v13031_v19  ;;  %v3024_v39 = vmul.f32 %v2909_v20, %v2727_v34  ;;  %v2716_v34 = vperm.slane %v9357_v15, 0  ;;  %v9381_v20 = vld [vmem:[%s12925_s2 + $0x5] ss:$8 sm:$0xf] }
 0x4bf   :  { %3215 = vmatpush.msra.mxu2 %v9271_v61  ;;  %v9456_v3 = vld [vmem:[%s12925_s2 + $0x4] ss:$8 sm:$0xf] }
 0x4c0   :  { %v9325_v51 = vand.u32 4294901760, %v3032_v16  ;;  %v3119_v47 = vand.u32 4294901760, %v3118_v43  ;;  %v9334_v10 = vand.u32 4294901760, %v3024_v39  ;;  %13406 = vst [vmem:[#allocation22_spill] sm:$0xff] %v9456_v3 }
 0x4c2   :  { %2880 = vrot.lane.b32.xlu0 %v9106_v22, %s7000_s17  ;;  %3071 = vmatpush.msra.mxu0 %v9325_v51  ;;  %v9332_v45 = vsub.f32 %v3032_v16, %v9325_v51  ;;  %13396 = vst [vmem:[#allocation20_spill] sm:$0xff] %v9334_v10  ;;  %v9360_v46 = vsub.f32 %v3024_v39, %v9334_v10  ;;  %v2694_v16 = vperm.slane %v9367_v24, 0 }
 0x4c3   :  { %2854 = vrot.lane.b32.xlu2 %v9121_v29, %s6991_s13  ;;  %3120 = vmatpush.msra.mxu1 %v3119_v47 }
 0x4c4   :  { %2829 = vrot.lane.b32.xlu1 %v9121_v29, %s6992_s14  ;;  %3267 = vmatpush.msra.mxu3 %v9325_v51  ;;  %v9341_v12 = vpop.permute.xlu0 %2913  ;;  %v9343_v58 = vpop.permute.xlu1 %2889  ;;  %v13029_v6 = vand.u32 4294901760, %v9332_v45  ;;  %v13033_v43 = vand.u32 4294901760, %v9360_v46 }
 0x4c5   :  { %v2921_v53 = vsel %vm230_vm2, %v9180_v32, %v9341_v12  ;;  %3126 = vmatpush.msra.mxu1 %v3125_v31  ;;  %3218 = vmatpush.msra.mxu2 %v9332_v45  ;;  %v9369_v5 = vpop.permute.xlu2 %2837 }
 0x4c6   :  { %v3028_v49 = vmul.f32 %v2921_v53, %v2738_v40  ;;  %v3130_v60 = vsub.f32 %v9332_v45, %v13029_v6  ;;  %13397 = vst [vmem:[#allocation13_spill] sm:$0xff] %v9369_v5  ;;  %v2683_v53 = vperm.slane %v9381_v20, 0  ;;  %v9412_v6 = vld [vmem:[%s12925_s2 + $0x7] ss:$8 sm:$0xf]  ;;  %v3142_v48 = vsub.f32 %v9360_v46, %v13033_v43 }
 0x4c8   :  { %v9362_v23 = vand.u32 4294901760, %v3028_v49  ;;  %v3131_v2 = vand.u32 4294901760, %v3130_v60 }
 0x4ca   :  { %2841 = vrot.lane.b32.xlu0 %v9121_v29, %s7001_s18  ;;  %3073 = vmatpush.msra.mxu0 %v9362_v23  ;;  %v9376_v41 = vsub.f32 %v3028_v49, %v9362_v23 }
 0x4cb   :  { %2817 = vrot.lane.b32.xlu2 %v9121_v29, %s6993_s15  ;;  %3132 = vmatpush.msra.mxu1 %v3131_v2 }
 0x4cc   :  { %3269 = vmatpush.msra.mxu3 %v9362_v23  ;;  %v9388_v39 = vpop.permute.xlu0 %2887  ;;  %v9390_v35 = vpop.permute.xlu1 %2862  ;;  %3075 = vmatpush.msra.mxu0 %v9334_v10  ;;  %v13032_v47 = vand.u32 4294901760, %v9376_v41 }
 0x4cd   :  { %13398 = vst [vmem:[#allocation18_spill] sm:$0xff] %v9388_v39  ;;  %v2897_v40 = vsel %vm204_vm0, %v9388_v39, %v9343_v58  ;;  %v2872_v31 = vsel %vm191_vm3, %v9390_v35, %v9314_v36  ;;  %3221 = vmatpush.msra.mxu2 %v9376_v41  ;;  %v9430_v43 = vpop.permute.xlu2 %2831 }
 0x4ce   :  { %13399 = vst [vmem:[#allocation10_spill] sm:$0xff] %v9390_v35  ;;  %v3020_v49 = vmul.f32 %v2897_v40, %v2716_v34  ;;  %3271 = vmatpush.msra.mxu3 %v9334_v10  ;;  %v3136_v60 = vsub.f32 %v9376_v41, %v13032_v47  ;;  %v3012_v2 = vmul.f32 %v2872_v31, %v2694_v16  ;;  %v2705_v16 = vperm.slane %v9412_v6, 0 }
 0x4cf   :  { %3224 = vmatpush.msra.mxu2 %v9360_v46  ;;  %v3008_v40 = vmul.f32 %v2683_v53, %v9052_v50  ;;  %13402 = vst [vmem:[#allocation7_spill] sm:$0xff] %v9430_v43  ;;  %v3143_v50 = vand.u32 4294901760, %v3142_v48 }
 0x4d0   :  { %v9417_v19 = vand.u32 4294901760, %v3020_v49  ;;  %v3137_v34 = vand.u32 4294901760, %v3136_v60  ;;  %v9428_v47 = vand.u32 4294901760, %v3012_v2 }
 0x4d1   :  { %v9443_v21 = vand.u32 4294901760, %v3008_v40 }
 0x4d2   :  { %13400 = vst [vmem:[#allocation3_spill] sm:$0xff] %v9417_v19  ;;  %2805 = vrot.lane.b32.xlu0 %v9121_v29, %s6994_s16  ;;  %3077 = vmatpush.msra.mxu0 %v9417_v19  ;;  %v9426_v31 = vsub.f32 %v3020_v49, %v9417_v19  ;;  %v9449_v22 = vsub.f32 %v3012_v2, %v9428_v47 }
 0x4d3   :  { %13401 = vst [vmem:[#allocation19_spill] sm:$0xff] %v9428_v47  ;;  %3138 = vmatpush.msra.mxu1 %v3137_v34  ;;  %3273 = vmatpush.msra.mxu3 %v9417_v19 }
 0x4d4   :  { %v9433_v53 = vpop.permute.xlu0 %2876  ;;  %v9435_v60 = vpop.permute.xlu1 %2825  ;;  %3227 = vmatpush.msra.mxu2 %v9426_v31  ;;  %v13040_v25 = vand.u32 4294901760, %v9426_v31  ;;  %13404 = vst [vmem:[#allocation14_spill] sm:$0xff] %v9443_v21  ;;  %v13411_v32 = vand.u32 4294901760, %v9449_v22 }
 0x4d5   :  { %13403 = vst [vmem:[#allocation2_spill] sm:$0xff] %v9435_v60  ;;  %v2885_v49 = vsel %vm2882_vm11, %v9260_v26, %v9433_v53  ;;  %3144 = vmatpush.msra.mxu1 %v3143_v50  ;;  %v9459_v50 = vsub.f32 %v3008_v40, %v9443_v21 }
 0x4d6   :  { %v3016_v34 = vmul.f32 %v2885_v49, %v2705_v16  ;;  %v3148_v48 = vsub.f32 %v9426_v31, %v13040_v25  ;;  %v9480_v25 = vpop.permute.xlu2 %2801  ;;  %v3160_v11 = vsub.f32 %v9449_v22, %v13411_v32  ;;  %v2836_v32 = vsel %vm165_vm5, %v9430_v43, %v9435_v60 }
 0x4d7   :  { %13407 = vst [vmem:[#allocation23_spill] sm:$0xff] %v9459_v50  ;;  %v13413_v30 = vand.u32 4294901760, %v9459_v50 }
 0x4d8   :  { %v9451_v35 = vand.u32 4294901760, %v3016_v34  ;;  %v3149_v39 = vand.u32 4294901760, %v3148_v48  ;;  %v2672_v48 = vperm.slane %v9456_v3, 0  ;;  %13409 = vst [vmem:[#allocation25_spill] sm:$0xff] %v9480_v25 }
 0x4da   :  { %13405 = vst [vmem:[#allocation21_spill] sm:$0xff] %v9451_v35  ;;  %3079 = vmatpush.msra.mxu0 %v9451_v35  ;;  %3150 = vmatpush.msra.mxu1 %v3149_v39  ;;  %v9463_v16 = vsub.f32 %v3016_v34, %v9451_v35  ;;  %v9478_v34 = vld [vmem:[%s12925_s2 + $0x2] ss:$8 sm:$0xf] }
 0x4db   :  { %3275 = vmatpush.msra.mxu3 %v9451_v35  ;;  %13408 = vst [vmem:[#allocation24_spill] sm:$0xff] %v9478_v34  ;;  %v2650_v33 = vperm.slane %v9478_v34, 0 }
 0x4dc   :  { %v9467_v49 = vpop.permute.xlu0 %2850  ;;  %3081 = vmatpush.msra.mxu0 %v9428_v47  ;;  %3230 = vmatpush.msra.mxu2 %v9463_v16  ;;  %v13047_v40 = vand.u32 4294901760, %v9463_v16 }
 0x4dd   :  { %3277 = vmatpush.msra.mxu3 %v9428_v47  ;;  %v9482_v2 = vpop.permute.xlu1 %2856 }
 0x4de   :  { %13410 = vst [vmem:[#allocation26_spill] sm:$0xff] %v9482_v2  ;;  %3083 = vmatpush.msra.mxu0 %v9443_v21  ;;  %3233 = vmatpush.msra.mxu2 %v9449_v22  ;;  %v3154_v26 = vsub.f32 %v9463_v16, %v13047_v40  ;;  %v2861_v39 = vsel %vm178_vm4, %v9482_v2, %v9467_v49  ;;  %v9502_v40 = vld [vmem:[%s12925_s2 + $0x1] ss:$8 sm:$0xf] }
 0x4df   :  { %3279 = vmatpush.msra.mxu3 %v9443_v21  ;;  %v3004_v9 = vmul.f32 %v2861_v39, %v2672_v48  ;;  %13412 = vst [vmem:[#allocation27_spill] sm:$0xff] %v9502_v40  ;;  %v3166_v2 = vsub.f32 %v9459_v50, %v13413_v30  ;;  %v2639_v29 = vperm.slane %v9502_v40, 0  ;;  %v2996_v30 = vmul.f32 %v2836_v32, %v2650_v33  ;;  %v9534_v33 = vpop.permute.xlu2 %2966  ;;  %v9568_v40 = vld [vmem:[%s12925_s2] ss:$8 sm:$0xf] }
 0x4e0   :  { %3236 = vmatpush.msra.mxu2 %v9459_v50  ;;  %v3155_v37 = vand.u32 4294901760, %v3154_v26  ;;  %v3161_v26 = vand.u32 4294901760, %v3160_v11  ;;  %13419 = vst [vmem:[#allocation33_spill] sm:$0xff] %v9534_v33 }
 0x4e1   :  { %v9511_v48 = vand.u32 4294901760, %v3004_v9  ;;  %v3167_v47 = vand.u32 4294901760, %v3166_v2  ;;  %13425 = vst [vmem:[#allocation39_spill] sm:$0xff] %v9568_v40 }
 0x4e2   :  { %3156 = vmatpush.msra.mxu1 %v3155_v37 }
 0x4e3   :  { %13414 = vst [vmem:[#allocation28_spill] sm:$0xff] %v9511_v48  ;;  %3085 = vmatpush.msra.mxu0 %v9511_v48  ;;  %3281 = vmatpush.msra.mxu3 %v9511_v48  ;;  %v9519_v21 = vsub.f32 %v3004_v9, %v9511_v48  ;;  %v9532_v9 = vld [vmem:[%s12925_s2 + $0x3] ss:$8 sm:$0xf] }
 0x4e4   :  { %v9515_v39 = vpop.permute.xlu0 %2813  ;;  %3162 = vmatpush.msra.mxu1 %v3161_v26  ;;  %13418 = vst [vmem:[#allocation32_spill] sm:$0xff] %v9532_v9  ;;  %v9539_v26 = vand.u32 4294901760, %v2996_v30  ;;  %v2661_v48 = vperm.slane %v9532_v9, 0 }
 0x4e5   :  { %13415 = vst [vmem:[#allocation29_spill] sm:$0xff] %v9515_v39  ;;  %v9521_v35 = vpop.permute.xlu1 %2819  ;;  %3239 = vmatpush.msra.mxu2 %v9519_v21  ;;  %v13058_v37 = vand.u32 4294901760, %v9519_v21 }
 0x4e6   :  { %13416 = vst [vmem:[#allocation30_spill] sm:$0xff] %v9519_v21  ;;  %v2824_v11 = vsel %vm13057_vm7, %v9521_v35, %v9515_v39  ;;  %3168 = vmatpush.msra.mxu1 %v3167_v47  ;;  %v3052_v47 = vld [vmem:[%s12926_s6] sm:$0xff]  ;;  %vm3054_vm7 = vcmask 7168   ;;  %v9559_v9 = vsub.f32 %v2996_v30, %v9539_v26  ;;  %v2794_v30 = vperm.slane %v9162_v55, 1 }
 0x4e7   :  { %13417 = vst [vmem:[#allocation31_spill] sm:$0xff] %v9521_v35  ;;  %v2992_v2 = vmul.f32 %v2824_v11, %v2639_v29  ;;  %v3172_v32 = vsub.f32 %v9519_v21, %v13058_v37  ;;  %v3053_v11 = vld [vmem:[%s12926_s6 + $0x8] sm:$0xff]  ;;  %v7002_v37 = vmov 0   ;;  %v9563_v21 = vand.u32 4294901760, %v3052_v47 }
 0x4e8   :  { %13420 = vst [vmem:[#allocation34_spill] sm:$0xff] %v9539_v26  ;;  %v3056_v10 = vsel %vm3054_vm7, %v3053_v11, 0  ;;  %vm13464_vm7 = vcmp.lt.s32.totalorder %v7134_v7, 16 }
 0x4e9   :  { %v3173_v43 = vand.u32 4294901760, %v3172_v32  ;;  %v9546_v35 = vand.u32 4294901760, %v2992_v2  ;;  %v3060_v32 = vsel %vm3058_vm6, 1.0, %v7002_v37  ;;  %13423 = vst [vmem:[#allocation37_spill] sm:$0xff] %v9559_v9  ;;  %v9587_v11 = vsub.f32 %v3052_v47, %v9563_v21 }
 0x4ea   :  { %v9570_v37 = vsub.f32 %v3060_v32, %v3060_v32  ;;  %v9589_v32 = vand.u32 4294901760, %v3056_v10 }
 0x4eb   :  { %13421 = vst [vmem:[#allocation35_spill] sm:$0xff] %v9546_v35  ;;  %3174 = vmatpush.msra.mxu1 %v3173_v43  ;;  %v9626_v34 = vand.u32 4294901760, %v9587_v11 }
 0x4ec   :  { %v9548_v29 = vpop.permute.xlu0 %2843  ;;  %v9594_v60 = vand.u32 4294901760, %v9570_v37 }
 0x4ed   :  { %13422 = vst [vmem:[#allocation36_spill] sm:$0xff] %v9548_v29  ;;  %v2849_v39 = vsel %vm2845_vm12, %v9548_v29, %v9369_v5  ;;  %v9561_v43 = vpop.permute.xlu1 %2979  ;;  %v9575_v29 = vsub.f32 %v2992_v2, %v9546_v35  ;;  %v2783_v2 = vperm.slane %v9185_v13, 1 }
 0x4ee   :  { %v3000_v19 = vmul.f32 %v2849_v39, %v2661_v48  ;;  %13424 = vst [vmem:[#allocation38_spill] sm:$0xff] %v9561_v43  ;;  %v9578_v48 = vpop.permute.xlu2 %2927  ;;  %v2628_v39 = vperm.slane %v9568_v40, 0  ;;  %v2972_v40 = vsel %vm2970_vm14, %v9210_v63, %v9534_v33  ;;  %v13431_v33 = vand.u32 4294901760, %v9559_v9 }
 0x4ef   :  { %13427 = vst [vmem:[#allocation41_spill] sm:$0xff] %v9575_v29 }
 0x4f0   :  { %v9572_v50 = vand.u32 4294901760, %v3000_v19  ;;  %13428 = vst [vmem:[#allocation42_spill] sm:$0xff] %v9578_v48 }
 0x4f1   :  { %13429 = vst [vmem:[#allocation43_spill] sm:$0xff] %v9594_v60 }
 0x4f2   :  { %13426 = vst [vmem:[#allocation40_spill] sm:$0xff] %v9572_v50  ;;  %3087 = vmatpush.msra.mxu0 %v9572_v50  ;;  %3283 = vmatpush.msra.mxu3 %v9572_v50  ;;  %v9584_v5 = vsub.f32 %v3000_v19, %v9572_v50  ;;  %v2985_v19 = vsel %vm2983_vm13, %v9141_v38, %v9561_v43 }
 0x4f3   :  { %v3184_v38 = vsub.f32 %v9559_v9, %v13431_v33  ;;  %13433 = vst [vmem:[#allocation46_spill] sm:$0xff] %v9626_v34  ;;  %v3447_v33 = vsub.f32 %v9570_v37, %v9594_v60 }
 0x4f4   :  { %v9604_v47 = vpop.permute.xlu0 %2807  ;;  %3089 = vmatpush.msra.mxu0 %v9539_v26  ;;  %3242 = vmatpush.msra.mxu2 %v9584_v5  ;;  %v13081_v55 = vand.u32 4294901760, %v9584_v5 }
 0x4f5   :  { %13430 = vst [vmem:[#allocation44_spill] sm:$0xff] %v9604_v47  ;;  %v2812_v63 = vsel %vm139_vm8, %v9604_v47, %v9480_v25  ;;  %3285 = vmatpush.msra.mxu3 %v9539_v26  ;;  %v9618_v50 = vpop.permute.xlu1 %2940  ;;  %v9629_v47 = vsub.f32 %v3056_v10, %v9589_v32  ;;  %v3045_v26 = vmul.f32 %v2972_v40, %v2783_v2  ;;  %v2750_v40 = vperm.slane %v9268_v28, 1 }
 0x4f6   :  { %v2988_v43 = vmul.f32 %v2812_v63, %v2628_v39  ;;  %13432 = vst [vmem:[#allocation45_spill] sm:$0xff] %v9618_v50  ;;  %3091 = vmatpush.msra.mxu0 %v9546_v35  ;;  %3245 = vmatpush.msra.mxu2 %v9559_v9  ;;  %v3178_v13 = vsub.f32 %v9584_v5, %v13081_v55  ;;  %v13436_v55 = vand.u32 4294901760, %v9575_v29  ;;  %v2772_v2 = vperm.slane %v9231_v42, 1 }
 0x4f7   :  { %13434 = vst [vmem:[#allocation47_spill] sm:$0xff] %v9629_v47  ;;  %v3049_v25 = vmul.f32 %v2985_v19, %v2794_v30  ;;  %3287 = vmatpush.msra.mxu3 %v9546_v35  ;;  %v3097_v10 = vsub.f32 %v9587_v11, %v9626_v34  ;;  %v2761_v30 = vperm.slane %v9192_v62, 1  ;;  %v3185_v19 = vand.u32 4294901760, %v3184_v38 }
 0x4f8   :  { %v9634_v39 = vand.u32 4294901760, %v2988_v43  ;;  %3248 = vmatpush.msra.mxu2 %v9575_v29  ;;  %v3179_v63 = vand.u32 4294901760, %v3178_v13  ;;  %v3190_v9 = vsub.f32 %v9575_v29, %v13436_v55  ;;  %v2933_v35 = vsel %vm2931_vm10, %v9252_v4, %v9578_v48 }
 0x4f9   :  { %v2946_v55 = vsel %vm2944_vm15, %v9157_v14, %v9618_v50  ;;  %v9658_v62 = vand.u32 4294901760, %v9629_v47  ;;  %v9660_v42 = vand.u32 4294901760, %v3049_v25  ;;  %v13438_v4 = vand.u32 4294901760, %v9195_v52  ;;  %v9669_v14 = vpop.permute.xlu2 %2891 }
 0x4fa   :  { %13435 = vst [vmem:[#allocation48_spill] sm:$0xff] %v9634_v39  ;;  %3093 = vmatpush.msra.mxu0 %v9634_v39  ;;  %3180 = vmatpush.msra.mxu1 %v3179_v63  ;;  %v9655_v28 = vsub.f32 %v2988_v43, %v9634_v39  ;;  %v9665_v13 = vand.u32 4294901760, %v3447_v33  ;;  %v9667_v38 = vand.u32 4294901760, %v3045_v26  ;;  %v3191_v63 = vand.u32 4294901760, %v3190_v9 }
 0x4fb   :  { %13437 = vst [vmem:[#allocation49_spill] sm:$0xff] %v9658_v62  ;;  %3289 = vmatpush.msra.mxu3 %v9634_v39  ;;  %v9675_v50 = vand.u32 4294901760, %v3097_v10  ;;  %v3033_v39 = vmul.f32 %v2933_v35, %v2750_v40  ;;  %v3037_v29 = vmul.f32 %v2946_v55, %v2761_v30  ;;  %v13440_v33 = vand.u32 4294901760, %v9241_v54 }
 0x4fc   :  { %3300 = vmatpush.msrb.mxu0 %v13438_v4  ;;  %13439 = vst [vmem:[#allocation50_spill] sm:$0xff] %v9665_v13  ;;  %3293 = vmatmul.f32.vlgmr.msra.gmra.mxu3 %v9626_v34  ;;  %v9672_v43 = vpop.permute.xlu0 %2953  ;;  %v13097_v48 = vand.u32 4294901760, %v9655_v28  ;;  %v3423_v9 = vsub.f32 %v9629_v47, %v9658_v62  ;;  %v13441_v10 = vand.u32 4294901760, %v9286_v17  ;;  %v2728_v40 = vperm.slane %v9278_v44, 1 }
 0x4fd   :  { %3186 = vmatpush.msra.mxu1 %v3185_v19  ;;  %v2959_v52 = vsel %vm2957_vm9, %v9250_v1, %v9672_v43  ;;  %3251 = vmatpush.msra.mxu2 %v9655_v28  ;;  %v9684_v34 = vpop.permute.xlu1 %2903  ;;  %v9693_v1 = vsub.f32 %v3049_v25, %v9660_v42  ;;  %v9705_v19 = vsub.f32 %v3045_v26, %v9667_v38  ;;  %v2717_v25 = vperm.slane %v9357_v15, 1 }
 0x4fe   :  { %3304 = vmatpush.msrb.mxu0 %v13440_v33  ;;  %v3041_v4 = vmul.f32 %v2959_v52, %v2772_v2  ;;  %3254 = vmatmul.f32.vlgmr.msra.gmra.mxu2 %v9587_v11  ;;  %v3196_v35 = vsub.f32 %v9655_v28, %v13097_v48  ;;  %v13090_v2 = vmov 1.0   ;;  %v9708_v17 = vand.u32 4294901760, %v3037_v29 }
 0x4ff   :  { %3192 = vmatpush.msra.mxu1 %v3191_v63  ;;  %3449 = vmatpush.msrb.mxu3 %v9665_v13  ;;  %v2908_v55 = vsel %vm217_vm1, %v9223_v27, %v9684_v34  ;;  %v13442_v44 = vand.u32 4294901760, %v9271_v61  ;;  %v9718_v63 = vand.u32 4294901760, %v3033_v39  ;;  %v2896_v26 = vsel %vm204_vm0, %v9343_v58, %v9669_v14 }
 0x500   :  { %3308 = vmatpush.msrb.mxu0 %v13441_v10  ;;  %v9698_v54 = vand.u32 4294901760, %v3041_v4  ;;  %v3197_v30 = vand.u32 4294901760, %v3196_v35  ;;  %6673 = vmatpush.msk.msrb.mxu2 %vm3058_vm6, %v13090_v2  ;;  %v2739_v52 = vperm.slane %v9320_v57, 1  ;;  %v9725_v33 = vand.u32 4294901760, %v3423_v9 }
 0x501   :  { %3099 = vmatmul.f32.vlgmr.msra.gmra.mxu0 %v9675_v50  ;;  %6674 = vmatpush.msk.msra.mxu3 %vm3058_vm6, %v13090_v2  ;;  %v13096_v27 = vand.u32 4294901760, %v9693_v1  ;;  %v13443_v35 = vand.u32 4294901760, %v9332_v45  ;;  %v3025_v10 = vmul.f32 %v2908_v55, %v2728_v40  ;;  %v3021_v9 = vmul.f32 %v2896_v26, %v2717_v25  ;;  %v9754_v40 = vpop.permute.xlu2 %2852 }
 0x502   :  { %3312 = vmatpush.msrb.mxu0 %v13442_v44  ;;  %3198 = vmatpush.msra.mxu1 %v3197_v30  ;;  %v9730_v61 = vsub.f32 %v3041_v4, %v9698_v54  ;;  %v9740_v30 = vsub.f32 %v3037_v29, %v9708_v17  ;;  %v13444_v44 = vand.u32 4294901760, %v9376_v41  ;;  %v9752_v45 = vsub.f32 %v3033_v39, %v9718_v63 }
 0x503   :  { %3472 = vmatpush.msra.mxu2 %v9570_v37  ;;  %3200 = vmatmul.f32.vlgmr.msra.gmra.mxu1 %v9563_v21  ;;  %13445 = vst [vmem:[#allocation51_spill] sm:$0xff] %v9754_v40  ;;  %v13446_v41 = vand.u32 4294901760, %v9360_v46  ;;  %v3593_v55 = vsub.f32 %v9693_v1, %v13096_v27  ;;  %v9768_v26 = vand.u32 4294901760, %v3025_v10  ;;  %v2684_v46 = vperm.slane %v9381_v20, 1  ;;  %v13457_v27 = vld [vmem:[#allocation27_spill] sm:$0xff] }
 0x504   :  { %3316 = vmatpush.msrb.mxu0 %v13443_v35  ;;  %3367 = vmatpush.msrb.mxu1 %v9187_v59  ;;  %v9737_v58 = vpop.permute.xlu0 %2915  ;;  %v13092_v59 = vand.u32 4294901760, %v9705_v19  ;;  %v13093_v39 = vand.u32 4294901760, %v9730_v61  ;;  %v13447_v35 = vand.u32 4294901760, %v9426_v31  ;;  %v2673_v20 = vperm.slane %v9456_v3, 1 }
 0x505   :  { %3451 = vmatmul.f32.vlgmr.msrb.gmra.mxu3 %v9589_v32  ;;  %v2920_v4 = vsel %vm230_vm2, %v9341_v12, %v9737_v58  ;;  %v9756_v25 = vpop.permute.xlu1 %2866  ;;  %v2695_v12 = vperm.slane %v9367_v24, 1  ;;  %v9778_v24 = vand.u32 4294901760, %v3021_v9  ;;  %v13448_v31 = vand.u32 4294901760, %v9463_v16 }
 0x506   :  { %3320 = vmatpush.msrb.mxu0 %v13444_v44  ;;  %6675 = vmatpush.msk.msrb.mxu3 %vm3058_vm6, %v13090_v2  ;;  %v3029_v29 = vmul.f32 %v2920_v4, %v2739_v52  ;;  %v3599_v4 = vsub.f32 %v9705_v19, %v13092_v59  ;;  %v13095_v44 = vand.u32 4294901760, %v9740_v30  ;;  %v3605_v59 = vsub.f32 %v9730_v61, %v13093_v39 }
 0x507   :  { %3369 = vmatpush.msrb.mxu1 %v9233_v56  ;;  %3425 = vmatmul.f32.vlgmr.msrb.gmra.mxu2 %v9725_v33  ;;  %v2871_v56 = vsel %vm191_vm3, %v9314_v36, %v9756_v25  ;;  %v13094_v36 = vand.u32 4294901760, %v9752_v45  ;;  %v3009_v16 = vmul.f32 %v2684_v46, %v9055_v0  ;;  %v13451_v46 = vld [vmem:[#allocation24_spill] sm:$0xff]  ;;  %v2640_v48 = vperm.slane %v13457_v27, 1 }
 0x508   :  { %3324 = vmatpush.msrb.mxu0 %v13446_v41  ;;  %3521 = vmatpush.msrb.mxu2 %v9594_v60  ;;  %v9770_v52 = vand.u32 4294901760, %v3029_v29  ;;  %v3013_v2 = vmul.f32 %v2871_v56, %v2695_v12  ;;  %v3600_v56 = vand.u32 4294901760, %v3599_v4  ;;  %v2651_v4 = vperm.slane %v13451_v46, 1 }
 0x509   :  { %3371 = vmatpush.msrb.mxu1 %v9273_v8  ;;  %v2706_v8 = vperm.slane %v9412_v6, 1  ;;  %v3617_v0 = vsub.f32 %v9752_v45, %v13094_v36  ;;  %v13454_v36 = vld [vmem:[#allocation23_spill] sm:$0xff] }
 0x50a   :  { %3328 = vmatpush.msrb.mxu0 %v13447_v35  ;;  %v9787_v41 = vsub.f32 %v3029_v29, %v9770_v52  ;;  %v3594_v35 = vand.u32 4294901760, %v3593_v55  ;;  %v9803_v29 = vsub.f32 %v3025_v10, %v9768_v26  ;;  %v9811_v55 = vsub.f32 %v3021_v9, %v9778_v24 }
 0x50b   :  { %3373 = vmatpush.msrb.mxu1 %v9243_v18  ;;  %v2860_v18 = vsel %vm178_vm4, %v9467_v49, %v9754_v40  ;;  %v13449_v10 = vand.u32 4294901760, %v9449_v22  ;;  %v9830_v9 = vand.u32 4294901760, %v3013_v2 }
 0x50c   :  { %3332 = vmatpush.msrb.mxu0 %v13448_v31  ;;  %v9807_v12 = vpop.permute.xlu0 %2878  ;;  %v3005_v22 = vmul.f32 %v2860_v18, %v2673_v20  ;;  %v13456_v20 = vld [vmem:[#allocation20_spill] sm:$0xff]  ;;  %v13462_v27 = vand.u32 4294901760, %v9787_v41 }
 0x50d   :  { %3375 = vmatpush.msrb.mxu1 %v9325_v51  ;;  %3499 = vmatmul.f32.vlgmr.msra.gmra.mxu3 %v9658_v62  ;;  %v2884_v49 = vsel %vm2882_vm11, %v9433_v53, %v9807_v12  ;;  %v3611_v51 = vsub.f32 %v9740_v30, %v13095_v44  ;;  %v9822_v39 = vpop.permute.xlu1 %2827  ;;  %v13455_v44 = vand.u32 4294901760, %v13454_v36  ;;  %v9849_v53 = vand.u32 4294901760, %v3009_v16  ;;  %v13461_v18 = vld [vmem:[#allocation32_spill] sm:$0xff] }
 0x50e   :  { %3595 = vmatpush.msra.mxu3 %v3594_v35  ;;  %3336 = vmatpush.msrb.mxu0 %v13449_v10  ;;  %v3017_v31 = vmul.f32 %v2884_v49, %v2706_v8  ;;  %13450 = vst [vmem:[#allocation52_spill] sm:$0xff] %v9822_v39  ;;  %v3606_v8 = vand.u32 4294901760, %v3605_v59  ;;  %v9834_v35 = vpop.permute.xlu2 %2815  ;;  %v13453_v49 = vld [vmem:[#allocation2_spill] sm:$0xff]  ;;  %v9868_v62 = vsub.f32 %v3013_v2, %v9830_v9  ;;  %v13468_v2 = vld [vmem:[#allocation13_spill] sm:$0xff] }
 0x50f   :  { %3377 = vmatpush.msrb.mxu1 %v9362_v23  ;;  %3475 = vmatmul.f32.vlgmr.msra.gmra.mxu2 %v9629_v47  ;;  %13452 = vst [vmem:[#allocation53_spill] sm:$0xff] %v9834_v35  ;;  %v2835_v10 = vsel %vm165_vm5, %v13453_v49, %v9822_v39  ;;  %v3612_v59 = vand.u32 4294901760, %v3611_v51  ;;  %v13458_v49 = vld [vmem:[#allocation30_spill] sm:$0xff]  ;;  %v2662_v39 = vperm.slane %v13461_v18, 1  ;;  %v9861_v51 = vand.u32 4294901760, %v3005_v22 }
 0x510   :  { %3550 = vmatpush.msra.mxu2 %v9660_v42  ;;  %3601 = vmatpush.msra.mxu3 %v3600_v56  ;;  %v9836_v23 = vand.u32 4294901760, %v3017_v31  ;;  %v13459_v36 = vand.u32 4294901760, %v13458_v49  ;;  %v13463_v56 = vld [vmem:[#allocation29_spill] sm:$0xff]  ;;  %v2997_v49 = vmul.f32 %v2835_v10, %v2651_v4 }
 0x511   :  { %3340 = vmatpush.msrb.mxu0 %v13455_v44  ;;  %3379 = vmatpush.msrb.mxu1 %v13456_v20  ;;  %v13460_v44 = vld [vmem:[#allocation3_spill] sm:$0xff]  ;;  %v3618_v20 = vand.u32 4294901760, %v3617_v0  ;;  %v13465_v0 = vand.u32 4294901760, %v9584_v5  ;;  %v13469_v5 = vand.u32 4294901760, %v9811_v55  ;;  %v9895_v40 = vsub.f32 %v3005_v22, %v9861_v51 }
 0x512   :  { %3552 = vmatpush.msra.mxu2 %v9667_v38  ;;  %3607 = vmatpush.msra.mxu3 %v3606_v8  ;;  %v9852_v46 = vsub.f32 %v3017_v31, %v9836_v23  ;;  %v3623_v8 = vsub.f32 %v9787_v41, %v13462_v27  ;;  %v2823_v31 = vsel %vm13464_vm7, %v13463_v56, %v9834_v35  ;;  %v13472_v56 = vld [vmem:[#allocation19_spill] sm:$0xff]  ;;  %v9897_v3 = vand.u32 4294901760, %v2997_v49 }
 0x513   :  { %3344 = vmatpush.msrb.mxu0 %v13459_v36  ;;  %3381 = vmatpush.msrb.mxu1 %v13460_v44  ;;  %v13466_v36 = vld [vmem:[#allocation21_spill] sm:$0xff]  ;;  %v13467_v44 = vand.u32 4294901760, %v9803_v29  ;;  %v3635_v10 = vsub.f32 %v9811_v55, %v13469_v5 }
 0x514   :  { %3554 = vmatpush.msra.mxu2 %v9698_v54  ;;  %3613 = vmatpush.msra.mxu3 %v3612_v59  ;;  %v9874_v27 = vpop.permute.xlu0 %2839  ;;  %v9889_v59 = vsub.f32 %v3009_v16, %v9849_v53 }
 0x515   :  { %3348 = vmatpush.msrb.mxu0 %v13465_v0  ;;  %3383 = vmatpush.msrb.mxu1 %v13466_v36  ;;  %v3629_v18 = vsub.f32 %v9803_v29, %v13467_v44  ;;  %v2848_v4 = vsel %vm2845_vm12, %v13468_v2, %v9874_v27  ;;  %v2993_v0 = vmul.f32 %v2823_v31, %v2640_v48  ;;  %v13470_v44 = vld [vmem:[#allocation37_spill] sm:$0xff]  ;;  %v13104_v2 = vand.u32 4294901760, %v9868_v62  ;;  %v13476_v31 = vld [vmem:[#allocation14_spill] sm:$0xff] }
 0x516   :  { %3556 = vmatpush.msra.mxu2 %v9708_v17  ;;  %3619 = vmatpush.msra.mxu3 %v3618_v20  ;;  %v3001_v36 = vmul.f32 %v2848_v4, %v2662_v39  ;;  %v13471_v35 = vand.u32 4294901760, %v13470_v44  ;;  %v3624_v20 = vand.u32 4294901760, %v3623_v8  ;;  %v13473_v48 = vld [vmem:[#allocation41_spill] sm:$0xff]  ;;  %v3636_v22 = vand.u32 4294901760, %v3635_v10 }
 0x517   :  { %3385 = vmatpush.msrb.mxu1 %v13472_v56  ;;  %v13474_v39 = vand.u32 4294901760, %v13473_v48  ;;  %v3630_v16 = vand.u32 4294901760, %v3629_v18  ;;  %v13106_v56 = vand.u32 4294901760, %v9889_v59  ;;  %v9911_v4 = vand.u32 4294901760, %v2993_v0  ;;  %v13478_v48 = vld [vmem:[#allocation39_spill] sm:$0xff]  ;;  %3523 = vmatmul.f32.vlgmr.msrb.gmra.mxu2 %v9589_v32 }
 0x518   :  { %3352 = vmatpush.msrb.mxu0 %v13471_v35  ;;  %3558 = vmatpush.msra.mxu2 %v9718_v63  ;;  %v9901_v5 = vand.u32 4294901760, %v3001_v36  ;;  %v13475_v35 = vand.u32 4294901760, %v9852_v46  ;;  %v3647_v10 = vsub.f32 %v9868_v62, %v13104_v2 }
 0x519   :  { %3625 = vmatpush.msra.mxu3 %v3624_v20  ;;  %3387 = vmatpush.msrb.mxu1 %v13476_v31  ;;  %v13477_v20 = vand.u32 4294901760, %v9655_v28  ;;  %v13479_v31 = vld [vmem:[#allocation28_spill] sm:$0xff] }
 0x51a   :  { %3356 = vmatpush.msrb.mxu0 %v13474_v39  ;;  %v3641_v8 = vsub.f32 %v9852_v46, %v13475_v35  ;;  %3560 = vmatpush.msra.mxu2 %v9770_v52  ;;  %v9914_v44 = vsub.f32 %v3001_v36, %v9901_v5  ;;  %v2629_v39 = vperm.slane %v13478_v48, 1  ;;  %v9920_v35 = vsub.f32 %v2997_v49, %v9897_v3  ;;  %v13482_v49 = vld [vmem:[#allocation25_spill] sm:$0xff] }
 0x51b   :  { %3631 = vmatpush.msra.mxu3 %v3630_v16  ;;  %3389 = vmatpush.msrb.mxu1 %v13479_v31  ;;  %v13107_v36 = vand.u32 4294901760, %v9895_v40  ;;  %v13481_v16 = vld [vmem:[#allocation40_spill] sm:$0xff] }
 0x51c   :  { %3360 = vmatpush.msrb.mxu0 %v13477_v20  ;;  %v3642_v18 = vand.u32 4294901760, %v3641_v8  ;;  %3562 = vmatpush.msra.mxu2 %v9768_v26  ;;  %v9929_v28 = vpop.permute.xlu0 %2803  ;;  %v3653_v20 = vsub.f32 %v9889_v59, %v13106_v56  ;;  %v3664_v31 = vand.u32 4294901760, %v9914_v44  ;;  %v13483_v56 = vld [vmem:[#allocation34_spill] sm:$0xff] }
 0x51d   :  { %3637 = vmatpush.msra.mxu3 %v3636_v22  ;;  %3362 = vmatmul.f32.vlgmr.msrb.gmra.mxu0 %v9563_v21  ;;  %13480 = vst [vmem:[#allocation2_spill] sm:$0xff] %v9929_v28  ;;  %v2811_v8 = vsel %vm139_vm8, %v13482_v49, %v9929_v28  ;;  %v9942_v22 = vsub.f32 %v2993_v0, %v9911_v4  ;;  %v3670_v28 = vand.u32 4294901760, %v9920_v35 }
 0x51e   :  { %3693 = vmatpush.msra.mxu0 %v9693_v1  ;;  %3391 = vmatpush.msrb.mxu1 %v13481_v16  ;;  %v2989_v2 = vmul.f32 %v2811_v8, %v2629_v39  ;;  %v3648_v16 = vand.u32 4294901760, %v3647_v10  ;;  %v3659_v49 = vsub.f32 %v9895_v40, %v13107_v36  ;;  %v3654_v0 = vand.u32 4294901760, %v3653_v20  ;;  %v13484_v10 = vld [vmem:[#allocation35_spill] sm:$0xff]  ;;  %v13485_v36 = vld [vmem:[#allocation48_spill] sm:$0xff] }
 0x51f   :  { %3564 = vmatpush.msra.mxu2 %v9778_v24  ;;  %3643 = vmatpush.msra.mxu3 %v3642_v18  ;;  %v3665_v18 = vsub.f32 %v9914_v44, %v3664_v31  ;;  %v3676_v8 = vand.u32 4294901760, %v9942_v22  ;;  %v3671_v20 = vsub.f32 %v9920_v35, %v3670_v28 }
 0x520   :  { %3696 = vmatpush.msra.mxu0 %v9705_v19  ;;  %v9950_v48 = vand.u32 4294901760, %v2989_v2  ;;  %3393 = vmatpush.msrb.mxu1 %v13483_v56  ;;  %v3660_v56 = vand.u32 4294901760, %v3659_v49 }
 0x521   :  { %3566 = vmatpush.msra.mxu2 %v9836_v23  ;;  %3649 = vmatpush.msra.mxu3 %v3648_v16  ;;  %v3666_v16 = vand.u32 4294901760, %v3665_v18  ;;  %v3677_v49 = vsub.f32 %v9942_v22, %v3676_v8 }
 0x522   :  { %3699 = vmatpush.msra.mxu0 %v9730_v61  ;;  %v9959_v39 = vsub.f32 %v2989_v2, %v9950_v48  ;;  %3395 = vmatpush.msrb.mxu1 %v13484_v10 }
 0x523   :  { %3568 = vmatpush.msra.mxu2 %v9830_v9  ;;  %3655 = vmatpush.msra.mxu3 %v3654_v0  ;;  %v3672_v0 = vand.u32 4294901760, %v3671_v20  ;;  %v3678_v18 = vand.u32 4294901760, %v3677_v49  ;;  %v10003_v20 = vpop.permute.xlu2 %2968  ;;  %v13487_v49 = vand.u32 4294901760, %v9705_v19 }
 0x524   :  { %3702 = vmatpush.msra.mxu0 %v9740_v30  ;;  %3397 = vmatpush.msrb.mxu1 %v13485_v36  ;;  %v13108_v2 = vand.u32 4294901760, %v9959_v39 }
 0x525   :  { %3570 = vmatpush.msra.mxu2 %v9849_v53  ;;  %3661 = vmatpush.msra.mxu3 %v3660_v56  ;;  %v9996_v56 = vpop.permute.xlu1 %2981 }
 0x526   :  { %3399 = vmatmul.f32.vlgmr.msrb.gmra.mxu1 %v9563_v21  ;;  %3705 = vmatpush.msra.mxu0 %v9752_v45  ;;  %v3683_v36 = vsub.f32 %v9959_v39, %v13108_v2  ;;  %v13503_v2 = vand.u32 4294901760, %v9895_v40 }
 0x527   :  { %3746 = vmatpush.msra.mxu1 %v9660_v42  ;;  %3572 = vmatpush.msra.mxu2 %v9861_v51 }
 0x528   :  { %3667 = vmatpush.msra.mxu3 %v3666_v16  ;;  %3708 = vmatpush.msra.mxu0 %v9787_v41  ;;  %v3684_v10 = vand.u32 4294901760, %v3683_v36  ;;  %v13486_v16 = vand.u32 4294901760, %v9693_v1  ;;  %v13488_v1 = vand.u32 4294901760, %v9730_v61  ;;  %v10043_v61 = vld [vmem:[%s12925_s2 + $0x27] ss:$8 sm:$0xf] }
 0x529   :  { %3748 = vmatpush.msra.mxu1 %v9667_v38  ;;  %3574 = vmatpush.msra.mxu2 %v9901_v5 }
 0x52a   :  { %3673 = vmatpush.msra.mxu3 %v3672_v0  ;;  %3711 = vmatpush.msra.mxu0 %v9803_v29  ;;  %v10060_v0 = vld [vmem:[%s12925_s2 + $0x26] ss:$8 sm:$0xf] }
 0x52b   :  { %3750 = vmatpush.msra.mxu1 %v9698_v54  ;;  %3576 = vmatpush.msra.mxu2 %v9897_v3  ;;  %v2784_v36 = vperm.slane %v10060_v0, 2 }
 0x52c   :  { %3679 = vmatpush.msra.mxu3 %v3678_v18  ;;  %3714 = vmatpush.msra.mxu0 %v9811_v55  ;;  %v13495_v18 = vmov 1.0  }
 0x52d   :  { %3545 = vmatmul.f32.vlgmr.msrb.gmra.mxu3 %v9589_v32  ;;  %3752 = vmatpush.msra.mxu1 %v9708_v17  ;;  %v10027_v19 = vpop.permute.xlu1 %2942 }
 0x52e   :  { %3578 = vmatpush.msra.mxu2 %v9911_v4  ;;  %3685 = vmatpush.msra.mxu3 %v3684_v10  ;;  %v13496_v10 = vld [vmem:[#allocation33_spill] sm:$0xff] }
 0x52f   :  { %3717 = vmatpush.msra.mxu0 %v9852_v46  ;;  %3754 = vmatpush.msra.mxu1 %v9718_v63 }
 0x530   :  { %3580 = vmatpush.msra.mxu2 %v9950_v48  ;;  %3854 = vmatpush.msrb.mxu3 %v9660_v42  ;;  %v10010_v42 = vpop.permute.xlu0 %2955 }
 0x531   :  { %3720 = vmatpush.msra.mxu0 %v9868_v62  ;;  %3756 = vmatpush.msra.mxu1 %v9770_v52 }
 0x532   :  { %3787 = vmatpush.msrb.mxu2 %v13486_v16  ;;  %3856 = vmatpush.msrb.mxu3 %v9667_v38  ;;  %v13489_v38 = vand.u32 4294901760, %v9740_v30  ;;  %v2795_v30 = vperm.slane %v10043_v61, 2 }
 0x533   :  { %3723 = vmatpush.msra.mxu0 %v9889_v59  ;;  %3758 = vmatpush.msra.mxu1 %v9768_v26 }
 0x534   :  { %3791 = vmatpush.msrb.mxu2 %v13487_v49  ;;  %3858 = vmatpush.msrb.mxu3 %v9698_v54  ;;  %v13490_v54 = vand.u32 4294901760, %v9752_v45  ;;  %v10076_v49 = vld [vmem:[%s12925_s2 + $0x25] ss:$8 sm:$0xf] }
 0x535   :  { %3726 = vmatpush.msra.mxu0 %v9895_v40  ;;  %3760 = vmatpush.msra.mxu1 %v9778_v24  ;;  %v10145_v40 = vld [vmem:[%s12925_s2 + $0x21] ss:$8 sm:$0xf] }
 0x536   :  { %3795 = vmatpush.msrb.mxu2 %v13488_v1  ;;  %3860 = vmatpush.msrb.mxu3 %v9708_v17  ;;  %v13491_v17 = vand.u32 4294901760, %v9787_v41  ;;  %v13497_v1 = vand.u32 4294901760, %v9852_v46 }
 0x537   :  { %3729 = vmatpush.msra.mxu0 %v9914_v44  ;;  %3762 = vmatpush.msra.mxu1 %v9836_v23 }
 0x538   :  { %3799 = vmatpush.msrb.mxu2 %v13489_v38  ;;  %3862 = vmatpush.msrb.mxu3 %v9718_v63  ;;  %v10034_v63 = vpop.permute.xlu2 %2929  ;;  %v10046_v45 = vpop.permute.xlu0 %2917 }
 0x539   :  { %3732 = vmatpush.msra.mxu0 %v9920_v35  ;;  %3764 = vmatpush.msra.mxu1 %v9830_v9 }
 0x53a   :  { %3803 = vmatpush.msrb.mxu2 %v13490_v54  ;;  %3864 = vmatpush.msrb.mxu3 %v9770_v52  ;;  %v13492_v52 = vand.u32 4294901760, %v9803_v29  ;;  %v13494_v29 = vand.u32 4294901760, %v9811_v55  ;;  %v2773_v55 = vperm.slane %v10076_v49, 2  ;;  %v10091_v54 = vld [vmem:[%s12925_s2 + $0x24] ss:$8 sm:$0xf] }
 0x53b   :  { %3735 = vmatpush.msra.mxu0 %v9942_v22  ;;  %3766 = vmatpush.msra.mxu1 %v9849_v53  ;;  %v2762_v46 = vperm.slane %v10091_v54, 2  ;;  %v13510_v22 = vand.u32 4294901760, %v9959_v39 }
 0x53c   :  { %3807 = vmatpush.msrb.mxu2 %v13491_v17  ;;  %3687 = vmatmul.f32.vlgmr.msra.gmra.mxu3 %v9563_v21  ;;  %v10094_v17 = vpop.permute.xlu1 %2905 }
 0x53d   :  { %3586 = vmatmul.f32.vlgmr.msra.gmra.mxu2 %v9675_v50  ;;  %3866 = vmatpush.msrb.mxu3 %v9768_v26  ;;  %v13493_v26 = vld [vmem:[#allocation38_spill] sm:$0xff] }
 0x53e   :  { %3738 = vmatpush.msra.mxu0 %v9959_v39  ;;  %3768 = vmatpush.msra.mxu1 %v9861_v51  ;;  %v2984_v41 = vsel %vm2983_vm13, %v13493_v26, %v9996_v56 }
 0x53f   :  { %3811 = vmatpush.msrb.mxu2 %v13492_v52  ;;  %3741 = vmatmul.f32.vlgmr.msra.gmra.mxu0 %v9587_v11  ;;  %v3050_v16 = vmul.f32 %v2984_v41, %v2795_v30  ;;  %v13498_v30 = vand.u32 4294901760, %v9868_v62  ;;  %v13499_v52 = vld [vmem:[#allocation45_spill] sm:$0xff]  ;;  %v13500_v41 = vld [vmem:[#allocation42_spill] sm:$0xff] }
 0x540   :  { %3868 = vmatpush.msrb.mxu3 %v9778_v24  ;;  %3770 = vmatpush.msra.mxu1 %v9901_v5  ;;  %v2971_v24 = vsel %vm2970_vm14, %v13496_v10, %v10003_v20  ;;  %v2945_v26 = vsel %vm2944_vm15, %v13499_v52, %v10027_v19  ;;  %v2932_v62 = vsel %vm2931_vm10, %v13500_v41, %v10034_v63  ;;  %v2740_v52 = vperm.slane %v9320_v57, 2  ;;  %v10126_v41 = vpop.permute.xlu0 %2880 }
 0x541   :  { %3815 = vmatpush.msrb.mxu2 %v13494_v29  ;;  %6676 = vmatpush.msk.msrb.mxu0 %vm3058_vm6, %v13495_v18  ;;  %v3046_v38 = vmul.f32 %v2971_v24, %v2784_v36  ;;  %v10114_v36 = vand.u32 4294901760, %v3050_v16  ;;  %v10116_v29 = vpop.permute.xlu2 %2893  ;;  %v13501_v24 = vand.u32 4294901760, %v9889_v59 }
 0x542   :  { %3870 = vmatpush.msrb.mxu3 %v9836_v23  ;;  %3772 = vmatpush.msra.mxu1 %v9897_v3  ;;  %v2958_v23 = vsel %vm2957_vm9, %v9672_v43, %v10010_v42  ;;  %v10101_v43 = vld [vmem:[%s12925_s2 + $0x23] ss:$8 sm:$0xf] }
 0x543   :  { %3819 = vmatpush.msrb.mxu2 %v13497_v1  ;;  %3959 = vmatpush.msra.mxu0 %v9570_v37  ;;  %v3042_v10 = vmul.f32 %v2958_v23, %v2773_v55  ;;  %v13502_v1 = vld [vmem:[#allocation46_spill] sm:$0xff]  ;;  %v10138_v55 = vsub.f32 %v3050_v16, %v10114_v36 }
 0x544   :  { %3872 = vmatpush.msrb.mxu3 %v9830_v9  ;;  %3774 = vmatpush.msra.mxu1 %v9911_v4  ;;  %v2751_v9 = vperm.slane %v10101_v43, 2 }
 0x545   :  { %3823 = vmatpush.msrb.mxu2 %v13498_v30  ;;  %v3038_v30 = vmul.f32 %v2945_v26, %v2762_v46  ;;  %v10140_v57 = vand.u32 4294901760, %v3042_v10  ;;  %v13109_v46 = vand.u32 4294901760, %v10138_v55 }
 0x546   :  { %3874 = vmatpush.msrb.mxu3 %v9849_v53  ;;  %3776 = vmatpush.msra.mxu1 %v9950_v48  ;;  %v10123_v53 = vand.u32 4294901760, %v3046_v38  ;;  %v3034_v59 = vmul.f32 %v2932_v62, %v2751_v9  ;;  %v10173_v9 = vpop.permute.xlu1 %2868 }
 0x547   :  { %3827 = vmatpush.msrb.mxu2 %v13501_v24  ;;  %3780 = vmatmul.f32.vlgmr.msra.gmra.mxu1 %v13502_v1  ;;  %13504 = vst [vmem:[#allocation23_spill] sm:$0xff] %v10140_v57  ;;  %v10179_v35 = vsub.f32 %v3042_v10, %v10140_v57  ;;  %v2870_v62 = vsel %vm191_vm3, %v9756_v25, %v10173_v9  ;;  %v10230_v25 = vld [vmem:[%s12925_s2 + $0x5] ss:$8 sm:$0xf] }
 0x548   :  { %3876 = vmatpush.msrb.mxu3 %v9861_v51  ;;  %3912 = vmatmul.f32.vlgmr.msrb.gmra.mxu0 %v9725_v33  ;;  %v2919_v51 = vsel %vm230_vm2, %v9737_v58, %v10046_v45  ;;  %v2907_v58 = vsel %vm217_vm1, %v9684_v34, %v10094_v17  ;;  %v10162_v23 = vsub.f32 %v3046_v38, %v10123_v53  ;;  %v10164_v44 = vand.u32 4294901760, %v3034_v59  ;;  %v10202_v38 = vld [vmem:[%s12925_s2 + $0x6] ss:$8 sm:$0xf]  ;;  %v10216_v10 = vpop.permute.xlu0 %2841 }
 0x549   :  { %3831 = vmatpush.msrb.mxu2 %v13503_v2  ;;  %3936 = vmatpush.msrb.mxu1 %v9665_v13  ;;  %v2729_v2 = vperm.slane %v10145_v40, 2  ;;  %v3030_v16 = vmul.f32 %v2919_v51, %v2740_v52  ;;  %13507 = vst [vmem:[#allocation3_spill] sm:$0xff] %v10173_v9  ;;  %v2696_v26 = vperm.slane %v10202_v38, 2  ;;  %v4080_v24 = vsub.f32 %v10138_v55, %v13109_v46  ;;  %v13515_v46 = vld [vmem:[#allocation51_spill] sm:$0xff] }
 0x54a   :  { %3878 = vmatpush.msrb.mxu3 %v9901_v5  ;;  %4008 = vmatpush.msrb.mxu0 %v9594_v60  ;;  %v10157_v5 = vand.u32 4294901760, %v3038_v30  ;;  %13506 = vst [vmem:[#allocation30_spill] sm:$0xff] %v10164_v44 }
 0x54b   :  { %3835 = vmatpush.msrb.mxu2 %v3664_v31  ;;  %6677 = vmatpush.msk.msra.mxu1 %vm3058_vm6, %v13495_v18  ;;  %v2718_v31 = vperm.slane %v9357_v15, 2  ;;  %v3026_v34 = vmul.f32 %v2907_v58, %v2729_v2  ;;  %v2707_v15 = vperm.slane %v9412_v6, 2  ;;  %13512 = vst [vmem:[#allocation37_spill] sm:$0xff] %v10216_v10  ;;  %v4081_v58 = vand.u32 4294901760, %v4080_v24 }
 0x54c   :  { %3880 = vmatpush.msrb.mxu3 %v9897_v3  ;;  %13505 = vst [vmem:[#allocation20_spill] sm:$0xff] %v10157_v5  ;;  %v2895_v3 = vsel %vm204_vm0, %v9669_v14, %v10116_v29  ;;  %v10186_v14 = vand.u32 4294901760, %v3030_v16  ;;  %v10196_v6 = vsub.f32 %v3038_v30, %v10157_v5  ;;  %v13115_v30 = vand.u32 4294901760, %v10179_v35 }
 0x54d   :  { %3839 = vmatpush.msrb.mxu2 %v3670_v28  ;;  %v2883_v28 = vsel %vm2882_vm11, %v9807_v12, %v10126_v41  ;;  %v10208_v12 = vsub.f32 %v3034_v59, %v10164_v44  ;;  %v10210_v39 = vand.u32 4294901760, %v3026_v34  ;;  %13513 = vst [vmem:[#allocation19_spill] sm:$0xff] %v10230_v25  ;;  %v2685_v59 = vperm.slane %v10230_v25, 2 }
 0x54e   :  { %3882 = vmatpush.msrb.mxu3 %v9911_v4  ;;  %v10184_v4 = vpop.permute.xlu2 %2854  ;;  %13509 = vst [vmem:[#allocation21_spill] sm:$0xff] %v10186_v14  ;;  %v3018_v52 = vmul.f32 %v2883_v28, %v2707_v15  ;;  %v10239_v2 = vsub.f32 %v3030_v16, %v10186_v14  ;;  %v3014_v28 = vmul.f32 %v2870_v62, %v2696_v26  ;;  %v13516_v16 = vld [vmem:[#allocation49_spill] sm:$0xff]  ;;  %v10266_v25 = vpop.permute.xlu1 %2829 }
 0x54f   :  { %3843 = vmatpush.msrb.mxu2 %v3676_v8  ;;  %3938 = vmatmul.f32.vlgmr.msrb.gmra.mxu1 %v9589_v32  ;;  %13508 = vst [vmem:[#allocation29_spill] sm:$0xff] %v10184_v4  ;;  %v3022_v8 = vmul.f32 %v2895_v3, %v2718_v31  ;;  %v13514_v3 = vld [vmem:[#allocation22_spill] sm:$0xff]  ;;  %v4092_v26 = vsub.f32 %v10179_v35, %v13115_v30  ;;  %v13520_v30 = vand.u32 4294901760, %v10196_v6 }
 0x550   :  { %3884 = vmatpush.msrb.mxu3 %v9950_v48  ;;  %3962 = vmatmul.f32.vlgmr.msra.gmra.mxu0 %v9629_v47  ;;  %v13110_v48 = vand.u32 4294901760, %v10162_v23  ;;  %13511 = vst [vmem:[#allocation13_spill] sm:$0xff] %v10210_v39  ;;  %v2674_v15 = vperm.slane %v13514_v3, 2  ;;  %v10258_v62 = vsub.f32 %v3026_v34, %v10210_v39  ;;  %v10260_v3 = vand.u32 4294901760, %v3018_v52 }
 0x551   :  { %4037 = vmatpush.msra.mxu0 %v10114_v36  ;;  %3847 = vmatpush.msrb.mxu2 %v13510_v22  ;;  %v10242_v31 = vand.u32 4294901760, %v3022_v8  ;;  %v13517_v22 = vld [vmem:[#allocation32_spill] sm:$0xff]  ;;  %13519 = vst [vmem:[#allocation41_spill] sm:$0xff] %v10266_v25  ;;  %v2847_v24 = vsel %vm2845_vm12, %v9874_v27, %v10216_v10 }
 0x552   :  { %4233 = vmatpush.msra.mxu3 %v10114_v36  ;;  %3849 = vmatmul.f32.vlgmr.msrb.gmra.mxu2 %v9563_v21  ;;  %v4086_v51 = vsub.f32 %v10162_v23, %v13110_v48  ;;  %v2859_v48 = vsel %vm178_vm4, %v13515_v46, %v10184_v4  ;;  %v2663_v47 = vperm.slane %v13517_v22, 2  ;;  %v13518_v46 = vld [vmem:[#allocation4_spill] sm:$0xff]  ;;  %v4098_v22 = vsub.f32 %v10196_v6, %v13520_v30 }
 0x553   :  { %4039 = vmatpush.msra.mxu0 %v10123_v53  ;;  %4180 = vmatpush.msra.mxu2 %v10138_v55  ;;  %v3010_v4 = vmul.f32 %v2685_v59, %v13518_v46  ;;  %v10282_v59 = vsub.f32 %v3022_v8, %v10242_v31  ;;  %v4093_v30 = vand.u32 4294901760, %v4092_v26  ;;  %v13523_v46 = vand.u32 4294901760, %v10208_v12 }
 0x554   :  { %4235 = vmatpush.msra.mxu3 %v10123_v53  ;;  %6678 = vmatpush.msk.msrb.mxu1 %vm3058_vm6, %v13495_v18  ;;  %v4087_v34 = vand.u32 4294901760, %v4086_v51  ;;  %v3002_v10 = vmul.f32 %v2847_v24, %v2663_v47  ;;  %v13530_v9 = vand.u32 4294901760, %v10258_v62 }
 0x555   :  { %3886 = vmatmul.f32.vlgmr.msrb.gmra.mxu3 %v9563_v21  ;;  %4041 = vmatpush.msra.mxu0 %v10140_v57  ;;  %v10301_v26 = vand.u32 4294901760, %v3010_v4 }
 0x556   :  { %4183 = vmatpush.msra.mxu2 %v10162_v23  ;;  %4237 = vmatpush.msra.mxu3 %v10140_v57  ;;  %v10277_v57 = vand.u32 4294901760, %v3014_v28  ;;  %v10284_v27 = vpop.permute.xlu2 %2817 }
 0x557   :  { %4043 = vmatpush.msra.mxu0 %v10157_v5  ;;  %3986 = vmatmul.f32.vlgmr.msra.gmra.mxu1 %v13516_v16  ;;  %13521 = vst [vmem:[#allocation14_spill] sm:$0xff] %v10284_v27  ;;  %v13524_v16 = vld [vmem:[#allocation52_spill] sm:$0xff] }
 0x558   :  { %4186 = vmatpush.msra.mxu2 %v10179_v35  ;;  %4239 = vmatpush.msra.mxu3 %v10157_v5  ;;  %v3006_v5 = vmul.f32 %v2859_v48, %v2674_v15  ;;  %v4104_v48 = vsub.f32 %v10208_v12, %v13523_v46  ;;  %v2834_v8 = vsel %vm165_vm5, %v13524_v16, %v10266_v25  ;;  %v10304_v46 = vpop.permute.xlu0 %2805  ;;  %v4099_v15 = vand.u32 4294901760, %v4098_v22  ;;  %v13528_v25 = vld [vmem:[#allocation53_spill] sm:$0xff] }
 0x559   :  { %4045 = vmatpush.msra.mxu0 %v10164_v44  ;;  %4082 = vmatpush.msra.mxu1 %v4081_v58  ;;  %v13522_v58 = vld [vmem:[#allocation24_spill] sm:$0xff]  ;;  %v13526_v16 = vand.u32 4294901760, %v10239_v2  ;;  %v13127_v22 = vand.u32 4294901760, %v10282_v59 }
 0x55a   :  { %4189 = vmatpush.msra.mxu2 %v10196_v6  ;;  %4241 = vmatpush.msra.mxu3 %v10164_v44  ;;  %v2652_v51 = vperm.slane %v13522_v58, 2  ;;  %v10299_v58 = vsub.f32 %v3018_v52, %v10260_v3  ;;  %v10310_v24 = vand.u32 4294901760, %v3006_v5  ;;  %v2822_v52 = vsel %vm13464_vm7, %v13528_v25, %v10284_v27 }
 0x55b   :  { %4047 = vmatpush.msra.mxu0 %v10186_v14  ;;  %4088 = vmatpush.msra.mxu1 %v4087_v34  ;;  %v13525_v34 = vld [vmem:[#allocation27_spill] sm:$0xff]  ;;  %v4110_v47 = vsub.f32 %v10239_v2, %v13526_v16  ;;  %v4105_v16 = vand.u32 4294901760, %v4104_v48  ;;  %v4116_v25 = vsub.f32 %v10258_v62, %v13530_v9  ;;  %v10327_v27 = vand.u32 4294901760, %v3002_v10 }
 0x55c   :  { %4192 = vmatpush.msra.mxu2 %v10208_v12  ;;  %4243 = vmatpush.msra.mxu3 %v10186_v14  ;;  %v2641_v44 = vperm.slane %v13525_v34, 2  ;;  %13527 = vst [vmem:[#allocation28_spill] sm:$0xff] %v10310_v24  ;;  %v10319_v34 = vsub.f32 %v3014_v28, %v10277_v57  ;;  %v13529_v14 = vld [vmem:[#allocation39_spill] sm:$0xff] }
 0x55d   :  { %4049 = vmatpush.msra.mxu0 %v10210_v39  ;;  %4094 = vmatpush.msra.mxu1 %v4093_v30  ;;  %v2998_v30 = vmul.f32 %v2834_v8, %v2652_v51  ;;  %v2630_v60 = vperm.slane %v13529_v14, 2  ;;  %v10336_v14 = vsub.f32 %v3010_v4, %v10301_v26  ;;  %v13129_v51 = vand.u32 4294901760, %v10299_v58 }
 0x55e   :  { %4195 = vmatpush.msra.mxu2 %v10239_v2  ;;  %4245 = vmatpush.msra.mxu3 %v10210_v39  ;;  %v13531_v39 = vld [vmem:[#allocation2_spill] sm:$0xff]  ;;  %v2994_v48 = vmul.f32 %v2822_v52, %v2641_v44  ;;  %v4111_v9 = vand.u32 4294901760, %v4110_v47  ;;  %v13128_v4 = vand.u32 4294901760, %v10319_v34  ;;  %v4117_v47 = vand.u32 4294901760, %v4116_v25 }
 0x55f   :  { %4051 = vmatpush.msra.mxu0 %v10242_v31  ;;  %4100 = vmatpush.msra.mxu1 %v4099_v15  ;;  %v2810_v28 = vsel %vm139_vm8, %v13531_v39, %v10304_v46  ;;  %v4122_v39 = vsub.f32 %v10282_v59, %v13127_v22  ;;  %v10346_v15 = vsub.f32 %v3006_v5, %v10310_v24  ;;  %v10349_v8 = vand.u32 4294901760, %v2998_v30 }
 0x560   :  { %4198 = vmatpush.msra.mxu2 %v10258_v62  ;;  %4247 = vmatpush.msra.mxu3 %v10242_v31  ;;  %v2990_v44 = vmul.f32 %v2810_v28, %v2630_v60  ;;  %v4128_v52 = vsub.f32 %v10299_v58, %v13129_v51  ;;  %v10358_v5 = vsub.f32 %v3002_v10, %v10327_v27  ;;  %v10361_v22 = vand.u32 4294901760, %v2994_v48 }
 0x561   :  { %4053 = vmatpush.msra.mxu0 %v10260_v3  ;;  %4106 = vmatpush.msra.mxu1 %v4105_v16  ;;  %v13130_v16 = vand.u32 4294901760, %v10336_v14  ;;  %v4123_v60 = vand.u32 4294901760, %v4122_v39  ;;  %v4134_v25 = vsub.f32 %v10319_v34, %v13128_v4  ;;  %v13132_v28 = vand.u32 4294901760, %v10346_v15  ;;  %v13532_v4 = vld [vmem:[#allocation5_spill] sm:$0xff] }
 0x562   :  { %4201 = vmatpush.msra.mxu2 %v10282_v59  ;;  %4249 = vmatpush.msra.mxu3 %v10260_v3  ;;  %v10370_v10 = vand.u32 4294901760, %v2990_v44  ;;  %v10385_v51 = vsub.f32 %v2994_v48, %v10361_v22  ;;  %v2774_v48 = vperm.slane %v10076_v49, 3 }
 0x563   :  { %4055 = vmatpush.msra.mxu0 %v10277_v57  ;;  %4112 = vmatpush.msra.mxu1 %v4111_v9  ;;  %v10375_v9 = vsub.f32 %v2998_v30, %v10349_v8  ;;  %v4140_v39 = vsub.f32 %v10336_v14, %v13130_v16  ;;  %v2796_v30 = vperm.slane %v10043_v61, 3  ;;  %v2785_v16 = vperm.slane %v10060_v0, 3 }
 0x564   :  { %4204 = vmatpush.msra.mxu2 %v10299_v58  ;;  %4251 = vmatpush.msra.mxu3 %v10277_v57  ;;  %v10400_v61 = vsub.f32 %v2990_v44, %v10370_v10  ;;  %v13133_v44 = vand.u32 4294901760, %v10385_v51 }
 0x565   :  { %4010 = vmatmul.f32.vlgmr.msrb.gmra.mxu0 %v9589_v32  ;;  %4118 = vmatpush.msra.mxu1 %v4117_v47  ;;  %v4129_v47 = vand.u32 4294901760, %v4128_v52  ;;  %v4146_v52 = vsub.f32 %v10346_v15, %v13132_v28  ;;  %v4141_v0 = vand.u32 4294901760, %v4140_v39 }
 0x566   :  { %4057 = vmatpush.msra.mxu0 %v10301_v26  ;;  %4207 = vmatpush.msra.mxu2 %v10319_v34  ;;  %v13136_v49 = vand.u32 4294901760, %v10400_v61 }
 0x567   :  { %4253 = vmatpush.msra.mxu3 %v10301_v26  ;;  %4032 = vmatmul.f32.vlgmr.msrb.gmra.mxu1 %v9589_v32 }
 0x568   :  { %4059 = vmatpush.msra.mxu0 %v10310_v24  ;;  %4124 = vmatpush.msra.mxu1 %v4123_v60  ;;  %v4135_v60 = vand.u32 4294901760, %v4134_v25  ;;  %v13533_v25 = vld [vmem:[#allocation15_spill] sm:$0xff] }
 0x569   :  { %4210 = vmatpush.msra.mxu2 %v10336_v14  ;;  %4255 = vmatpush.msra.mxu3 %v10310_v24  ;;  %v2987_v24 = vsel %vm2983_vm13, %v9996_v56, %v13532_v4  ;;  %v13534_v56 = vand.u32 4294901760, %v10358_v5 }
 0x56a   :  { %4061 = vmatpush.msra.mxu0 %v10327_v27  ;;  %4130 = vmatpush.msra.mxu1 %v4129_v47  ;;  %v2974_v47 = vsel %vm2970_vm14, %v10003_v20, %v13533_v25  ;;  %v3051_v28 = vmul.f32 %v2987_v24, %v2796_v30  ;;  %v4147_v20 = vand.u32 4294901760, %v4146_v52  ;;  %v2763_v30 = vperm.slane %v10091_v54, 3  ;;  %v13538_v54 = vld [vmem:[#allocation8_spill] sm:$0xff] }
 0x56b   :  { %4213 = vmatpush.msra.mxu2 %v10346_v15  ;;  %4257 = vmatpush.msra.mxu3 %v10327_v27  ;;  %v4152_v4 = vsub.f32 %v10358_v5, %v13534_v56  ;;  %v3047_v25 = vmul.f32 %v2974_v47, %v2785_v16  ;;  %v13536_v56 = vand.u32 4294901760, %v10375_v9  ;;  %v2752_v52 = vperm.slane %v10101_v43, 3  ;;  %v13537_v47 = vld [vmem:[#allocation17_spill] sm:$0xff] }
 0x56c   :  { %4063 = vmatpush.msra.mxu0 %v10349_v8  ;;  %4136 = vmatpush.msra.mxu1 %v4135_v60  ;;  %v13535_v60 = vld [vmem:[#allocation6_spill] sm:$0xff] }
 0x56d   :  { %4216 = vmatpush.msra.mxu2 %v10358_v5  ;;  %4259 = vmatpush.msra.mxu3 %v10349_v8  ;;  %v2961_v39 = vsel %vm2957_vm9, %v10010_v42, %v13535_v60  ;;  %v4158_v24 = vsub.f32 %v10375_v9, %v13536_v56  ;;  %v4153_v16 = vand.u32 4294901760, %v4152_v4  ;;  %v2948_v42 = vsel %vm2944_vm15, %v10027_v19, %v13537_v47 }
 0x56e   :  { %4065 = vmatpush.msra.mxu0 %v10361_v22  ;;  %4142 = vmatpush.msra.mxu1 %v4141_v0  ;;  %v4164_v0 = vsub.f32 %v10385_v51, %v13133_v44  ;;  %v2935_v4 = vsel %vm2931_vm10, %v10034_v63, %v13538_v54  ;;  %v3043_v43 = vmul.f32 %v2961_v39, %v2774_v48  ;;  %v13539_v60 = vand.u32 4294901760, %v10138_v55  ;;  %v6979_v63 = vld [vmem:[%s12925_s2 + $0x22] ss:$8 sm:$0xf] }
 0x56f   :  { %4219 = vmatpush.msra.mxu2 %v10375_v9  ;;  %4261 = vmatpush.msra.mxu3 %v10361_v22  ;;  %v10446_v19 = vand.u32 4294901760, %v3047_v25  ;;  %v4159_v56 = vand.u32 4294901760, %v4158_v24  ;;  %v4170_v47 = vsub.f32 %v10400_v61, %v13136_v49  ;;  %v3039_v44 = vmul.f32 %v2948_v42, %v2763_v30 }
 0x570   :  { %4067 = vmatpush.msra.mxu0 %v10370_v10  ;;  %4148 = vmatpush.msra.mxu1 %v4147_v20  ;;  %v10442_v20 = vand.u32 4294901760, %v3051_v28  ;;  %v2741_v48 = vperm.slane %v6979_v63, 3  ;;  %v13540_v55 = vand.u32 4294901760, %v10162_v23  ;;  %v3035_v39 = vmul.f32 %v2935_v4, %v2752_v52  ;;  %v13545_v63 = vld [vmem:[#allocation18_spill] sm:$0xff] }
 0x571   :  { %4222 = vmatpush.msra.mxu2 %v10385_v51  ;;  %4263 = vmatpush.msra.mxu3 %v10370_v10  ;;  %v4165_v54 = vand.u32 4294901760, %v4164_v0  ;;  %v10467_v42 = vand.u32 4294901760, %v3043_v43  ;;  %v13542_v23 = vand.u32 4294901760, %v10179_v35  ;;  %v10474_v52 = vsub.f32 %v3047_v25, %v10446_v19 }
 0x572   :  { %4274 = vmatpush.msrb.mxu0 %v13539_v60  ;;  %4154 = vmatpush.msra.mxu1 %v4153_v16  ;;  %v13541_v16 = vld [vmem:[#allocation16_spill] sm:$0xff]  ;;  %v10465_v30 = vsub.f32 %v3051_v28, %v10442_v20  ;;  %v2730_v60 = vperm.slane %v10145_v40, 3  ;;  %v4171_v28 = vand.u32 4294901760, %v4170_v47  ;;  %v10482_v4 = vand.u32 4294901760, %v3039_v44 }
 0x573   :  { %4225 = vmatpush.msra.mxu2 %v10400_v61  ;;  %4267 = vmatmul.f32.vlgmr.msra.gmra.mxu3 %v13502_v1  ;;  %v2922_v24 = vsel %vm230_vm2, %v10046_v45, %v13541_v16  ;;  %v13543_v45 = vld [vmem:[#allocation11_spill] sm:$0xff]  ;;  %v13544_v35 = vand.u32 4294901760, %v10196_v6  ;;  %v10488_v25 = vand.u32 4294901760, %v3035_v39  ;;  %v2898_v6 = vsel %vm204_vm0, %v10116_v29, %v13545_v63  ;;  %vm13577_vm0 = vmmov %vm13464_vm7 }
 0x574   :  { %4228 = vmatmul.f32.vlgmr.msra.gmra.mxu2 %v9587_v11  ;;  %4278 = vmatpush.msrb.mxu0 %v13540_v55  ;;  %v2910_v0 = vsel %vm217_vm1, %v10094_v17, %v13543_v45  ;;  %v3031_v40 = vmul.f32 %v2922_v24, %v2741_v48  ;;  %v6980_v17 = vld [vmem:[%s12925_s2 + $0x20] ss:$8 sm:$0xf]  ;;  %v13135_v47 = vand.u32 4294901760, %v10465_v30  ;;  %v10500_v48 = vsub.f32 %v3043_v43, %v10467_v42 }
 0x575   :  { %4160 = vmatpush.msra.mxu1 %v4159_v56  ;;  %4073 = vmatmul.f32.vlgmr.msra.gmra.mxu0 %v9675_v50  ;;  %v2719_v56 = vperm.slane %v6980_v17, 3  ;;  %v3027_v55 = vmul.f32 %v2910_v0, %v2730_v60  ;;  %v13546_v16 = vand.u32 4294901760, %v10208_v12  ;;  %v6981_v24 = vld [vmem:[%s12925_s2 + $0x7] ss:$8 sm:$0xf]  ;;  %v13134_v29 = vand.u32 4294901760, %v10474_v52 }
 0x576   :  { %4282 = vmatpush.msrb.mxu0 %v13542_v23  ;;  %4423 = vmatpush.msrb.mxu3 %v9665_v13  ;;  %v10512_v43 = vsub.f32 %v3039_v44, %v10482_v4  ;;  %v10514_v60 = vand.u32 4294901760, %v3031_v40  ;;  %v13547_v23 = vld [vmem:[#allocation12_spill] sm:$0xff]  ;;  %v13548_v45 = vand.u32 4294901760, %v10239_v2  ;;  %v13551_v17 = vand.u32 4294901760, %v10258_v62  ;;  %v13553_v63 = vld [vmem:[#allocation23_spill] sm:$0xff] }
 0x577   :  { %4166 = vmatpush.msra.mxu1 %v4165_v54  ;;  %6679 = vmatpush.msk.msrb.mxu2 %vm3058_vm6, %v13495_v18  ;;  %v2708_v54 = vperm.slane %v6981_v24, 3  ;;  %v2886_v12 = vsel %vm2882_vm11, %v10126_v41, %v13547_v23  ;;  %v3023_v0 = vmul.f32 %v2898_v6, %v2719_v56  ;;  %v10530_v44 = vand.u32 4294901760, %v3027_v55  ;;  %v13550_v41 = vld [vmem:[#allocation3_spill] sm:$0xff] }
 0x578   :  { %4286 = vmatpush.msrb.mxu0 %v13544_v35  ;;  %6680 = vmatpush.msk.msra.mxu3 %vm3058_vm6, %v13495_v18  ;;  %v13549_v35 = vld [vmem:[#allocation10_spill] sm:$0xff]  ;;  %v4573_v6 = vsub.f32 %v10474_v52, %v13134_v29  ;;  %v13558_v29 = vld [vmem:[#allocation20_spill] sm:$0xff]  ;;  %v13578_v13 = vand.u32 4294901760, %v10346_v15 }
 0x579   :  { %4172 = vmatpush.msra.mxu1 %v4171_v28  ;;  %4446 = vmatpush.msra.mxu2 %v9570_v37  ;;  %v2697_v28 = vperm.slane %v10202_v38, 3  ;;  %v2873_v2 = vsel %vm191_vm3, %v13550_v41, %v13549_v35  ;;  %v4567_v38 = vsub.f32 %v10465_v30, %v13135_v47  ;;  %v3019_v56 = vmul.f32 %v2886_v12, %v2708_v54  ;;  %v6982_v62 = vld [vmem:[%s12925_s2 + $0x4] ss:$8 sm:$0xf] }
 0x57a   :  { %4174 = vmatmul.f32.vlgmr.msra.gmra.mxu1 %v9563_v21  ;;  %4290 = vmatpush.msrb.mxu0 %v13546_v16  ;;  %v13554_v16 = vld [vmem:[#allocation19_spill] sm:$0xff]  ;;  %v2675_v23 = vperm.slane %v6982_v62, 3  ;;  %v13555_v35 = vand.u32 4294901760, %v10282_v59  ;;  %v10557_v12 = vand.u32 4294901760, %v3023_v0  ;;  %v13556_v41 = vld [vmem:[#allocation26_spill] sm:$0xff]  ;;  %v10565_v62 = vsub.f32 %v3027_v55, %v10530_v44  ;;  %v13561_v55 = vld [vmem:[#allocation49_spill] sm:$0xff] }
 0x57b   :  { %4341 = vmatpush.msrb.mxu1 %v10114_v36  ;;  %4425 = vmatmul.f32.vlgmr.msrb.gmra.mxu3 %v9589_v32  ;;  %v10524_v36 = vsub.f32 %v3035_v39, %v10488_v25  ;;  %v13552_v39 = vld [vmem:[#allocation43_spill] sm:$0xff]  ;;  %v2686_v24 = vperm.slane %v13554_v16, 3  ;;  %v3015_v16 = vmul.f32 %v2873_v2, %v2697_v28  ;;  %v4568_v59 = vand.u32 4294901760, %v4567_v38  ;;  %v13560_v2 = vld [vmem:[#allocation30_spill] sm:$0xff]  ;;  %v13564_v54 = vld [vmem:[#allocation37_spill] sm:$0xff] }
 0x57c   :  { %4294 = vmatpush.msrb.mxu0 %v13548_v45  ;;  %4399 = vmatmul.f32.vlgmr.msrb.gmra.mxu2 %v9725_v33  ;;  %v10552_v45 = vsub.f32 %v3031_v40, %v10514_v60  ;;  %v13559_v40 = vand.u32 4294901760, %v10299_v58  ;;  %v10573_v49 = vand.u32 4294901760, %v3019_v56  ;;  %v6983_v28 = vld [vmem:[%s12925_s2 + $0x3] ss:$8 sm:$0xf]  ;;  %v4574_v58 = vand.u32 4294901760, %v4573_v6 }
 0x57d   :  { %4343 = vmatpush.msrb.mxu1 %v10123_v53  ;;  %6681 = vmatpush.msk.msrb.mxu3 %vm3058_vm6, %v13495_v18  ;;  %v13137_v53 = vand.u32 4294901760, %v10500_v48  ;;  %v13565_v47 = vand.u32 4294901760, %v10319_v34  ;;  %v10592_v6 = vsub.f32 %v3023_v0, %v10557_v12  ;;  %v13568_v34 = vld [vmem:[#allocation47_spill] sm:$0xff] }
 0x57e   :  { %4298 = vmatpush.msrb.mxu0 %v13551_v17  ;;  %4495 = vmatpush.msrb.mxu2 %v13552_v39  ;;  %v13557_v17 = vld [vmem:[#allocation29_spill] sm:$0xff]  ;;  %v13566_v39 = vand.u32 4294901760, %v10512_v43 }
 0x57f   :  { %4345 = vmatpush.msrb.mxu1 %v13553_v63  ;;  %v2858_v63 = vsel %vm178_vm4, %v13557_v17, %v13556_v41  ;;  %v13562_v41 = vld [vmem:[#allocation9_spill] sm:$0xff] }
 0x580   :  { %4302 = vmatpush.msrb.mxu0 %v13555_v35  ;;  %v4579_v35 = vsub.f32 %v10500_v48, %v13137_v53  ;;  %v3011_v38 = vmul.f32 %v2686_v24, %v13562_v41  ;;  %v3007_v17 = vmul.f32 %v2858_v63, %v2675_v23  ;;  %v10594_v24 = vand.u32 4294901760, %v3015_v16  ;;  %v6984_v23 = vld [vmem:[%s12925_s2 + $0x2] ss:$8 sm:$0xf] }
 0x581   :  { %4347 = vmatpush.msrb.mxu1 %v13558_v29  ;;  %v2664_v29 = vperm.slane %v6983_v28, 3  ;;  %v4585_v28 = vsub.f32 %v10512_v43, %v13566_v39  ;;  %v13567_v63 = vld [vmem:[#allocation21_spill] sm:$0xff]  ;;  %v13571_v41 = vand.u32 4294901760, %v10524_v36 }
 0x582   :  { %4306 = vmatpush.msrb.mxu0 %v13559_v40  ;;  %v13563_v40 = vld [vmem:[#allocation36_spill] sm:$0xff]  ;;  %v4580_v0 = vand.u32 4294901760, %v4579_v35 }
 0x583   :  { %4349 = vmatpush.msrb.mxu1 %v13560_v2  ;;  %4473 = vmatmul.f32.vlgmr.msra.gmra.mxu3 %v13561_v55  ;;  %v2846_v53 = vsel %vm2845_vm12, %v13564_v54, %v13563_v40  ;;  %v2653_v54 = vperm.slane %v6984_v23, 3  ;;  %v4591_v40 = vsub.f32 %v10524_v36, %v13571_v41  ;;  %v10611_v23 = vsub.f32 %v3019_v56, %v10573_v49  ;;  %v6985_v35 = vld [vmem:[%s12925_s2 + $0x1] ss:$8 sm:$0xf] }
 0x584   :  { %4569 = vmatpush.msra.mxu3 %v4568_v59  ;;  %4310 = vmatpush.msrb.mxu0 %v13565_v47  ;;  %v13569_v47 = vld [vmem:[#allocation7_spill] sm:$0xff]  ;;  %v13570_v59 = vld [vmem:[#allocation41_spill] sm:$0xff]  ;;  %v13572_v55 = vand.u32 4294901760, %v10336_v14  ;;  %v4586_v56 = vand.u32 4294901760, %v4585_v28  ;;  %v10632_v41 = vsub.f32 %v3015_v16, %v10594_v24  ;;  %v4608_v28 = vand.u32 4294901760, %v10592_v6 }
 0x585   :  { %4351 = vmatpush.msrb.mxu1 %v13567_v63  ;;  %4449 = vmatmul.f32.vlgmr.msra.gmra.mxu2 %v13568_v34  ;;  %v2833_v39 = vsel %vm165_vm5, %v13570_v59, %v13569_v47  ;;  %v3003_v63 = vmul.f32 %v2846_v53, %v2664_v29  ;;  %v13573_v34 = vld [vmem:[#allocation13_spill] sm:$0xff]  ;;  %v10616_v47 = vand.u32 4294901760, %v3011_v38  ;;  %v10618_v59 = vand.u32 4294901760, %v3007_v17  ;;  %v13575_v29 = vld [vmem:[#allocation31_spill] sm:$0xff] }
 0x586   :  { %4524 = vmatpush.msra.mxu2 %v10442_v20  ;;  %4575 = vmatpush.msra.mxu3 %v4574_v58  ;;  %v2642_v58 = vperm.slane %v6985_v35, 3  ;;  %v13574_v53 = vand.u32 4294901760, %v10552_v45  ;;  %v2999_v2 = vmul.f32 %v2833_v39, %v2653_v54  ;;  %v13579_v35 = vand.u32 4294901760, %v10565_v62  ;;  %v6986_v16 = vld [vmem:[%s12925_s2] ss:$8 sm:$0xf] }
 0x587   :  { %4314 = vmatpush.msrb.mxu0 %v13572_v55  ;;  %4353 = vmatpush.msrb.mxu1 %v13573_v34  ;;  %v13576_v55 = vld [vmem:[#allocation14_spill] sm:$0xff]  ;;  %v2631_v15 = vperm.slane %v6986_v16, 3  ;;  %v10652_v54 = vsub.f32 %v3011_v38, %v10616_v47  ;;  %v4609_v38 = vsub.f32 %v10592_v6, %v4608_v28 }
 0x588   :  { %4526 = vmatpush.msra.mxu2 %v10446_v19  ;;  %4581 = vmatpush.msra.mxu3 %v4580_v0  ;;  %v4597_v14 = vsub.f32 %v10552_v45, %v13574_v53  ;;  %v2821_v34 = vsel %vm13577_vm0, %v13576_v55, %v13575_v29  ;;  %v4592_v0 = vand.u32 4294901760, %v4591_v40  ;;  %v4603_v53 = vsub.f32 %v10565_v62, %v13579_v35  ;;  %v13581_v40 = vld [vmem:[#allocation44_spill] sm:$0xff] }
 0x589   :  { %4318 = vmatpush.msrb.mxu0 %v13578_v13  ;;  %4355 = vmatpush.msrb.mxu1 %v10242_v31  ;;  %v10642_v29 = vand.u32 4294901760, %v3003_v63  ;;  %v13580_v13 = vand.u32 4294901760, %v10358_v5  ;;  %v4614_v31 = vand.u32 4294901760, %v10611_v23  ;;  %v2995_v39 = vmul.f32 %v2821_v34, %v2642_v58 }
 0x58a   :  { %4528 = vmatpush.msra.mxu2 %v10467_v42  ;;  %4587 = vmatpush.msra.mxu3 %v4586_v56  ;;  %v2809_v56 = vsel %vm139_vm8, %v10304_v46, %v13581_v40  ;;  %v4598_v55 = vand.u32 4294901760, %v4597_v14  ;;  %v10660_v5 = vsub.f32 %v3007_v17, %v10618_v59  ;;  %v10662_v35 = vand.u32 4294901760, %v2999_v2 }
 0x58b   :  { %4322 = vmatpush.msrb.mxu0 %v13580_v13  ;;  %4357 = vmatpush.msrb.mxu1 %v10260_v3  ;;  %v13582_v3 = vand.u32 4294901760, %v10375_v9  ;;  %v4620_v46 = vand.u32 4294901760, %v10632_v41  ;;  %v4604_v58 = vand.u32 4294901760, %v4603_v53  ;;  %v10673_v17 = vsub.f32 %v3003_v63, %v10642_v29 }
 0x58c   :  { %4530 = vmatpush.msra.mxu2 %v10482_v4  ;;  %4593 = vmatpush.msra.mxu3 %v4592_v0  ;;  %v2991_v14 = vmul.f32 %v2809_v56, %v2631_v15  ;;  %v13583_v34 = vand.u32 4294901760, %v10385_v51  ;;  %v4626_v9 = vand.u32 4294901760, %v10652_v54  ;;  %v10682_v0 = vand.u32 4294901760, %v2995_v39  ;;  %v13585_v51 = vld [vmem:[#allocation28_spill] sm:$0xff] }
 0x58d   :  { %4326 = vmatpush.msrb.mxu0 %v13582_v3  ;;  %4359 = vmatpush.msrb.mxu1 %v10277_v57  ;;  %v4615_v57 = vsub.f32 %v10611_v23, %v4614_v31  ;;  %v10686_v63 = vsub.f32 %v2999_v2, %v10662_v35  ;;  %v13584_v53 = vand.u32 4294901760, %v10400_v61  ;;  %v4621_v16 = vsub.f32 %v10632_v41, %v4620_v46  ;;  %v3201_v3 = vpop.f32.mrf.mxu1 }
 0x58e   :  { %4532 = vmatpush.msra.mxu2 %v10488_v25  ;;  %4599 = vmatpush.msra.mxu3 %v4598_v55  ;;  %v4632_v15 = vand.u32 4294901760, %v10660_v5  ;;  %v10697_v13 = vand.u32 4294901760, %v2991_v14  ;;  %v4627_v2 = vsub.f32 %v10652_v54, %v4626_v9  ;;  %v4638_v40 = vand.u32 4294901760, %v10673_v17  ;;  %v3100_v55 = vpop.f32.mrf.mxu0 }
 0x58f   :  { %4330 = vmatpush.msrb.mxu0 %v13583_v34  ;;  %4361 = vmatpush.msrb.mxu1 %v10301_v26  ;;  %v4610_v26 = vand.u32 4294901760, %v4609_v38  ;;  %v4616_v61 = vand.u32 4294901760, %v4615_v57  ;;  %v10707_v56 = vsub.f32 %v2995_v39, %v10682_v0  ;;  %v4622_v38 = vand.u32 4294901760, %v4621_v16 }
 0x590   :  { %4534 = vmatpush.msra.mxu2 %v10514_v60  ;;  %4605 = vmatpush.msra.mxu3 %v4604_v58  ;;  %v4633_v58 = vsub.f32 %v10660_v5, %v4632_v15  ;;  %v4644_v34 = vand.u32 4294901760, %v10686_v63  ;;  %v4628_v39 = vand.u32 4294901760, %v4627_v2  ;;  %v4639_v57 = vsub.f32 %v10673_v17, %v4638_v40  ;;  %v3294_v2 = vpop.f32.mrf.mxu3 }
 0x591   :  { %4334 = vmatpush.msrb.mxu0 %v13584_v53  ;;  %4363 = vmatpush.msrb.mxu1 %v13585_v51  ;;  %v3202_v53 = vadd.f32 %v3201_v3, %v3100_v55  ;;  %v3255_v51 = vpop.f32.mrf.mxu2 }
 0x592   :  { %4536 = vmatpush.msra.mxu2 %v10530_v44  ;;  %4336 = vmatmul.f32.vlgmr.msrb.gmra.mxu0 %v9563_v21 }
 0x593   :  { %4611 = vmatpush.msra.mxu3 %v4610_v26  ;;  %4667 = vmatpush.msra.mxu0 %v10465_v30  ;;  %v4650_v26 = vand.u32 4294901760, %v10707_v56 }
 0x594   :  { %4365 = vmatpush.msrb.mxu1 %v10327_v27  ;;  %4538 = vmatpush.msra.mxu2 %v10557_v12  ;;  %v10717_v27 = vsub.f32 %v2991_v14, %v10697_v13  ;;  %v4645_v14 = vsub.f32 %v10686_v63, %v4644_v34 }
 0x595   :  { %4617 = vmatpush.msra.mxu3 %v4616_v61  ;;  %4670 = vmatpush.msra.mxu0 %v10474_v52  ;;  %v3256_v61 = vadd.f32 %v3255_v51, %v3202_v53 }
 0x596   :  { %4367 = vmatpush.msrb.mxu1 %v10349_v8  ;;  %4540 = vmatpush.msra.mxu2 %v10573_v49  ;;  %v4634_v8 = vand.u32 4294901760, %v4633_v58  ;;  %v4656_v16 = vand.u32 4294901760, %v10717_v27  ;;  %v4646_v55 = vand.u32 4294901760, %v4645_v14 }
 0x597   :  { %4623 = vmatpush.msra.mxu3 %v4622_v38  ;;  %4673 = vmatpush.msra.mxu0 %v10500_v48  ;;  %v3295_v58 = vadd.f32 %v3294_v2, %v3256_v61  ;;  %v13586_v2 = vand.u32 4294901760, %v10465_v30  ;;  %v13588_v30 = vand.u32 4294901760, %v10500_v48  ;;  %v13591_v48 = vand.u32 4294901760, %v10524_v36 }
 0x598   :  { %4369 = vmatpush.msrb.mxu1 %v10361_v22  ;;  %4542 = vmatpush.msra.mxu2 %v10594_v24  ;;  %v4640_v22 = vand.u32 4294901760, %v4639_v57  ;;  %v4657_v38 = vsub.f32 %v10717_v27, %v4656_v16  ;;  %v3452_v61 = vpop.f32.mrf.mxu3 }
 0x599   :  { %4629 = vmatpush.msra.mxu3 %v4628_v39  ;;  %4676 = vmatpush.msra.mxu0 %v10512_v43  ;;  %v3426_v51 = vpop.f32.mrf.mxu2 }
 0x59a   :  { %4371 = vmatpush.msrb.mxu1 %v10370_v10  ;;  %4544 = vmatpush.msra.mxu2 %v10616_v47  ;;  %v4651_v10 = vsub.f32 %v10707_v56, %v4650_v26  ;;  %v3363_v3 = vpop.f32.mrf.mxu0 }
 0x59b   :  { %4373 = vmatmul.f32.vlgmr.msrb.gmra.mxu1 %v9563_v21  ;;  %4635 = vmatpush.msra.mxu3 %v4634_v8  ;;  %v3364_v57 = vadd.f32 %v3363_v3, %v3295_v58  ;;  %v4658_v8 = vand.u32 4294901760, %v4657_v38 }
 0x59c   :  { %4679 = vmatpush.msra.mxu0 %v10524_v36  ;;  %4720 = vmatpush.msra.mxu1 %v10442_v20  ;;  %v4652_v39 = vand.u32 4294901760, %v4651_v10  ;;  %v5075_v10 = vshra.s32 %v7134_v7, 6 }
 0x59d   :  { %4546 = vmatpush.msra.mxu2 %v10618_v59  ;;  %4641 = vmatpush.msra.mxu3 %v4640_v22  ;;  %v5077_v22 = vand.u32 63, %v7134_v7 }
 0x59e   :  { %4682 = vmatpush.msra.mxu0 %v10552_v45  ;;  %4722 = vmatpush.msra.mxu1 %v10446_v19  ;;  %v5076_v38 = vshll.u32 %v5075_v10, 8 }
 0x59f   :  { %4548 = vmatpush.msra.mxu2 %v10642_v29  ;;  %4647 = vmatpush.msra.mxu3 %v4646_v55  ;;  %v5078_v3 = vshra.s32 %v5077_v22, 3 }
 0x5a0   :  { %4497 = vmatmul.f32.vlgmr.msrb.gmra.mxu2 %v9589_v32  ;;  %4685 = vmatpush.msra.mxu0 %v10565_v62 }
 0x5a1   :  { %4724 = vmatpush.msra.mxu1 %v10467_v42  ;;  %4550 = vmatpush.msra.mxu2 %v10662_v35  ;;  %v5079_v58 = vshll.u32 %v5078_v3, 5 }
 0x5a2   :  { %4519 = vmatmul.f32.vlgmr.msrb.gmra.mxu3 %v9589_v32  ;;  %4688 = vmatpush.msra.mxu0 %v10592_v6 }
 0x5a3   :  { %v3400_v53 = vpop.f32.mrf.mxu1  ;;  %4653 = vmatpush.msra.mxu3 %v4652_v39  ;;  %4726 = vmatpush.msra.mxu1 %v10482_v4  ;;  %v5081_v39 = vand.u32 7, %v7134_v7 }
 0x5a4   :  { %4552 = vmatpush.msra.mxu2 %v10682_v0  ;;  %4691 = vmatpush.msra.mxu0 %v10611_v23  ;;  %v3401_v14 = vadd.f32 %v3400_v53, %v3364_v57  ;;  %v3476_v57 = vpop.f32.mrf.mxu2  ;;  %v5080_v53 = vor.u32 %v5079_v58, %v5076_v38 }
 0x5a5   :  { %4659 = vmatpush.msra.mxu3 %v4658_v8  ;;  %4728 = vmatpush.msra.mxu1 %v10488_v25  ;;  %v3500_v8 = vpop.f32.mrf.mxu3 }
 0x5a6   :  { %4554 = vmatpush.msra.mxu2 %v10697_v13  ;;  %4694 = vmatpush.msra.mxu0 %v10632_v41  ;;  %v3427_v55 = vadd.f32 %v3426_v51, %v3401_v14  ;;  %v5082_v51 = vshll.u32 %v5081_v39, 1  ;;  %v13593_v14 = vand.u32 4294901760, %v10565_v62 }
 0x5a7   :  { %4828 = vmatpush.msrb.mxu3 %v10442_v20  ;;  %4730 = vmatpush.msra.mxu1 %v10514_v60  ;;  %v13587_v20 = vand.u32 4294901760, %v10474_v52  ;;  %v13590_v52 = vlaneseq }
 0x5a8   :  { %4761 = vmatpush.msrb.mxu2 %v13586_v2  ;;  %4697 = vmatpush.msra.mxu0 %v10652_v54  ;;  %v10801_v36 = vor.u32 %v5082_v51, %v5080_v53  ;;  %v13595_v54 = vld [vmem:[#allocation43_spill] sm:$0xff] }
 0x5a9   :  { %4830 = vmatpush.msrb.mxu3 %v10446_v19  ;;  %4732 = vmatpush.msra.mxu1 %v10530_v44  ;;  %v3453_v19 = vadd.f32 %v3452_v61, %v3427_v55 }
 0x5aa   :  { %4765 = vmatpush.msrb.mxu2 %v13587_v20  ;;  %4700 = vmatpush.msra.mxu0 %v10660_v5 }
 0x5ab   :  { %4832 = vmatpush.msrb.mxu3 %v10467_v42  ;;  %4734 = vmatpush.msra.mxu1 %v10557_v12  ;;  %v13589_v42 = vand.u32 4294901760, %v10512_v43  ;;  %v3477_v7 = vadd.f32 %v3476_v57, %v3453_v19 }
 0x5ac   :  { %4769 = vmatpush.msrb.mxu2 %v13588_v30  ;;  %4703 = vmatpush.msra.mxu0 %v10673_v17 }
 0x5ad   :  { %4834 = vmatpush.msrb.mxu3 %v10482_v4  ;;  %4736 = vmatpush.msra.mxu1 %v10573_v49  ;;  %v10784_v4 = vshrl.u32 %v13590_v52, 7  ;;  %v3501_v43 = vadd.f32 %v3500_v8, %v3477_v7 }
 0x5ae   :  { %4773 = vmatpush.msrb.mxu2 %v13589_v42  ;;  %4706 = vmatpush.msra.mxu0 %v10686_v63 }
 0x5af   :  { %4836 = vmatpush.msrb.mxu3 %v10488_v25  ;;  %4738 = vmatpush.msra.mxu1 %v10594_v24  ;;  %v13592_v25 = vand.u32 4294901760, %v10552_v45  ;;  %v3524_v45 = vpop.f32.mrf.mxu2  ;;  %v10828_v62 = vadd.s32 96, %v10784_v4  ;;  %v10884_v5 = vadd.s32 64, %v10784_v4  ;;  %v10930_v61 = vadd.s32 48, %v10784_v4 }
 0x5b0   :  { %4777 = vmatpush.msrb.mxu2 %v13591_v48  ;;  %4709 = vmatpush.msra.mxu0 %v10707_v56  ;;  %v13597_v56 = vld [vmem:[#allocation47_spill] sm:$0xff]  ;;  %v10939_v55 = vadd.s32 40, %v10784_v4  ;;  %v10976_v19 = vadd.s32 32, %v10784_v4  ;;  %v10993_v39 = vadd.s32 24, %v10784_v4 }
 0x5b1   :  { %4838 = vmatpush.msrb.mxu3 %v10514_v60  ;;  %4740 = vmatpush.msra.mxu1 %v10616_v47  ;;  %v10799_v60 = vadd.s32 120, %v10784_v4  ;;  %vm5096_vm4 = vcmp.eq.s32.totalorder %v10828_v62, %v10801_v36  ;;  %vm13140_vm14 = vcmp.eq.s32.totalorder %v10884_v5, %v10801_v36  ;;  %13596 = vst [vmem:[#allocation40_spill] sm:$0xff] %v10930_v61 }
 0x5b2   :  { %4781 = vmatpush.msrb.mxu2 %v13592_v25  ;;  %4661 = vmatmul.f32.vlgmr.msra.gmra.mxu3 %v9563_v21  ;;  %13598 = vst [vmem:[#allocation25_spill] sm:$0xff] %v10939_v55  ;;  %vm13151_vm9 = vcmp.eq.s32.totalorder %v10930_v61, %v10801_v36  ;;  %vm13158_vm10 = vcmp.eq.s32.totalorder %v10939_v55, %v10801_v36 }
 0x5b3   :  { %4560 = vmatmul.f32.vlgmr.msra.gmra.mxu2 %v9675_v50  ;;  %4840 = vmatpush.msrb.mxu3 %v10530_v44  ;;  %v10807_v50 = vadd.s32 112, %v10784_v4  ;;  %v10816_v44 = vadd.s32 104, %v10784_v4  ;;  %vm5099_vm1 = vcmp.eq.s32.totalorder %v10799_v60, %v10801_v36  ;;  %13599 = vst [vmem:[#allocation34_spill] sm:$0xff] %v10976_v19  ;;  %vm13160_vm11 = vcmp.eq.s32.totalorder %v10976_v19, %v10801_v36 }
 0x5b4   :  { %4712 = vmatpush.msra.mxu0 %v10717_v27  ;;  %4742 = vmatpush.msra.mxu1 %v10618_v59  ;;  %13600 = vst [vmem:[#allocation35_spill] sm:$0xff] %v10993_v39 }
 0x5b5   :  { %4785 = vmatpush.msrb.mxu2 %v13593_v14  ;;  %4715 = vmatmul.f32.vlgmr.msra.gmra.mxu0 %v9587_v11  ;;  %v3525_v11 = vadd.f32 %v3524_v45, %v3501_v43  ;;  %vm5098_vm2 = vcmp.eq.s32.totalorder %v10807_v50, %v10801_v36  ;;  %vm5097_vm3 = vcmp.eq.s32.totalorder %v10816_v44, %v10801_v36  ;;  %v13601_v43 = vld [vmem:[#allocation49_spill] sm:$0xff] }
 0x5b6   :  { %4842 = vmatpush.msrb.mxu3 %v10557_v12  ;;  %4744 = vmatpush.msra.mxu1 %v10642_v29  ;;  %v3546_v12 = vpop.f32.mrf.mxu3 }
 0x5b7   :  { %4789 = vmatpush.msrb.mxu2 %v4608_v28  ;;  %6682 = vmatpush.msk.msrb.mxu0 %vm3058_vm6, %v13495_v18  ;;  %v3547_v23 = vadd.f32 %v3546_v12, %v3525_v11  ;;  %v10863_v28 = vadd.s32 80, %v10784_v4  ;;  %v11036_v11 = vadd.s32 16, %v10784_v4 }
 0x5b8   :  { %4844 = vmatpush.msrb.mxu3 %v10573_v49  ;;  %4746 = vmatpush.msra.mxu1 %v10662_v35  ;;  %v13166_v49 = vmov 0.0  }
 0x5b9   :  { %4793 = vmatpush.msrb.mxu2 %v4614_v31  ;;  %4933 = vmatpush.msra.mxu0 %v9570_v37  ;;  %v6700_v6 = vsel %vm5099_vm1, 1.0, %v13166_v49  ;;  %v10841_v37 = vadd.s32 88, %v10784_v4  ;;  %v6698_v41 = vsel %vm5097_vm3, 1.0, %v13166_v49  ;;  %v10866_v31 = vadd.s32 72, %v10784_v4  ;;  %13602 = vst [vmem:[#allocation48_spill] sm:$0xff] %v11036_v11 }
 0x5ba   :  { %4846 = vmatpush.msrb.mxu3 %v10594_v24  ;;  %4748 = vmatpush.msra.mxu1 %v10682_v0  ;;  %v6699_v24 = vsel %vm5098_vm2, 1.0, %v13166_v49  ;;  %vm13147_vm8 = vcmp.eq.s32.totalorder %v10863_v28, %v10801_v36  ;;  %v6693_v3 = vsel %vm13140_vm14, 1.0, %v13166_v49  ;;  %v6691_v25 = vsel %vm13151_vm9, 1.0, %v13166_v49 }
 0x5bb   :  { %4797 = vmatpush.msrb.mxu2 %v4620_v46  ;;  %vm5095_vm5 = vcmp.eq.s32.totalorder %v10841_v37, %v10801_v36  ;;  %v6697_v46 = vsel %vm5096_vm4, 1.0, %v13166_v49  ;;  %vm13141_vm13 = vcmp.eq.s32.totalorder %v10866_v31, %v10801_v36  ;;  %v10984_v38 = vsub.f32 %v6693_v3, %v6693_v3 }
 0x5bc   :  { %4848 = vmatpush.msrb.mxu3 %v10616_v47  ;;  %4750 = vmatpush.msra.mxu1 %v10697_v13  ;;  %v10856_v47 = vsub.f32 %v6700_v6, %v6700_v6  ;;  %v10904_v17 = vsub.f32 %v6697_v46, %v6697_v46  ;;  %v6690_v45 = vsel %vm13158_vm10, 1.0, %v13166_v49  ;;  %v11056_v46 = vadd.s32 248, %v10784_v4 }
 0x5bd   :  { %4801 = vmatpush.msrb.mxu2 %v4626_v9  ;;  %4754 = vmatmul.f32.vlgmr.msra.gmra.mxu1 %v13502_v1  ;;  %v13594_v1 = vld [vmem:[#allocation50_spill] sm:$0xff]  ;;  %v10890_v9 = vsub.f32 %v6698_v41, %v6698_v41  ;;  %vm13164_vm12 = vcmp.eq.s32.totalorder %v11036_v11, %v10801_v36  ;;  %v11089_v3 = vadd.s32 8, %v10784_v4  ;;  %v11357_v11 = vadd.s32 168, %v10784_v4 }
 0x5be   :  { %4850 = vmatpush.msrb.mxu3 %v10618_v59  ;;  %4886 = vmatmul.f32.vlgmr.msrb.gmra.mxu0 %v9725_v33  ;;  %v10871_v59 = vsub.f32 %v6699_v24, %v6699_v24  ;;  %v10875_v33 = vand.u32 4294901760, %v3547_v23  ;;  %v13150_v10 = vand.u32 4294901760, %v10904_v17  ;;  %v3742_v24 = vpop.f32.mrf.mxu0  ;;  %vm13182_vm7 = vcmp.eq.s32.totalorder %v11056_v46, %v10801_v36 }
 0x5bf   :  { %4805 = vmatpush.msrb.mxu2 %v4632_v15  ;;  %4910 = vmatpush.msrb.mxu1 %v13594_v1  ;;  %v6696_v15 = vsel %vm5095_vm5, 1.0, %v13166_v49  ;;  %v13154_v2 = vand.u32 4294901760, %v10890_v9  ;;  %v3688_v42 = vpop.f32.mrf.mxu3  ;;  %13603 = vst [vmem:[#allocation38_spill] sm:$0xff] %v11089_v3  ;;  %vm13173_vm0 = vcmp.eq.s32.totalorder %v11089_v3, %v10801_v36 }
 0x5c0   :  { %4852 = vmatpush.msrb.mxu3 %v10642_v29  ;;  %4982 = vmatpush.msrb.mxu0 %v13595_v54  ;;  %v13157_v29 = vand.u32 4294901760, %v10856_v47  ;;  %v10911_v22 = vsub.f32 %v3547_v23, %v10875_v33  ;;  %v10919_v63 = vsub.f32 %v6696_v15, %v6696_v15  ;;  %v3587_v57 = vpop.f32.mrf.mxu2  ;;  %v5338_v53 = vsub.f32 %v10904_v17, %v13150_v10 }
 0x5c1   :  { %4809 = vmatpush.msrb.mxu2 %v4638_v40  ;;  %6683 = vmatpush.msk.msra.mxu1 %vm3058_vm6, %v13495_v18  ;;  %v10908_v40 = vadd.s32 56, %v10784_v4  ;;  %v5332_v7 = vsub.f32 %v10890_v9, %v13154_v2  ;;  %v3689_v12 = vadd.f32 %v3688_v42, %v3587_v57  ;;  %v13143_v23 = vand.u32 4294901760, %v10984_v38 }
 0x5c2   :  { %4854 = vmatpush.msrb.mxu3 %v10662_v35  ;;  %v13155_v35 = vand.u32 4294901760, %v10871_v59  ;;  %v13156_v20 = vand.u32 4294901760, %v10911_v22  ;;  %v13149_v30 = vand.u32 4294901760, %v10919_v63  ;;  %v5339_v1 = vand.u32 4294901760, %v5338_v53 }
 0x5c3   :  { %4813 = vmatpush.msrb.mxu2 %v4644_v34  ;;  %v6695_v34 = vsel %vm13147_vm8, 1.0, %v13166_v49  ;;  %vm13145_vm15 = vcmp.eq.s32.totalorder %v10908_v40, %v10801_v36  ;;  %v5333_v41 = vand.u32 4294901760, %v5332_v7  ;;  %v11053_v54 = vsub.f32 %v6691_v25, %v6691_v25 }
 0x5c4   :  { %4856 = vmatpush.msrb.mxu3 %v10682_v0  ;;  %v6694_v0 = vsel %vm13141_vm13, 1.0, %v13166_v49  ;;  %v10963_v27 = vsub.f32 %v6695_v34, %v6695_v34  ;;  %v6692_v58 = vsel %vm13145_vm15, 1.0, %v13166_v49  ;;  %v11009_v51 = vsub.f32 %v10911_v22, %v13156_v20 }
 0x5c5   :  { %4817 = vmatpush.msrb.mxu2 %v4650_v26  ;;  %4912 = vmatmul.f32.vlgmr.msrb.gmra.mxu1 %v9589_v32  ;;  %v5320_v26 = vsub.f32 %v10856_v47, %v13157_v29  ;;  %v11027_v14 = vsub.f32 %v6692_v58, %v6692_v58  ;;  %v5344_v6 = vsub.f32 %v10919_v63, %v13149_v30  ;;  %v13142_v53 = vand.u32 4294901760, %v11053_v54 }
 0x5c6   :  { %4858 = vmatpush.msrb.mxu3 %v10697_v13  ;;  %4936 = vmatmul.f32.vlgmr.msra.gmra.mxu0 %v13597_v56  ;;  %v5326_v13 = vsub.f32 %v10871_v59, %v13155_v35  ;;  %v6689_v56 = vsel %vm13160_vm11, 1.0, %v13166_v49  ;;  %v3743_v57 = vadd.f32 %v3742_v24, %v3689_v12  ;;  %v11112_v25 = vadd.s32 240, %v10784_v4 }
 0x5c7   :  { %6749 = vmatpush.msk.msra.mxu0 %vm5099_vm1, %v13495_v18  ;;  %4821 = vmatpush.msrb.mxu2 %v4656_v16  ;;  %v10965_v16 = vsub.f32 %v6694_v0, %v6694_v0  ;;  %v5321_v52 = vand.u32 4294901760, %v5320_v26  ;;  %v11071_v0 = vsub.f32 %v6690_v45, %v6690_v45  ;;  %v13139_v26 = vand.u32 4294901760, %v11027_v14 }
 0x5c8   :  { %6765 = vmatpush.msk.msra.mxu3 %vm5099_vm1, %v13495_v18  ;;  %4823 = vmatmul.f32.vlgmr.msrb.gmra.mxu2 %v9563_v21  ;;  %v5327_v48 = vand.u32 4294901760, %v5326_v13  ;;  %v5345_v42 = vand.u32 4294901760, %v5344_v6  ;;  %v11106_v7 = vsub.f32 %v6689_v56, %v6689_v56  ;;  %v6687_v12 = vsel %vm13164_vm12, 1.0, %v13166_v49 }
 0x5c9   :  { %6750 = vmatpush.msk.msra.mxu0 %vm5098_vm2, %v13495_v18  ;;  %5420 = vmatpush.msra.mxu2 %v10856_v47  ;;  %v13144_v8 = vand.u32 4294901760, %v10965_v16  ;;  %v11126_v6 = vadd.s32 232, %v10784_v4  ;;  %v11254_v20 = vadd.s32 200, %v10784_v4 }
 0x5ca   :  { %6766 = vmatpush.msk.msra.mxu3 %vm5098_vm2, %v13495_v18  ;;  %6684 = vmatpush.msk.msrb.mxu1 %vm3058_vm6, %v13495_v18  ;;  %vm13163_vm6 = vcmp.eq.s32.totalorder %v10993_v39, %v10801_v36 }
 0x5cb   :  { %4860 = vmatmul.f32.vlgmr.msrb.gmra.mxu3 %v9563_v21  ;;  %6751 = vmatpush.msk.msra.mxu0 %vm5097_vm3, %v13495_v18  ;;  %v13146_v21 = vand.u32 4294901760, %v10963_v27  ;;  %v11069_v34 = vsub.f32 %v10965_v16, %v13144_v8  ;;  %v6688_v13 = vsel %vm13163_vm6, 1.0, %v13166_v49 }
 0x5cc   :  { %5423 = vmatpush.msra.mxu2 %v10871_v59  ;;  %6767 = vmatpush.msk.msra.mxu3 %vm5097_vm3, %v13495_v18  ;;  %v11119_v45 = vsub.f32 %v6688_v13, %v6688_v13  ;;  %v11152_v13 = vadd.s32 224, %v10784_v4 }
 0x5cd   :  { %6752 = vmatpush.msk.msra.mxu0 %vm5096_vm4, %v13495_v18  ;;  %4960 = vmatmul.f32.vlgmr.msra.gmra.mxu1 %v13601_v43  ;;  %v5350_v15 = vsub.f32 %v10963_v27, %v13146_v21  ;;  %v5357_v24 = vand.u32 4294901760, %v11069_v34  ;;  %v6716_v34 = vsel %vm13182_vm7, 1.0, %v13166_v49 }
 0x5ce   :  { %5426 = vmatpush.msra.mxu2 %v10890_v9  ;;  %6768 = vmatpush.msk.msra.mxu3 %vm5096_vm4, %v13495_v18  ;;  %v11195_v21 = vsub.f32 %v6716_v34, %v6716_v34 }
 0x5cf   :  { %6753 = vmatpush.msk.msra.mxu0 %vm5095_vm5, %v13495_v18  ;;  %5322 = vmatpush.msra.mxu1 %v5321_v52  ;;  %v11100_v52 = vsub.f32 %v10984_v38, %v13143_v23  ;;  %v5351_v43 = vand.u32 4294901760, %v5350_v15  ;;  %v13148_v15 = vand.u32 4294901760, %v11071_v0 }
 0x5d0   :  { %5429 = vmatpush.msra.mxu2 %v10904_v17  ;;  %6769 = vmatpush.msk.msra.mxu3 %vm5095_vm5, %v13495_v18  ;;  %13605 = vst [vmem:[#allocation45_spill] sm:$0xff] %v11195_v21 }
 0x5d1   :  { %6754 = vmatpush.msk.msra.mxu0 %vm13147_vm8, %v13495_v18  ;;  %5328 = vmatpush.msra.mxu1 %v5327_v48  ;;  %v3781_v48 = vpop.f32.mrf.mxu1  ;;  %v11191_v8 = vsub.f32 %v11071_v0, %v13148_v15  ;;  %v11209_v15 = vadd.s32 208, %v10784_v4 }
 0x5d2   :  { %5432 = vmatpush.msra.mxu2 %v10919_v63  ;;  %6770 = vmatpush.msk.msra.mxu3 %vm13147_vm8, %v13495_v18  ;;  %v3782_v56 = vadd.f32 %v3781_v48, %v3743_v57  ;;  %v11161_v48 = vsub.f32 %v11053_v54, %v13142_v53  ;;  %v11181_v53 = vadd.s32 216, %v10784_v4  ;;  %vm5112_vm8 = vcmp.eq.s32.totalorder %v11152_v13, %v10801_v36 }
 0x5d3   :  { %6755 = vmatpush.msk.msra.mxu0 %vm13141_vm13, %v13495_v18  ;;  %5334 = vmatpush.msra.mxu1 %v5333_v41  ;;  %v11136_v41 = vsub.f32 %v11027_v14, %v13139_v26  ;;  %v13152_v26 = vand.u32 4294901760, %v11106_v7  ;;  %v6713_v35 = vsel %vm5112_vm8, 1.0, %v13166_v49 }
 0x5d4   :  { %5435 = vmatpush.msra.mxu2 %v10963_v27  ;;  %6771 = vmatpush.msk.msra.mxu3 %vm13141_vm13, %v13495_v18  ;;  %vm13186_vm13 = vcmp.eq.s32.totalorder %v11126_v6, %v10801_v36  ;;  %v5375_v30 = vand.u32 4294901760, %v11161_v48 }
 0x5d5   :  { %6756 = vmatpush.msk.msra.mxu0 %vm13140_vm14, %v13495_v18  ;;  %5340 = vmatpush.msra.mxu1 %v5339_v1  ;;  %v5363_v1 = vand.u32 4294901760, %v11100_v52  ;;  %v3850_v57 = vpop.f32.mrf.mxu2  ;;  %v11163_v52 = vsub.f32 %v6687_v12, %v6687_v12  ;;  %v13153_v12 = vand.u32 4294901760, %v11119_v45  ;;  %v5369_v23 = vand.u32 4294901760, %v11136_v41 }
 0x5d6   :  { %5438 = vmatpush.msra.mxu2 %v10965_v16  ;;  %6772 = vmatpush.msk.msra.mxu3 %vm13140_vm14, %v13495_v18  ;;  %vm13185_vm14 = vcmp.eq.s32.totalorder %v11112_v25, %v10801_v36  ;;  %v6714_v10 = vsel %vm13186_vm13, 1.0, %v13166_v49 }
 0x5d7   :  { %6757 = vmatpush.msk.msra.mxu0 %vm13145_vm15, %v13495_v18  ;;  %5346 = vmatpush.msra.mxu1 %v5345_v42  ;;  %13604 = vst [vmem:[#allocation33_spill] sm:$0xff] %v11163_v52  ;;  %v6686_v42 = vsel %vm13173_vm0, 1.0, %v13166_v49  ;;  %v6715_v41 = vsel %vm13185_vm14, 1.0, %v13166_v49  ;;  %v11261_v58 = vsub.f32 %v6714_v10, %v6714_v10 }
 0x5d8   :  { %5441 = vmatpush.msra.mxu2 %v10984_v38  ;;  %6773 = vmatpush.msk.msra.mxu3 %vm13145_vm15, %v13495_v18  ;;  %vm13180_vm15 = vcmp.eq.s32.totalorder %v10784_v4, %v10801_v36  ;;  %v3887_v34 = vpop.f32.mrf.mxu3  ;;  %v11247_v2 = vsub.f32 %v6715_v41, %v6715_v41 }
 0x5d9   :  { %6758 = vmatpush.msk.msra.mxu0 %vm13151_vm9, %v13495_v18  ;;  %5352 = vmatpush.msra.mxu1 %v5351_v43  ;;  %v3851_v43 = vadd.f32 %v3850_v57, %v3782_v56  ;;  %v11216_v56 = vsub.f32 %v11106_v7, %v13152_v26  ;;  %v11218_v57 = vsub.f32 %v6686_v42, %v6686_v42  ;;  %v6685_v48 = vsel %vm13180_vm15, 1.0, %v13166_v49  ;;  %v3913_v26 = vpop.f32.mrf.mxu0 }
 0x5da   :  { %5444 = vmatpush.msra.mxu2 %v11027_v14  ;;  %6774 = vmatpush.msk.msra.mxu3 %vm13151_vm9, %v13495_v18  ;;  %v13159_v42 = vand.u32 4294901760, %v11163_v52  ;;  %vm5111_vm9 = vcmp.eq.s32.totalorder %v11181_v53, %v10801_v36  ;;  %13607 = vst [vmem:[#allocation46_spill] sm:$0xff] %v11247_v2  ;;  %v11270_v41 = vsub.f32 %v6685_v48, %v6685_v48  ;;  %v11293_v48 = vadd.s32 184, %v10784_v4 }
 0x5db   :  { %4984 = vmatmul.f32.vlgmr.msrb.gmra.mxu0 %v9589_v32  ;;  %5358 = vmatpush.msra.mxu1 %v5357_v24  ;;  %13606 = vst [vmem:[#allocation42_spill] sm:$0xff] %v11218_v57  ;;  %v11232_v24 = vsub.f32 %v11119_v45, %v13153_v12  ;;  %v3888_v29 = vadd.f32 %v3887_v34, %v3851_v43  ;;  %v6712_v10 = vsel %vm5111_vm9, 1.0, %v13166_v49  ;;  %v3939_v12 = vpop.f32.mrf.mxu1  ;;  %v13613_v3 = vand.u32 4294901760, %v11261_v58 }
 0x5dc   :  { %6759 = vmatpush.msk.msra.mxu0 %vm13158_vm10, %v13495_v18  ;;  %5447 = vmatpush.msra.mxu2 %v11053_v54  ;;  %13608 = vst [vmem:[#allocation22_spill] sm:$0xff] %v11261_v58  ;;  %v11288_v43 = vsub.f32 %v11163_v52, %v13159_v42  ;;  %v11290_v34 = vsub.f32 %v6713_v35, %v6713_v35 }
 0x5dd   :  { %6775 = vmatpush.msk.msra.mxu3 %vm13158_vm10, %v13495_v18  ;;  %5006 = vmatmul.f32.vlgmr.msrb.gmra.mxu1 %v9589_v32  ;;  %v5381_v32 = vand.u32 4294901760, %v11191_v8  ;;  %vm5110_vm10 = vcmp.eq.s32.totalorder %v11209_v15, %v10801_v36  ;;  %v11278_v8 = vadd.s32 192, %v10784_v4  ;;  %v3914_v19 = vadd.f32 %v3913_v26, %v3888_v29 }
 0x5de   :  { %6760 = vmatpush.msk.msra.mxu0 %vm13160_vm11, %v13495_v18  ;;  %5364 = vmatpush.msra.mxu1 %v5363_v1  ;;  %v5387_v1 = vand.u32 4294901760, %v11216_v56  ;;  %v6711_v35 = vsel %vm5110_vm10, 1.0, %v13166_v49  ;;  %v5393_v39 = vand.u32 4294901760, %v11232_v24  ;;  %v11316_v42 = vsub.f32 %v6712_v10, %v6712_v10 }
 0x5df   :  { %5450 = vmatpush.msra.mxu2 %v11071_v0  ;;  %6776 = vmatpush.msk.msra.mxu3 %vm13160_vm11, %v13495_v18  ;;  %vm5109_vm11 = vcmp.eq.s32.totalorder %v11254_v20, %v10801_v36  ;;  %v13610_v29 = vand.u32 4294901760, %v11218_v57  ;;  %v11332_v24 = vadd.s32 176, %v10784_v4  ;;  %v5399_v10 = vand.u32 4294901760, %v11288_v43 }
 0x5e0   :  { %6761 = vmatpush.msk.msra.mxu0 %vm13163_vm6, %v13495_v18  ;;  %5370 = vmatpush.msra.mxu1 %v5369_v23  ;;  %v13609_v23 = vand.u32 4294901760, %v11195_v21  ;;  %v11819_v20 = vadd.s32 336, %v10784_v4 }
 0x5e1   :  { %5453 = vmatpush.msra.mxu2 %v11106_v7  ;;  %6777 = vmatpush.msk.msra.mxu3 %vm13163_vm6, %v13495_v18  ;;  %v11326_v26 = vsub.f32 %v11218_v57, %v13610_v29  ;;  %vm5108_vm6 = vcmp.eq.s32.totalorder %v11278_v8, %v10801_v36  ;;  %v6710_v29 = vsel %vm5109_vm11, 1.0, %v13166_v49  ;;  %v3940_v49 = vadd.f32 %v3939_v12, %v3914_v19 }
 0x5e2   :  { %v5661_v56 = vsub.f32 %v11195_v21, %v13609_v23  ;;  %6762 = vmatpush.msk.msra.mxu0 %vm13164_vm12, %v13495_v18  ;;  %5376 = vmatpush.msra.mxu1 %v5375_v30  ;;  %v11339_v23 = vsub.f32 %v6711_v35, %v6711_v35  ;;  %v13612_v35 = vand.u32 4294901760, %v11247_v2  ;;  %v13614_v21 = vmov 0.0  }
 0x5e3   :  { %5456 = vmatpush.msra.mxu2 %v11119_v45  ;;  %6778 = vmatpush.msk.msra.mxu3 %vm13164_vm12, %v13495_v18  ;;  %vm13181_vm12 = vcmp.eq.s32.totalorder %v11293_v48, %v10801_v36  ;;  %v13615_v19 = vand.u32 4294901760, %v11009_v51  ;;  %v11374_v12 = vsub.f32 %v6710_v29, %v6710_v29  ;;  %v13616_v51 = vand.u32 4294901760, %v10856_v47 }
 0x5e4   :  { %6763 = vmatpush.msk.msra.mxu0 %vm13173_vm0, %v13495_v18  ;;  %5382 = vmatpush.msra.mxu1 %v5381_v32  ;;  %13611 = vst [vmem:[#allocation51_spill] sm:$0xff] %v11339_v23  ;;  %v5662_v32 = vand.u32 4294901760, %v5661_v56  ;;  %v5667_v30 = vsub.f32 %v11247_v2, %v13612_v35  ;;  %v5673_v56 = vsub.f32 %v11261_v58, %v13613_v3  ;;  %v6709_v35 = vsel %vm5108_vm6, 1.0, %v13614_v21  ;;  %v3963_v2 = vpop.f32.mrf.mxu0 }
 0x5e5   :  { %5459 = vmatpush.msra.mxu2 %v11163_v52  ;;  %6779 = vmatpush.msk.msra.mxu3 %vm13173_vm0, %v13495_v18  ;;  %v6708_v3 = vsel %vm13181_vm12, 1.0, %v13614_v21  ;;  %vm5106_vm0 = vcmp.eq.s32.totalorder %v11332_v24, %v10801_v36  ;;  %v5405_v29 = vand.u32 4294901760, %v11326_v26  ;;  %v13618_v58 = vand.u32 4294901760, %v11290_v34 }
 0x5e6   :  { %6764 = vmatpush.msk.msra.mxu0 %vm13180_vm15, %v13495_v18  ;;  %5388 = vmatpush.msra.mxu1 %v5387_v1  ;;  %v11383_v1 = vadd.s32 160, %v10784_v4  ;;  %v5668_v61 = vand.u32 4294901760, %v5667_v30  ;;  %v11400_v52 = vsub.f32 %v6709_v35, %v6709_v35  ;;  %v11405_v47 = vadd.s32 152, %v10784_v4  ;;  %v3987_v30 = vpop.f32.mrf.mxu1 }
 0x5e7   :  { %5462 = vmatpush.msra.mxu2 %v11218_v57  ;;  %5313 = vmatmul.f32.vlgmr.msra.gmra.mxu0 %v13615_v19  ;;  %v13617_v19 = vand.u32 4294901760, %v11270_v41  ;;  %v5679_v55 = vsub.f32 %v11290_v34, %v13618_v58  ;;  %v13619_v26 = vand.u32 4294901760, %v10911_v22  ;;  %v3964_v58 = vadd.f32 %v3963_v2, %v3940_v49 }
 0x5e8   :  { %6780 = vmatpush.msk.msra.mxu3 %vm13180_vm15, %v13495_v18  ;;  %5514 = vmatpush.msrb.mxu0 %v13616_v51  ;;  %vm5105_vm15 = vcmp.eq.s32.totalorder %v11357_v11, %v10801_v36  ;;  %v5674_v51 = vand.u32 4294901760, %v5673_v56  ;;  %v13620_v35 = vand.u32 4294901760, %v10871_v59  ;;  %v13621_v57 = vand.u32 4294901760, %v11316_v42 }
 0x5e9   :  { %v5410_v43 = vsub.f32 %v11270_v41, %v13617_v19  ;;  %5394 = vmatpush.msra.mxu1 %v5393_v39  ;;  %5465 = vmatpush.msra.mxu2 %v11270_v41  ;;  %v11410_v19 = vsub.f32 %v6708_v3, %v6708_v3  ;;  %v6707_v39 = vsel %vm5106_vm0, 1.0, %v13614_v21  ;;  %vm5104_vm12 = vcmp.eq.s32.totalorder %v11383_v1, %v10801_v36 }
 0x5ea   :  { %5507 = vmatmul.f32.vlgmr.msra.gmra.mxu3 %v13619_v26  ;;  %5468 = vmatmul.f32.vlgmr.msra.gmra.mxu2 %v10911_v22  ;;  %v5685_v26 = vsub.f32 %v11316_v42, %v13621_v57  ;;  %v11425_v49 = vadd.s32 144, %v10784_v4  ;;  %v5680_v2 = vand.u32 4294901760, %v5679_v55  ;;  %v6706_v56 = vsel %vm5105_vm15, 1.0, %v13614_v21 }
 0x5eb   :  { %5663 = vmatpush.msrb.mxu3 %v5662_v32  ;;  %5518 = vmatpush.msrb.mxu0 %v13620_v35  ;;  %v5411_v59 = vand.u32 4294901760, %v5410_v43  ;;  %v13622_v32 = vand.u32 4294901760, %v11339_v23  ;;  %v13623_v3 = vand.u32 4294901760, %v10890_v9  ;;  %v11441_v22 = vsub.f32 %v6707_v39, %v6707_v39 }
 0x5ec   :  { %6797 = vmatpush.msk.msrb.mxu2 %vm13182_vm7, %v13495_v18  ;;  %5400 = vmatpush.msra.mxu1 %v5399_v10  ;;  %vm5103_vm7 = vcmp.eq.s32.totalorder %v11405_v47, %v10801_v36  ;;  %v11446_v55 = vadd.s32 136, %v10784_v4  ;;  %v3988_v10 = vadd.f32 %v3987_v30, %v3964_v58  ;;  %v5708_v9 = vand.u32 4294901760, %v11410_v19  ;;  %v4011_v43 = vpop.f32.mrf.mxu0 }
 0x5ed   :  { %v5691_v57 = vsub.f32 %v11339_v23, %v13622_v32  ;;  %5669 = vmatpush.msrb.mxu3 %v5668_v61  ;;  %5522 = vmatpush.msrb.mxu0 %v13623_v3  ;;  %v6705_v61 = vsel %vm5104_vm12, 1.0, %v13614_v21  ;;  %v13624_v39 = vand.u32 4294901760, %v10904_v17  ;;  %v5686_v32 = vand.u32 4294901760, %v5685_v26 }
 0x5ee   :  { %6798 = vmatpush.msk.msrb.mxu2 %vm13185_vm14, %v13495_v18  ;;  %5406 = vmatpush.msra.mxu1 %v5405_v29  ;;  %v13625_v3 = vand.u32 4294901760, %v11374_v12  ;;  %v11462_v23 = vsub.f32 %v6706_v56, %v6706_v56  ;;  %vm5102_vm14 = vcmp.eq.s32.totalorder %v11425_v49, %v10801_v36  ;;  %v6704_v17 = vsel %vm5103_vm7, 1.0, %v13614_v21 }
 0x5ef   :  { %5675 = vmatpush.msrb.mxu3 %v5674_v51  ;;  %5526 = vmatpush.msrb.mxu0 %v13624_v39  ;;  %v5692_v29 = vand.u32 4294901760, %v5691_v57  ;;  %v11475_v58 = vadd.s32 128, %v10784_v4  ;;  %v13626_v51 = vand.u32 4294901760, %v11400_v52  ;;  %v5714_v26 = vand.u32 4294901760, %v11441_v22  ;;  %v4033_v39 = vpop.f32.mrf.mxu1 }
 0x5f0   :  { %v5697_v35 = vsub.f32 %v11374_v12, %v13625_v3  ;;  %6799 = vmatpush.msk.msrb.mxu2 %vm13186_vm13, %v13495_v18  ;;  %5412 = vmatpush.msra.mxu1 %v5411_v59  ;;  %v11482_v56 = vsub.f32 %v6705_v61, %v6705_v61  ;;  %vm5101_vm13 = vcmp.eq.s32.totalorder %v11446_v55, %v10801_v36  ;;  %v13627_v57 = vand.u32 4294901760, %v10919_v63 }
 0x5f1   :  { %5681 = vmatpush.msrb.mxu3 %v5680_v2  ;;  %5414 = vmatmul.f32.vlgmr.msra.gmra.mxu1 %v10875_v33  ;;  %v5703_v30 = vsub.f32 %v11400_v52, %v13626_v51  ;;  %v4012_v59 = vadd.f32 %v4011_v43, %v3988_v10  ;;  %v5709_v2 = vsub.f32 %v11410_v19, %v5708_v9  ;;  %v6703_v61 = vsel %vm5102_vm14, 1.0, %v13614_v21 }
 0x5f2   :  { %5530 = vmatpush.msrb.mxu0 %v13627_v57  ;;  %6781 = vmatpush.msk.msrb.mxu1 %vm5099_vm1, %v13495_v18  ;;  %v5698_v63 = vand.u32 4294901760, %v5697_v35  ;;  %v5720_v60 = vand.u32 4294901760, %v11462_v23  ;;  %v11504_v10 = vsub.f32 %v6704_v17, %v6704_v17  ;;  %v13628_v43 = vand.u32 4294901760, %v10963_v27 }
 0x5f3   :  { %6800 = vmatpush.msk.msrb.mxu2 %vm5112_vm8, %v13495_v18  ;;  %5687 = vmatpush.msrb.mxu3 %v5686_v32  ;;  %v6702_v3 = vsel %vm5101_vm13, 1.0, %v13614_v21  ;;  %vm5100_vm1 = vcmp.eq.s32.totalorder %v11475_v58, %v10801_v36  ;;  %v5704_v27 = vand.u32 4294901760, %v5703_v30  ;;  %v5715_v50 = vsub.f32 %v11441_v22, %v5714_v26 }
 0x5f4   :  { %5534 = vmatpush.msrb.mxu0 %v13628_v43  ;;  %6782 = vmatpush.msk.msrb.mxu1 %vm5098_vm2, %v13495_v18  ;;  %v5726_v35 = vand.u32 4294901760, %v11482_v56  ;;  %v11526_v32 = vsub.f32 %v6703_v61, %v6703_v61  ;;  %v4034_v17 = vadd.f32 %v4033_v39, %v4012_v59  ;;  %v13629_v51 = vand.u32 4294901760, %v10965_v16 }
 0x5f5   :  { %6801 = vmatpush.msk.msrb.mxu2 %vm5111_vm9, %v13495_v18  ;;  %5693 = vmatpush.msrb.mxu3 %v5692_v29  ;;  %v5710_v57 = vand.u32 4294901760, %v5709_v2  ;;  %v5721_v29 = vsub.f32 %v11462_v23, %v5720_v60  ;;  %v5732_v30 = vand.u32 4294901760, %v11504_v10  ;;  %v11542_v16 = vsub.f32 %v6702_v3, %v6702_v3 }
 0x5f6   :  { %5538 = vmatpush.msrb.mxu0 %v13629_v51  ;;  %6783 = vmatpush.msk.msrb.mxu1 %vm5097_vm3, %v13495_v18  ;;  %v6701_v44 = vsel %vm5100_vm1, 1.0, %v13614_v21  ;;  %v13630_v59 = vand.u32 4294901760, %v10984_v38  ;;  %v5716_v2 = vand.u32 4294901760, %v5715_v50  ;;  %v5727_v61 = vsub.f32 %v11482_v56, %v5726_v35 }
 0x5f7   :  { %6802 = vmatpush.msk.msrb.mxu2 %vm5110_vm10, %v13495_v18  ;;  %5699 = vmatpush.msrb.mxu3 %v5698_v63  ;;  %v5738_v39 = vand.u32 4294901760, %v11526_v32  ;;  %v11562_v38 = vand.u32 4294901760, %v4034_v17  ;;  %v13631_v63 = vand.u32 4294901760, %v11027_v14  ;;  %v11570_v62 = vsub.f32 %v6701_v44, %v6701_v44 }
 0x5f8   :  { %5542 = vmatpush.msrb.mxu0 %v13630_v59  ;;  %6784 = vmatpush.msk.msrb.mxu1 %vm5096_vm4, %v13495_v18  ;;  %v5722_v43 = vand.u32 4294901760, %v5721_v29  ;;  %v5733_v3 = vsub.f32 %v11504_v10, %v5732_v30  ;;  %v5744_v14 = vand.u32 4294901760, %v11542_v16  ;;  %vm13633_vm2 = vcmp.eq.s32.totalorder %v10863_v28, %v10801_v36  ;;  %v13641_v59 = vld [vmem:[#allocation33_spill] sm:$0xff] }
 0x5f9   :  { %6803 = vmatpush.msk.msrb.mxu2 %vm5109_vm11, %v13495_v18  ;;  %5705 = vmatpush.msrb.mxu3 %v5704_v27  ;;  %v13632_v27 = vand.u32 4294901760, %v11053_v54  ;;  %vm13634_vm3 = vcmp.eq.s32.totalorder %v11293_v48, %v10801_v36  ;;  %v5728_v37 = vand.u32 4294901760, %v5727_v61  ;;  %v5739_v50 = vsub.f32 %v11526_v32, %v5738_v39  ;;  %v13645_v61 = vld [vmem:[#allocation42_spill] sm:$0xff] }
 0x5fa   :  { %5546 = vmatpush.msrb.mxu0 %v13631_v63  ;;  %6785 = vmatpush.msk.msrb.mxu1 %vm5095_vm5, %v13495_v18  ;;  %v11594_v51 = vsub.f32 %v4034_v17, %v11562_v38  ;;  %v13635_v54 = vand.u32 4294901760, %v11071_v0  ;;  %vm13636_vm4 = vcmp.eq.s32.totalorder %v10866_v31, %v10801_v36  ;;  %v5750_v28 = vand.u32 4294901760, %v11570_v62 }
 0x5fb   :  { %6804 = vmatpush.msk.msrb.mxu2 %vm5108_vm6, %v13495_v18  ;;  %5711 = vmatpush.msrb.mxu3 %v5710_v57  ;;  %v5734_v57 = vand.u32 4294901760, %v5733_v3  ;;  %v5745_v17 = vsub.f32 %v11542_v16, %v5744_v14  ;;  %v13637_v0 = vand.u32 4294901760, %v11106_v7  ;;  %vm13638_vm5 = vcmp.eq.s32.totalorder %v10884_v5, %v10801_v36 }
 0x5fc   :  { %5550 = vmatpush.msrb.mxu0 %v13632_v27  ;;  %6786 = vmatpush.msk.msrb.mxu1 %vm13633_vm2, %v13495_v18  ;;  %v5740_v31 = vand.u32 4294901760, %v5739_v50  ;;  %v5651_v29 = vand.u32 4294901760, %v11594_v51  ;;  %v13639_v44 = vand.u32 4294901760, %v11119_v45  ;;  %vm13640_vm2 = vcmp.eq.s32.totalorder %v10908_v40, %v10801_v36  ;;  %v13643_v45 = vld [vmem:[#allocation40_spill] sm:$0xff] }
 0x5fd   :  { %6805 = vmatpush.msk.msrb.mxu2 %vm13634_vm3, %v13495_v18  ;;  %5717 = vmatpush.msrb.mxu3 %v5716_v2  ;;  %v5751_v5 = vsub.f32 %v11570_v62, %v5750_v28  ;;  %v5746_v7 = vand.u32 4294901760, %v5745_v17  ;;  %v13642_v2 = vand.u32 4294901760, %v13641_v59  ;;  %vm13644_vm3 = vcmp.eq.s32.totalorder %v13643_v45, %v10801_v36  ;;  %v13652_v17 = vld [vmem:[#allocation45_spill] sm:$0xff]  ;;  %v13661_v59 = vld [vmem:[#allocation22_spill] sm:$0xff] }
 0x5fe   :  { %5554 = vmatpush.msrb.mxu0 %v13635_v54  ;;  %6787 = vmatpush.msk.msrb.mxu1 %vm13636_vm4, %v13495_v18  ;;  %v5652_v40 = vsub.f32 %v11594_v51, %v5651_v29  ;;  %v13646_v63 = vand.u32 4294901760, %v13645_v61  ;;  %v13649_v27 = vand.u32 4294901760, %v11270_v41  ;;  %v4074_v54 = vpop.f32.mrf.mxu0  ;;  %v13653_v41 = vld [vmem:[#allocation35_spill] sm:$0xff]  ;;  %v13663_v45 = vld [vmem:[#allocation38_spill] sm:$0xff]  ;;  %v4268_v61 = vpop.f32.mrf.mxu3 }
 0x5ff   :  { %6806 = vmatpush.msk.msrb.mxu2 %vm5106_vm0, %v13495_v18  ;;  %5723 = vmatpush.msrb.mxu3 %v5722_v43  ;;  %v13647_v43 = vld [vmem:[#allocation25_spill] sm:$0xff]  ;;  %v5752_v3 = vand.u32 4294901760, %v5751_v5  ;;  %v13657_v5 = vand.u32 4294901760, %v13652_v17 }
 0x600   :  { %5558 = vmatpush.msrb.mxu0 %v13637_v0  ;;  %6788 = vmatpush.msk.msrb.mxu1 %vm13638_vm5, %v13495_v18  ;;  %vm13648_vm4 = vcmp.eq.s32.totalorder %v13647_v43, %v10801_v36  ;;  %v5653_v50 = vand.u32 4294901760, %v5652_v40 }
 0x601   :  { %6807 = vmatpush.msk.msrb.mxu2 %vm5105_vm15, %v13495_v18  ;;  %5729 = vmatpush.msrb.mxu3 %v5728_v37  ;;  %v13650_v37 = vld [vmem:[#allocation34_spill] sm:$0xff] }
 0x602   :  { %5562 = vmatpush.msrb.mxu0 %v13639_v44  ;;  %6789 = vmatpush.msk.msrb.mxu1 %vm13640_vm2, %v13495_v18  ;;  %vm13651_vm5 = vcmp.eq.s32.totalorder %v13650_v37, %v10801_v36  ;;  %vm13654_vm2 = vcmp.eq.s32.totalorder %v13653_v41, %v10801_v36  ;;  %v13656_v44 = vld [vmem:[#allocation46_spill] sm:$0xff]  ;;  %v13670_v37 = vld [vmem:[#allocation51_spill] sm:$0xff]  ;;  %v13675_v41 = vand.u32 4294901760, %v11400_v52 }
 0x603   :  { %6808 = vmatpush.msk.msrb.mxu2 %vm5104_vm12, %v13495_v18  ;;  %5735 = vmatpush.msrb.mxu3 %v5734_v57  ;;  %v4175_v57 = vpop.f32.mrf.mxu1 }
 0x604   :  { %5566 = vmatpush.msrb.mxu0 %v13642_v2  ;;  %6790 = vmatpush.msk.msrb.mxu1 %vm13644_vm3, %v13495_v18  ;;  %v4176_v0 = vadd.f32 %v4175_v57, %v4074_v54  ;;  %vm13655_vm3 = vcmp.eq.s32.totalorder %v11056_v46, %v10801_v36  ;;  %v13662_v2 = vand.u32 4294901760, %v13656_v44  ;;  %v11750_v54 = vadd.s32 376, %v10784_v4 }
 0x605   :  { %6809 = vmatpush.msk.msrb.mxu2 %vm5103_vm7, %v13495_v18  ;;  %5741 = vmatpush.msrb.mxu3 %v5740_v31  ;;  %v4229_v31 = vpop.f32.mrf.mxu2  ;;  %v13674_v57 = vand.u32 4294901760, %v11374_v12 }
 0x606   :  { %5570 = vmatpush.msrb.mxu0 %v13646_v63  ;;  %6791 = vmatpush.msk.msrb.mxu1 %vm13648_vm4, %v13495_v18  ;;  %v4230_v40 = vadd.f32 %v4229_v31, %v4176_v0  ;;  %v13666_v63 = vand.u32 4294901760, %v13661_v59  ;;  %v11862_v0 = vadd.s32 328, %v10784_v4  ;;  %v11865_v31 = vadd.s32 320, %v10784_v4 }
 0x607   :  { %6810 = vmatpush.msk.msrb.mxu2 %vm5102_vm14, %v13495_v18  ;;  %5747 = vmatpush.msrb.mxu3 %v5746_v7  ;;  %v13658_v7 = vld [vmem:[#allocation48_spill] sm:$0xff] }
 0x608   :  { %5574 = vmatpush.msrb.mxu0 %v13649_v27  ;;  %6792 = vmatpush.msk.msrb.mxu1 %vm13651_vm5, %v13495_v18  ;;  %vm13659_vm4 = vcmp.eq.s32.totalorder %v13658_v7, %v10801_v36  ;;  %vm13660_vm5 = vcmp.eq.s32.totalorder %v11112_v25, %v10801_v36  ;;  %v13669_v27 = vand.u32 4294901760, %v11290_v34  ;;  %13678 = vst [vmem:[#allocation32_spill] sm:$0xff] %v11865_v31 }
 0x609   :  { %6811 = vmatpush.msk.msrb.mxu2 %vm5101_vm13, %v13495_v18  ;;  %5576 = vmatmul.f32.vlgmr.msrb.gmra.mxu0 %v10875_v33 }
 0x60a   :  { %5753 = vmatpush.msrb.mxu3 %v5752_v3  ;;  %5761 = vmatpush.msra.mxu0 %v13652_v17  ;;  %v4269_v3 = vadd.f32 %v4268_v61, %v4230_v40  ;;  %v11764_v17 = vadd.s32 368, %v10784_v4  ;;  %v11951_v40 = vadd.s32 296, %v10784_v4 }
 0x60b   :  { %6793 = vmatpush.msk.msrb.mxu1 %vm13654_vm2, %v13495_v18  ;;  %6812 = vmatpush.msk.msrb.mxu2 %vm5100_vm1, %v13495_v18  ;;  %vm13664_vm2 = vcmp.eq.s32.totalorder %v13663_v45, %v10801_v36 }
 0x60c   :  { %5755 = vmatmul.f32.vlgmr.msrb.gmra.mxu3 %v11562_v38  ;;  %5654 = vmatmul.f32.vlgmr.msrb.gmra.mxu2 %v5653_v50  ;;  %13681 = vst [vmem:[#allocation52_spill] sm:$0xff] %v11951_v40 }
 0x60d   :  { %6829 = vmatpush.msk.msra.mxu3 %vm13655_vm3, %v13495_v18  ;;  %5764 = vmatpush.msra.mxu0 %v13656_v44  ;;  %vm13665_vm3 = vcmp.eq.s32.totalorder %v11126_v6, %v10801_v36  ;;  %v4426_v6 = vpop.f32.mrf.mxu3 }
 0x60e   :  { %5855 = vmatpush.msra.mxu2 %v13657_v5  ;;  %6794 = vmatpush.msk.msrb.mxu1 %vm13659_vm4, %v13495_v18  ;;  %vm13667_vm4 = vcmp.eq.s32.totalorder %v10784_v4, %v10801_v36 }
 0x60f   :  { %6830 = vmatpush.msk.msra.mxu3 %vm13660_vm5, %v13495_v18  ;;  %5767 = vmatpush.msra.mxu0 %v13661_v59  ;;  %vm13668_vm5 = vcmp.eq.s32.totalorder %v11056_v46, %v10801_v36  ;;  %v4337_v43 = vpop.f32.mrf.mxu0  ;;  %v13672_v46 = vand.u32 4294901760, %v11316_v42 }
 0x610   :  { %5859 = vmatpush.msra.mxu2 %v13662_v2  ;;  %6795 = vmatpush.msk.msrb.mxu1 %vm13664_vm2, %v13495_v18  ;;  %vm13671_vm2 = vcmp.eq.s32.totalorder %v11112_v25, %v10801_v36  ;;  %v13673_v25 = vand.u32 4294901760, %v13670_v37 }
 0x611   :  { %6831 = vmatpush.msk.msra.mxu3 %vm13665_vm3, %v13495_v18  ;;  %5770 = vmatpush.msra.mxu0 %v11290_v34  ;;  %v4338_v34 = vadd.f32 %v4337_v43, %v4269_v3 }
 0x612   :  { %5863 = vmatpush.msra.mxu2 %v13666_v63  ;;  %6796 = vmatpush.msk.msrb.mxu1 %vm13667_vm4, %v13495_v18  ;;  %vm5131_vm4 = vcmp.eq.s32.totalorder %v11750_v54, %v10801_v36 }
 0x613   :  { %6832 = vmatpush.msk.msra.mxu3 %vm5112_vm8, %v13495_v18  ;;  %5613 = vmatmul.f32.vlgmr.msrb.gmra.mxu1 %v10875_v33  ;;  %v4400_v33 = vpop.f32.mrf.mxu2  ;;  %v6732_v15 = vsel %vm5131_vm4, 1.0, %v13614_v21 }
 0x614   :  { %5773 = vmatpush.msra.mxu0 %v11316_v42  ;;  %6813 = vmatpush.msk.msra.mxu1 %vm13668_vm5, %v13495_v18 }
 0x615   :  { %5867 = vmatpush.msra.mxu2 %v13669_v27  ;;  %6833 = vmatpush.msk.msra.mxu3 %vm5111_vm9, %v13495_v18  ;;  %v11980_v27 = vadd.s32 288, %v10784_v4 }
 0x616   :  { %5776 = vmatpush.msra.mxu0 %v13670_v37  ;;  %6814 = vmatpush.msk.msra.mxu1 %vm13671_vm2, %v13495_v18  ;;  %vm13187_vm2 = vcmp.eq.s32.totalorder %v11819_v20, %v10801_v36 }
 0x617   :  { %5871 = vmatpush.msra.mxu2 %v13672_v46  ;;  %6834 = vmatpush.msk.msra.mxu3 %vm5110_vm10, %v13495_v18  ;;  %v6727_v5 = vsel %vm13187_vm2, 1.0, %v13614_v21  ;;  %13682 = vst [vmem:[#allocation27_spill] sm:$0xff] %v11980_v27 }
 0x618   :  { %5779 = vmatpush.msra.mxu0 %v11374_v12  ;;  %6815 = vmatpush.msk.msra.mxu1 %vm13665_vm3, %v13495_v18  ;;  %v4374_v50 = vpop.f32.mrf.mxu1  ;;  %v11780_v12 = vadd.s32 360, %v10784_v4  ;;  %v11930_v45 = vsub.f32 %v6727_v5, %v6727_v5 }
 0x619   :  { %5875 = vmatpush.msra.mxu2 %v13673_v25  ;;  %6835 = vmatpush.msk.msra.mxu3 %vm5109_vm11, %v13495_v18  ;;  %v4375_v42 = vadd.f32 %v4374_v50, %v4338_v34  ;;  %v12010_v25 = vadd.s32 280, %v10784_v4 }
 0x61a   :  { %5782 = vmatpush.msra.mxu0 %v11400_v52  ;;  %6816 = vmatpush.msk.msra.mxu1 %vm5112_vm8, %v13495_v18  ;;  %vm13676_vm8 = vcmp.eq.s32.totalorder %v11293_v48, %v10801_v36  ;;  %v11805_v52 = vadd.s32 352, %v10784_v4  ;;  %v13195_v46 = vand.u32 4294901760, %v11930_v45 }
 0x61b   :  { %5879 = vmatpush.msra.mxu2 %v13674_v57  ;;  %6836 = vmatpush.msk.msra.mxu3 %vm5108_vm6, %v13495_v18  ;;  %v4401_v13 = vadd.f32 %v4400_v33, %v4375_v42  ;;  %13683 = vst [vmem:[#allocation53_spill] sm:$0xff] %v12010_v25 }
 0x61c   :  { %5785 = vmatpush.msra.mxu0 %v11410_v19  ;;  %6817 = vmatpush.msk.msra.mxu1 %vm5111_vm9, %v13495_v18  ;;  %vm5130_vm9 = vcmp.eq.s32.totalorder %v11764_v17, %v10801_v36  ;;  %v11808_v19 = vadd.s32 344, %v10784_v4 }
 0x61d   :  { %5883 = vmatpush.msra.mxu2 %v13675_v41  ;;  %6837 = vmatpush.msk.msra.mxu3 %vm13676_vm8, %v13495_v18  ;;  %v4427_v53 = vadd.f32 %v4426_v6, %v4401_v13  ;;  %v12023_v6 = vadd.s32 272, %v10784_v4 }
 0x61e   :  { %5788 = vmatpush.msra.mxu0 %v11441_v22  ;;  %6818 = vmatpush.msk.msra.mxu1 %vm5110_vm10, %v13495_v18  ;;  %vm5129_vm10 = vcmp.eq.s32.totalorder %v11780_v12, %v10801_v36  ;;  %v6731_v22 = vsel %vm5130_vm9, 1.0, %v13614_v21  ;;  %vm5127_vm5 = vcmp.eq.s32.totalorder %v11808_v19, %v10801_v36 }
 0x61f   :  { %5887 = vmatpush.msra.mxu2 %v5708_v9  ;;  %6838 = vmatpush.msk.msra.mxu3 %vm5106_vm0, %v13495_v18  ;;  %v4450_v9 = vpop.f32.mrf.mxu2  ;;  %v11857_v48 = vsub.f32 %v6731_v22, %v6731_v22  ;;  %v6728_v24 = vsel %vm5127_vm5, 1.0, %v13614_v21  ;;  %13684 = vst [vmem:[#allocation39_spill] sm:$0xff] %v12023_v6 }
 0x620   :  { %5791 = vmatpush.msra.mxu0 %v11462_v23  ;;  %6819 = vmatpush.msk.msra.mxu1 %vm5109_vm11, %v13495_v18  ;;  %vm13677_vm11 = vmmov %vm13676_vm8  ;;  %v4451_v8 = vadd.f32 %v4450_v9, %v4427_v53  ;;  %v6730_v23 = vsel %vm5129_vm10, 1.0, %v13614_v21 }
 0x621   :  { %5891 = vmatpush.msra.mxu2 %v5714_v26  ;;  %6839 = vmatpush.msk.msra.mxu3 %vm5105_vm15, %v13495_v18  ;;  %v11836_v26 = vsub.f32 %v6732_v15, %v6732_v15  ;;  %v13200_v11 = vand.u32 4294901760, %v11857_v48 }
 0x622   :  { %5794 = vmatpush.msra.mxu0 %v11482_v56  ;;  %6820 = vmatpush.msk.msra.mxu1 %vm5108_vm6, %v13495_v18  ;;  %vm5128_vm6 = vcmp.eq.s32.totalorder %v11805_v52, %v10801_v36  ;;  %v11873_v56 = vadd.s32 312, %v10784_v4 }
 0x623   :  { %5895 = vmatpush.msra.mxu2 %v5720_v60  ;;  %6840 = vmatpush.msk.msra.mxu3 %vm5104_vm12, %v13495_v18  ;;  %v4474_v60 = vpop.f32.mrf.mxu3  ;;  %v6729_v44 = vsel %vm5128_vm6, 1.0, %v13614_v21  ;;  %v13202_v59 = vand.u32 4294901760, %v11836_v26  ;;  %v11965_v43 = vsub.f32 %v11857_v48, %v13200_v11  ;;  %v12249_v11 = vadd.s32 464, %v10784_v4 }
 0x624   :  { %5797 = vmatpush.msra.mxu0 %v11504_v10  ;;  %6821 = vmatpush.msk.msra.mxu1 %vm13677_vm11, %v13495_v18  ;;  %13679 = vst [vmem:[#allocation4_spill] sm:$0xff] %v11873_v56  ;;  %v11892_v10 = vadd.s32 304, %v10784_v4  ;;  %vm13199_vm3 = vcmp.eq.s32.totalorder %v11873_v56, %v10801_v36 }
 0x625   :  { %5899 = vmatpush.msra.mxu2 %v5726_v35  ;;  %6841 = vmatpush.msk.msra.mxu3 %vm5103_vm7, %v13495_v18  ;;  %v11881_v35 = vsub.f32 %v6730_v23, %v6730_v23  ;;  %v6002_v63 = vsub.f32 %v11836_v26, %v13202_v59  ;;  %v6724_v3 = vsel %vm13199_vm3, 1.0, %v13614_v21  ;;  %v6009_v57 = vand.u32 4294901760, %v11965_v43 }
 0x626   :  { %5800 = vmatpush.msra.mxu0 %v11526_v32  ;;  %6822 = vmatpush.msk.msra.mxu1 %vm5106_vm0, %v13495_v18  ;;  %13680 = vst [vmem:[#allocation24_spill] sm:$0xff] %v11892_v10  ;;  %vm13193_vm0 = vcmp.eq.s32.totalorder %v11865_v31, %v10801_v36  ;;  %v11920_v32 = vsub.f32 %v6729_v44, %v6729_v44  ;;  %v12085_v44 = vadd.s32 264, %v10784_v4  ;;  %v12133_v43 = vadd.s32 256, %v10784_v4 }
 0x627   :  { %5903 = vmatpush.msra.mxu2 %v5732_v30  ;;  %6842 = vmatpush.msk.msra.mxu3 %vm5102_vm14, %v13495_v18  ;;  %v4475_v30 = vadd.f32 %v4474_v60, %v4451_v8  ;;  %v4498_v7 = vpop.f32.mrf.mxu2  ;;  %v13198_v2 = vand.u32 4294901760, %v11881_v35  ;;  %vm13204_vm8 = vcmp.eq.s32.totalorder %v11892_v10, %v10801_v36  ;;  %v12005_v50 = vsub.f32 %v6724_v3, %v6724_v3 }
 0x628   :  { %5803 = vmatpush.msra.mxu0 %v11542_v16  ;;  %6823 = vmatpush.msk.msra.mxu1 %vm5105_vm15, %v13495_v18  ;;  %vm13188_vm15 = vcmp.eq.s32.totalorder %v11862_v0, %v10801_v36  ;;  %v13197_v47 = vand.u32 4294901760, %v11920_v32  ;;  %v6003_v49 = vand.u32 4294901760, %v6002_v63  ;;  %v12066_v8 = vsub.f32 %v11930_v45, %v13195_v46  ;;  %13685 = vst [vmem:[#allocation2_spill] sm:$0xff] %v12085_v44 }
 0x629   :  { %5907 = vmatpush.msra.mxu2 %v5738_v39  ;;  %6843 = vmatpush.msk.msra.mxu3 %vm5101_vm13, %v13495_v18  ;;  %v11922_v39 = vsub.f32 %v6728_v24, %v6728_v24  ;;  %v4499_v1 = vadd.f32 %v4498_v7, %v4475_v30  ;;  %v6726_v16 = vsel %vm13188_vm15, 1.0, %v13614_v21  ;;  %v13190_v23 = vand.u32 4294901760, %v12005_v50  ;;  %13686 = vst [vmem:[#allocation5_spill] sm:$0xff] %v12133_v43 }
 0x62a   :  { %5806 = vmatpush.msra.mxu0 %v11570_v62  ;;  %6824 = vmatpush.msk.msra.mxu1 %vm5104_vm12, %v13495_v18  ;;  %v11995_v37 = vsub.f32 %v6726_v16, %v6726_v16  ;;  %vm13207_vm12 = vcmp.eq.s32.totalorder %v11951_v40, %v10801_v36  ;;  %v6020_v13 = vsub.f32 %v11920_v32, %v13197_v47  ;;  %v12095_v30 = vadd.s32 504, %v10784_v4 }
 0x62b   :  { %5911 = vmatpush.msra.mxu2 %v5744_v14  ;;  %5809 = vmatmul.f32.vlgmr.msra.gmra.mxu0 %v11594_v51  ;;  %v6725_v14 = vsel %vm13193_vm0, 1.0, %v13614_v21  ;;  %v4520_v61 = vpop.f32.mrf.mxu3  ;;  %v13196_v62 = vand.u32 4294901760, %v11922_v39  ;;  %v6722_v9 = vsel %vm13207_vm12, 1.0, %v13614_v21  ;;  %v12117_v16 = vadd.s32 496, %v10784_v4 }
 0x62c   :  { %6844 = vmatpush.msk.msra.mxu3 %vm5100_vm1, %v13495_v18  ;;  %6845 = vmatpush.msk.msrb.mxu0 %vm5131_vm4, %v13495_v18  ;;  %v11997_v33 = vsub.f32 %v6725_v14, %v6725_v14  ;;  %v4521_v34 = vadd.f32 %v4520_v61, %v4499_v1  ;;  %v13192_v53 = vand.u32 4294901760, %v11995_v37  ;;  %v6021_v51 = vand.u32 4294901760, %v6020_v13 }
 0x62d   :  { %6825 = vmatpush.msk.msra.mxu1 %vm5103_vm7, %v13495_v18  ;;  %5915 = vmatpush.msra.mxu2 %v5750_v28  ;;  %v6723_v28 = vsel %vm13204_vm8, 1.0, %v13614_v21  ;;  %v12037_v41 = vsub.f32 %v11922_v39, %v13196_v62  ;;  %vm13217_vm7 = vcmp.eq.s32.totalorder %v12023_v6, %v10801_v36  ;;  %v12092_v24 = vsub.f32 %v6722_v9, %v6722_v9 }
 0x62e   :  { %5954 = vmatmul.f32.vlgmr.msra.gmra.mxu3 %v11562_v38  ;;  %5917 = vmatmul.f32.vlgmr.msra.gmra.mxu2 %v11562_v38  ;;  %v11993_v38 = vsub.f32 %v11881_v35, %v13198_v2  ;;  %v12020_v42 = vsub.f32 %v6723_v28, %v6723_v28  ;;  %v13191_v15 = vand.u32 4294901760, %v11997_v33  ;;  %v12056_v22 = vand.u32 4294901760, %v4521_v34 }
 0x62f   :  { %6861 = vmatpush.msk.msrb.mxu3 %vm5131_vm4, %v13495_v18  ;;  %6846 = vmatpush.msk.msrb.mxu0 %vm5130_vm9, %v13495_v18  ;;  %v12105_v5 = vsub.f32 %v11995_v37, %v13192_v53  ;;  %v6719_v63 = vsel %vm13217_vm7, 1.0, %v13614_v21  ;;  %v6033_v3 = vand.u32 4294901760, %v12066_v8  ;;  %v12144_v28 = vsub.f32 %v12005_v50, %v13190_v23 }
 0x630   :  { %6102 = vmatpush.msrb.mxu2 %v11836_v26  ;;  %6826 = vmatpush.msk.msra.mxu1 %vm5102_vm14, %v13495_v18  ;;  %vm13209_vm14 = vcmp.eq.s32.totalorder %v11980_v27, %v10801_v36  ;;  %v6015_v55 = vand.u32 4294901760, %v11993_v38  ;;  %v13189_v60 = vand.u32 4294901760, %v12020_v42  ;;  %v12110_v7 = vsub.f32 %v11997_v33, %v13191_v15 }
 0x631   :  { %6862 = vmatpush.msk.msrb.mxu3 %vm5130_vm9, %v13495_v18  ;;  %6847 = vmatpush.msk.msrb.mxu0 %vm5129_vm10, %v13495_v18  ;;  %v6721_v58 = vsel %vm13209_vm14, 1.0, %v13614_v21  ;;  %v12120_v14 = vsub.f32 %v4521_v34, %v12056_v22  ;;  %vm13231_vm11 = vcmp.eq.s32.totalorder %v12095_v30, %v10801_v36  ;;  %v6039_v13 = vand.u32 4294901760, %v12105_v5 }
 0x632   :  { %6105 = vmatpush.msrb.mxu2 %v11857_v48  ;;  %6827 = vmatpush.msk.msra.mxu1 %vm5101_vm13, %v13495_v18  ;;  %vm13213_vm13 = vcmp.eq.s32.totalorder %v12010_v25, %v10801_v36  ;;  %v12126_v61 = vsub.f32 %v6721_v58, %v6721_v58  ;;  %v12149_v38 = vsub.f32 %v12020_v42, %v13189_v60  ;;  %v4716_v8 = vpop.f32.mrf.mxu0  ;;  %v12188_v5 = vadd.s32 480, %v10784_v4 }
 0x633   :  { %6863 = vmatpush.msk.msrb.mxu3 %vm5129_vm10, %v13495_v18  ;;  %6848 = vmatpush.msk.msrb.mxu0 %vm5128_vm6, %v13495_v18  ;;  %v6720_v1 = vsel %vm13213_vm13, 1.0, %v13614_v21  ;;  %v13201_v9 = vand.u32 4294901760, %v12120_v14  ;;  %v12233_v47 = vadd.s32 472, %v10784_v4  ;;  %v12410_v6 = vadd.s32 424, %v10784_v4 }
 0x634   :  { %6108 = vmatpush.msrb.mxu2 %v11881_v35  ;;  %6828 = vmatpush.msk.msra.mxu1 %vm5100_vm1, %v13495_v18  ;;  %vm13225_vm1 = vcmp.eq.s32.totalorder %v12085_v44, %v10801_v36  ;;  %v12157_v34 = vsub.f32 %v6720_v1, %v6720_v1  ;;  %v13203_v1 = vand.u32 4294901760, %v12126_v61  ;;  %v13693_v25 = vand.u32 4294901760, %v12149_v38 }
 0x635   :  { %6864 = vmatpush.msk.msrb.mxu3 %vm5128_vm6, %v13495_v18  ;;  %5848 = vmatmul.f32.vlgmr.msra.gmra.mxu1 %v5651_v29  ;;  %v6027_v29 = vand.u32 4294901760, %v12037_v41  ;;  %v6045_v41 = vand.u32 4294901760, %v12110_v7  ;;  %v6718_v58 = vsel %vm13225_vm1, 1.0, %v13614_v21  ;;  %v4662_v23 = vpop.f32.mrf.mxu3  ;;  %v12238_v2 = vsub.f32 %v12120_v14, %v13201_v9 }
 0x636   :  { %6849 = vmatpush.msk.msrb.mxu0 %vm5127_vm5, %v13495_v18  ;;  %6004 = vmatpush.msrb.mxu1 %v6003_v49  ;;  %13687 = vst [vmem:[#allocation15_spill] sm:$0xff] %v12157_v34  ;;  %v13194_v49 = vand.u32 4294901760, %v12092_v24  ;;  %v4561_v60 = vpop.f32.mrf.mxu2  ;;  %v13205_v15 = vand.u32 4294901760, %v12157_v34  ;;  %v12309_v7 = vadd.s32 448, %v10784_v4 }
 0x637   :  { %6111 = vmatpush.msrb.mxu2 %v11920_v32  ;;  %6865 = vmatpush.msk.msrb.mxu3 %vm5127_vm5, %v13495_v18  ;;  %v4663_v9 = vadd.f32 %v4662_v23, %v4561_v60 }
 0x638   :  { %6850 = vmatpush.msk.msrb.mxu0 %vm13187_vm2, %v13495_v18  ;;  %6010 = vmatpush.msrb.mxu1 %v6009_v57  ;;  %v12163_v57 = vadd.s32 488, %v10784_v4  ;;  %v12275_v60 = vsub.f32 %v12157_v34, %v13205_v15 }
 0x639   :  { %6114 = vmatpush.msrb.mxu2 %v11922_v39  ;;  %6866 = vmatpush.msk.msrb.mxu3 %vm13187_vm2, %v13495_v18  ;;  %vm13233_vm2 = vcmp.eq.s32.totalorder %v12117_v16, %v10801_v36  ;;  %v4717_v40 = vadd.f32 %v4716_v8, %v4663_v9  ;;  %v12334_v8 = vadd.s32 440, %v10784_v4 }
 0x63a   :  { %6851 = vmatpush.msk.msrb.mxu0 %vm13188_vm15, %v13495_v18  ;;  %6016 = vmatpush.msrb.mxu1 %v6015_v55  ;;  %v12172_v55 = vsub.f32 %v6719_v63, %v6719_v63  ;;  %v6748_v63 = vsel %vm13231_vm11, 1.0, %v13614_v21  ;;  %v6747_v53 = vsel %vm13233_vm2, 1.0, %v13614_v21 }
 0x63b   :  { %6117 = vmatpush.msrb.mxu2 %v11930_v45  ;;  %6867 = vmatpush.msk.msrb.mxu3 %vm13188_vm15, %v13495_v18  ;;  %vm13229_vm15 = vcmp.eq.s32.totalorder %v12133_v43, %v10801_v36  ;;  %v12323_v15 = vpop.f32.mrf.mxu0 }
 0x63c   :  { %13688 = vst [vmem:[#allocation6_spill] sm:$0xff] %v12172_v55  ;;  %6852 = vmatpush.msk.msrb.mxu0 %vm13193_vm0, %v13495_v18  ;;  %6022 = vmatpush.msrb.mxu1 %v6021_v51  ;;  %v6051_v51 = vand.u32 4294901760, %v12144_v28  ;;  %v12209_v28 = vsub.f32 %v12092_v24, %v13194_v49  ;;  %v12225_v49 = vsub.f32 %v6718_v58, %v6718_v58  ;;  %v6717_v46 = vsel %vm13229_vm15, 1.0, %v13614_v21 }
 0x63d   :  { %6120 = vmatpush.msrb.mxu2 %v11995_v37  ;;  %6868 = vmatpush.msk.msrb.mxu3 %vm13193_vm0, %v13495_v18  ;;  %vm13234_vm0 = vcmp.eq.s32.totalorder %v12163_v57, %v10801_v36  ;;  %v13206_v62 = vand.u32 4294901760, %v12172_v55  ;;  %v12244_v58 = vsub.f32 %v6748_v63, %v6748_v63  ;;  %v12261_v63 = vsub.f32 %v6747_v53, %v6747_v53 }
 0x63e   :  { %6853 = vmatpush.msk.msrb.mxu0 %vm13199_vm3, %v13495_v18  ;;  %6028 = vmatpush.msrb.mxu1 %v6027_v29  ;;  %v12223_v29 = vpop.f32.mrf.mxu1  ;;  %v6746_v59 = vsel %vm13234_vm0, 1.0, %v13614_v21  ;;  %v6063_v23 = vand.u32 4294901760, %v12209_v28  ;;  %v12277_v53 = vsub.f32 %v6717_v46, %v6717_v46  ;;  %v5994_v28 = vand.u32 4294901760, %v12238_v2 }
 0x63f   :  { %6123 = vmatpush.msrb.mxu2 %v11997_v33  ;;  %6869 = vmatpush.msk.msrb.mxu3 %vm13199_vm3, %v13495_v18  ;;  %13689 = vst [vmem:[#allocation17_spill] sm:$0xff] %v12244_v58  ;;  %vm5144_vm3 = vcmp.eq.s32.totalorder %v12188_v5, %v10801_v36  ;;  %v4756_v56 = vadd.f32 %v12223_v29, %v4717_v40 }
 0x640   :  { %6854 = vmatpush.msk.msrb.mxu0 %vm13204_vm8, %v13495_v18  ;;  %6034 = vmatpush.msrb.mxu1 %v6033_v3  ;;  %v12259_v3 = vsub.f32 %v12126_v61, %v13203_v1  ;;  %13690 = vst [vmem:[#allocation8_spill] sm:$0xff] %v12261_v63  ;;  %v12280_v1 = vadd.s32 456, %v10784_v4  ;;  %v6745_v46 = vsel %vm5144_vm3, 1.0, %v13614_v21  ;;  %v13696_v29 = vand.u32 4294901760, %v12277_v53 }
 0x641   :  { %6126 = vmatpush.msrb.mxu2 %v12005_v50  ;;  %6870 = vmatpush.msk.msrb.mxu3 %vm13204_vm8, %v13495_v18  ;;  %vm5143_vm8 = vcmp.eq.s32.totalorder %v12233_v47, %v10801_v36  ;;  %v12325_v2 = vsub.f32 %v6745_v46, %v6745_v46 }
 0x642   :  { %6855 = vmatpush.msk.msrb.mxu0 %vm13207_vm12, %v13495_v18  ;;  %6040 = vmatpush.msrb.mxu1 %v6039_v13  ;;  %v12290_v13 = vsub.f32 %v12172_v55, %v13206_v62  ;;  %v12304_v62 = vsub.f32 %v6746_v59, %v6746_v59  ;;  %v6744_v9 = vsel %vm5143_vm8, 1.0, %v13614_v21  ;;  %v12382_v59 = vadd.s32 432, %v10784_v4 }
 0x643   :  { %6129 = vmatpush.msrb.mxu2 %v12020_v42  ;;  %6871 = vmatpush.msk.msrb.mxu3 %vm13207_vm12, %v13495_v18  ;;  %vm5142_vm12 = vcmp.eq.s32.totalorder %v12249_v11, %v10801_v36 }
 0x644   :  { %6856 = vmatpush.msk.msrb.mxu0 %vm13209_vm14, %v13495_v18  ;;  %6046 = vmatpush.msrb.mxu1 %v6045_v41  ;;  %13691 = vst [vmem:[#allocation16_spill] sm:$0xff] %v12304_v62  ;;  %v6069_v41 = vand.u32 4294901760, %v12259_v3  ;;  %v13692_v3 = vand.u32 4294901760, %v12225_v49  ;;  %v6743_v27 = vsel %vm5142_vm12, 1.0, %v13614_v21  ;;  %v6081_v10 = vand.u32 4294901760, %v12290_v13 }
 0x645   :  { %6132 = vmatpush.msrb.mxu2 %v12092_v24  ;;  %6872 = vmatpush.msk.msrb.mxu3 %vm13209_vm14, %v13495_v18  ;;  %vm5141_vm14 = vcmp.eq.s32.totalorder %v12280_v1, %v10801_v36  ;;  %v13697_v44 = vand.u32 4294901760, %v12304_v62 }
 0x646   :  { %6857 = vmatpush.msk.msrb.mxu0 %vm13213_vm13, %v13495_v18  ;;  %6052 = vmatpush.msrb.mxu1 %v6051_v51  ;;  %v6075_v51 = vand.u32 4294901760, %v12275_v60  ;;  %v12345_v46 = vsub.f32 %v12225_v49, %v13692_v3  ;;  %v13694_v60 = vand.u32 4294901760, %v12244_v58  ;;  %v12370_v38 = vpop.f32.mrf.mxu1  ;;  %v6742_v13 = vsel %vm5141_vm14, 1.0, %v13614_v21 }
 0x647   :  { %6135 = vmatpush.msrb.mxu2 %v12126_v61  ;;  %6873 = vmatpush.msk.msrb.mxu3 %vm13213_vm13, %v13495_v18  ;;  %vm5140_vm13 = vcmp.eq.s32.totalorder %v12309_v7, %v10801_v36 }
 0x648   :  { %6858 = vmatpush.msk.msrb.mxu0 %vm13217_vm7, %v13495_v18  ;;  %6058 = vmatpush.msrb.mxu1 %v13693_v25  ;;  %v6343_v3 = vsub.f32 %v12244_v58, %v13694_v60  ;;  %v13695_v25 = vand.u32 4294901760, %v12261_v63  ;;  %v12375_v58 = vsub.f32 %v6744_v9, %v6744_v9  ;;  %v12390_v9 = vsub.f32 %v6743_v27, %v6743_v27 }
 0x649   :  { %6138 = vmatpush.msrb.mxu2 %v12157_v34  ;;  %6874 = vmatpush.msk.msrb.mxu3 %vm13217_vm7, %v13495_v18  ;;  %vm13230_vm7 = vcmp.eq.s32.totalorder %v12334_v8, %v10801_v36  ;;  %v6087_v40 = vand.u32 4294901760, %v12345_v46  ;;  %v6741_v27 = vsel %vm5140_vm13, 1.0, %v13614_v21 }
 0x64a   :  { %v6349_v60 = vsub.f32 %v12261_v63, %v13695_v25  ;;  %6859 = vmatpush.msk.msrb.mxu0 %vm13225_vm1, %v13495_v18  ;;  %6064 = vmatpush.msrb.mxu1 %v6063_v23  ;;  %v12403_v23 = vsub.f32 %v12277_v53, %v13696_v29  ;;  %v6344_v46 = vand.u32 4294901760, %v6343_v3  ;;  %v6355_v29 = vsub.f32 %v12304_v62, %v13697_v44 }
 0x64b   :  { %6141 = vmatpush.msrb.mxu2 %v12172_v55  ;;  %6875 = vmatpush.msk.msrb.mxu3 %vm13225_vm1, %v13495_v18  ;;  %v4824_v25 = vpop.f32.mrf.mxu2  ;;  %v12419_v55 = vsub.f32 %v6742_v13, %v6742_v13  ;;  %v6740_v31 = vsel %vm13230_vm7, 1.0, %v13614_v21  ;;  %vm5138_vm1 = vcmp.eq.s32.totalorder %v12382_v59, %v10801_v36  ;;  %v12442_v34 = vsub.f32 %v6741_v27, %v6741_v27  ;;  %v4937_v27 = vpop.f32.mrf.mxu0 }
 0x64c   :  { %6860 = vmatpush.msk.msrb.mxu0 %vm13229_vm15, %v13495_v18  ;;  %6070 = vmatpush.msrb.mxu1 %v6069_v41  ;;  %v4825_v63 = vadd.f32 %v4824_v25, %v4756_v56  ;;  %v12430_v41 = vadd.s32 416, %v10784_v4  ;;  %v13698_v56 = vand.u32 4294901760, %v11836_v26  ;;  %v6350_v44 = vand.u32 4294901760, %v6349_v60 }
 0x64d   :  { %6144 = vmatpush.msrb.mxu2 %v12225_v49  ;;  %5995 = vmatmul.f32.vlgmr.msrb.gmra.mxu0 %v5994_v28  ;;  %v13699_v28 = vand.u32 4294901760, %v12325_v2  ;;  %v13232_v25 = vand.u32 4294901760, %v12390_v9  ;;  %v6093_v62 = vand.u32 4294901760, %v12403_v23  ;;  %v12449_v26 = vadd.s32 408, %v10784_v4 }
 0x64e   :  { %6876 = vmatpush.msk.msrb.mxu3 %vm13229_vm15, %v13495_v18  ;;  %6196 = vmatpush.msra.mxu0 %v13698_v56  ;;  %v4861_v13 = vpop.f32.mrf.mxu3  ;;  %vm5137_vm15 = vcmp.eq.s32.totalorder %v12410_v6, %v10801_v36  ;;  %v13700_v60 = vand.u32 4294901760, %v12120_v14  ;;  %v6356_v56 = vand.u32 4294901760, %v6355_v29  ;;  %v13701_v23 = vand.u32 4294901760, %v11857_v48 }
 0x64f   :  { %v6361_v3 = vsub.f32 %v12325_v2, %v13699_v28  ;;  %6076 = vmatpush.msrb.mxu1 %v6075_v51  ;;  %6147 = vmatpush.msrb.mxu2 %v12277_v53  ;;  %v4862_v43 = vadd.f32 %v4861_v13, %v4825_v63  ;;  %v6378_v51 = vand.u32 4294901760, %v12419_v55  ;;  %v12455_v28 = vsub.f32 %v6740_v31, %v6740_v31 }
 0x650   :  { %6189 = vmatmul.f32.vlgmr.msrb.gmra.mxu3 %v13700_v60  ;;  %6150 = vmatmul.f32.vlgmr.msrb.gmra.mxu2 %v12120_v14  ;;  %v6739_v63 = vsel %vm5138_vm1, 1.0, %v13614_v21  ;;  %v13702_v13 = vand.u32 4294901760, %v12375_v58  ;;  %vm5136_vm7 = vcmp.eq.s32.totalorder %v12430_v41, %v10801_v36  ;;  %v12470_v31 = vadd.s32 400, %v10784_v4 }
 0x651   :  { %6345 = vmatpush.msra.mxu3 %v6344_v46  ;;  %6200 = vmatpush.msra.mxu0 %v13701_v23  ;;  %v4888_v14 = vadd.f32 %v12323_v15, %v4862_v43  ;;  %v6362_v48 = vand.u32 4294901760, %v6361_v3  ;;  %v6373_v46 = vsub.f32 %v12390_v9, %v13232_v25  ;;  %v6384_v29 = vand.u32 4294901760, %v12442_v34  ;;  %v4961_v23 = vpop.f32.mrf.mxu1 }
 0x652   :  { %v6367_v60 = vsub.f32 %v12375_v58, %v13702_v13  ;;  %6893 = vmatpush.msk.msra.mxu2 %vm13231_vm11, %v13495_v18  ;;  %6082 = vmatpush.msrb.mxu1 %v6081_v10  ;;  %v6738_v15 = vsel %vm5137_vm15, 1.0, %v13614_v21  ;;  %v13703_v43 = vand.u32 4294901760, %v11881_v35  ;;  %v12487_v10 = vsub.f32 %v6739_v63, %v6739_v63 }
 0x653   :  { %6351 = vmatpush.msra.mxu3 %v6350_v44  ;;  %v4914_v13 = vadd.f32 %v12370_v38, %v4888_v14  ;;  %vm5135_vm11 = vcmp.eq.s32.totalorder %v12449_v26, %v10801_v36  ;;  %v12492_v3 = vadd.s32 392, %v10784_v4  ;;  %v6379_v35 = vsub.f32 %v12419_v55, %v6378_v51 }
 0x654   :  { %6204 = vmatpush.msra.mxu0 %v13703_v43  ;;  %6894 = vmatpush.msk.msra.mxu2 %vm13233_vm2, %v13495_v18  ;;  %v6390_v38 = vand.u32 4294901760, %v12455_v28  ;;  %v6737_v44 = vsel %vm5136_vm7, 1.0, %v13614_v21  ;;  %v13704_v63 = vand.u32 4294901760, %v11920_v32  ;;  %v6368_v14 = vand.u32 4294901760, %v6367_v60 }
 0x655   :  { %6088 = vmatpush.msrb.mxu1 %v6087_v40  ;;  %6357 = vmatpush.msra.mxu3 %v6356_v56  ;;  %v4938_v43 = vadd.f32 %v4937_v27, %v4914_v13  ;;  %v12508_v25 = vsub.f32 %v6738_v15, %v6738_v15  ;;  %vm5134_vm2 = vcmp.eq.s32.totalorder %v12470_v31, %v10801_v36  ;;  %v6374_v40 = vand.u32 4294901760, %v6373_v46 }
 0x656   :  { %6208 = vmatpush.msra.mxu0 %v13704_v63  ;;  %6895 = vmatpush.msk.msra.mxu2 %vm13234_vm0, %v13495_v18  ;;  %v6385_v56 = vsub.f32 %v12442_v34, %v6384_v29  ;;  %v6736_v32 = vsel %vm5135_vm11, 1.0, %v13614_v21  ;;  %v12524_v27 = vadd.s32 384, %v10784_v4  ;;  %v6396_v60 = vand.u32 4294901760, %v12487_v10 }
 0x657   :  { %6094 = vmatpush.msrb.mxu1 %v6093_v62  ;;  %6363 = vmatpush.msra.mxu3 %v6362_v48  ;;  %v4962_v15 = vadd.f32 %v4961_v23, %v4938_v43  ;;  %v12528_v62 = vsub.f32 %v6737_v44, %v6737_v44  ;;  %vm5133_vm0 = vcmp.eq.s32.totalorder %v12492_v3, %v10801_v36  ;;  %v13705_v46 = vand.u32 4294901760, %v11922_v39 }
 0x658   :  { %6096 = vmatmul.f32.vlgmr.msrb.gmra.mxu1 %v12056_v22  ;;  %v6391_v4 = vsub.f32 %v12455_v28, %v6390_v38  ;;  %v4985_v48 = vpop.f32.mrf.mxu0  ;;  %v6735_v23 = vsel %vm5134_vm2, 1.0, %v13614_v21  ;;  %6896 = vmatpush.msk.msra.mxu2 %vm5144_vm3, %v13495_v18  ;;  %v6380_v39 = vand.u32 4294901760, %v6379_v35  ;;  %v6402_v54 = vand.u32 4294901760, %v12508_v25 }
 0x659   :  { %6212 = vmatpush.msra.mxu0 %v13705_v46  ;;  %6877 = vmatpush.msk.msra.mxu1 %vm5131_vm4, %v13495_v18  ;;  %v12550_v13 = vsub.f32 %v6736_v32, %v6736_v32  ;;  %v13706_v44 = vand.u32 4294901760, %v11930_v45  ;;  %v4986_v63 = vadd.f32 %v4985_v48, %v4962_v15  ;;  %v6734_v43 = vsel %vm5133_vm0, 1.0, %v13614_v21 }
 0x65a   :  { %6369 = vmatpush.msra.mxu3 %v6368_v14  ;;  %vm5132_vm4 = vcmp.eq.s32.totalorder %v12524_v27, %v10801_v36  ;;  %6897 = vmatpush.msk.msra.mxu2 %vm5143_vm8, %v13495_v18  ;;  %v6386_v45 = vand.u32 4294901760, %v6385_v56  ;;  %v6397_v17 = vsub.f32 %v12487_v10, %v6396_v60  ;;  %v5007_v35 = vpop.f32.mrf.mxu1  ;;  %v6408_v14 = vand.u32 4294901760, %v12528_v62 }
 0x65b   :  { %6216 = vmatpush.msra.mxu0 %v13706_v44  ;;  %6878 = vmatpush.msk.msra.mxu1 %vm5130_vm9, %v13495_v18  ;;  %v12572_v32 = vsub.f32 %v6735_v23, %v6735_v23  ;;  %v13707_v15 = vand.u32 4294901760, %v11995_v37  ;;  %v6392_v46 = vand.u32 4294901760, %v6391_v4  ;;  %v6414_v56 = vand.u32 4294901760, %v12550_v13 }
 0x65c   :  { %6375 = vmatpush.msra.mxu3 %v6374_v40  ;;  %6898 = vmatpush.msk.msra.mxu2 %vm5142_vm12, %v13495_v18  ;;  %v6403_v40 = vsub.f32 %v12508_v25, %v6402_v54  ;;  %v12588_v37 = vsub.f32 %v6734_v43, %v6734_v43  ;;  %v6733_v12 = vsel %vm5132_vm4, 1.0, %v13614_v21  ;;  %v13708_v4 = vand.u32 4294901760, %v11997_v33 }
 0x65d   :  { %6220 = vmatpush.msra.mxu0 %v13707_v15  ;;  %6879 = vmatpush.msk.msra.mxu1 %vm5129_vm10, %v13495_v18  ;;  %v5008_v48 = vadd.f32 %v5007_v35, %v4986_v63  ;;  %v6398_v23 = vand.u32 4294901760, %v6397_v17  ;;  %v6409_v21 = vsub.f32 %v12528_v62, %v6408_v14  ;;  %v6420_v33 = vand.u32 4294901760, %v12572_v32 }
 0x65e   :  { %6381 = vmatpush.msra.mxu3 %v6380_v39  ;;  %6899 = vmatpush.msk.msra.mxu2 %vm5141_vm14, %v13495_v18  ;;  %v13709_v39 = vand.u32 4294901760, %v12005_v50  ;;  %v12614_v52 = vsub.f32 %v6733_v12, %v6733_v12  ;;  %v6404_v44 = vand.u32 4294901760, %v6403_v40  ;;  %v6415_v63 = vsub.f32 %v12550_v13, %v6414_v56  ;;  %v13718_v12 = vld [vmem:[#allocation15_spill] sm:$0xff] }
 0x65f   :  { %6224 = vmatpush.msra.mxu0 %v13708_v4  ;;  %6880 = vmatpush.msk.msra.mxu1 %vm5128_vm6, %v13495_v18  ;;  %v6426_v50 = vand.u32 4294901760, %v12588_v37  ;;  %v13710_v43 = vand.u32 4294901760, %v12020_v42  ;;  %vm13711_vm9 = vcmp.eq.s32.totalorder %v11819_v20, %v10801_v36  ;;  %v12630_v19 = vand.u32 4294901760, %v5008_v48 }
 0x660   :  { %6387 = vmatpush.msra.mxu3 %v6386_v45  ;;  %6900 = vmatpush.msk.msra.mxu2 %vm5140_vm13, %v13495_v18  ;;  %vm13712_vm10 = vcmp.eq.s32.totalorder %v12334_v8, %v10801_v36  ;;  %v6410_v45 = vand.u32 4294901760, %v6409_v21  ;;  %v6421_v17 = vsub.f32 %v12572_v32, %v6420_v33  ;;  %v13713_v42 = vand.u32 4294901760, %v12092_v24 }
 0x661   :  { %6228 = vmatpush.msra.mxu0 %v13709_v39  ;;  %6881 = vmatpush.msk.msra.mxu1 %vm5127_vm5, %v13495_v18  ;;  %vm13714_vm6 = vcmp.eq.s32.totalorder %v11862_v0, %v10801_v36  ;;  %v6432_v20 = vand.u32 4294901760, %v12614_v52  ;;  %v6416_v35 = vand.u32 4294901760, %v6415_v63  ;;  %v6427_v15 = vsub.f32 %v12588_v37, %v6426_v50  ;;  %v13722_v39 = vld [vmem:[#allocation6_spill] sm:$0xff]  ;;  %v13724_v63 = vld [vmem:[#allocation24_spill] sm:$0xff] }
 0x662   :  { %6393 = vmatpush.msra.mxu3 %v6392_v46  ;;  %6901 = vmatpush.msk.msra.mxu2 %vm13712_vm10, %v13495_v18  ;;  %v13715_v24 = vand.u32 4294901760, %v12126_v61  ;;  %v13716_v46 = vld [vmem:[#allocation32_spill] sm:$0xff]  ;;  %v12660_v0 = vsub.f32 %v5008_v48, %v12630_v19  ;;  %v6422_v40 = vand.u32 4294901760, %v6421_v17  ;;  %v13719_v4 = vand.u32 4294901760, %v13718_v12  ;;  %v13738_v12 = vld [vmem:[#allocation39_spill] sm:$0xff] }
 0x663   :  { %6232 = vmatpush.msra.mxu0 %v13710_v43  ;;  %6882 = vmatpush.msk.msra.mxu1 %vm13711_vm9, %v13495_v18  ;;  %vm13717_vm5 = vcmp.eq.s32.totalorder %v13716_v46, %v10801_v36  ;;  %v13720_v61 = vld [vmem:[#allocation4_spill] sm:$0xff]  ;;  %v6433_v48 = vsub.f32 %v12614_v52, %v6432_v20  ;;  %vm13725_vm10 = vcmp.eq.s32.totalorder %v13724_v63, %v10801_v36  ;;  %v13726_v43 = vand.u32 4294901760, %v12225_v49  ;;  %v13730_v49 = vld [vmem:[#allocation27_spill] sm:$0xff] }
 0x664   :  { %6399 = vmatpush.msra.mxu3 %v6398_v23  ;;  %6902 = vmatpush.msk.msra.mxu2 %vm5138_vm1, %v13495_v18  ;;  %vm13721_vm9 = vcmp.eq.s32.totalorder %v13720_v61, %v10801_v36  ;;  %v6428_v23 = vand.u32 4294901760, %v6427_v15  ;;  %v6333_v21 = vand.u32 4294901760, %v12660_v0  ;;  %v13732_v15 = vld [vmem:[#allocation17_spill] sm:$0xff]  ;;  %v13735_v46 = vld [vmem:[#allocation8_spill] sm:$0xff]  ;;  %v5314_v47 = vpop.f32.mrf.mxu0 }
 0x665   :  { %6236 = vmatpush.msra.mxu0 %v13713_v42  ;;  %6883 = vmatpush.msk.msra.mxu1 %vm13714_vm6, %v13495_v18  ;;  %v6434_v17 = vand.u32 4294901760, %v6433_v48  ;;  %v13742_v61 = vand.u32 4294901760, %v13735_v46  ;;  %v13743_v48 = vld [vmem:[#allocation2_spill] sm:$0xff] }
 0x666   :  { %6405 = vmatpush.msra.mxu3 %v6404_v44  ;;  %6903 = vmatpush.msk.msra.mxu2 %vm5137_vm15, %v13495_v18  ;;  %v13723_v44 = vand.u32 4294901760, %v13722_v39  ;;  %v6334_v42 = vsub.f32 %v12660_v0, %v6333_v21  ;;  %v13747_v39 = vld [vmem:[#allocation5_spill] sm:$0xff] }
 0x667   :  { %6240 = vmatpush.msra.mxu0 %v13715_v24  ;;  %6884 = vmatpush.msk.msra.mxu1 %vm13717_vm5, %v13495_v18  ;;  %vm13731_vm5 = vcmp.eq.s32.totalorder %v13730_v49, %v10801_v36  ;;  %v13733_v24 = vld [vmem:[#allocation53_spill] sm:$0xff] }
 0x668   :  { %6411 = vmatpush.msra.mxu3 %v6410_v45  ;;  %6904 = vmatpush.msk.msra.mxu2 %vm5136_vm7, %v13495_v18  ;;  %v13727_v45 = vld [vmem:[#allocation52_spill] sm:$0xff] }
 0x669   :  { %6244 = vmatpush.msra.mxu0 %v13719_v4  ;;  %6885 = vmatpush.msk.msra.mxu1 %vm13721_vm9, %v13495_v18  ;;  %vm13728_vm6 = vcmp.eq.s32.totalorder %v13727_v45, %v10801_v36  ;;  %vm13734_vm9 = vcmp.eq.s32.totalorder %v13733_v24, %v10801_v36  ;;  %v13740_v4 = vld [vmem:[#allocation16_spill] sm:$0xff] }
 0x66a   :  { %6417 = vmatpush.msra.mxu3 %v6416_v35  ;;  %6905 = vmatpush.msk.msra.mxu2 %vm5135_vm11, %v13495_v18  ;;  %v13729_v35 = vand.u32 4294901760, %v12277_v53  ;;  %v6335_v53 = vand.u32 4294901760, %v6334_v42 }
 0x66b   :  { %6248 = vmatpush.msra.mxu0 %v13723_v44  ;;  %6886 = vmatpush.msk.msra.mxu1 %vm13725_vm10, %v13495_v18  ;;  %vm13736_vm10 = vcmp.eq.s32.totalorder %v12095_v30, %v10801_v36  ;;  %v13750_v44 = vand.u32 4294901760, %v12325_v2 }
 0x66c   :  { %6423 = vmatpush.msra.mxu3 %v6422_v40  ;;  %6906 = vmatpush.msk.msra.mxu2 %vm5134_vm2, %v13495_v18  ;;  %v13737_v40 = vand.u32 4294901760, %v13732_v15 }
 0x66d   :  { %6252 = vmatpush.msra.mxu0 %v13726_v43  ;;  %6887 = vmatpush.msk.msra.mxu1 %vm13728_vm6, %v13495_v18  ;;  %vm13739_vm6 = vcmp.eq.s32.totalorder %v13738_v12, %v10801_v36 }
 0x66e   :  { %6429 = vmatpush.msra.mxu3 %v6428_v23  ;;  %6907 = vmatpush.msk.msra.mxu2 %vm5133_vm0, %v13495_v18  ;;  %v13746_v23 = vand.u32 4294901760, %v13740_v4  ;;  %v5415_v11 = vpop.f32.mrf.mxu1 }
 0x66f   :  { %6256 = vmatpush.msra.mxu0 %v13729_v35  ;;  %6888 = vmatpush.msk.msra.mxu1 %vm13731_vm5, %v13495_v18  ;;  %vm13741_vm5 = vcmp.eq.s32.totalorder %v12117_v16, %v10801_v36  ;;  %v5416_v6 = vadd.f32 %v5415_v11, %v5314_v47 }
 0x670   :  { %6258 = vmatmul.f32.vlgmr.msra.gmra.mxu0 %v12056_v22  ;;  %6435 = vmatpush.msra.mxu3 %v6434_v17 }
 0x671   :  { %6443 = vmatpush.msrb.mxu0 %v13732_v15  ;;  %6889 = vmatpush.msk.msra.mxu1 %vm13734_vm9, %v13495_v18  ;;  %vm13744_vm9 = vcmp.eq.s32.totalorder %v13743_v48, %v10801_v36 }
 0x672   :  { %6908 = vmatpush.msk.msra.mxu2 %vm5132_vm4, %v13495_v18  ;;  %6437 = vmatmul.f32.vlgmr.msra.gmra.mxu3 %v12630_v19 }
 0x673   :  { %6446 = vmatpush.msrb.mxu0 %v13735_v46  ;;  %6925 = vmatpush.msk.msrb.mxu3 %vm13736_vm10, %v13495_v18  ;;  %vm13745_vm10 = vcmp.eq.s32.totalorder %v12163_v57, %v10801_v36  ;;  %v5508_v57 = vpop.f32.mrf.mxu3 }
 0x674   :  { %6537 = vmatpush.msrb.mxu2 %v13737_v40  ;;  %6890 = vmatpush.msk.msra.mxu1 %vm13739_vm6, %v13495_v18  ;;  %vm13748_vm6 = vcmp.eq.s32.totalorder %v13747_v39, %v10801_v36 }
 0x675   :  { %6449 = vmatpush.msrb.mxu0 %v13740_v4  ;;  %6926 = vmatpush.msk.msrb.mxu3 %vm13741_vm5, %v13495_v18  ;;  %vm13749_vm5 = vcmp.eq.s32.totalorder %v12095_v30, %v10801_v36  ;;  %v13753_v30 = vand.u32 4294901760, %v12390_v9 }
 0x676   :  { %6541 = vmatpush.msrb.mxu2 %v13742_v61  ;;  %6891 = vmatpush.msk.msra.mxu1 %vm13744_vm9, %v13495_v18  ;;  %vm13751_vm9 = vcmp.eq.s32.totalorder %v12117_v16, %v10801_v36  ;;  %v5469_v16 = vpop.f32.mrf.mxu2 }
 0x677   :  { %6336 = vmatmul.f32.vlgmr.msra.gmra.mxu2 %v6335_v53  ;;  %6927 = vmatpush.msk.msrb.mxu3 %vm13745_vm10, %v13495_v18 }
 0x678   :  { %6452 = vmatpush.msrb.mxu0 %v12325_v2  ;;  %6545 = vmatpush.msrb.mxu2 %v13746_v23 }
 0x679   :  { %6892 = vmatpush.msk.msra.mxu1 %vm13748_vm6, %v13495_v18  ;;  %6928 = vmatpush.msk.msrb.mxu3 %vm5144_vm3, %v13495_v18 }
 0x67a   :  { %6295 = vmatmul.f32.vlgmr.msra.gmra.mxu1 %v12056_v22  ;;  %6455 = vmatpush.msrb.mxu0 %v12375_v58  ;;  %v13752_v22 = vand.u32 4294901760, %v12375_v58 }
 0x67b   :  { %6909 = vmatpush.msk.msrb.mxu1 %vm13749_vm5, %v13495_v18  ;;  %6549 = vmatpush.msrb.mxu2 %v13750_v44 }
 0x67c   :  { %6929 = vmatpush.msk.msrb.mxu3 %vm5143_vm8, %v13495_v18  ;;  %6458 = vmatpush.msrb.mxu0 %v12390_v9 }
 0x67d   :  { %6910 = vmatpush.msk.msrb.mxu1 %vm13751_vm9, %v13495_v18  ;;  %6553 = vmatpush.msrb.mxu2 %v13752_v22 }
 0x67e   :  { %6930 = vmatpush.msk.msrb.mxu3 %vm5142_vm12, %v13495_v18  ;;  %6461 = vmatpush.msrb.mxu0 %v12419_v55 }
 0x67f   :  { %6911 = vmatpush.msk.msrb.mxu1 %vm13745_vm10, %v13495_v18  ;;  %6557 = vmatpush.msrb.mxu2 %v13753_v30 }
 0x680   :  { %6931 = vmatpush.msk.msrb.mxu3 %vm5141_vm14, %v13495_v18  ;;  %6464 = vmatpush.msrb.mxu0 %v12442_v34  ;;  %v5470_v34 = vadd.f32 %v5469_v16, %v5416_v6 }
 0x681   :  { %6912 = vmatpush.msk.msrb.mxu1 %vm5144_vm3, %v13495_v18  ;;  %6561 = vmatpush.msrb.mxu2 %v6378_v51  ;;  %vm13754_vm3 = vcmp.eq.s32.totalorder %v12334_v8, %v10801_v36 }
 0x682   :  { %6932 = vmatpush.msk.msrb.mxu3 %vm5140_vm13, %v13495_v18  ;;  %6467 = vmatpush.msrb.mxu0 %v12455_v28  ;;  %v5509_v5 = vadd.f32 %v5508_v57, %v5470_v34 }
 0x683   :  { %6913 = vmatpush.msk.msrb.mxu1 %vm5143_vm8, %v13495_v18  ;;  %6565 = vmatpush.msrb.mxu2 %v6384_v29  ;;  %vm13755_vm8 = vmmov %vm13754_vm3 }
 0x684   :  { %6933 = vmatpush.msk.msrb.mxu3 %vm13754_vm3, %v13495_v18  ;;  %6470 = vmatpush.msrb.mxu0 %v12487_v10 }
 0x685   :  { %6914 = vmatpush.msk.msrb.mxu1 %vm5142_vm12, %v13495_v18  ;;  %6569 = vmatpush.msrb.mxu2 %v6390_v38 }
 0x686   :  { %6934 = vmatpush.msk.msrb.mxu3 %vm5138_vm1, %v13495_v18  ;;  %6473 = vmatpush.msrb.mxu0 %v12508_v25  ;;  %v5577_v55 = vpop.f32.mrf.mxu0 }
 0x687   :  { %6915 = vmatpush.msk.msrb.mxu1 %vm5141_vm14, %v13495_v18  ;;  %6573 = vmatpush.msrb.mxu2 %v6396_v60  ;;  %v5578_v1 = vadd.f32 %v5577_v55, %v5509_v5 }
 0x688   :  { %6935 = vmatpush.msk.msrb.mxu3 %vm5137_vm15, %v13495_v18  ;;  %6476 = vmatpush.msrb.mxu0 %v12528_v62 }
 0x689   :  { %6916 = vmatpush.msk.msrb.mxu1 %vm5140_vm13, %v13495_v18  ;;  %6577 = vmatpush.msrb.mxu2 %v6402_v54 }
 0x68a   :  { %6936 = vmatpush.msk.msrb.mxu3 %vm5136_vm7, %v13495_v18  ;;  %6479 = vmatpush.msrb.mxu0 %v12550_v13 }
 0x68b   :  { %6917 = vmatpush.msk.msrb.mxu1 %vm13755_vm8, %v13495_v18  ;;  %6581 = vmatpush.msrb.mxu2 %v6408_v14 }
 0x68c   :  { %6937 = vmatpush.msk.msrb.mxu3 %vm5135_vm11, %v13495_v18  ;;  %6482 = vmatpush.msrb.mxu0 %v12572_v32 }
 0x68d   :  { %6918 = vmatpush.msk.msrb.mxu1 %vm5138_vm1, %v13495_v18  ;;  %6585 = vmatpush.msrb.mxu2 %v6414_v56 }
 0x68e   :  { %6938 = vmatpush.msk.msrb.mxu3 %vm5134_vm2, %v13495_v18  ;;  %6485 = vmatpush.msrb.mxu0 %v12588_v37 }
 0x68f   :  { %6919 = vmatpush.msk.msrb.mxu1 %vm5137_vm15, %v13495_v18  ;;  %6589 = vmatpush.msrb.mxu2 %v6420_v33  ;;  %v5655_v59 = vpop.f32.mrf.mxu2  ;;  %v5756_v8 = vpop.f32.mrf.mxu3 }
 0x690   :  { %6939 = vmatpush.msk.msrb.mxu3 %vm5133_vm0, %v13495_v18  ;;  %6488 = vmatpush.msrb.mxu0 %v12614_v52  ;;  %v5614_v7 = vpop.f32.mrf.mxu1 }
 0x691   :  { %6920 = vmatpush.msk.msrb.mxu1 %vm5136_vm7, %v13495_v18  ;;  %6593 = vmatpush.msrb.mxu2 %v6426_v50  ;;  %v5615_v58 = vadd.f32 %v5614_v7, %v5578_v1 }
 0x692   :  { %6491 = vmatmul.f32.vlgmr.msrb.gmra.mxu0 %v12660_v0  ;;  %6940 = vmatpush.msk.msrb.mxu3 %vm5132_vm4, %v13495_v18 }
 0x693   :  { %6921 = vmatpush.msk.msrb.mxu1 %vm5135_vm11, %v13495_v18  ;;  %6597 = vmatpush.msrb.mxu2 %v6432_v20  ;;  %v5656_v2 = vadd.f32 %v5655_v59, %v5615_v58 }
 0x694   :  { %6636 = vmatmul.f32.vlgmr.msrb.gmra.mxu3 %v12630_v19  ;;  %6599 = vmatmul.f32.vlgmr.msrb.gmra.mxu2 %v12630_v19 }
 0x695   :  { %6922 = vmatpush.msk.msrb.mxu1 %vm5134_vm2, %v13495_v18  ;;  %v5757_v36 = vadd.f32 %v5756_v8, %v5656_v2 }
 0x697   :  { %6923 = vmatpush.msk.msrb.mxu1 %vm5133_vm0, %v13495_v18 }
 0x699   :  { %6924 = vmatpush.msk.msrb.mxu1 %vm5132_vm4, %v13495_v18 }
 0x69a   :  { %6530 = vmatmul.f32.vlgmr.msrb.gmra.mxu1 %v6333_v21 }
 0x6a8   :  { %v5810_v9 = vpop.f32.mrf.mxu0 }
 0x6a9   :  { %v5811_v41 = vadd.f32 %v5810_v9, %v5757_v36 }
 0x6b1   :  { %v5918_v26 = vpop.f32.mrf.mxu2  ;;  %v5955_v28 = vpop.f32.mrf.mxu3 }
 0x6b2   :  { %v5849_v18 = vpop.f32.mrf.mxu1 }
 0x6b3   :  { %v5850_v25 = vadd.f32 %v5849_v18, %v5811_v41 }
 0x6b5   :  { %v5919_v51 = vadd.f32 %v5918_v26, %v5850_v25 }
 0x6b7   :  { %v5956_v29 = vadd.f32 %v5955_v28, %v5919_v51 }
 0x6ca   :  { %v5996_v31 = vpop.f32.mrf.mxu0 }
 0x6cb   :  { %v5997_v3 = vadd.f32 %v5996_v31, %v5956_v29 }
 0x6d3   :  { %v6151_v27 = vpop.f32.mrf.mxu2  ;;  %v6190_v62 = vpop.f32.mrf.mxu3 }
 0x6d5   :  { %v6097_v10 = vpop.f32.mrf.mxu1 }
 0x6d6   :  { %v6098_v38 = vadd.f32 %v6097_v10, %v5997_v3 }
 0x6d8   :  { %v6152_v60 = vadd.f32 %v6151_v27, %v6098_v38 }
 0x6da   :  { %v6191_v13 = vadd.f32 %v6190_v62, %v6152_v60 }
 0x6ed   :  { %v6259_v54 = vpop.f32.mrf.mxu0 }
 0x6ee   :  { %v6260_v32 = vadd.f32 %v6259_v54, %v6191_v13 }
 0x6f5   :  { %v6438_v52 = vpop.f32.mrf.mxu3 }
 0x6f7   :  { %v6296_v14 = vpop.f32.mrf.mxu1 }
 0x6f8   :  { %v6297_v56 = vadd.f32 %v6296_v14, %v6260_v32 }
 0x6fa   :  { %v6337_v37 = vpop.f32.mrf.mxu2 }
 0x6fb   :  { %v6338_v33 = vadd.f32 %v6337_v37, %v6297_v56 }
 0x6fd   :  { %v6439_v19 = vadd.f32 %v6438_v52, %v6338_v33 }
 0x70f   :  { %v6492_v50 = vpop.f32.mrf.mxu0 }
 0x710   :  { %v6493_v20 = vadd.f32 %v6492_v50, %v6439_v19 }
 0x717   :  { %v6531_v0 = vpop.f32.mrf.mxu1  ;;  %v6600_v63 = vpop.f32.mrf.mxu2 }
 0x718   :  { %v6532_v21 = vadd.f32 %v6531_v0, %v6493_v20  ;;  %v6637_v45 = vpop.f32.mrf.mxu3 }
 0x71a   :  { %v6601_v43 = vadd.f32 %v6600_v63, %v6532_v21 }
 0x71c   :  { %v6638_v17 = vadd.f32 %v6637_v45, %v6601_v43 }
 0x71e   :  { %6640 = vst [vmem:[%s12927_s7] sm:$0xff] %v6638_v17 }

</bundles_post_ra>
